<compile_context>
chip_gen: v7x
topology: tpu7x:2x2x1
jax: 0.10.0
libtpu: 0.0.40
codegen_flags: <defaults>
</compile_context>

<pallas_src>
import math
import functools

import jax
import jax.numpy as jnp
from jax.experimental import pallas as pl
from jax.experimental.pallas import tpu as pltpu


# ----------------------------------------------------------------------------
# In-kernel helpers (traced inside the fused Pallas kernel)
# ----------------------------------------------------------------------------
def _ln(x, g, b, eps=1e-5):
    mean = jnp.mean(x, axis=-1, keepdims=True)
    var = jnp.mean((x - mean) ** 2, axis=-1, keepdims=True)
    return (x - mean) * jax.lax.rsqrt(var + eps) * g + b


def _heads_attention(q_full, k_full, v_full, wo_heads, bo, nhead):
    """Scaled dot-product attention given already-projected Q/K/V.

    q_full: (T, D) f32, k_full/v_full: (S, D) f32
    wo_heads: list of nhead bf16 (Dh, D) output-projection row blocks
    bo: (1, D) f32
    """
    T, D = q_full.shape
    Dh = D // nhead
    scale = 1.0 / math.sqrt(Dh)
    out = None
    for h in range(nhead):  # static unrolled loop (nhead small)
        lo = h * Dh
        qh = q_full[:, lo:lo + Dh].astype(jnp.bfloat16)
        kh = k_full[:, lo:lo + Dh].astype(jnp.bfloat16)
        vh = v_full[:, lo:lo + Dh].astype(jnp.bfloat16)
        s = jax.lax.dot_general(qh, kh, (((1,), (1,)), ((), ())),
                                preferred_element_type=jnp.float32) * scale  # (T, S)
        m = jnp.max(s, axis=-1, keepdims=True)
        p = jnp.exp(s - m)
        p = p * pl.reciprocal(jnp.sum(p, axis=-1, keepdims=True), approx=True)
        ctx = jnp.dot(p.astype(jnp.bfloat16), vh,
                      preferred_element_type=jnp.float32)                    # (T, Dh)
        c = jnp.dot(ctx.astype(jnp.bfloat16), wo_heads[h],
                    preferred_element_type=jnp.float32)                      # (T, D)
        out = c if out is None else out + c
    return out + bo


def _self_attention(xn, wqkv, bqkv, wo_heads, bo, nhead):
    """Fused QKV projection (one lane-dense matmul) + per-head attention."""
    D = xn.shape[-1]
    qkv = jnp.dot(xn.astype(jnp.bfloat16), wqkv,
                  preferred_element_type=jnp.float32) + bqkv                 # (T, 3D)
    return _heads_attention(qkv[:, :D], qkv[:, D:2 * D], qkv[:, 2 * D:],
                            wo_heads, bo, nhead)


def _ffn(x, w1, b1, w2, b2):
    h = jnp.maximum(
        jnp.dot(x.astype(jnp.bfloat16), w1, preferred_element_type=jnp.float32) + b1,
        0.0)
    return jnp.dot(h.astype(jnp.bfloat16), w2, preferred_element_type=jnp.float32) + b2


# ----------------------------------------------------------------------------
# The single fused kernel: whole forward pass for one batch element per step.
# ----------------------------------------------------------------------------
def _x0_model_kernel(
        # per-batch activations
        gat_ref, csc_ref, tmb_ref, dec_ref,
        # fused 5x Linear(1, D) condition features
        wsc, bsc,
        # timestep-embedding projection
        tw, tb,
        # encoder layers (stacked along a leading layer axis)
        e_ln1g, e_ln1b, e_wqkv, e_bqkv, e_wo, e_bo,
        e_ln2g, e_ln2b, e_w1, e_b1, e_w2, e_b2,
        # encoder final LayerNorm
        ef_g, ef_b,
        # decoder layers
        d_ln1g, d_ln1b, d_swqkv, d_sbqkv, d_swo, d_sbo,
        d_ln2g, d_ln2b, d_cwq, d_cbq, d_cwkv, d_cbkv, d_cwo, d_cbo,
        d_ln3g, d_ln3b, d_w1, d_b1, d_w2, d_b2,
        # decoder final LayerNorm + output head
        df_g, df_b, ow, ob,
        # output
        o_ref,
        *, nhead, nlayers):
    D = gat_ref.shape[-1]

    # ---- encoder input: gathered categorical rows + 5 fused Linear(1,D) rows
    x = gat_ref[0] + csc_ref[0] * wsc[...] + bsc[...]                        # (8, D) f32

    # ---- encoder stack (pre-norm)
    for l in range(nlayers):
        xn = _ln(x, e_ln1g[l], e_ln1b[l])
        wo_heads = [e_wo[l, h] for h in range(nhead)]
        x = x + _self_attention(xn, e_wqkv[l], e_bqkv[l], wo_heads, e_bo[l], nhead)
        x = x + _ffn(_ln(x, e_ln2g[l], e_ln2b[l]),
                     e_w1[l], e_b1[l], e_w2[l], e_b2[l])
    mem = _ln(x, ef_g[...], ef_b[...])                                       # (8, D)
    mem_b = mem.astype(jnp.bfloat16)

    # ---- decoder input: node emb + pos enc (precomputed) + timestep projection
    temb = jnp.dot(tmb_ref[0].astype(jnp.bfloat16), tw[...],
                   preferred_element_type=jnp.float32) + tb[...]             # (1, D)
    y = dec_ref[0] + temb                                                    # (L, D)

    # ---- decoder stack (pre-norm; no causal mask: decoder_attn_mask=None)
    for l in range(nlayers):
        yn = _ln(y, d_ln1g[l], d_ln1b[l])
        wo_s = [d_swo[l, h] for h in range(nhead)]
        y = y + _self_attention(yn, d_swqkv[l], d_sbqkv[l], wo_s, d_sbo[l], nhead)

        # cross-attention: K/V projected from memory ONCE per layer
        kv = jnp.dot(mem_b, d_cwkv[l], preferred_element_type=jnp.float32) + d_cbkv[l]
        yn2 = _ln(y, d_ln2g[l], d_ln2b[l])
        q = jnp.dot(yn2.astype(jnp.bfloat16), d_cwq[l],
                    preferred_element_type=jnp.float32) + d_cbq[l]
        wo_c = [d_cwo[l, h] for h in range(nhead)]
        y = y + _heads_attention(q, kv[:, :D], kv[:, D:], wo_c, d_cbo[l], nhead)

        y = y + _ffn(_ln(y, d_ln3g[l], d_ln3b[l]),
                     d_w1[l], d_b1[l], d_w2[l], d_b2[l])

    # ---- final LN + lane-dense (KP=128) output projection
    yn = _ln(y, df_g[...], df_b[...])
    o_ref[0] = jnp.dot(yn.astype(jnp.bfloat16), ow[...],
                       preferred_element_type=jnp.float32) + ob[...]


# ----------------------------------------------------------------------------
# pallas_call wrapper
# ----------------------------------------------------------------------------
_WEIGHT_ORDER = (
    'wsc', 'bsc', 'tw', 'tb',
    'e_ln1g', 'e_ln1b', 'e_wqkv', 'e_bqkv', 'e_wo', 'e_bo',
    'e_ln2g', 'e_ln2b', 'e_w1', 'e_b1', 'e_w2', 'e_b2',
    'ef_g', 'ef_b',
    'd_ln1g', 'd_ln1b', 'd_swqkv', 'd_sbqkv', 'd_swo', 'd_sbo',
    'd_ln2g', 'd_ln2b', 'd_cwq', 'd_cbq', 'd_cwkv', 'd_cbkv', 'd_cwo', 'd_cbo',
    'd_ln3g', 'd_ln3b', 'd_w1', 'd_b1', 'd_w2', 'd_b2',
    'df_g', 'df_b', 'out_w', 'out_b',
)


def _const_idx(ndim):
    return lambda b: (0,) * ndim


def pallas_forward(gathered_pad, cscal, tmb, dec_embed, params, *, nhead):
    B, L, D = dec_embed.shape
    S = gathered_pad.shape[1]
    Ft = tmb.shape[-1]
    KP = params['out_w'].shape[-1]
    nlayers = params['e_wqkv'].shape[0]

    weights = [params[k] for k in _WEIGHT_ORDER]
    in_specs = ([pl.BlockSpec((1, S, D), lambda b: (b, 0, 0)),
                 pl.BlockSpec((1, S, 1), lambda b: (b, 0, 0)),
                 pl.BlockSpec((1, 1, Ft), lambda b: (b, 0, 0)),
                 pl.BlockSpec((1, L, D), lambda b: (b, 0, 0))]
                + [pl.BlockSpec(w.shape, _const_idx(w.ndim)) for w in weights])

    return pl.pallas_call(
        functools.partial(_x0_model_kernel, nhead=nhead, nlayers=nlayers),
        out_shape=jax.ShapeDtypeStruct((B, L, KP), jnp.float32),
        grid=(B,),
        in_specs=in_specs,
        out_specs=pl.BlockSpec((1, L, KP), lambda b: (b, 0, 0)),
        compiler_params=pltpu.CompilerParams(dimension_semantics=("parallel",)),
    )(gathered_pad, cscal, tmb, dec_embed, *weights)


# ----------------------------------------------------------------------------
# Model glue (embedding gathers, padding, jit entry point)
# ----------------------------------------------------------------------------
def gen_pos_encoding(max_len, dim):
    pos = jnp.arange(max_len, dtype=jnp.float32)[:, None]
    i = jnp.arange(0, dim, 2, dtype=jnp.float32)
    div = jnp.exp(-math.log(10000.0) * i / dim)
    pe = jnp.zeros((max_len, dim), jnp.float32)
    pe = pe.at[:, 0::2].set(jnp.sin(pos * div))
    pe = pe.at[:, 1::2].set(jnp.cos(pos * div))
    return pe


# TODO(synk): Timestep_Transformer source was not provided; implemented as a
# standard PRE-norm encoder-decoder transformer (pre_norm=True in the spec)
# with the 786-dim sinusoidal timestep embedding linearly projected to
# model_dim and added to the decoder input; dropout(0.1) omitted (eval
# semantics); no decoder causal mask (decoder_attn_mask=None in the call).
def forward(params, noise, t, condition, *, nhead, K):
    """noise: (B, L, 1) int, t: (B,) int, condition: (B, 8) float."""
    B, L, _ = noise.shape
    cond_f = condition.astype(jnp.float32)

    # categorical condition features: embedding gathers (XLA glue)
    dep = params['departure_emb'][condition[:, 0].astype(jnp.int32)]
    sr = params['start_emb'][condition[:, 6].astype(jnp.int32)]
    er = params['end_emb'][condition[:, 7].astype(jnp.int32)]
    gathered = jnp.stack([dep, sr, er], axis=1)                       # (B, 3, D)
    gathered_pad = jnp.pad(gathered, ((0, 0), (0, 5), (0, 0)))        # (B, 8, D)

    # rows 3..7 carry the five scalar condition features (rows 0..2 zero)
    cscal = jnp.pad(cond_f[:, 1:6], ((0, 0), (3, 0)))[:, :, None]     # (B, 8, 1)

    # timestep sinusoidal embedding + decoder token embeddings (XLA gathers)
    tmb = params['sin_emb'][t][:, None, :]                            # (B, 1, 786)
    dec_embed = (params['node_emb'][noise[:, :, 0].astype(jnp.int32)]
                 + params['pos_enc'][:L, :])                          # (B, L, D)

    logits = pallas_forward(gathered_pad, cscal, tmb, dec_embed, params,
                            nhead=nhead)                              # (B, L, KP)
    return logits[:, :, :K]


# ----------------------------------------------------------------------------
# Deterministic parameter init (normal(0, 0.02) weights, zero biases per the
# module's _ini_para; LayerNorm gamma=1, beta=0).  Matmul weights stored bf16;
# attention QKV fused as (D, 3D); output projections head-blocked (H, Dh, D).
# ----------------------------------------------------------------------------
def init_params(key, K, nlayers, nhead, model_dim, ff_dim, freq_dim=786):
    D, F = model_dim, ff_dim
    Dh = D // nhead
    keys = iter(jax.random.split(key, 4096))

    def nrm(shape):
        return 0.02 * jax.random.normal(next(keys), shape, jnp.float32)

    def zeros(shape):
        return jnp.zeros(shape, jnp.float32)

    def ones(shape):
        return jnp.ones(shape, jnp.float32)

    def stack_b16(shape):
        return jnp.stack([nrm(shape) for _ in range(nlayers)]).astype(jnp.bfloat16)

    def stack_wo():
        return jnp.stack([nrm((D, D)).reshape(nhead, Dh, D)
                          for _ in range(nlayers)]).astype(jnp.bfloat16)

    KP = max(128, ((K + 127) // 128) * 128)
    out_w = jnp.zeros((D, KP), jnp.float32).at[:, :K].set(nrm((D, K)))
    wsc = jnp.zeros((8, D), jnp.float32).at[3:, :].set(nrm((5, D)))

    return {
        # embedding tables / buffers (gathered by XLA glue)
        'departure_emb': nrm((288, D)),
        'start_emb': nrm((256, D)),
        'end_emb': nrm((256, D)),
        'node_emb': nrm((K, D)),
        'sin_emb': gen_pos_encoding(5000, freq_dim),
        'pos_enc': gen_pos_encoding(10000, D),
        # fused 5x Linear(1, D) condition features (rows 3..7; rows 0..2 zero)
        'wsc': wsc, 'bsc': zeros((8, D)),
        # timestep embedding projection
        'tw': nrm((freq_dim, D)).astype(jnp.bfloat16), 'tb': zeros((1, D)),
        # encoder layers
        'e_ln1g': ones((nlayers, 1, D)), 'e_ln1b': zeros((nlayers, 1, D)),
        'e_wqkv': stack_b16((D, 3 * D)), 'e_bqkv': zeros((nlayers, 1, 3 * D)),
        'e_wo': stack_wo(), 'e_bo': zeros((nlayers, 1, D)),
        'e_ln2g': ones((nlayers, 1, D)), 'e_ln2b': zeros((nlayers, 1, D)),
        'e_w1': stack_b16((D, F)), 'e_b1': zeros((nlayers, 1, F)),
        'e_w2': stack_b16((F, D)), 'e_b2': zeros((nlayers, 1, D)),
        'ef_g': ones((1, D)), 'ef_b': zeros((1, D)),
        # decoder layers
        'd_ln1g': ones((nlayers, 1, D)), 'd_ln1b': zeros((nlayers, 1, D)),
        'd_swqkv': stack_b16((D, 3 * D)), 'd_sbqkv': zeros((nlayers, 1, 3 * D)),
        'd_swo': stack_wo(), 'd_sbo': zeros((nlayers, 1, D)),
        'd_ln2g': ones((nlayers, 1, D)), 'd_ln2b': zeros((nlayers, 1, D)),
        'd_cwq': stack_b16((D, D)), 'd_cbq': zeros((nlayers, 1, D)),
        'd_cwkv': stack_b16((D, 2 * D)), 'd_cbkv': zeros((nlayers, 1, 2 * D)),
        'd_cwo': stack_wo(), 'd_cbo': zeros((nlayers, 1, D)),
        'd_ln3g': ones((nlayers, 1, D)), 'd_ln3b': zeros((nlayers, 1, D)),
        'd_w1': stack_b16((D, F)), 'd_b1': zeros((nlayers, 1, F)),
        'd_w2': stack_b16((F, D)), 'd_b2': zeros((nlayers, 1, D)),
        'df_g': ones((1, D)), 'df_b': zeros((1, D)),
        # final LN + lane-dense (padded-to-128) output projection
        'out_w': out_w.astype(jnp.bfloat16), 'out_b': zeros((1, KP)),
    }


# ----------------------------------------------------------------------------
if __name__ == "__main__":
    K, nlayers, nhead, model_dim, feedforward_dim = 16, 2, 4, 32, 64
    B, L = 2, 8

    key = jax.random.PRNGKey(0)
    pk, nk, tk, k1, k2, k3 = jax.random.split(key, 6)

    params = init_params(pk, K, nlayers, nhead, model_dim, feedforward_dim)

    noise = jax.random.randint(nk, (B, L, 1), 0, K)                  # node indices
    t = jax.random.randint(tk, (B,), 0, 5000)                        # diffusion step
    dep = jax.random.randint(k1, (B, 1), 0, 288).astype(jnp.float32)
    conts = jax.random.uniform(k2, (B, 5), jnp.float32)
    regs = jax.random.randint(k3, (B, 2), 0, 256).astype(jnp.float32)
    condition = jnp.concatenate([dep, conts, regs], axis=1)          # (B, 8)

    fwd = jax.jit(functools.partial(forward, nhead=nhead, K=K))
    out = fwd(params, noise, t, condition)
    out = jax.block_until_ready(out)
    assert out.shape == (B, L, K) and out.dtype == jnp.float32
    print("KERNEL_OK")
</pallas_src>

<mosaic_0001>
module attributes {stable_mosaic.version = 11 : i64} {
  func.func @_x0_model_kernel(%arg0: i32, %arg1: memref<1x8x32xf32, #tpu.memory_space<vmem>>, %arg2: memref<1x8x1xf32, #tpu.memory_space<vmem>>, %arg3: memref<1x1x786xf32, #tpu.memory_space<vmem>>, %arg4: memref<1x8x32xf32, #tpu.memory_space<vmem>>, %arg5: memref<8x32xf32, #tpu.memory_space<vmem>>, %arg6: memref<8x32xf32, #tpu.memory_space<vmem>>, %arg7: memref<786x32xbf16, #tpu.memory_space<vmem>>, %arg8: memref<1x32xf32, #tpu.memory_space<vmem>>, %arg9: memref<2x1x32xf32, #tpu.memory_space<vmem>>, %arg10: memref<2x1x32xf32, #tpu.memory_space<vmem>>, %arg11: memref<2x32x96xbf16, #tpu.memory_space<vmem>>, %arg12: memref<2x1x96xf32, #tpu.memory_space<vmem>>, %arg13: memref<2x4x8x32xbf16, #tpu.memory_space<vmem>>, %arg14: memref<2x1x32xf32, #tpu.memory_space<vmem>>, %arg15: memref<2x1x32xf32, #tpu.memory_space<vmem>>, %arg16: memref<2x1x32xf32, #tpu.memory_space<vmem>>, %arg17: memref<2x32x64xbf16, #tpu.memory_space<vmem>>, %arg18: memref<2x1x64xf32, #tpu.memory_space<vmem>>, %arg19: memref<2x64x32xbf16, #tpu.memory_space<vmem>>, %arg20: memref<2x1x32xf32, #tpu.memory_space<vmem>>, %arg21: memref<1x32xf32, #tpu.memory_space<vmem>>, %arg22: memref<1x32xf32, #tpu.memory_space<vmem>>, %arg23: memref<2x1x32xf32, #tpu.memory_space<vmem>>, %arg24: memref<2x1x32xf32, #tpu.memory_space<vmem>>, %arg25: memref<2x32x96xbf16, #tpu.memory_space<vmem>>, %arg26: memref<2x1x96xf32, #tpu.memory_space<vmem>>, %arg27: memref<2x4x8x32xbf16, #tpu.memory_space<vmem>>, %arg28: memref<2x1x32xf32, #tpu.memory_space<vmem>>, %arg29: memref<2x1x32xf32, #tpu.memory_space<vmem>>, %arg30: memref<2x1x32xf32, #tpu.memory_space<vmem>>, %arg31: memref<2x32x32xbf16, #tpu.memory_space<vmem>>, %arg32: memref<2x1x32xf32, #tpu.memory_space<vmem>>, %arg33: memref<2x32x64xbf16, #tpu.memory_space<vmem>>, %arg34: memref<2x1x64xf32, #tpu.memory_space<vmem>>, %arg35: memref<2x4x8x32xbf16, #tpu.memory_space<vmem>>, %arg36: memref<2x1x32xf32, #tpu.memory_space<vmem>>, %arg37: memref<2x1x32xf32, #tpu.memory_space<vmem>>, %arg38: memref<2x1x32xf32, #tpu.memory_space<vmem>>, %arg39: memref<2x32x64xbf16, #tpu.memory_space<vmem>>, %arg40: memref<2x1x64xf32, #tpu.memory_space<vmem>>, %arg41: memref<2x64x32xbf16, #tpu.memory_space<vmem>>, %arg42: memref<2x1x32xf32, #tpu.memory_space<vmem>>, %arg43: memref<1x32xf32, #tpu.memory_space<vmem>>, %arg44: memref<1x32xf32, #tpu.memory_space<vmem>>, %arg45: memref<32x128xbf16, #tpu.memory_space<vmem>>, %arg46: memref<1x128xf32, #tpu.memory_space<vmem>>, %arg47: memref<1x8x128xf32, #tpu.memory_space<vmem>>) attributes {dimension_semantics = [#tpu.dimension_semantics<parallel>], iteration_bounds = array<i64: 2>, scalar_prefetch = 0 : i64, scratch_operands = 0 : i64, tpu.core_type = #tpu.core_type<tc>, window_params = [{transform_indices = @transform_0, window_bounds = array<i64: 1, 8, 32>}, {transform_indices = @transform_1, window_bounds = array<i64: 1, 8, 1>}, {transform_indices = @transform_2, window_bounds = array<i64: 1, 1, 786>}, {transform_indices = @transform_3, window_bounds = array<i64: 1, 8, 32>}, {pipeline_mode = #tpu.pipeline_mode<synchronous>, transform_indices = @transform_4, window_bounds = array<i64: 8, 32>}, {pipeline_mode = #tpu.pipeline_mode<synchronous>, transform_indices = @transform_5, window_bounds = array<i64: 8, 32>}, {pipeline_mode = #tpu.pipeline_mode<synchronous>, transform_indices = @transform_6, window_bounds = array<i64: 786, 32>}, {pipeline_mode = #tpu.pipeline_mode<synchronous>, transform_indices = @transform_7, window_bounds = array<i64: 1, 32>}, {pipeline_mode = #tpu.pipeline_mode<synchronous>, transform_indices = @transform_8, window_bounds = array<i64: 2, 1, 32>}, {pipeline_mode = #tpu.pipeline_mode<synchronous>, transform_indices = @transform_9, window_bounds = array<i64: 2, 1, 32>}, {pipeline_mode = #tpu.pipeline_mode<synchronous>, transform_indices = @transform_10, window_bounds = array<i64: 2, 32, 96>}, {pipeline_mode = #tpu.pipeline_mode<synchronous>, transform_indices = @transform_11, window_bounds = array<i64: 2, 1, 96>}, {pipeline_mode = #tpu.pipeline_mode<synchronous>, transform_indices = @transform_12, window_bounds = array<i64: 2, 4, 8, 32>}, {pipeline_mode = #tpu.pipeline_mode<synchronous>, transform_indices = @transform_13, window_bounds = array<i64: 2, 1, 32>}, {pipeline_mode = #tpu.pipeline_mode<synchronous>, transform_indices = @transform_14, window_bounds = array<i64: 2, 1, 32>}, {pipeline_mode = #tpu.pipeline_mode<synchronous>, transform_indices = @transform_15, window_bounds = array<i64: 2, 1, 32>}, {pipeline_mode = #tpu.pipeline_mode<synchronous>, transform_indices = @transform_16, window_bounds = array<i64: 2, 32, 64>}, {pipeline_mode = #tpu.pipeline_mode<synchronous>, transform_indices = @transform_17, window_bounds = array<i64: 2, 1, 64>}, {pipeline_mode = #tpu.pipeline_mode<synchronous>, transform_indices = @transform_18, window_bounds = array<i64: 2, 64, 32>}, {pipeline_mode = #tpu.pipeline_mode<synchronous>, transform_indices = @transform_19, window_bounds = array<i64: 2, 1, 32>}, {pipeline_mode = #tpu.pipeline_mode<synchronous>, transform_indices = @transform_20, window_bounds = array<i64: 1, 32>}, {pipeline_mode = #tpu.pipeline_mode<synchronous>, transform_indices = @transform_21, window_bounds = array<i64: 1, 32>}, {pipeline_mode = #tpu.pipeline_mode<synchronous>, transform_indices = @transform_22, window_bounds = array<i64: 2, 1, 32>}, {pipeline_mode = #tpu.pipeline_mode<synchronous>, transform_indices = @transform_23, window_bounds = array<i64: 2, 1, 32>}, {pipeline_mode = #tpu.pipeline_mode<synchronous>, transform_indices = @transform_24, window_bounds = array<i64: 2, 32, 96>}, {pipeline_mode = #tpu.pipeline_mode<synchronous>, transform_indices = @transform_25, window_bounds = array<i64: 2, 1, 96>}, {pipeline_mode = #tpu.pipeline_mode<synchronous>, transform_indices = @transform_26, window_bounds = array<i64: 2, 4, 8, 32>}, {pipeline_mode = #tpu.pipeline_mode<synchronous>, transform_indices = @transform_27, window_bounds = array<i64: 2, 1, 32>}, {pipeline_mode = #tpu.pipeline_mode<synchronous>, transform_indices = @transform_28, window_bounds = array<i64: 2, 1, 32>}, {pipeline_mode = #tpu.pipeline_mode<synchronous>, transform_indices = @transform_29, window_bounds = array<i64: 2, 1, 32>}, {pipeline_mode = #tpu.pipeline_mode<synchronous>, transform_indices = @transform_30, window_bounds = array<i64: 2, 32, 32>}, {pipeline_mode = #tpu.pipeline_mode<synchronous>, transform_indices = @transform_31, window_bounds = array<i64: 2, 1, 32>}, {pipeline_mode = #tpu.pipeline_mode<synchronous>, transform_indices = @transform_32, window_bounds = array<i64: 2, 32, 64>}, {pipeline_mode = #tpu.pipeline_mode<synchronous>, transform_indices = @transform_33, window_bounds = array<i64: 2, 1, 64>}, {pipeline_mode = #tpu.pipeline_mode<synchronous>, transform_indices = @transform_34, window_bounds = array<i64: 2, 4, 8, 32>}, {pipeline_mode = #tpu.pipeline_mode<synchronous>, transform_indices = @transform_35, window_bounds = array<i64: 2, 1, 32>}, {pipeline_mode = #tpu.pipeline_mode<synchronous>, transform_indices = @transform_36, window_bounds = array<i64: 2, 1, 32>}, {pipeline_mode = #tpu.pipeline_mode<synchronous>, transform_indices = @transform_37, window_bounds = array<i64: 2, 1, 32>}, {pipeline_mode = #tpu.pipeline_mode<synchronous>, transform_indices = @transform_38, window_bounds = array<i64: 2, 32, 64>}, {pipeline_mode = #tpu.pipeline_mode<synchronous>, transform_indices = @transform_39, window_bounds = array<i64: 2, 1, 64>}, {pipeline_mode = #tpu.pipeline_mode<synchronous>, transform_indices = @transform_40, window_bounds = array<i64: 2, 64, 32>}, {pipeline_mode = #tpu.pipeline_mode<synchronous>, transform_indices = @transform_41, window_bounds = array<i64: 2, 1, 32>}, {pipeline_mode = #tpu.pipeline_mode<synchronous>, transform_indices = @transform_42, window_bounds = array<i64: 1, 32>}, {pipeline_mode = #tpu.pipeline_mode<synchronous>, transform_indices = @transform_43, window_bounds = array<i64: 1, 32>}, {pipeline_mode = #tpu.pipeline_mode<synchronous>, transform_indices = @transform_44, window_bounds = array<i64: 32, 128>}, {pipeline_mode = #tpu.pipeline_mode<synchronous>, transform_indices = @transform_45, window_bounds = array<i64: 1, 128>}, {transform_indices = @transform_46, window_bounds = array<i64: 1, 8, 128>}]} {
    %c0 = arith.constant 0 : index
    %c0_0 = arith.constant 0 : index
    %c0_1 = arith.constant 0 : index
    %0 = vector.load %arg1[%c0, %c0_0, %c0_1] : memref<1x8x32xf32, #tpu.memory_space<vmem>>, vector<1x8x32xf32>
    %1 = vector.shape_cast %0 : vector<1x8x32xf32> to vector<8x32xf32>
    %c0_2 = arith.constant 0 : index
    %c0_3 = arith.constant 0 : index
    %c0_4 = arith.constant 0 : index
    %2 = vector.load %arg2[%c0_2, %c0_3, %c0_4] : memref<1x8x1xf32, #tpu.memory_space<vmem>>, vector<1x8x1xf32>
    %3 = vector.shape_cast %2 : vector<1x8x1xf32> to vector<8x1xf32>
    %c0_5 = arith.constant 0 : index
    %c0_6 = arith.constant 0 : index
    %4 = vector.load %arg5[%c0_5, %c0_6] : memref<8x32xf32, #tpu.memory_space<vmem>>, vector<8x32xf32>
    %5 = vector.broadcast %3 : vector<8x1xf32> to vector<8x32xf32>
    %6 = arith.mulf %5, %4 : vector<8x32xf32>
    %7 = arith.addf %1, %6 : vector<8x32xf32>
    %c0_7 = arith.constant 0 : index
    %c0_8 = arith.constant 0 : index
    %8 = vector.load %arg6[%c0_7, %c0_8] : memref<8x32xf32, #tpu.memory_space<vmem>>, vector<8x32xf32>
    %9 = arith.addf %7, %8 : vector<8x32xf32>
    %c0_9 = arith.constant 0 : index
    %c0_10 = arith.constant 0 : index
    %c0_11 = arith.constant 0 : index
    %10 = vector.load %arg9[%c0_9, %c0_10, %c0_11] : memref<2x1x32xf32, #tpu.memory_space<vmem>>, vector<1x1x32xf32>
    %11 = vector.shape_cast %10 : vector<1x1x32xf32> to vector<1x32xf32>
    %c0_12 = arith.constant 0 : index
    %c0_13 = arith.constant 0 : index
    %c0_14 = arith.constant 0 : index
    %12 = vector.load %arg10[%c0_12, %c0_13, %c0_14] : memref<2x1x32xf32, #tpu.memory_space<vmem>>, vector<1x1x32xf32>
    %13 = vector.shape_cast %12 : vector<1x1x32xf32> to vector<1x32xf32>
    %cst = arith.constant dense<0.000000e+00> : vector<8xf32>
    %14 = vector.multi_reduction <add>, %9, %cst [1] : vector<8x32xf32> to vector<8xf32>
    %15 = vector.shape_cast %14 : vector<8xf32> to vector<8x1xf32>
    %cst_15 = arith.constant 3.200000e+01 : f32
    %16 = vector.broadcast %cst_15 : f32 to vector<8x1xf32>
    %17 = arith.divf %15, %16 : vector<8x1xf32>
    %18 = vector.broadcast %17 : vector<8x1xf32> to vector<8x32xf32>
    %19 = arith.subf %9, %18 : vector<8x32xf32>
    %20 = arith.mulf %19, %19 : vector<8x32xf32>
    %cst_16 = arith.constant dense<0.000000e+00> : vector<8xf32>
    %21 = vector.multi_reduction <add>, %20, %cst_16 [1] : vector<8x32xf32> to vector<8xf32>
    %22 = vector.shape_cast %21 : vector<8xf32> to vector<8x1xf32>
    %cst_17 = arith.constant 3.200000e+01 : f32
    %23 = vector.broadcast %cst_17 : f32 to vector<8x1xf32>
    %24 = arith.divf %22, %23 : vector<8x1xf32>
    %25 = vector.broadcast %17 : vector<8x1xf32> to vector<8x32xf32>
    %26 = arith.subf %9, %25 : vector<8x32xf32>
    %cst_18 = arith.constant 9.99999974E-6 : f32
    %27 = vector.broadcast %cst_18 : f32 to vector<8x1xf32>
    %28 = arith.addf %24, %27 : vector<8x1xf32>
    %29 = math.rsqrt %28 : vector<8x1xf32>
    %30 = vector.broadcast %29 : vector<8x1xf32> to vector<8x32xf32>
    %31 = arith.mulf %26, %30 : vector<8x32xf32>
    %32 = vector.broadcast %11 : vector<1x32xf32> to vector<8x32xf32>
    %33 = arith.mulf %31, %32 : vector<8x32xf32>
    %34 = vector.broadcast %13 : vector<1x32xf32> to vector<8x32xf32>
    %35 = arith.addf %33, %34 : vector<8x32xf32>
    %c0_19 = arith.constant 0 : index
    %c0_20 = arith.constant 0 : index
    %c0_21 = arith.constant 0 : index
    %c0_22 = arith.constant 0 : index
    %36 = vector.load %arg13[%c0_19, %c0_20, %c0_21, %c0_22] : memref<2x4x8x32xbf16, #tpu.memory_space<vmem>>, vector<1x1x8x32xbf16>
    %37 = vector.shape_cast %36 : vector<1x1x8x32xbf16> to vector<8x32xbf16>
    %c0_23 = arith.constant 0 : index
    %c1 = arith.constant 1 : index
    %c0_24 = arith.constant 0 : index
    %c0_25 = arith.constant 0 : index
    %38 = vector.load %arg13[%c0_23, %c1, %c0_24, %c0_25] : memref<2x4x8x32xbf16, #tpu.memory_space<vmem>>, vector<1x1x8x32xbf16>
    %39 = vector.shape_cast %38 : vector<1x1x8x32xbf16> to vector<8x32xbf16>
    %c0_26 = arith.constant 0 : index
    %c2 = arith.constant 2 : index
    %c0_27 = arith.constant 0 : index
    %c0_28 = arith.constant 0 : index
    %40 = vector.load %arg13[%c0_26, %c2, %c0_27, %c0_28] : memref<2x4x8x32xbf16, #tpu.memory_space<vmem>>, vector<1x1x8x32xbf16>
    %41 = vector.shape_cast %40 : vector<1x1x8x32xbf16> to vector<8x32xbf16>
    %c0_29 = arith.constant 0 : index
    %c3 = arith.constant 3 : index
    %c0_30 = arith.constant 0 : index
    %c0_31 = arith.constant 0 : index
    %42 = vector.load %arg13[%c0_29, %c3, %c0_30, %c0_31] : memref<2x4x8x32xbf16, #tpu.memory_space<vmem>>, vector<1x1x8x32xbf16>
    %43 = vector.shape_cast %42 : vector<1x1x8x32xbf16> to vector<8x32xbf16>
    %c0_32 = arith.constant 0 : index
    %c0_33 = arith.constant 0 : index
    %c0_34 = arith.constant 0 : index
    %44 = vector.load %arg11[%c0_32, %c0_33, %c0_34] : memref<2x32x96xbf16, #tpu.memory_space<vmem>>, vector<1x32x96xbf16>
    %45 = vector.shape_cast %44 : vector<1x32x96xbf16> to vector<32x96xbf16>
    %c0_35 = arith.constant 0 : index
    %c0_36 = arith.constant 0 : index
    %c0_37 = arith.constant 0 : index
    %46 = vector.load %arg12[%c0_35, %c0_36, %c0_37] : memref<2x1x96xf32, #tpu.memory_space<vmem>>, vector<1x1x96xf32>
    %47 = vector.shape_cast %46 : vector<1x1x96xf32> to vector<1x96xf32>
    %c0_38 = arith.constant 0 : index
    %c0_39 = arith.constant 0 : index
    %c0_40 = arith.constant 0 : index
    %48 = vector.load %arg14[%c0_38, %c0_39, %c0_40] : memref<2x1x32xf32, #tpu.memory_space<vmem>>, vector<1x1x32xf32>
    %49 = vector.shape_cast %48 : vector<1x1x32xf32> to vector<1x32xf32>
    %50 = arith.truncf %35 : vector<8x32xf32> to vector<8x32xbf16>
    %cst_41 = arith.constant dense<0.000000e+00> : vector<8x96xf32>
    %51 = tpu.matmul %50, %45, %cst_41 {dimension_numbers = #tpu.dot_dimension_numbers<[1], [0], [0], [1], [0, 0, 1, 1], [], []>} : vector<8x32xbf16>, vector<32x96xbf16>, vector<8x96xf32> -> vector<8x96xf32>
    %52 = vector.broadcast %47 : vector<1x96xf32> to vector<8x96xf32>
    %53 = arith.addf %51, %52 : vector<8x96xf32>
    %54 = vector.extract_strided_slice %53 {offsets = [0, 0], sizes = [8, 32], strides = [1, 1]} : vector<8x96xf32> to vector<8x32xf32>
    %55 = vector.extract_strided_slice %53 {offsets = [0, 32], sizes = [8, 32], strides = [1, 1]} : vector<8x96xf32> to vector<8x32xf32>
    %56 = vector.extract_strided_slice %53 {offsets = [0, 64], sizes = [8, 32], strides = [1, 1]} : vector<8x96xf32> to vector<8x32xf32>
    %57 = vector.extract_strided_slice %54 {offsets = [0, 0], sizes = [8, 8], strides = [1, 1]} : vector<8x32xf32> to vector<8x8xf32>
    %58 = arith.truncf %57 : vector<8x8xf32> to vector<8x8xbf16>
    %59 = vector.extract_strided_slice %55 {offsets = [0, 0], sizes = [8, 8], strides = [1, 1]} : vector<8x32xf32> to vector<8x8xf32>
    %60 = arith.truncf %59 : vector<8x8xf32> to vector<8x8xbf16>
    %61 = vector.extract_strided_slice %56 {offsets = [0, 0], sizes = [8, 8], strides = [1, 1]} : vector<8x32xf32> to vector<8x8xf32>
    %62 = arith.truncf %61 : vector<8x8xf32> to vector<8x8xbf16>
    %cst_42 = arith.constant dense<0.000000e+00> : vector<8x8xf32>
    %63 = tpu.matmul %58, %60, %cst_42 {dimension_numbers = #tpu.dot_dimension_numbers<[1], [1], [0], [0], [0, 0, 1, 0], [], []>} : vector<8x8xbf16>, vector<8x8xbf16>, vector<8x8xf32> -> vector<8x8xf32>
    %cst_43 = arith.constant 0.353553385 : f32
    %64 = vector.broadcast %cst_43 : f32 to vector<8x8xf32>
    %65 = arith.mulf %63, %64 : vector<8x8xf32>
    %cst_44 = arith.constant dense<0xFF800000> : vector<8xf32>
    %66 = vector.multi_reduction <maximumf>, %65, %cst_44 [1] : vector<8x8xf32> to vector<8xf32>
    %67 = vector.shape_cast %66 : vector<8xf32> to vector<8x1xf32>
    %68 = vector.broadcast %67 : vector<8x1xf32> to vector<8x8xf32>
    %69 = arith.subf %65, %68 : vector<8x8xf32>
    %70 = math.exp %69 : vector<8x8xf32>
    %cst_45 = arith.constant dense<0.000000e+00> : vector<8xf32>
    %71 = vector.multi_reduction <add>, %70, %cst_45 [1] : vector<8x8xf32> to vector<8xf32>
    %72 = vector.shape_cast %71 : vector<8xf32> to vector<8x1xf32>
    %73 = tpu.reciprocal %72 {approx = true} : vector<8x1xf32> -> vector<8x1xf32>
    %74 = vector.broadcast %73 : vector<8x1xf32> to vector<8x8xf32>
    %75 = arith.mulf %70, %74 : vector<8x8xf32>
    %76 = arith.truncf %75 : vector<8x8xf32> to vector<8x8xbf16>
    %cst_46 = arith.constant dense<0.000000e+00> : vector<8x8xf32>
    %77 = tpu.matmul %76, %62, %cst_46 {dimension_numbers = #tpu.dot_dimension_numbers<[1], [0], [0], [1], [0, 0, 1, 1], [], []>} : vector<8x8xbf16>, vector<8x8xbf16>, vector<8x8xf32> -> vector<8x8xf32>
    %78 = arith.truncf %77 : vector<8x8xf32> to vector<8x8xbf16>
    %cst_47 = arith.constant dense<0.000000e+00> : vector<8x32xf32>
    %79 = tpu.matmul %78, %37, %cst_47 {dimension_numbers = #tpu.dot_dimension_numbers<[1], [0], [0], [1], [0, 0, 1, 1], [], []>} : vector<8x8xbf16>, vector<8x32xbf16>, vector<8x32xf32> -> vector<8x32xf32>
    %80 = vector.extract_strided_slice %54 {offsets = [0, 8], sizes = [8, 8], strides = [1, 1]} : vector<8x32xf32> to vector<8x8xf32>
    %81 = arith.truncf %80 : vector<8x8xf32> to vector<8x8xbf16>
    %82 = vector.extract_strided_slice %55 {offsets = [0, 8], sizes = [8, 8], strides = [1, 1]} : vector<8x32xf32> to vector<8x8xf32>
    %83 = arith.truncf %82 : vector<8x8xf32> to vector<8x8xbf16>
    %84 = vector.extract_strided_slice %56 {offsets = [0, 8], sizes = [8, 8], strides = [1, 1]} : vector<8x32xf32> to vector<8x8xf32>
    %85 = arith.truncf %84 : vector<8x8xf32> to vector<8x8xbf16>
    %cst_48 = arith.constant dense<0.000000e+00> : vector<8x8xf32>
    %86 = tpu.matmul %81, %83, %cst_48 {dimension_numbers = #tpu.dot_dimension_numbers<[1], [1], [0], [0], [0, 0, 1, 0], [], []>} : vector<8x8xbf16>, vector<8x8xbf16>, vector<8x8xf32> -> vector<8x8xf32>
    %cst_49 = arith.constant 0.353553385 : f32
    %87 = vector.broadcast %cst_49 : f32 to vector<8x8xf32>
    %88 = arith.mulf %86, %87 : vector<8x8xf32>
    %cst_50 = arith.constant dense<0xFF800000> : vector<8xf32>
    %89 = vector.multi_reduction <maximumf>, %88, %cst_50 [1] : vector<8x8xf32> to vector<8xf32>
    %90 = vector.shape_cast %89 : vector<8xf32> to vector<8x1xf32>
    %91 = vector.broadcast %90 : vector<8x1xf32> to vector<8x8xf32>
    %92 = arith.subf %88, %91 : vector<8x8xf32>
    %93 = math.exp %92 : vector<8x8xf32>
    %cst_51 = arith.constant dense<0.000000e+00> : vector<8xf32>
    %94 = vector.multi_reduction <add>, %93, %cst_51 [1] : vector<8x8xf32> to vector<8xf32>
    %95 = vector.shape_cast %94 : vector<8xf32> to vector<8x1xf32>
    %96 = tpu.reciprocal %95 {approx = true} : vector<8x1xf32> -> vector<8x1xf32>
    %97 = vector.broadcast %96 : vector<8x1xf32> to vector<8x8xf32>
    %98 = arith.mulf %93, %97 : vector<8x8xf32>
    %99 = arith.truncf %98 : vector<8x8xf32> to vector<8x8xbf16>
    %cst_52 = arith.constant dense<0.000000e+00> : vector<8x8xf32>
    %100 = tpu.matmul %99, %85, %cst_52 {dimension_numbers = #tpu.dot_dimension_numbers<[1], [0], [0], [1], [0, 0, 1, 1], [], []>} : vector<8x8xbf16>, vector<8x8xbf16>, vector<8x8xf32> -> vector<8x8xf32>
    %101 = arith.truncf %100 : vector<8x8xf32> to vector<8x8xbf16>
    %cst_53 = arith.constant dense<0.000000e+00> : vector<8x32xf32>
    %102 = tpu.matmul %101, %39, %cst_53 {dimension_numbers = #tpu.dot_dimension_numbers<[1], [0], [0], [1], [0, 0, 1, 1], [], []>} : vector<8x8xbf16>, vector<8x32xbf16>, vector<8x32xf32> -> vector<8x32xf32>
    %103 = arith.addf %79, %102 : vector<8x32xf32>
    %104 = vector.extract_strided_slice %54 {offsets = [0, 16], sizes = [8, 8], strides = [1, 1]} : vector<8x32xf32> to vector<8x8xf32>
    %105 = arith.truncf %104 : vector<8x8xf32> to vector<8x8xbf16>
    %106 = vector.extract_strided_slice %55 {offsets = [0, 16], sizes = [8, 8], strides = [1, 1]} : vector<8x32xf32> to vector<8x8xf32>
    %107 = arith.truncf %106 : vector<8x8xf32> to vector<8x8xbf16>
    %108 = vector.extract_strided_slice %56 {offsets = [0, 16], sizes = [8, 8], strides = [1, 1]} : vector<8x32xf32> to vector<8x8xf32>
    %109 = arith.truncf %108 : vector<8x8xf32> to vector<8x8xbf16>
    %cst_54 = arith.constant dense<0.000000e+00> : vector<8x8xf32>
    %110 = tpu.matmul %105, %107, %cst_54 {dimension_numbers = #tpu.dot_dimension_numbers<[1], [1], [0], [0], [0, 0, 1, 0], [], []>} : vector<8x8xbf16>, vector<8x8xbf16>, vector<8x8xf32> -> vector<8x8xf32>
    %cst_55 = arith.constant 0.353553385 : f32
    %111 = vector.broadcast %cst_55 : f32 to vector<8x8xf32>
    %112 = arith.mulf %110, %111 : vector<8x8xf32>
    %cst_56 = arith.constant dense<0xFF800000> : vector<8xf32>
    %113 = vector.multi_reduction <maximumf>, %112, %cst_56 [1] : vector<8x8xf32> to vector<8xf32>
    %114 = vector.shape_cast %113 : vector<8xf32> to vector<8x1xf32>
    %115 = vector.broadcast %114 : vector<8x1xf32> to vector<8x8xf32>
    %116 = arith.subf %112, %115 : vector<8x8xf32>
    %117 = math.exp %116 : vector<8x8xf32>
    %cst_57 = arith.constant dense<0.000000e+00> : vector<8xf32>
    %118 = vector.multi_reduction <add>, %117, %cst_57 [1] : vector<8x8xf32> to vector<8xf32>
    %119 = vector.shape_cast %118 : vector<8xf32> to vector<8x1xf32>
    %120 = tpu.reciprocal %119 {approx = true} : vector<8x1xf32> -> vector<8x1xf32>
    %121 = vector.broadcast %120 : vector<8x1xf32> to vector<8x8xf32>
    %122 = arith.mulf %117, %121 : vector<8x8xf32>
    %123 = arith.truncf %122 : vector<8x8xf32> to vector<8x8xbf16>
    %cst_58 = arith.constant dense<0.000000e+00> : vector<8x8xf32>
    %124 = tpu.matmul %123, %109, %cst_58 {dimension_numbers = #tpu.dot_dimension_numbers<[1], [0], [0], [1], [0, 0, 1, 1], [], []>} : vector<8x8xbf16>, vector<8x8xbf16>, vector<8x8xf32> -> vector<8x8xf32>
    %125 = arith.truncf %124 : vector<8x8xf32> to vector<8x8xbf16>
    %cst_59 = arith.constant dense<0.000000e+00> : vector<8x32xf32>
    %126 = tpu.matmul %125, %41, %cst_59 {dimension_numbers = #tpu.dot_dimension_numbers<[1], [0], [0], [1], [0, 0, 1, 1], [], []>} : vector<8x8xbf16>, vector<8x32xbf16>, vector<8x32xf32> -> vector<8x32xf32>
    %127 = arith.addf %103, %126 : vector<8x32xf32>
    %128 = vector.extract_strided_slice %54 {offsets = [0, 24], sizes = [8, 8], strides = [1, 1]} : vector<8x32xf32> to vector<8x8xf32>
    %129 = arith.truncf %128 : vector<8x8xf32> to vector<8x8xbf16>
    %130 = vector.extract_strided_slice %55 {offsets = [0, 24], sizes = [8, 8], strides = [1, 1]} : vector<8x32xf32> to vector<8x8xf32>
    %131 = arith.truncf %130 : vector<8x8xf32> to vector<8x8xbf16>
    %132 = vector.extract_strided_slice %56 {offsets = [0, 24], sizes = [8, 8], strides = [1, 1]} : vector<8x32xf32> to vector<8x8xf32>
    %133 = arith.truncf %132 : vector<8x8xf32> to vector<8x8xbf16>
    %cst_60 = arith.constant dense<0.000000e+00> : vector<8x8xf32>
    %134 = tpu.matmul %129, %131, %cst_60 {dimension_numbers = #tpu.dot_dimension_numbers<[1], [1], [0], [0], [0, 0, 1, 0], [], []>} : vector<8x8xbf16>, vector<8x8xbf16>, vector<8x8xf32> -> vector<8x8xf32>
    %cst_61 = arith.constant 0.353553385 : f32
    %135 = vector.broadcast %cst_61 : f32 to vector<8x8xf32>
    %136 = arith.mulf %134, %135 : vector<8x8xf32>
    %cst_62 = arith.constant dense<0xFF800000> : vector<8xf32>
    %137 = vector.multi_reduction <maximumf>, %136, %cst_62 [1] : vector<8x8xf32> to vector<8xf32>
    %138 = vector.shape_cast %137 : vector<8xf32> to vector<8x1xf32>
    %139 = vector.broadcast %138 : vector<8x1xf32> to vector<8x8xf32>
    %140 = arith.subf %136, %139 : vector<8x8xf32>
    %141 = math.exp %140 : vector<8x8xf32>
    %cst_63 = arith.constant dense<0.000000e+00> : vector<8xf32>
    %142 = vector.multi_reduction <add>, %141, %cst_63 [1] : vector<8x8xf32> to vector<8xf32>
    %143 = vector.shape_cast %142 : vector<8xf32> to vector<8x1xf32>
    %144 = tpu.reciprocal %143 {approx = true} : vector<8x1xf32> -> vector<8x1xf32>
    %145 = vector.broadcast %144 : vector<8x1xf32> to vector<8x8xf32>
    %146 = arith.mulf %141, %145 : vector<8x8xf32>
    %147 = arith.truncf %146 : vector<8x8xf32> to vector<8x8xbf16>
    %cst_64 = arith.constant dense<0.000000e+00> : vector<8x8xf32>
    %148 = tpu.matmul %147, %133, %cst_64 {dimension_numbers = #tpu.dot_dimension_numbers<[1], [0], [0], [1], [0, 0, 1, 1], [], []>} : vector<8x8xbf16>, vector<8x8xbf16>, vector<8x8xf32> -> vector<8x8xf32>
    %149 = arith.truncf %148 : vector<8x8xf32> to vector<8x8xbf16>
    %cst_65 = arith.constant dense<0.000000e+00> : vector<8x32xf32>
    %150 = tpu.matmul %149, %43, %cst_65 {dimension_numbers = #tpu.dot_dimension_numbers<[1], [0], [0], [1], [0, 0, 1, 1], [], []>} : vector<8x8xbf16>, vector<8x32xbf16>, vector<8x32xf32> -> vector<8x32xf32>
    %151 = arith.addf %127, %150 : vector<8x32xf32>
    %152 = vector.broadcast %49 : vector<1x32xf32> to vector<8x32xf32>
    %153 = arith.addf %151, %152 : vector<8x32xf32>
    %154 = arith.addf %9, %153 : vector<8x32xf32>
    %c0_66 = arith.constant 0 : index
    %c0_67 = arith.constant 0 : index
    %c0_68 = arith.constant 0 : index
    %155 = vector.load %arg15[%c0_66, %c0_67, %c0_68] : memref<2x1x32xf32, #tpu.memory_space<vmem>>, vector<1x1x32xf32>
    %156 = vector.shape_cast %155 : vector<1x1x32xf32> to vector<1x32xf32>
    %c0_69 = arith.constant 0 : index
    %c0_70 = arith.constant 0 : index
    %c0_71 = arith.constant 0 : index
    %157 = vector.load %arg16[%c0_69, %c0_70, %c0_71] : memref<2x1x32xf32, #tpu.memory_space<vmem>>, vector<1x1x32xf32>
    %158 = vector.shape_cast %157 : vector<1x1x32xf32> to vector<1x32xf32>
    %cst_72 = arith.constant dense<0.000000e+00> : vector<8xf32>
    %159 = vector.multi_reduction <add>, %154, %cst_72 [1] : vector<8x32xf32> to vector<8xf32>
    %160 = vector.shape_cast %159 : vector<8xf32> to vector<8x1xf32>
    %cst_73 = arith.constant 3.200000e+01 : f32
    %161 = vector.broadcast %cst_73 : f32 to vector<8x1xf32>
    %162 = arith.divf %160, %161 : vector<8x1xf32>
    %163 = vector.broadcast %162 : vector<8x1xf32> to vector<8x32xf32>
    %164 = arith.subf %154, %163 : vector<8x32xf32>
    %165 = arith.mulf %164, %164 : vector<8x32xf32>
    %cst_74 = arith.constant dense<0.000000e+00> : vector<8xf32>
    %166 = vector.multi_reduction <add>, %165, %cst_74 [1] : vector<8x32xf32> to vector<8xf32>
    %167 = vector.shape_cast %166 : vector<8xf32> to vector<8x1xf32>
    %cst_75 = arith.constant 3.200000e+01 : f32
    %168 = vector.broadcast %cst_75 : f32 to vector<8x1xf32>
    %169 = arith.divf %167, %168 : vector<8x1xf32>
    %170 = vector.broadcast %162 : vector<8x1xf32> to vector<8x32xf32>
    %171 = arith.subf %154, %170 : vector<8x32xf32>
    %cst_76 = arith.constant 9.99999974E-6 : f32
    %172 = vector.broadcast %cst_76 : f32 to vector<8x1xf32>
    %173 = arith.addf %169, %172 : vector<8x1xf32>
    %174 = math.rsqrt %173 : vector<8x1xf32>
    %175 = vector.broadcast %174 : vector<8x1xf32> to vector<8x32xf32>
    %176 = arith.mulf %171, %175 : vector<8x32xf32>
    %177 = vector.broadcast %156 : vector<1x32xf32> to vector<8x32xf32>
    %178 = arith.mulf %176, %177 : vector<8x32xf32>
    %179 = vector.broadcast %158 : vector<1x32xf32> to vector<8x32xf32>
    %180 = arith.addf %178, %179 : vector<8x32xf32>
    %c0_77 = arith.constant 0 : index
    %c0_78 = arith.constant 0 : index
    %c0_79 = arith.constant 0 : index
    %181 = vector.load %arg17[%c0_77, %c0_78, %c0_79] : memref<2x32x64xbf16, #tpu.memory_space<vmem>>, vector<1x32x64xbf16>
    %182 = vector.shape_cast %181 : vector<1x32x64xbf16> to vector<32x64xbf16>
    %c0_80 = arith.constant 0 : index
    %c0_81 = arith.constant 0 : index
    %c0_82 = arith.constant 0 : index
    %183 = vector.load %arg18[%c0_80, %c0_81, %c0_82] : memref<2x1x64xf32, #tpu.memory_space<vmem>>, vector<1x1x64xf32>
    %184 = vector.shape_cast %183 : vector<1x1x64xf32> to vector<1x64xf32>
    %c0_83 = arith.constant 0 : index
    %c0_84 = arith.constant 0 : index
    %c0_85 = arith.constant 0 : index
    %185 = vector.load %arg19[%c0_83, %c0_84, %c0_85] : memref<2x64x32xbf16, #tpu.memory_space<vmem>>, vector<1x64x32xbf16>
    %186 = vector.shape_cast %185 : vector<1x64x32xbf16> to vector<64x32xbf16>
    %c0_86 = arith.constant 0 : index
    %c0_87 = arith.constant 0 : index
    %c0_88 = arith.constant 0 : index
    %187 = vector.load %arg20[%c0_86, %c0_87, %c0_88] : memref<2x1x32xf32, #tpu.memory_space<vmem>>, vector<1x1x32xf32>
    %188 = vector.shape_cast %187 : vector<1x1x32xf32> to vector<1x32xf32>
    %189 = arith.truncf %180 : vector<8x32xf32> to vector<8x32xbf16>
    %cst_89 = arith.constant dense<0.000000e+00> : vector<8x64xf32>
    %190 = tpu.matmul %189, %182, %cst_89 {dimension_numbers = #tpu.dot_dimension_numbers<[1], [0], [0], [1], [0, 0, 1, 1], [], []>} : vector<8x32xbf16>, vector<32x64xbf16>, vector<8x64xf32> -> vector<8x64xf32>
    %191 = vector.broadcast %184 : vector<1x64xf32> to vector<8x64xf32>
    %192 = arith.addf %190, %191 : vector<8x64xf32>
    %cst_90 = arith.constant 0.000000e+00 : f32
    %193 = vector.broadcast %cst_90 : f32 to vector<8x64xf32>
    %194 = arith.maximumf %192, %193 : vector<8x64xf32>
    %195 = arith.truncf %194 : vector<8x64xf32> to vector<8x64xbf16>
    %cst_91 = arith.constant dense<0.000000e+00> : vector<8x32xf32>
    %196 = tpu.matmul %195, %186, %cst_91 {dimension_numbers = #tpu.dot_dimension_numbers<[1], [0], [0], [1], [0, 0, 1, 1], [], []>} : vector<8x64xbf16>, vector<64x32xbf16>, vector<8x32xf32> -> vector<8x32xf32>
    %197 = vector.broadcast %188 : vector<1x32xf32> to vector<8x32xf32>
    %198 = arith.addf %196, %197 : vector<8x32xf32>
    %199 = arith.addf %154, %198 : vector<8x32xf32>
    %c1_92 = arith.constant 1 : index
    %c0_93 = arith.constant 0 : index
    %c0_94 = arith.constant 0 : index
    %200 = vector.load %arg9[%c1_92, %c0_93, %c0_94] : memref<2x1x32xf32, #tpu.memory_space<vmem>>, vector<1x1x32xf32>
    %201 = vector.shape_cast %200 : vector<1x1x32xf32> to vector<1x32xf32>
    %c1_95 = arith.constant 1 : index
    %c0_96 = arith.constant 0 : index
    %c0_97 = arith.constant 0 : index
    %202 = vector.load %arg10[%c1_95, %c0_96, %c0_97] : memref<2x1x32xf32, #tpu.memory_space<vmem>>, vector<1x1x32xf32>
    %203 = vector.shape_cast %202 : vector<1x1x32xf32> to vector<1x32xf32>
    %cst_98 = arith.constant dense<0.000000e+00> : vector<8xf32>
    %204 = vector.multi_reduction <add>, %199, %cst_98 [1] : vector<8x32xf32> to vector<8xf32>
    %205 = vector.shape_cast %204 : vector<8xf32> to vector<8x1xf32>
    %cst_99 = arith.constant 3.200000e+01 : f32
    %206 = vector.broadcast %cst_99 : f32 to vector<8x1xf32>
    %207 = arith.divf %205, %206 : vector<8x1xf32>
    %208 = vector.broadcast %207 : vector<8x1xf32> to vector<8x32xf32>
    %209 = arith.subf %199, %208 : vector<8x32xf32>
    %210 = arith.mulf %209, %209 : vector<8x32xf32>
    %cst_100 = arith.constant dense<0.000000e+00> : vector<8xf32>
    %211 = vector.multi_reduction <add>, %210, %cst_100 [1] : vector<8x32xf32> to vector<8xf32>
    %212 = vector.shape_cast %211 : vector<8xf32> to vector<8x1xf32>
    %cst_101 = arith.constant 3.200000e+01 : f32
    %213 = vector.broadcast %cst_101 : f32 to vector<8x1xf32>
    %214 = arith.divf %212, %213 : vector<8x1xf32>
    %215 = vector.broadcast %207 : vector<8x1xf32> to vector<8x32xf32>
    %216 = arith.subf %199, %215 : vector<8x32xf32>
    %cst_102 = arith.constant 9.99999974E-6 : f32
    %217 = vector.broadcast %cst_102 : f32 to vector<8x1xf32>
    %218 = arith.addf %214, %217 : vector<8x1xf32>
    %219 = math.rsqrt %218 : vector<8x1xf32>
    %220 = vector.broadcast %219 : vector<8x1xf32> to vector<8x32xf32>
    %221 = arith.mulf %216, %220 : vector<8x32xf32>
    %222 = vector.broadcast %201 : vector<1x32xf32> to vector<8x32xf32>
    %223 = arith.mulf %221, %222 : vector<8x32xf32>
    %224 = vector.broadcast %203 : vector<1x32xf32> to vector<8x32xf32>
    %225 = arith.addf %223, %224 : vector<8x32xf32>
    %c1_103 = arith.constant 1 : index
    %c0_104 = arith.constant 0 : index
    %c0_105 = arith.constant 0 : index
    %c0_106 = arith.constant 0 : index
    %226 = vector.load %arg13[%c1_103, %c0_104, %c0_105, %c0_106] : memref<2x4x8x32xbf16, #tpu.memory_space<vmem>>, vector<1x1x8x32xbf16>
    %227 = vector.shape_cast %226 : vector<1x1x8x32xbf16> to vector<8x32xbf16>
    %c1_107 = arith.constant 1 : index
    %c1_108 = arith.constant 1 : index
    %c0_109 = arith.constant 0 : index
    %c0_110 = arith.constant 0 : index
    %228 = vector.load %arg13[%c1_107, %c1_108, %c0_109, %c0_110] : memref<2x4x8x32xbf16, #tpu.memory_space<vmem>>, vector<1x1x8x32xbf16>
    %229 = vector.shape_cast %228 : vector<1x1x8x32xbf16> to vector<8x32xbf16>
    %c1_111 = arith.constant 1 : index
    %c2_112 = arith.constant 2 : index
    %c0_113 = arith.constant 0 : index
    %c0_114 = arith.constant 0 : index
    %230 = vector.load %arg13[%c1_111, %c2_112, %c0_113, %c0_114] : memref<2x4x8x32xbf16, #tpu.memory_space<vmem>>, vector<1x1x8x32xbf16>
    %231 = vector.shape_cast %230 : vector<1x1x8x32xbf16> to vector<8x32xbf16>
    %c1_115 = arith.constant 1 : index
    %c3_116 = arith.constant 3 : index
    %c0_117 = arith.constant 0 : index
    %c0_118 = arith.constant 0 : index
    %232 = vector.load %arg13[%c1_115, %c3_116, %c0_117, %c0_118] : memref<2x4x8x32xbf16, #tpu.memory_space<vmem>>, vector<1x1x8x32xbf16>
    %233 = vector.shape_cast %232 : vector<1x1x8x32xbf16> to vector<8x32xbf16>
    %c1_119 = arith.constant 1 : index
    %c0_120 = arith.constant 0 : index
    %c0_121 = arith.constant 0 : index
    %234 = vector.load %arg11[%c1_119, %c0_120, %c0_121] : memref<2x32x96xbf16, #tpu.memory_space<vmem>>, vector<1x32x96xbf16>
    %235 = vector.shape_cast %234 : vector<1x32x96xbf16> to vector<32x96xbf16>
    %c1_122 = arith.constant 1 : index
    %c0_123 = arith.constant 0 : index
    %c0_124 = arith.constant 0 : index
    %236 = vector.load %arg12[%c1_122, %c0_123, %c0_124] : memref<2x1x96xf32, #tpu.memory_space<vmem>>, vector<1x1x96xf32>
    %237 = vector.shape_cast %236 : vector<1x1x96xf32> to vector<1x96xf32>
    %c1_125 = arith.constant 1 : index
    %c0_126 = arith.constant 0 : index
    %c0_127 = arith.constant 0 : index
    %238 = vector.load %arg14[%c1_125, %c0_126, %c0_127] : memref<2x1x32xf32, #tpu.memory_space<vmem>>, vector<1x1x32xf32>
    %239 = vector.shape_cast %238 : vector<1x1x32xf32> to vector<1x32xf32>
    %240 = arith.truncf %225 : vector<8x32xf32> to vector<8x32xbf16>
    %cst_128 = arith.constant dense<0.000000e+00> : vector<8x96xf32>
    %241 = tpu.matmul %240, %235, %cst_128 {dimension_numbers = #tpu.dot_dimension_numbers<[1], [0], [0], [1], [0, 0, 1, 1], [], []>} : vector<8x32xbf16>, vector<32x96xbf16>, vector<8x96xf32> -> vector<8x96xf32>
    %242 = vector.broadcast %237 : vector<1x96xf32> to vector<8x96xf32>
    %243 = arith.addf %241, %242 : vector<8x96xf32>
    %244 = vector.extract_strided_slice %243 {offsets = [0, 0], sizes = [8, 32], strides = [1, 1]} : vector<8x96xf32> to vector<8x32xf32>
    %245 = vector.extract_strided_slice %243 {offsets = [0, 32], sizes = [8, 32], strides = [1, 1]} : vector<8x96xf32> to vector<8x32xf32>
    %246 = vector.extract_strided_slice %243 {offsets = [0, 64], sizes = [8, 32], strides = [1, 1]} : vector<8x96xf32> to vector<8x32xf32>
    %247 = vector.extract_strided_slice %244 {offsets = [0, 0], sizes = [8, 8], strides = [1, 1]} : vector<8x32xf32> to vector<8x8xf32>
    %248 = arith.truncf %247 : vector<8x8xf32> to vector<8x8xbf16>
    %249 = vector.extract_strided_slice %245 {offsets = [0, 0], sizes = [8, 8], strides = [1, 1]} : vector<8x32xf32> to vector<8x8xf32>
    %250 = arith.truncf %249 : vector<8x8xf32> to vector<8x8xbf16>
    %251 = vector.extract_strided_slice %246 {offsets = [0, 0], sizes = [8, 8], strides = [1, 1]} : vector<8x32xf32> to vector<8x8xf32>
    %252 = arith.truncf %251 : vector<8x8xf32> to vector<8x8xbf16>
    %cst_129 = arith.constant dense<0.000000e+00> : vector<8x8xf32>
    %253 = tpu.matmul %248, %250, %cst_129 {dimension_numbers = #tpu.dot_dimension_numbers<[1], [1], [0], [0], [0, 0, 1, 0], [], []>} : vector<8x8xbf16>, vector<8x8xbf16>, vector<8x8xf32> -> vector<8x8xf32>
    %cst_130 = arith.constant 0.353553385 : f32
    %254 = vector.broadcast %cst_130 : f32 to vector<8x8xf32>
    %255 = arith.mulf %253, %254 : vector<8x8xf32>
    %cst_131 = arith.constant dense<0xFF800000> : vector<8xf32>
    %256 = vector.multi_reduction <maximumf>, %255, %cst_131 [1] : vector<8x8xf32> to vector<8xf32>
    %257 = vector.shape_cast %256 : vector<8xf32> to vector<8x1xf32>
    %258 = vector.broadcast %257 : vector<8x1xf32> to vector<8x8xf32>
    %259 = arith.subf %255, %258 : vector<8x8xf32>
    %260 = math.exp %259 : vector<8x8xf32>
    %cst_132 = arith.constant dense<0.000000e+00> : vector<8xf32>
    %261 = vector.multi_reduction <add>, %260, %cst_132 [1] : vector<8x8xf32> to vector<8xf32>
    %262 = vector.shape_cast %261 : vector<8xf32> to vector<8x1xf32>
    %263 = tpu.reciprocal %262 {approx = true} : vector<8x1xf32> -> vector<8x1xf32>
    %264 = vector.broadcast %263 : vector<8x1xf32> to vector<8x8xf32>
    %265 = arith.mulf %260, %264 : vector<8x8xf32>
    %266 = arith.truncf %265 : vector<8x8xf32> to vector<8x8xbf16>
    %cst_133 = arith.constant dense<0.000000e+00> : vector<8x8xf32>
    %267 = tpu.matmul %266, %252, %cst_133 {dimension_numbers = #tpu.dot_dimension_numbers<[1], [0], [0], [1], [0, 0, 1, 1], [], []>} : vector<8x8xbf16>, vector<8x8xbf16>, vector<8x8xf32> -> vector<8x8xf32>
    %268 = arith.truncf %267 : vector<8x8xf32> to vector<8x8xbf16>
    %cst_134 = arith.constant dense<0.000000e+00> : vector<8x32xf32>
    %269 = tpu.matmul %268, %227, %cst_134 {dimension_numbers = #tpu.dot_dimension_numbers<[1], [0], [0], [1], [0, 0, 1, 1], [], []>} : vector<8x8xbf16>, vector<8x32xbf16>, vector<8x32xf32> -> vector<8x32xf32>
    %270 = vector.extract_strided_slice %244 {offsets = [0, 8], sizes = [8, 8], strides = [1, 1]} : vector<8x32xf32> to vector<8x8xf32>
    %271 = arith.truncf %270 : vector<8x8xf32> to vector<8x8xbf16>
    %272 = vector.extract_strided_slice %245 {offsets = [0, 8], sizes = [8, 8], strides = [1, 1]} : vector<8x32xf32> to vector<8x8xf32>
    %273 = arith.truncf %272 : vector<8x8xf32> to vector<8x8xbf16>
    %274 = vector.extract_strided_slice %246 {offsets = [0, 8], sizes = [8, 8], strides = [1, 1]} : vector<8x32xf32> to vector<8x8xf32>
    %275 = arith.truncf %274 : vector<8x8xf32> to vector<8x8xbf16>
    %cst_135 = arith.constant dense<0.000000e+00> : vector<8x8xf32>
    %276 = tpu.matmul %271, %273, %cst_135 {dimension_numbers = #tpu.dot_dimension_numbers<[1], [1], [0], [0], [0, 0, 1, 0], [], []>} : vector<8x8xbf16>, vector<8x8xbf16>, vector<8x8xf32> -> vector<8x8xf32>
    %cst_136 = arith.constant 0.353553385 : f32
    %277 = vector.broadcast %cst_136 : f32 to vector<8x8xf32>
    %278 = arith.mulf %276, %277 : vector<8x8xf32>
    %cst_137 = arith.constant dense<0xFF800000> : vector<8xf32>
    %279 = vector.multi_reduction <maximumf>, %278, %cst_137 [1] : vector<8x8xf32> to vector<8xf32>
    %280 = vector.shape_cast %279 : vector<8xf32> to vector<8x1xf32>
    %281 = vector.broadcast %280 : vector<8x1xf32> to vector<8x8xf32>
    %282 = arith.subf %278, %281 : vector<8x8xf32>
    %283 = math.exp %282 : vector<8x8xf32>
    %cst_138 = arith.constant dense<0.000000e+00> : vector<8xf32>
    %284 = vector.multi_reduction <add>, %283, %cst_138 [1] : vector<8x8xf32> to vector<8xf32>
    %285 = vector.shape_cast %284 : vector<8xf32> to vector<8x1xf32>
    %286 = tpu.reciprocal %285 {approx = true} : vector<8x1xf32> -> vector<8x1xf32>
    %287 = vector.broadcast %286 : vector<8x1xf32> to vector<8x8xf32>
    %288 = arith.mulf %283, %287 : vector<8x8xf32>
    %289 = arith.truncf %288 : vector<8x8xf32> to vector<8x8xbf16>
    %cst_139 = arith.constant dense<0.000000e+00> : vector<8x8xf32>
    %290 = tpu.matmul %289, %275, %cst_139 {dimension_numbers = #tpu.dot_dimension_numbers<[1], [0], [0], [1], [0, 0, 1, 1], [], []>} : vector<8x8xbf16>, vector<8x8xbf16>, vector<8x8xf32> -> vector<8x8xf32>
    %291 = arith.truncf %290 : vector<8x8xf32> to vector<8x8xbf16>
    %cst_140 = arith.constant dense<0.000000e+00> : vector<8x32xf32>
    %292 = tpu.matmul %291, %229, %cst_140 {dimension_numbers = #tpu.dot_dimension_numbers<[1], [0], [0], [1], [0, 0, 1, 1], [], []>} : vector<8x8xbf16>, vector<8x32xbf16>, vector<8x32xf32> -> vector<8x32xf32>
    %293 = arith.addf %269, %292 : vector<8x32xf32>
    %294 = vector.extract_strided_slice %244 {offsets = [0, 16], sizes = [8, 8], strides = [1, 1]} : vector<8x32xf32> to vector<8x8xf32>
    %295 = arith.truncf %294 : vector<8x8xf32> to vector<8x8xbf16>
    %296 = vector.extract_strided_slice %245 {offsets = [0, 16], sizes = [8, 8], strides = [1, 1]} : vector<8x32xf32> to vector<8x8xf32>
    %297 = arith.truncf %296 : vector<8x8xf32> to vector<8x8xbf16>
    %298 = vector.extract_strided_slice %246 {offsets = [0, 16], sizes = [8, 8], strides = [1, 1]} : vector<8x32xf32> to vector<8x8xf32>
    %299 = arith.truncf %298 : vector<8x8xf32> to vector<8x8xbf16>
    %cst_141 = arith.constant dense<0.000000e+00> : vector<8x8xf32>
    %300 = tpu.matmul %295, %297, %cst_141 {dimension_numbers = #tpu.dot_dimension_numbers<[1], [1], [0], [0], [0, 0, 1, 0], [], []>} : vector<8x8xbf16>, vector<8x8xbf16>, vector<8x8xf32> -> vector<8x8xf32>
    %cst_142 = arith.constant 0.353553385 : f32
    %301 = vector.broadcast %cst_142 : f32 to vector<8x8xf32>
    %302 = arith.mulf %300, %301 : vector<8x8xf32>
    %cst_143 = arith.constant dense<0xFF800000> : vector<8xf32>
    %303 = vector.multi_reduction <maximumf>, %302, %cst_143 [1] : vector<8x8xf32> to vector<8xf32>
    %304 = vector.shape_cast %303 : vector<8xf32> to vector<8x1xf32>
    %305 = vector.broadcast %304 : vector<8x1xf32> to vector<8x8xf32>
    %306 = arith.subf %302, %305 : vector<8x8xf32>
    %307 = math.exp %306 : vector<8x8xf32>
    %cst_144 = arith.constant dense<0.000000e+00> : vector<8xf32>
    %308 = vector.multi_reduction <add>, %307, %cst_144 [1] : vector<8x8xf32> to vector<8xf32>
    %309 = vector.shape_cast %308 : vector<8xf32> to vector<8x1xf32>
    %310 = tpu.reciprocal %309 {approx = true} : vector<8x1xf32> -> vector<8x1xf32>
    %311 = vector.broadcast %310 : vector<8x1xf32> to vector<8x8xf32>
    %312 = arith.mulf %307, %311 : vector<8x8xf32>
    %313 = arith.truncf %312 : vector<8x8xf32> to vector<8x8xbf16>
    %cst_145 = arith.constant dense<0.000000e+00> : vector<8x8xf32>
    %314 = tpu.matmul %313, %299, %cst_145 {dimension_numbers = #tpu.dot_dimension_numbers<[1], [0], [0], [1], [0, 0, 1, 1], [], []>} : vector<8x8xbf16>, vector<8x8xbf16>, vector<8x8xf32> -> vector<8x8xf32>
    %315 = arith.truncf %314 : vector<8x8xf32> to vector<8x8xbf16>
    %cst_146 = arith.constant dense<0.000000e+00> : vector<8x32xf32>
    %316 = tpu.matmul %315, %231, %cst_146 {dimension_numbers = #tpu.dot_dimension_numbers<[1], [0], [0], [1], [0, 0, 1, 1], [], []>} : vector<8x8xbf16>, vector<8x32xbf16>, vector<8x32xf32> -> vector<8x32xf32>
    %317 = arith.addf %293, %316 : vector<8x32xf32>
    %318 = vector.extract_strided_slice %244 {offsets = [0, 24], sizes = [8, 8], strides = [1, 1]} : vector<8x32xf32> to vector<8x8xf32>
    %319 = arith.truncf %318 : vector<8x8xf32> to vector<8x8xbf16>
    %320 = vector.extract_strided_slice %245 {offsets = [0, 24], sizes = [8, 8], strides = [1, 1]} : vector<8x32xf32> to vector<8x8xf32>
    %321 = arith.truncf %320 : vector<8x8xf32> to vector<8x8xbf16>
    %322 = vector.extract_strided_slice %246 {offsets = [0, 24], sizes = [8, 8], strides = [1, 1]} : vector<8x32xf32> to vector<8x8xf32>
    %323 = arith.truncf %322 : vector<8x8xf32> to vector<8x8xbf16>
    %cst_147 = arith.constant dense<0.000000e+00> : vector<8x8xf32>
    %324 = tpu.matmul %319, %321, %cst_147 {dimension_numbers = #tpu.dot_dimension_numbers<[1], [1], [0], [0], [0, 0, 1, 0], [], []>} : vector<8x8xbf16>, vector<8x8xbf16>, vector<8x8xf32> -> vector<8x8xf32>
    %cst_148 = arith.constant 0.353553385 : f32
    %325 = vector.broadcast %cst_148 : f32 to vector<8x8xf32>
    %326 = arith.mulf %324, %325 : vector<8x8xf32>
    %cst_149 = arith.constant dense<0xFF800000> : vector<8xf32>
    %327 = vector.multi_reduction <maximumf>, %326, %cst_149 [1] : vector<8x8xf32> to vector<8xf32>
    %328 = vector.shape_cast %327 : vector<8xf32> to vector<8x1xf32>
    %329 = vector.broadcast %328 : vector<8x1xf32> to vector<8x8xf32>
    %330 = arith.subf %326, %329 : vector<8x8xf32>
    %331 = math.exp %330 : vector<8x8xf32>
    %cst_150 = arith.constant dense<0.000000e+00> : vector<8xf32>
    %332 = vector.multi_reduction <add>, %331, %cst_150 [1] : vector<8x8xf32> to vector<8xf32>
    %333 = vector.shape_cast %332 : vector<8xf32> to vector<8x1xf32>
    %334 = tpu.reciprocal %333 {approx = true} : vector<8x1xf32> -> vector<8x1xf32>
    %335 = vector.broadcast %334 : vector<8x1xf32> to vector<8x8xf32>
    %336 = arith.mulf %331, %335 : vector<8x8xf32>
    %337 = arith.truncf %336 : vector<8x8xf32> to vector<8x8xbf16>
    %cst_151 = arith.constant dense<0.000000e+00> : vector<8x8xf32>
    %338 = tpu.matmul %337, %323, %cst_151 {dimension_numbers = #tpu.dot_dimension_numbers<[1], [0], [0], [1], [0, 0, 1, 1], [], []>} : vector<8x8xbf16>, vector<8x8xbf16>, vector<8x8xf32> -> vector<8x8xf32>
    %339 = arith.truncf %338 : vector<8x8xf32> to vector<8x8xbf16>
    %cst_152 = arith.constant dense<0.000000e+00> : vector<8x32xf32>
    %340 = tpu.matmul %339, %233, %cst_152 {dimension_numbers = #tpu.dot_dimension_numbers<[1], [0], [0], [1], [0, 0, 1, 1], [], []>} : vector<8x8xbf16>, vector<8x32xbf16>, vector<8x32xf32> -> vector<8x32xf32>
    %341 = arith.addf %317, %340 : vector<8x32xf32>
    %342 = vector.broadcast %239 : vector<1x32xf32> to vector<8x32xf32>
    %343 = arith.addf %341, %342 : vector<8x32xf32>
    %344 = arith.addf %199, %343 : vector<8x32xf32>
    %c1_153 = arith.constant 1 : index
    %c0_154 = arith.constant 0 : index
    %c0_155 = arith.constant 0 : index
    %345 = vector.load %arg15[%c1_153, %c0_154, %c0_155] : memref<2x1x32xf32, #tpu.memory_space<vmem>>, vector<1x1x32xf32>
    %346 = vector.shape_cast %345 : vector<1x1x32xf32> to vector<1x32xf32>
    %c1_156 = arith.constant 1 : index
    %c0_157 = arith.constant 0 : index
    %c0_158 = arith.constant 0 : index
    %347 = vector.load %arg16[%c1_156, %c0_157, %c0_158] : memref<2x1x32xf32, #tpu.memory_space<vmem>>, vector<1x1x32xf32>
    %348 = vector.shape_cast %347 : vector<1x1x32xf32> to vector<1x32xf32>
    %cst_159 = arith.constant dense<0.000000e+00> : vector<8xf32>
    %349 = vector.multi_reduction <add>, %344, %cst_159 [1] : vector<8x32xf32> to vector<8xf32>
    %350 = vector.shape_cast %349 : vector<8xf32> to vector<8x1xf32>
    %cst_160 = arith.constant 3.200000e+01 : f32
    %351 = vector.broadcast %cst_160 : f32 to vector<8x1xf32>
    %352 = arith.divf %350, %351 : vector<8x1xf32>
    %353 = vector.broadcast %352 : vector<8x1xf32> to vector<8x32xf32>
    %354 = arith.subf %344, %353 : vector<8x32xf32>
    %355 = arith.mulf %354, %354 : vector<8x32xf32>
    %cst_161 = arith.constant dense<0.000000e+00> : vector<8xf32>
    %356 = vector.multi_reduction <add>, %355, %cst_161 [1] : vector<8x32xf32> to vector<8xf32>
    %357 = vector.shape_cast %356 : vector<8xf32> to vector<8x1xf32>
    %cst_162 = arith.constant 3.200000e+01 : f32
    %358 = vector.broadcast %cst_162 : f32 to vector<8x1xf32>
    %359 = arith.divf %357, %358 : vector<8x1xf32>
    %360 = vector.broadcast %352 : vector<8x1xf32> to vector<8x32xf32>
    %361 = arith.subf %344, %360 : vector<8x32xf32>
    %cst_163 = arith.constant 9.99999974E-6 : f32
    %362 = vector.broadcast %cst_163 : f32 to vector<8x1xf32>
    %363 = arith.addf %359, %362 : vector<8x1xf32>
    %364 = math.rsqrt %363 : vector<8x1xf32>
    %365 = vector.broadcast %364 : vector<8x1xf32> to vector<8x32xf32>
    %366 = arith.mulf %361, %365 : vector<8x32xf32>
    %367 = vector.broadcast %346 : vector<1x32xf32> to vector<8x32xf32>
    %368 = arith.mulf %366, %367 : vector<8x32xf32>
    %369 = vector.broadcast %348 : vector<1x32xf32> to vector<8x32xf32>
    %370 = arith.addf %368, %369 : vector<8x32xf32>
    %c1_164 = arith.constant 1 : index
    %c0_165 = arith.constant 0 : index
    %c0_166 = arith.constant 0 : index
    %371 = vector.load %arg17[%c1_164, %c0_165, %c0_166] : memref<2x32x64xbf16, #tpu.memory_space<vmem>>, vector<1x32x64xbf16>
    %372 = vector.shape_cast %371 : vector<1x32x64xbf16> to vector<32x64xbf16>
    %c1_167 = arith.constant 1 : index
    %c0_168 = arith.constant 0 : index
    %c0_169 = arith.constant 0 : index
    %373 = vector.load %arg18[%c1_167, %c0_168, %c0_169] : memref<2x1x64xf32, #tpu.memory_space<vmem>>, vector<1x1x64xf32>
    %374 = vector.shape_cast %373 : vector<1x1x64xf32> to vector<1x64xf32>
    %c1_170 = arith.constant 1 : index
    %c0_171 = arith.constant 0 : index
    %c0_172 = arith.constant 0 : index
    %375 = vector.load %arg19[%c1_170, %c0_171, %c0_172] : memref<2x64x32xbf16, #tpu.memory_space<vmem>>, vector<1x64x32xbf16>
    %376 = vector.shape_cast %375 : vector<1x64x32xbf16> to vector<64x32xbf16>
    %c1_173 = arith.constant 1 : index
    %c0_174 = arith.constant 0 : index
    %c0_175 = arith.constant 0 : index
    %377 = vector.load %arg20[%c1_173, %c0_174, %c0_175] : memref<2x1x32xf32, #tpu.memory_space<vmem>>, vector<1x1x32xf32>
    %378 = vector.shape_cast %377 : vector<1x1x32xf32> to vector<1x32xf32>
    %379 = arith.truncf %370 : vector<8x32xf32> to vector<8x32xbf16>
    %cst_176 = arith.constant dense<0.000000e+00> : vector<8x64xf32>
    %380 = tpu.matmul %379, %372, %cst_176 {dimension_numbers = #tpu.dot_dimension_numbers<[1], [0], [0], [1], [0, 0, 1, 1], [], []>} : vector<8x32xbf16>, vector<32x64xbf16>, vector<8x64xf32> -> vector<8x64xf32>
    %381 = vector.broadcast %374 : vector<1x64xf32> to vector<8x64xf32>
    %382 = arith.addf %380, %381 : vector<8x64xf32>
    %cst_177 = arith.constant 0.000000e+00 : f32
    %383 = vector.broadcast %cst_177 : f32 to vector<8x64xf32>
    %384 = arith.maximumf %382, %383 : vector<8x64xf32>
    %385 = arith.truncf %384 : vector<8x64xf32> to vector<8x64xbf16>
    %cst_178 = arith.constant dense<0.000000e+00> : vector<8x32xf32>
    %386 = tpu.matmul %385, %376, %cst_178 {dimension_numbers = #tpu.dot_dimension_numbers<[1], [0], [0], [1], [0, 0, 1, 1], [], []>} : vector<8x64xbf16>, vector<64x32xbf16>, vector<8x32xf32> -> vector<8x32xf32>
    %387 = vector.broadcast %378 : vector<1x32xf32> to vector<8x32xf32>
    %388 = arith.addf %386, %387 : vector<8x32xf32>
    %389 = arith.addf %344, %388 : vector<8x32xf32>
    %c0_179 = arith.constant 0 : index
    %c0_180 = arith.constant 0 : index
    %390 = vector.load %arg21[%c0_179, %c0_180] : memref<1x32xf32, #tpu.memory_space<vmem>>, vector<1x32xf32>
    %c0_181 = arith.constant 0 : index
    %c0_182 = arith.constant 0 : index
    %391 = vector.load %arg22[%c0_181, %c0_182] : memref<1x32xf32, #tpu.memory_space<vmem>>, vector<1x32xf32>
    %cst_183 = arith.constant dense<0.000000e+00> : vector<8xf32>
    %392 = vector.multi_reduction <add>, %389, %cst_183 [1] : vector<8x32xf32> to vector<8xf32>
    %393 = vector.shape_cast %392 : vector<8xf32> to vector<8x1xf32>
    %cst_184 = arith.constant 3.200000e+01 : f32
    %394 = vector.broadcast %cst_184 : f32 to vector<8x1xf32>
    %395 = arith.divf %393, %394 : vector<8x1xf32>
    %396 = vector.broadcast %395 : vector<8x1xf32> to vector<8x32xf32>
    %397 = arith.subf %389, %396 : vector<8x32xf32>
    %398 = arith.mulf %397, %397 : vector<8x32xf32>
    %cst_185 = arith.constant dense<0.000000e+00> : vector<8xf32>
    %399 = vector.multi_reduction <add>, %398, %cst_185 [1] : vector<8x32xf32> to vector<8xf32>
    %400 = vector.shape_cast %399 : vector<8xf32> to vector<8x1xf32>
    %cst_186 = arith.constant 3.200000e+01 : f32
    %401 = vector.broadcast %cst_186 : f32 to vector<8x1xf32>
    %402 = arith.divf %400, %401 : vector<8x1xf32>
    %403 = vector.broadcast %395 : vector<8x1xf32> to vector<8x32xf32>
    %404 = arith.subf %389, %403 : vector<8x32xf32>
    %cst_187 = arith.constant 9.99999974E-6 : f32
    %405 = vector.broadcast %cst_187 : f32 to vector<8x1xf32>
    %406 = arith.addf %402, %405 : vector<8x1xf32>
    %407 = math.rsqrt %406 : vector<8x1xf32>
    %408 = vector.broadcast %407 : vector<8x1xf32> to vector<8x32xf32>
    %409 = arith.mulf %404, %408 : vector<8x32xf32>
    %410 = vector.broadcast %390 : vector<1x32xf32> to vector<8x32xf32>
    %411 = arith.mulf %409, %410 : vector<8x32xf32>
    %412 = vector.broadcast %391 : vector<1x32xf32> to vector<8x32xf32>
    %413 = arith.addf %411, %412 : vector<8x32xf32>
    %414 = arith.truncf %413 : vector<8x32xf32> to vector<8x32xbf16>
    %c0_188 = arith.constant 0 : index
    %c0_189 = arith.constant 0 : index
    %c0_190 = arith.constant 0 : index
    %415 = vector.load %arg3[%c0_188, %c0_189, %c0_190] : memref<1x1x786xf32, #tpu.memory_space<vmem>>, vector<1x1x786xf32>
    %416 = vector.shape_cast %415 : vector<1x1x786xf32> to vector<1x786xf32>
    %417 = arith.truncf %416 : vector<1x786xf32> to vector<1x786xbf16>
    %c0_191 = arith.constant 0 : index
    %c0_192 = arith.constant 0 : index
    %418 = vector.load %arg7[%c0_191, %c0_192] : memref<786x32xbf16, #tpu.memory_space<vmem>>, vector<786x32xbf16>
    %cst_193 = arith.constant dense<0.000000e+00> : vector<1x32xf32>
    %419 = tpu.matmul %417, %418, %cst_193 {dimension_numbers = #tpu.dot_dimension_numbers<[1], [0], [0], [1], [0, 0, 1, 1], [], []>} : vector<1x786xbf16>, vector<786x32xbf16>, vector<1x32xf32> -> vector<1x32xf32>
    %c0_194 = arith.constant 0 : index
    %c0_195 = arith.constant 0 : index
    %420 = vector.load %arg8[%c0_194, %c0_195] : memref<1x32xf32, #tpu.memory_space<vmem>>, vector<1x32xf32>
    %421 = arith.addf %419, %420 : vector<1x32xf32>
    %c0_196 = arith.constant 0 : index
    %c0_197 = arith.constant 0 : index
    %c0_198 = arith.constant 0 : index
    %422 = vector.load %arg4[%c0_196, %c0_197, %c0_198] : memref<1x8x32xf32, #tpu.memory_space<vmem>>, vector<1x8x32xf32>
    %423 = vector.shape_cast %422 : vector<1x8x32xf32> to vector<8x32xf32>
    %424 = vector.broadcast %421 : vector<1x32xf32> to vector<8x32xf32>
    %425 = arith.addf %423, %424 : vector<8x32xf32>
    %c0_199 = arith.constant 0 : index
    %c0_200 = arith.constant 0 : index
    %c0_201 = arith.constant 0 : index
    %426 = vector.load %arg23[%c0_199, %c0_200, %c0_201] : memref<2x1x32xf32, #tpu.memory_space<vmem>>, vector<1x1x32xf32>
    %427 = vector.shape_cast %426 : vector<1x1x32xf32> to vector<1x32xf32>
    %c0_202 = arith.constant 0 : index
    %c0_203 = arith.constant 0 : index
    %c0_204 = arith.constant 0 : index
    %428 = vector.load %arg24[%c0_202, %c0_203, %c0_204] : memref<2x1x32xf32, #tpu.memory_space<vmem>>, vector<1x1x32xf32>
    %429 = vector.shape_cast %428 : vector<1x1x32xf32> to vector<1x32xf32>
    %cst_205 = arith.constant dense<0.000000e+00> : vector<8xf32>
    %430 = vector.multi_reduction <add>, %425, %cst_205 [1] : vector<8x32xf32> to vector<8xf32>
    %431 = vector.shape_cast %430 : vector<8xf32> to vector<8x1xf32>
    %cst_206 = arith.constant 3.200000e+01 : f32
    %432 = vector.broadcast %cst_206 : f32 to vector<8x1xf32>
    %433 = arith.divf %431, %432 : vector<8x1xf32>
    %434 = vector.broadcast %433 : vector<8x1xf32> to vector<8x32xf32>
    %435 = arith.subf %425, %434 : vector<8x32xf32>
    %436 = arith.mulf %435, %435 : vector<8x32xf32>
    %cst_207 = arith.constant dense<0.000000e+00> : vector<8xf32>
    %437 = vector.multi_reduction <add>, %436, %cst_207 [1] : vector<8x32xf32> to vector<8xf32>
    %438 = vector.shape_cast %437 : vector<8xf32> to vector<8x1xf32>
    %cst_208 = arith.constant 3.200000e+01 : f32
    %439 = vector.broadcast %cst_208 : f32 to vector<8x1xf32>
    %440 = arith.divf %438, %439 : vector<8x1xf32>
    %441 = vector.broadcast %433 : vector<8x1xf32> to vector<8x32xf32>
    %442 = arith.subf %425, %441 : vector<8x32xf32>
    %cst_209 = arith.constant 9.99999974E-6 : f32
    %443 = vector.broadcast %cst_209 : f32 to vector<8x1xf32>
    %444 = arith.addf %440, %443 : vector<8x1xf32>
    %445 = math.rsqrt %444 : vector<8x1xf32>
    %446 = vector.broadcast %445 : vector<8x1xf32> to vector<8x32xf32>
    %447 = arith.mulf %442, %446 : vector<8x32xf32>
    %448 = vector.broadcast %427 : vector<1x32xf32> to vector<8x32xf32>
    %449 = arith.mulf %447, %448 : vector<8x32xf32>
    %450 = vector.broadcast %429 : vector<1x32xf32> to vector<8x32xf32>
    %451 = arith.addf %449, %450 : vector<8x32xf32>
    %c0_210 = arith.constant 0 : index
    %c0_211 = arith.constant 0 : index
    %c0_212 = arith.constant 0 : index
    %c0_213 = arith.constant 0 : index
    %452 = vector.load %arg27[%c0_210, %c0_211, %c0_212, %c0_213] : memref<2x4x8x32xbf16, #tpu.memory_space<vmem>>, vector<1x1x8x32xbf16>
    %453 = vector.shape_cast %452 : vector<1x1x8x32xbf16> to vector<8x32xbf16>
    %c0_214 = arith.constant 0 : index
    %c1_215 = arith.constant 1 : index
    %c0_216 = arith.constant 0 : index
    %c0_217 = arith.constant 0 : index
    %454 = vector.load %arg27[%c0_214, %c1_215, %c0_216, %c0_217] : memref<2x4x8x32xbf16, #tpu.memory_space<vmem>>, vector<1x1x8x32xbf16>
    %455 = vector.shape_cast %454 : vector<1x1x8x32xbf16> to vector<8x32xbf16>
    %c0_218 = arith.constant 0 : index
    %c2_219 = arith.constant 2 : index
    %c0_220 = arith.constant 0 : index
    %c0_221 = arith.constant 0 : index
    %456 = vector.load %arg27[%c0_218, %c2_219, %c0_220, %c0_221] : memref<2x4x8x32xbf16, #tpu.memory_space<vmem>>, vector<1x1x8x32xbf16>
    %457 = vector.shape_cast %456 : vector<1x1x8x32xbf16> to vector<8x32xbf16>
    %c0_222 = arith.constant 0 : index
    %c3_223 = arith.constant 3 : index
    %c0_224 = arith.constant 0 : index
    %c0_225 = arith.constant 0 : index
    %458 = vector.load %arg27[%c0_222, %c3_223, %c0_224, %c0_225] : memref<2x4x8x32xbf16, #tpu.memory_space<vmem>>, vector<1x1x8x32xbf16>
    %459 = vector.shape_cast %458 : vector<1x1x8x32xbf16> to vector<8x32xbf16>
    %c0_226 = arith.constant 0 : index
    %c0_227 = arith.constant 0 : index
    %c0_228 = arith.constant 0 : index
    %460 = vector.load %arg25[%c0_226, %c0_227, %c0_228] : memref<2x32x96xbf16, #tpu.memory_space<vmem>>, vector<1x32x96xbf16>
    %461 = vector.shape_cast %460 : vector<1x32x96xbf16> to vector<32x96xbf16>
    %c0_229 = arith.constant 0 : index
    %c0_230 = arith.constant 0 : index
    %c0_231 = arith.constant 0 : index
    %462 = vector.load %arg26[%c0_229, %c0_230, %c0_231] : memref<2x1x96xf32, #tpu.memory_space<vmem>>, vector<1x1x96xf32>
    %463 = vector.shape_cast %462 : vector<1x1x96xf32> to vector<1x96xf32>
    %c0_232 = arith.constant 0 : index
    %c0_233 = arith.constant 0 : index
    %c0_234 = arith.constant 0 : index
    %464 = vector.load %arg28[%c0_232, %c0_233, %c0_234] : memref<2x1x32xf32, #tpu.memory_space<vmem>>, vector<1x1x32xf32>
    %465 = vector.shape_cast %464 : vector<1x1x32xf32> to vector<1x32xf32>
    %466 = arith.truncf %451 : vector<8x32xf32> to vector<8x32xbf16>
    %cst_235 = arith.constant dense<0.000000e+00> : vector<8x96xf32>
    %467 = tpu.matmul %466, %461, %cst_235 {dimension_numbers = #tpu.dot_dimension_numbers<[1], [0], [0], [1], [0, 0, 1, 1], [], []>} : vector<8x32xbf16>, vector<32x96xbf16>, vector<8x96xf32> -> vector<8x96xf32>
    %468 = vector.broadcast %463 : vector<1x96xf32> to vector<8x96xf32>
    %469 = arith.addf %467, %468 : vector<8x96xf32>
    %470 = vector.extract_strided_slice %469 {offsets = [0, 0], sizes = [8, 32], strides = [1, 1]} : vector<8x96xf32> to vector<8x32xf32>
    %471 = vector.extract_strided_slice %469 {offsets = [0, 32], sizes = [8, 32], strides = [1, 1]} : vector<8x96xf32> to vector<8x32xf32>
    %472 = vector.extract_strided_slice %469 {offsets = [0, 64], sizes = [8, 32], strides = [1, 1]} : vector<8x96xf32> to vector<8x32xf32>
    %473 = vector.extract_strided_slice %470 {offsets = [0, 0], sizes = [8, 8], strides = [1, 1]} : vector<8x32xf32> to vector<8x8xf32>
    %474 = arith.truncf %473 : vector<8x8xf32> to vector<8x8xbf16>
    %475 = vector.extract_strided_slice %471 {offsets = [0, 0], sizes = [8, 8], strides = [1, 1]} : vector<8x32xf32> to vector<8x8xf32>
    %476 = arith.truncf %475 : vector<8x8xf32> to vector<8x8xbf16>
    %477 = vector.extract_strided_slice %472 {offsets = [0, 0], sizes = [8, 8], strides = [1, 1]} : vector<8x32xf32> to vector<8x8xf32>
    %478 = arith.truncf %477 : vector<8x8xf32> to vector<8x8xbf16>
    %cst_236 = arith.constant dense<0.000000e+00> : vector<8x8xf32>
    %479 = tpu.matmul %474, %476, %cst_236 {dimension_numbers = #tpu.dot_dimension_numbers<[1], [1], [0], [0], [0, 0, 1, 0], [], []>} : vector<8x8xbf16>, vector<8x8xbf16>, vector<8x8xf32> -> vector<8x8xf32>
    %cst_237 = arith.constant 0.353553385 : f32
    %480 = vector.broadcast %cst_237 : f32 to vector<8x8xf32>
    %481 = arith.mulf %479, %480 : vector<8x8xf32>
    %cst_238 = arith.constant dense<0xFF800000> : vector<8xf32>
    %482 = vector.multi_reduction <maximumf>, %481, %cst_238 [1] : vector<8x8xf32> to vector<8xf32>
    %483 = vector.shape_cast %482 : vector<8xf32> to vector<8x1xf32>
    %484 = vector.broadcast %483 : vector<8x1xf32> to vector<8x8xf32>
    %485 = arith.subf %481, %484 : vector<8x8xf32>
    %486 = math.exp %485 : vector<8x8xf32>
    %cst_239 = arith.constant dense<0.000000e+00> : vector<8xf32>
    %487 = vector.multi_reduction <add>, %486, %cst_239 [1] : vector<8x8xf32> to vector<8xf32>
    %488 = vector.shape_cast %487 : vector<8xf32> to vector<8x1xf32>
    %489 = tpu.reciprocal %488 {approx = true} : vector<8x1xf32> -> vector<8x1xf32>
    %490 = vector.broadcast %489 : vector<8x1xf32> to vector<8x8xf32>
    %491 = arith.mulf %486, %490 : vector<8x8xf32>
    %492 = arith.truncf %491 : vector<8x8xf32> to vector<8x8xbf16>
    %cst_240 = arith.constant dense<0.000000e+00> : vector<8x8xf32>
    %493 = tpu.matmul %492, %478, %cst_240 {dimension_numbers = #tpu.dot_dimension_numbers<[1], [0], [0], [1], [0, 0, 1, 1], [], []>} : vector<8x8xbf16>, vector<8x8xbf16>, vector<8x8xf32> -> vector<8x8xf32>
    %494 = arith.truncf %493 : vector<8x8xf32> to vector<8x8xbf16>
    %cst_241 = arith.constant dense<0.000000e+00> : vector<8x32xf32>
    %495 = tpu.matmul %494, %453, %cst_241 {dimension_numbers = #tpu.dot_dimension_numbers<[1], [0], [0], [1], [0, 0, 1, 1], [], []>} : vector<8x8xbf16>, vector<8x32xbf16>, vector<8x32xf32> -> vector<8x32xf32>
    %496 = vector.extract_strided_slice %470 {offsets = [0, 8], sizes = [8, 8], strides = [1, 1]} : vector<8x32xf32> to vector<8x8xf32>
    %497 = arith.truncf %496 : vector<8x8xf32> to vector<8x8xbf16>
    %498 = vector.extract_strided_slice %471 {offsets = [0, 8], sizes = [8, 8], strides = [1, 1]} : vector<8x32xf32> to vector<8x8xf32>
    %499 = arith.truncf %498 : vector<8x8xf32> to vector<8x8xbf16>
    %500 = vector.extract_strided_slice %472 {offsets = [0, 8], sizes = [8, 8], strides = [1, 1]} : vector<8x32xf32> to vector<8x8xf32>
    %501 = arith.truncf %500 : vector<8x8xf32> to vector<8x8xbf16>
    %cst_242 = arith.constant dense<0.000000e+00> : vector<8x8xf32>
    %502 = tpu.matmul %497, %499, %cst_242 {dimension_numbers = #tpu.dot_dimension_numbers<[1], [1], [0], [0], [0, 0, 1, 0], [], []>} : vector<8x8xbf16>, vector<8x8xbf16>, vector<8x8xf32> -> vector<8x8xf32>
    %cst_243 = arith.constant 0.353553385 : f32
    %503 = vector.broadcast %cst_243 : f32 to vector<8x8xf32>
    %504 = arith.mulf %502, %503 : vector<8x8xf32>
    %cst_244 = arith.constant dense<0xFF800000> : vector<8xf32>
    %505 = vector.multi_reduction <maximumf>, %504, %cst_244 [1] : vector<8x8xf32> to vector<8xf32>
    %506 = vector.shape_cast %505 : vector<8xf32> to vector<8x1xf32>
    %507 = vector.broadcast %506 : vector<8x1xf32> to vector<8x8xf32>
    %508 = arith.subf %504, %507 : vector<8x8xf32>
    %509 = math.exp %508 : vector<8x8xf32>
    %cst_245 = arith.constant dense<0.000000e+00> : vector<8xf32>
    %510 = vector.multi_reduction <add>, %509, %cst_245 [1] : vector<8x8xf32> to vector<8xf32>
    %511 = vector.shape_cast %510 : vector<8xf32> to vector<8x1xf32>
    %512 = tpu.reciprocal %511 {approx = true} : vector<8x1xf32> -> vector<8x1xf32>
    %513 = vector.broadcast %512 : vector<8x1xf32> to vector<8x8xf32>
    %514 = arith.mulf %509, %513 : vector<8x8xf32>
    %515 = arith.truncf %514 : vector<8x8xf32> to vector<8x8xbf16>
    %cst_246 = arith.constant dense<0.000000e+00> : vector<8x8xf32>
    %516 = tpu.matmul %515, %501, %cst_246 {dimension_numbers = #tpu.dot_dimension_numbers<[1], [0], [0], [1], [0, 0, 1, 1], [], []>} : vector<8x8xbf16>, vector<8x8xbf16>, vector<8x8xf32> -> vector<8x8xf32>
    %517 = arith.truncf %516 : vector<8x8xf32> to vector<8x8xbf16>
    %cst_247 = arith.constant dense<0.000000e+00> : vector<8x32xf32>
    %518 = tpu.matmul %517, %455, %cst_247 {dimension_numbers = #tpu.dot_dimension_numbers<[1], [0], [0], [1], [0, 0, 1, 1], [], []>} : vector<8x8xbf16>, vector<8x32xbf16>, vector<8x32xf32> -> vector<8x32xf32>
    %519 = arith.addf %495, %518 : vector<8x32xf32>
    %520 = vector.extract_strided_slice %470 {offsets = [0, 16], sizes = [8, 8], strides = [1, 1]} : vector<8x32xf32> to vector<8x8xf32>
    %521 = arith.truncf %520 : vector<8x8xf32> to vector<8x8xbf16>
    %522 = vector.extract_strided_slice %471 {offsets = [0, 16], sizes = [8, 8], strides = [1, 1]} : vector<8x32xf32> to vector<8x8xf32>
    %523 = arith.truncf %522 : vector<8x8xf32> to vector<8x8xbf16>
    %524 = vector.extract_strided_slice %472 {offsets = [0, 16], sizes = [8, 8], strides = [1, 1]} : vector<8x32xf32> to vector<8x8xf32>
    %525 = arith.truncf %524 : vector<8x8xf32> to vector<8x8xbf16>
    %cst_248 = arith.constant dense<0.000000e+00> : vector<8x8xf32>
    %526 = tpu.matmul %521, %523, %cst_248 {dimension_numbers = #tpu.dot_dimension_numbers<[1], [1], [0], [0], [0, 0, 1, 0], [], []>} : vector<8x8xbf16>, vector<8x8xbf16>, vector<8x8xf32> -> vector<8x8xf32>
    %cst_249 = arith.constant 0.353553385 : f32
    %527 = vector.broadcast %cst_249 : f32 to vector<8x8xf32>
    %528 = arith.mulf %526, %527 : vector<8x8xf32>
    %cst_250 = arith.constant dense<0xFF800000> : vector<8xf32>
    %529 = vector.multi_reduction <maximumf>, %528, %cst_250 [1] : vector<8x8xf32> to vector<8xf32>
    %530 = vector.shape_cast %529 : vector<8xf32> to vector<8x1xf32>
    %531 = vector.broadcast %530 : vector<8x1xf32> to vector<8x8xf32>
    %532 = arith.subf %528, %531 : vector<8x8xf32>
    %533 = math.exp %532 : vector<8x8xf32>
    %cst_251 = arith.constant dense<0.000000e+00> : vector<8xf32>
    %534 = vector.multi_reduction <add>, %533, %cst_251 [1] : vector<8x8xf32> to vector<8xf32>
    %535 = vector.shape_cast %534 : vector<8xf32> to vector<8x1xf32>
    %536 = tpu.reciprocal %535 {approx = true} : vector<8x1xf32> -> vector<8x1xf32>
    %537 = vector.broadcast %536 : vector<8x1xf32> to vector<8x8xf32>
    %538 = arith.mulf %533, %537 : vector<8x8xf32>
    %539 = arith.truncf %538 : vector<8x8xf32> to vector<8x8xbf16>
    %cst_252 = arith.constant dense<0.000000e+00> : vector<8x8xf32>
    %540 = tpu.matmul %539, %525, %cst_252 {dimension_numbers = #tpu.dot_dimension_numbers<[1], [0], [0], [1], [0, 0, 1, 1], [], []>} : vector<8x8xbf16>, vector<8x8xbf16>, vector<8x8xf32> -> vector<8x8xf32>
    %541 = arith.truncf %540 : vector<8x8xf32> to vector<8x8xbf16>
    %cst_253 = arith.constant dense<0.000000e+00> : vector<8x32xf32>
    %542 = tpu.matmul %541, %457, %cst_253 {dimension_numbers = #tpu.dot_dimension_numbers<[1], [0], [0], [1], [0, 0, 1, 1], [], []>} : vector<8x8xbf16>, vector<8x32xbf16>, vector<8x32xf32> -> vector<8x32xf32>
    %543 = arith.addf %519, %542 : vector<8x32xf32>
    %544 = vector.extract_strided_slice %470 {offsets = [0, 24], sizes = [8, 8], strides = [1, 1]} : vector<8x32xf32> to vector<8x8xf32>
    %545 = arith.truncf %544 : vector<8x8xf32> to vector<8x8xbf16>
    %546 = vector.extract_strided_slice %471 {offsets = [0, 24], sizes = [8, 8], strides = [1, 1]} : vector<8x32xf32> to vector<8x8xf32>
    %547 = arith.truncf %546 : vector<8x8xf32> to vector<8x8xbf16>
    %548 = vector.extract_strided_slice %472 {offsets = [0, 24], sizes = [8, 8], strides = [1, 1]} : vector<8x32xf32> to vector<8x8xf32>
    %549 = arith.truncf %548 : vector<8x8xf32> to vector<8x8xbf16>
    %cst_254 = arith.constant dense<0.000000e+00> : vector<8x8xf32>
    %550 = tpu.matmul %545, %547, %cst_254 {dimension_numbers = #tpu.dot_dimension_numbers<[1], [1], [0], [0], [0, 0, 1, 0], [], []>} : vector<8x8xbf16>, vector<8x8xbf16>, vector<8x8xf32> -> vector<8x8xf32>
    %cst_255 = arith.constant 0.353553385 : f32
    %551 = vector.broadcast %cst_255 : f32 to vector<8x8xf32>
    %552 = arith.mulf %550, %551 : vector<8x8xf32>
    %cst_256 = arith.constant dense<0xFF800000> : vector<8xf32>
    %553 = vector.multi_reduction <maximumf>, %552, %cst_256 [1] : vector<8x8xf32> to vector<8xf32>
    %554 = vector.shape_cast %553 : vector<8xf32> to vector<8x1xf32>
    %555 = vector.broadcast %554 : vector<8x1xf32> to vector<8x8xf32>
    %556 = arith.subf %552, %555 : vector<8x8xf32>
    %557 = math.exp %556 : vector<8x8xf32>
    %cst_257 = arith.constant dense<0.000000e+00> : vector<8xf32>
    %558 = vector.multi_reduction <add>, %557, %cst_257 [1] : vector<8x8xf32> to vector<8xf32>
    %559 = vector.shape_cast %558 : vector<8xf32> to vector<8x1xf32>
    %560 = tpu.reciprocal %559 {approx = true} : vector<8x1xf32> -> vector<8x1xf32>
    %561 = vector.broadcast %560 : vector<8x1xf32> to vector<8x8xf32>
    %562 = arith.mulf %557, %561 : vector<8x8xf32>
    %563 = arith.truncf %562 : vector<8x8xf32> to vector<8x8xbf16>
    %cst_258 = arith.constant dense<0.000000e+00> : vector<8x8xf32>
    %564 = tpu.matmul %563, %549, %cst_258 {dimension_numbers = #tpu.dot_dimension_numbers<[1], [0], [0], [1], [0, 0, 1, 1], [], []>} : vector<8x8xbf16>, vector<8x8xbf16>, vector<8x8xf32> -> vector<8x8xf32>
    %565 = arith.truncf %564 : vector<8x8xf32> to vector<8x8xbf16>
    %cst_259 = arith.constant dense<0.000000e+00> : vector<8x32xf32>
    %566 = tpu.matmul %565, %459, %cst_259 {dimension_numbers = #tpu.dot_dimension_numbers<[1], [0], [0], [1], [0, 0, 1, 1], [], []>} : vector<8x8xbf16>, vector<8x32xbf16>, vector<8x32xf32> -> vector<8x32xf32>
    %567 = arith.addf %543, %566 : vector<8x32xf32>
    %568 = vector.broadcast %465 : vector<1x32xf32> to vector<8x32xf32>
    %569 = arith.addf %567, %568 : vector<8x32xf32>
    %570 = arith.addf %425, %569 : vector<8x32xf32>
    %c0_260 = arith.constant 0 : index
    %c0_261 = arith.constant 0 : index
    %c0_262 = arith.constant 0 : index
    %571 = vector.load %arg33[%c0_260, %c0_261, %c0_262] : memref<2x32x64xbf16, #tpu.memory_space<vmem>>, vector<1x32x64xbf16>
    %572 = vector.shape_cast %571 : vector<1x32x64xbf16> to vector<32x64xbf16>
    %cst_263 = arith.constant dense<0.000000e+00> : vector<8x64xf32>
    %573 = tpu.matmul %414, %572, %cst_263 {dimension_numbers = #tpu.dot_dimension_numbers<[1], [0], [0], [1], [0, 0, 1, 1], [], []>} : vector<8x32xbf16>, vector<32x64xbf16>, vector<8x64xf32> -> vector<8x64xf32>
    %c0_264 = arith.constant 0 : index
    %c0_265 = arith.constant 0 : index
    %c0_266 = arith.constant 0 : index
    %574 = vector.load %arg34[%c0_264, %c0_265, %c0_266] : memref<2x1x64xf32, #tpu.memory_space<vmem>>, vector<1x1x64xf32>
    %575 = vector.shape_cast %574 : vector<1x1x64xf32> to vector<1x64xf32>
    %576 = vector.broadcast %575 : vector<1x64xf32> to vector<8x64xf32>
    %577 = arith.addf %573, %576 : vector<8x64xf32>
    %c0_267 = arith.constant 0 : index
    %c0_268 = arith.constant 0 : index
    %c0_269 = arith.constant 0 : index
    %578 = vector.load %arg29[%c0_267, %c0_268, %c0_269] : memref<2x1x32xf32, #tpu.memory_space<vmem>>, vector<1x1x32xf32>
    %579 = vector.shape_cast %578 : vector<1x1x32xf32> to vector<1x32xf32>
    %c0_270 = arith.constant 0 : index
    %c0_271 = arith.constant 0 : index
    %c0_272 = arith.constant 0 : index
    %580 = vector.load %arg30[%c0_270, %c0_271, %c0_272] : memref<2x1x32xf32, #tpu.memory_space<vmem>>, vector<1x1x32xf32>
    %581 = vector.shape_cast %580 : vector<1x1x32xf32> to vector<1x32xf32>
    %cst_273 = arith.constant dense<0.000000e+00> : vector<8xf32>
    %582 = vector.multi_reduction <add>, %570, %cst_273 [1] : vector<8x32xf32> to vector<8xf32>
    %583 = vector.shape_cast %582 : vector<8xf32> to vector<8x1xf32>
    %cst_274 = arith.constant 3.200000e+01 : f32
    %584 = vector.broadcast %cst_274 : f32 to vector<8x1xf32>
    %585 = arith.divf %583, %584 : vector<8x1xf32>
    %586 = vector.broadcast %585 : vector<8x1xf32> to vector<8x32xf32>
    %587 = arith.subf %570, %586 : vector<8x32xf32>
    %588 = arith.mulf %587, %587 : vector<8x32xf32>
    %cst_275 = arith.constant dense<0.000000e+00> : vector<8xf32>
    %589 = vector.multi_reduction <add>, %588, %cst_275 [1] : vector<8x32xf32> to vector<8xf32>
    %590 = vector.shape_cast %589 : vector<8xf32> to vector<8x1xf32>
    %cst_276 = arith.constant 3.200000e+01 : f32
    %591 = vector.broadcast %cst_276 : f32 to vector<8x1xf32>
    %592 = arith.divf %590, %591 : vector<8x1xf32>
    %593 = vector.broadcast %585 : vector<8x1xf32> to vector<8x32xf32>
    %594 = arith.subf %570, %593 : vector<8x32xf32>
    %cst_277 = arith.constant 9.99999974E-6 : f32
    %595 = vector.broadcast %cst_277 : f32 to vector<8x1xf32>
    %596 = arith.addf %592, %595 : vector<8x1xf32>
    %597 = math.rsqrt %596 : vector<8x1xf32>
    %598 = vector.broadcast %597 : vector<8x1xf32> to vector<8x32xf32>
    %599 = arith.mulf %594, %598 : vector<8x32xf32>
    %600 = vector.broadcast %579 : vector<1x32xf32> to vector<8x32xf32>
    %601 = arith.mulf %599, %600 : vector<8x32xf32>
    %602 = vector.broadcast %581 : vector<1x32xf32> to vector<8x32xf32>
    %603 = arith.addf %601, %602 : vector<8x32xf32>
    %604 = arith.truncf %603 : vector<8x32xf32> to vector<8x32xbf16>
    %c0_278 = arith.constant 0 : index
    %c0_279 = arith.constant 0 : index
    %c0_280 = arith.constant 0 : index
    %605 = vector.load %arg31[%c0_278, %c0_279, %c0_280] : memref<2x32x32xbf16, #tpu.memory_space<vmem>>, vector<1x32x32xbf16>
    %606 = vector.shape_cast %605 : vector<1x32x32xbf16> to vector<32x32xbf16>
    %cst_281 = arith.constant dense<0.000000e+00> : vector<8x32xf32>
    %607 = tpu.matmul %604, %606, %cst_281 {dimension_numbers = #tpu.dot_dimension_numbers<[1], [0], [0], [1], [0, 0, 1, 1], [], []>} : vector<8x32xbf16>, vector<32x32xbf16>, vector<8x32xf32> -> vector<8x32xf32>
    %c0_282 = arith.constant 0 : index
    %c0_283 = arith.constant 0 : index
    %c0_284 = arith.constant 0 : index
    %608 = vector.load %arg32[%c0_282, %c0_283, %c0_284] : memref<2x1x32xf32, #tpu.memory_space<vmem>>, vector<1x1x32xf32>
    %609 = vector.shape_cast %608 : vector<1x1x32xf32> to vector<1x32xf32>
    %610 = vector.broadcast %609 : vector<1x32xf32> to vector<8x32xf32>
    %611 = arith.addf %607, %610 : vector<8x32xf32>
    %c0_285 = arith.constant 0 : index
    %c0_286 = arith.constant 0 : index
    %c0_287 = arith.constant 0 : index
    %c0_288 = arith.constant 0 : index
    %612 = vector.load %arg35[%c0_285, %c0_286, %c0_287, %c0_288] : memref<2x4x8x32xbf16, #tpu.memory_space<vmem>>, vector<1x1x8x32xbf16>
    %613 = vector.shape_cast %612 : vector<1x1x8x32xbf16> to vector<8x32xbf16>
    %c0_289 = arith.constant 0 : index
    %c1_290 = arith.constant 1 : index
    %c0_291 = arith.constant 0 : index
    %c0_292 = arith.constant 0 : index
    %614 = vector.load %arg35[%c0_289, %c1_290, %c0_291, %c0_292] : memref<2x4x8x32xbf16, #tpu.memory_space<vmem>>, vector<1x1x8x32xbf16>
    %615 = vector.shape_cast %614 : vector<1x1x8x32xbf16> to vector<8x32xbf16>
    %c0_293 = arith.constant 0 : index
    %c2_294 = arith.constant 2 : index
    %c0_295 = arith.constant 0 : index
    %c0_296 = arith.constant 0 : index
    %616 = vector.load %arg35[%c0_293, %c2_294, %c0_295, %c0_296] : memref<2x4x8x32xbf16, #tpu.memory_space<vmem>>, vector<1x1x8x32xbf16>
    %617 = vector.shape_cast %616 : vector<1x1x8x32xbf16> to vector<8x32xbf16>
    %c0_297 = arith.constant 0 : index
    %c3_298 = arith.constant 3 : index
    %c0_299 = arith.constant 0 : index
    %c0_300 = arith.constant 0 : index
    %618 = vector.load %arg35[%c0_297, %c3_298, %c0_299, %c0_300] : memref<2x4x8x32xbf16, #tpu.memory_space<vmem>>, vector<1x1x8x32xbf16>
    %619 = vector.shape_cast %618 : vector<1x1x8x32xbf16> to vector<8x32xbf16>
    %620 = vector.extract_strided_slice %577 {offsets = [0, 0], sizes = [8, 32], strides = [1, 1]} : vector<8x64xf32> to vector<8x32xf32>
    %621 = vector.extract_strided_slice %577 {offsets = [0, 32], sizes = [8, 32], strides = [1, 1]} : vector<8x64xf32> to vector<8x32xf32>
    %c0_301 = arith.constant 0 : index
    %c0_302 = arith.constant 0 : index
    %c0_303 = arith.constant 0 : index
    %622 = vector.load %arg36[%c0_301, %c0_302, %c0_303] : memref<2x1x32xf32, #tpu.memory_space<vmem>>, vector<1x1x32xf32>
    %623 = vector.shape_cast %622 : vector<1x1x32xf32> to vector<1x32xf32>
    %624 = vector.extract_strided_slice %611 {offsets = [0, 0], sizes = [8, 8], strides = [1, 1]} : vector<8x32xf32> to vector<8x8xf32>
    %625 = arith.truncf %624 : vector<8x8xf32> to vector<8x8xbf16>
    %626 = vector.extract_strided_slice %620 {offsets = [0, 0], sizes = [8, 8], strides = [1, 1]} : vector<8x32xf32> to vector<8x8xf32>
    %627 = arith.truncf %626 : vector<8x8xf32> to vector<8x8xbf16>
    %628 = vector.extract_strided_slice %621 {offsets = [0, 0], sizes = [8, 8], strides = [1, 1]} : vector<8x32xf32> to vector<8x8xf32>
    %629 = arith.truncf %628 : vector<8x8xf32> to vector<8x8xbf16>
    %cst_304 = arith.constant dense<0.000000e+00> : vector<8x8xf32>
    %630 = tpu.matmul %625, %627, %cst_304 {dimension_numbers = #tpu.dot_dimension_numbers<[1], [1], [0], [0], [0, 0, 1, 0], [], []>} : vector<8x8xbf16>, vector<8x8xbf16>, vector<8x8xf32> -> vector<8x8xf32>
    %cst_305 = arith.constant 0.353553385 : f32
    %631 = vector.broadcast %cst_305 : f32 to vector<8x8xf32>
    %632 = arith.mulf %630, %631 : vector<8x8xf32>
    %cst_306 = arith.constant dense<0xFF800000> : vector<8xf32>
    %633 = vector.multi_reduction <maximumf>, %632, %cst_306 [1] : vector<8x8xf32> to vector<8xf32>
    %634 = vector.shape_cast %633 : vector<8xf32> to vector<8x1xf32>
    %635 = vector.broadcast %634 : vector<8x1xf32> to vector<8x8xf32>
    %636 = arith.subf %632, %635 : vector<8x8xf32>
    %637 = math.exp %636 : vector<8x8xf32>
    %cst_307 = arith.constant dense<0.000000e+00> : vector<8xf32>
    %638 = vector.multi_reduction <add>, %637, %cst_307 [1] : vector<8x8xf32> to vector<8xf32>
    %639 = vector.shape_cast %638 : vector<8xf32> to vector<8x1xf32>
    %640 = tpu.reciprocal %639 {approx = true} : vector<8x1xf32> -> vector<8x1xf32>
    %641 = vector.broadcast %640 : vector<8x1xf32> to vector<8x8xf32>
    %642 = arith.mulf %637, %641 : vector<8x8xf32>
    %643 = arith.truncf %642 : vector<8x8xf32> to vector<8x8xbf16>
    %cst_308 = arith.constant dense<0.000000e+00> : vector<8x8xf32>
    %644 = tpu.matmul %643, %629, %cst_308 {dimension_numbers = #tpu.dot_dimension_numbers<[1], [0], [0], [1], [0, 0, 1, 1], [], []>} : vector<8x8xbf16>, vector<8x8xbf16>, vector<8x8xf32> -> vector<8x8xf32>
    %645 = arith.truncf %644 : vector<8x8xf32> to vector<8x8xbf16>
    %cst_309 = arith.constant dense<0.000000e+00> : vector<8x32xf32>
    %646 = tpu.matmul %645, %613, %cst_309 {dimension_numbers = #tpu.dot_dimension_numbers<[1], [0], [0], [1], [0, 0, 1, 1], [], []>} : vector<8x8xbf16>, vector<8x32xbf16>, vector<8x32xf32> -> vector<8x32xf32>
    %647 = vector.extract_strided_slice %611 {offsets = [0, 8], sizes = [8, 8], strides = [1, 1]} : vector<8x32xf32> to vector<8x8xf32>
    %648 = arith.truncf %647 : vector<8x8xf32> to vector<8x8xbf16>
    %649 = vector.extract_strided_slice %620 {offsets = [0, 8], sizes = [8, 8], strides = [1, 1]} : vector<8x32xf32> to vector<8x8xf32>
    %650 = arith.truncf %649 : vector<8x8xf32> to vector<8x8xbf16>
    %651 = vector.extract_strided_slice %621 {offsets = [0, 8], sizes = [8, 8], strides = [1, 1]} : vector<8x32xf32> to vector<8x8xf32>
    %652 = arith.truncf %651 : vector<8x8xf32> to vector<8x8xbf16>
    %cst_310 = arith.constant dense<0.000000e+00> : vector<8x8xf32>
    %653 = tpu.matmul %648, %650, %cst_310 {dimension_numbers = #tpu.dot_dimension_numbers<[1], [1], [0], [0], [0, 0, 1, 0], [], []>} : vector<8x8xbf16>, vector<8x8xbf16>, vector<8x8xf32> -> vector<8x8xf32>
    %cst_311 = arith.constant 0.353553385 : f32
    %654 = vector.broadcast %cst_311 : f32 to vector<8x8xf32>
    %655 = arith.mulf %653, %654 : vector<8x8xf32>
    %cst_312 = arith.constant dense<0xFF800000> : vector<8xf32>
    %656 = vector.multi_reduction <maximumf>, %655, %cst_312 [1] : vector<8x8xf32> to vector<8xf32>
    %657 = vector.shape_cast %656 : vector<8xf32> to vector<8x1xf32>
    %658 = vector.broadcast %657 : vector<8x1xf32> to vector<8x8xf32>
    %659 = arith.subf %655, %658 : vector<8x8xf32>
    %660 = math.exp %659 : vector<8x8xf32>
    %cst_313 = arith.constant dense<0.000000e+00> : vector<8xf32>
    %661 = vector.multi_reduction <add>, %660, %cst_313 [1] : vector<8x8xf32> to vector<8xf32>
    %662 = vector.shape_cast %661 : vector<8xf32> to vector<8x1xf32>
    %663 = tpu.reciprocal %662 {approx = true} : vector<8x1xf32> -> vector<8x1xf32>
    %664 = vector.broadcast %663 : vector<8x1xf32> to vector<8x8xf32>
    %665 = arith.mulf %660, %664 : vector<8x8xf32>
    %666 = arith.truncf %665 : vector<8x8xf32> to vector<8x8xbf16>
    %cst_314 = arith.constant dense<0.000000e+00> : vector<8x8xf32>
    %667 = tpu.matmul %666, %652, %cst_314 {dimension_numbers = #tpu.dot_dimension_numbers<[1], [0], [0], [1], [0, 0, 1, 1], [], []>} : vector<8x8xbf16>, vector<8x8xbf16>, vector<8x8xf32> -> vector<8x8xf32>
    %668 = arith.truncf %667 : vector<8x8xf32> to vector<8x8xbf16>
    %cst_315 = arith.constant dense<0.000000e+00> : vector<8x32xf32>
    %669 = tpu.matmul %668, %615, %cst_315 {dimension_numbers = #tpu.dot_dimension_numbers<[1], [0], [0], [1], [0, 0, 1, 1], [], []>} : vector<8x8xbf16>, vector<8x32xbf16>, vector<8x32xf32> -> vector<8x32xf32>
    %670 = arith.addf %646, %669 : vector<8x32xf32>
    %671 = vector.extract_strided_slice %611 {offsets = [0, 16], sizes = [8, 8], strides = [1, 1]} : vector<8x32xf32> to vector<8x8xf32>
    %672 = arith.truncf %671 : vector<8x8xf32> to vector<8x8xbf16>
    %673 = vector.extract_strided_slice %620 {offsets = [0, 16], sizes = [8, 8], strides = [1, 1]} : vector<8x32xf32> to vector<8x8xf32>
    %674 = arith.truncf %673 : vector<8x8xf32> to vector<8x8xbf16>
    %675 = vector.extract_strided_slice %621 {offsets = [0, 16], sizes = [8, 8], strides = [1, 1]} : vector<8x32xf32> to vector<8x8xf32>
    %676 = arith.truncf %675 : vector<8x8xf32> to vector<8x8xbf16>
    %cst_316 = arith.constant dense<0.000000e+00> : vector<8x8xf32>
    %677 = tpu.matmul %672, %674, %cst_316 {dimension_numbers = #tpu.dot_dimension_numbers<[1], [1], [0], [0], [0, 0, 1, 0], [], []>} : vector<8x8xbf16>, vector<8x8xbf16>, vector<8x8xf32> -> vector<8x8xf32>
    %cst_317 = arith.constant 0.353553385 : f32
    %678 = vector.broadcast %cst_317 : f32 to vector<8x8xf32>
    %679 = arith.mulf %677, %678 : vector<8x8xf32>
    %cst_318 = arith.constant dense<0xFF800000> : vector<8xf32>
    %680 = vector.multi_reduction <maximumf>, %679, %cst_318 [1] : vector<8x8xf32> to vector<8xf32>
    %681 = vector.shape_cast %680 : vector<8xf32> to vector<8x1xf32>
    %682 = vector.broadcast %681 : vector<8x1xf32> to vector<8x8xf32>
    %683 = arith.subf %679, %682 : vector<8x8xf32>
    %684 = math.exp %683 : vector<8x8xf32>
    %cst_319 = arith.constant dense<0.000000e+00> : vector<8xf32>
    %685 = vector.multi_reduction <add>, %684, %cst_319 [1] : vector<8x8xf32> to vector<8xf32>
    %686 = vector.shape_cast %685 : vector<8xf32> to vector<8x1xf32>
    %687 = tpu.reciprocal %686 {approx = true} : vector<8x1xf32> -> vector<8x1xf32>
    %688 = vector.broadcast %687 : vector<8x1xf32> to vector<8x8xf32>
    %689 = arith.mulf %684, %688 : vector<8x8xf32>
    %690 = arith.truncf %689 : vector<8x8xf32> to vector<8x8xbf16>
    %cst_320 = arith.constant dense<0.000000e+00> : vector<8x8xf32>
    %691 = tpu.matmul %690, %676, %cst_320 {dimension_numbers = #tpu.dot_dimension_numbers<[1], [0], [0], [1], [0, 0, 1, 1], [], []>} : vector<8x8xbf16>, vector<8x8xbf16>, vector<8x8xf32> -> vector<8x8xf32>
    %692 = arith.truncf %691 : vector<8x8xf32> to vector<8x8xbf16>
    %cst_321 = arith.constant dense<0.000000e+00> : vector<8x32xf32>
    %693 = tpu.matmul %692, %617, %cst_321 {dimension_numbers = #tpu.dot_dimension_numbers<[1], [0], [0], [1], [0, 0, 1, 1], [], []>} : vector<8x8xbf16>, vector<8x32xbf16>, vector<8x32xf32> -> vector<8x32xf32>
    %694 = arith.addf %670, %693 : vector<8x32xf32>
    %695 = vector.extract_strided_slice %611 {offsets = [0, 24], sizes = [8, 8], strides = [1, 1]} : vector<8x32xf32> to vector<8x8xf32>
    %696 = arith.truncf %695 : vector<8x8xf32> to vector<8x8xbf16>
    %697 = vector.extract_strided_slice %620 {offsets = [0, 24], sizes = [8, 8], strides = [1, 1]} : vector<8x32xf32> to vector<8x8xf32>
    %698 = arith.truncf %697 : vector<8x8xf32> to vector<8x8xbf16>
    %699 = vector.extract_strided_slice %621 {offsets = [0, 24], sizes = [8, 8], strides = [1, 1]} : vector<8x32xf32> to vector<8x8xf32>
    %700 = arith.truncf %699 : vector<8x8xf32> to vector<8x8xbf16>
    %cst_322 = arith.constant dense<0.000000e+00> : vector<8x8xf32>
    %701 = tpu.matmul %696, %698, %cst_322 {dimension_numbers = #tpu.dot_dimension_numbers<[1], [1], [0], [0], [0, 0, 1, 0], [], []>} : vector<8x8xbf16>, vector<8x8xbf16>, vector<8x8xf32> -> vector<8x8xf32>
    %cst_323 = arith.constant 0.353553385 : f32
    %702 = vector.broadcast %cst_323 : f32 to vector<8x8xf32>
    %703 = arith.mulf %701, %702 : vector<8x8xf32>
    %cst_324 = arith.constant dense<0xFF800000> : vector<8xf32>
    %704 = vector.multi_reduction <maximumf>, %703, %cst_324 [1] : vector<8x8xf32> to vector<8xf32>
    %705 = vector.shape_cast %704 : vector<8xf32> to vector<8x1xf32>
    %706 = vector.broadcast %705 : vector<8x1xf32> to vector<8x8xf32>
    %707 = arith.subf %703, %706 : vector<8x8xf32>
    %708 = math.exp %707 : vector<8x8xf32>
    %cst_325 = arith.constant dense<0.000000e+00> : vector<8xf32>
    %709 = vector.multi_reduction <add>, %708, %cst_325 [1] : vector<8x8xf32> to vector<8xf32>
    %710 = vector.shape_cast %709 : vector<8xf32> to vector<8x1xf32>
    %711 = tpu.reciprocal %710 {approx = true} : vector<8x1xf32> -> vector<8x1xf32>
    %712 = vector.broadcast %711 : vector<8x1xf32> to vector<8x8xf32>
    %713 = arith.mulf %708, %712 : vector<8x8xf32>
    %714 = arith.truncf %713 : vector<8x8xf32> to vector<8x8xbf16>
    %cst_326 = arith.constant dense<0.000000e+00> : vector<8x8xf32>
    %715 = tpu.matmul %714, %700, %cst_326 {dimension_numbers = #tpu.dot_dimension_numbers<[1], [0], [0], [1], [0, 0, 1, 1], [], []>} : vector<8x8xbf16>, vector<8x8xbf16>, vector<8x8xf32> -> vector<8x8xf32>
    %716 = arith.truncf %715 : vector<8x8xf32> to vector<8x8xbf16>
    %cst_327 = arith.constant dense<0.000000e+00> : vector<8x32xf32>
    %717 = tpu.matmul %716, %619, %cst_327 {dimension_numbers = #tpu.dot_dimension_numbers<[1], [0], [0], [1], [0, 0, 1, 1], [], []>} : vector<8x8xbf16>, vector<8x32xbf16>, vector<8x32xf32> -> vector<8x32xf32>
    %718 = arith.addf %694, %717 : vector<8x32xf32>
    %719 = vector.broadcast %623 : vector<1x32xf32> to vector<8x32xf32>
    %720 = arith.addf %718, %719 : vector<8x32xf32>
    %721 = arith.addf %570, %720 : vector<8x32xf32>
    %c0_328 = arith.constant 0 : index
    %c0_329 = arith.constant 0 : index
    %c0_330 = arith.constant 0 : index
    %722 = vector.load %arg37[%c0_328, %c0_329, %c0_330] : memref<2x1x32xf32, #tpu.memory_space<vmem>>, vector<1x1x32xf32>
    %723 = vector.shape_cast %722 : vector<1x1x32xf32> to vector<1x32xf32>
    %c0_331 = arith.constant 0 : index
    %c0_332 = arith.constant 0 : index
    %c0_333 = arith.constant 0 : index
    %724 = vector.load %arg38[%c0_331, %c0_332, %c0_333] : memref<2x1x32xf32, #tpu.memory_space<vmem>>, vector<1x1x32xf32>
    %725 = vector.shape_cast %724 : vector<1x1x32xf32> to vector<1x32xf32>
    %cst_334 = arith.constant dense<0.000000e+00> : vector<8xf32>
    %726 = vector.multi_reduction <add>, %721, %cst_334 [1] : vector<8x32xf32> to vector<8xf32>
    %727 = vector.shape_cast %726 : vector<8xf32> to vector<8x1xf32>
    %cst_335 = arith.constant 3.200000e+01 : f32
    %728 = vector.broadcast %cst_335 : f32 to vector<8x1xf32>
    %729 = arith.divf %727, %728 : vector<8x1xf32>
    %730 = vector.broadcast %729 : vector<8x1xf32> to vector<8x32xf32>
    %731 = arith.subf %721, %730 : vector<8x32xf32>
    %732 = arith.mulf %731, %731 : vector<8x32xf32>
    %cst_336 = arith.constant dense<0.000000e+00> : vector<8xf32>
    %733 = vector.multi_reduction <add>, %732, %cst_336 [1] : vector<8x32xf32> to vector<8xf32>
    %734 = vector.shape_cast %733 : vector<8xf32> to vector<8x1xf32>
    %cst_337 = arith.constant 3.200000e+01 : f32
    %735 = vector.broadcast %cst_337 : f32 to vector<8x1xf32>
    %736 = arith.divf %734, %735 : vector<8x1xf32>
    %737 = vector.broadcast %729 : vector<8x1xf32> to vector<8x32xf32>
    %738 = arith.subf %721, %737 : vector<8x32xf32>
    %cst_338 = arith.constant 9.99999974E-6 : f32
    %739 = vector.broadcast %cst_338 : f32 to vector<8x1xf32>
    %740 = arith.addf %736, %739 : vector<8x1xf32>
    %741 = math.rsqrt %740 : vector<8x1xf32>
    %742 = vector.broadcast %741 : vector<8x1xf32> to vector<8x32xf32>
    %743 = arith.mulf %738, %742 : vector<8x32xf32>
    %744 = vector.broadcast %723 : vector<1x32xf32> to vector<8x32xf32>
    %745 = arith.mulf %743, %744 : vector<8x32xf32>
    %746 = vector.broadcast %725 : vector<1x32xf32> to vector<8x32xf32>
    %747 = arith.addf %745, %746 : vector<8x32xf32>
    %c0_339 = arith.constant 0 : index
    %c0_340 = arith.constant 0 : index
    %c0_341 = arith.constant 0 : index
    %748 = vector.load %arg39[%c0_339, %c0_340, %c0_341] : memref<2x32x64xbf16, #tpu.memory_space<vmem>>, vector<1x32x64xbf16>
    %749 = vector.shape_cast %748 : vector<1x32x64xbf16> to vector<32x64xbf16>
    %c0_342 = arith.constant 0 : index
    %c0_343 = arith.constant 0 : index
    %c0_344 = arith.constant 0 : index
    %750 = vector.load %arg40[%c0_342, %c0_343, %c0_344] : memref<2x1x64xf32, #tpu.memory_space<vmem>>, vector<1x1x64xf32>
    %751 = vector.shape_cast %750 : vector<1x1x64xf32> to vector<1x64xf32>
    %c0_345 = arith.constant 0 : index
    %c0_346 = arith.constant 0 : index
    %c0_347 = arith.constant 0 : index
    %752 = vector.load %arg41[%c0_345, %c0_346, %c0_347] : memref<2x64x32xbf16, #tpu.memory_space<vmem>>, vector<1x64x32xbf16>
    %753 = vector.shape_cast %752 : vector<1x64x32xbf16> to vector<64x32xbf16>
    %c0_348 = arith.constant 0 : index
    %c0_349 = arith.constant 0 : index
    %c0_350 = arith.constant 0 : index
    %754 = vector.load %arg42[%c0_348, %c0_349, %c0_350] : memref<2x1x32xf32, #tpu.memory_space<vmem>>, vector<1x1x32xf32>
    %755 = vector.shape_cast %754 : vector<1x1x32xf32> to vector<1x32xf32>
    %756 = arith.truncf %747 : vector<8x32xf32> to vector<8x32xbf16>
    %cst_351 = arith.constant dense<0.000000e+00> : vector<8x64xf32>
    %757 = tpu.matmul %756, %749, %cst_351 {dimension_numbers = #tpu.dot_dimension_numbers<[1], [0], [0], [1], [0, 0, 1, 1], [], []>} : vector<8x32xbf16>, vector<32x64xbf16>, vector<8x64xf32> -> vector<8x64xf32>
    %758 = vector.broadcast %751 : vector<1x64xf32> to vector<8x64xf32>
    %759 = arith.addf %757, %758 : vector<8x64xf32>
    %cst_352 = arith.constant 0.000000e+00 : f32
    %760 = vector.broadcast %cst_352 : f32 to vector<8x64xf32>
    %761 = arith.maximumf %759, %760 : vector<8x64xf32>
    %762 = arith.truncf %761 : vector<8x64xf32> to vector<8x64xbf16>
    %cst_353 = arith.constant dense<0.000000e+00> : vector<8x32xf32>
    %763 = tpu.matmul %762, %753, %cst_353 {dimension_numbers = #tpu.dot_dimension_numbers<[1], [0], [0], [1], [0, 0, 1, 1], [], []>} : vector<8x64xbf16>, vector<64x32xbf16>, vector<8x32xf32> -> vector<8x32xf32>
    %764 = vector.broadcast %755 : vector<1x32xf32> to vector<8x32xf32>
    %765 = arith.addf %763, %764 : vector<8x32xf32>
    %766 = arith.addf %721, %765 : vector<8x32xf32>
    %c1_354 = arith.constant 1 : index
    %c0_355 = arith.constant 0 : index
    %c0_356 = arith.constant 0 : index
    %767 = vector.load %arg23[%c1_354, %c0_355, %c0_356] : memref<2x1x32xf32, #tpu.memory_space<vmem>>, vector<1x1x32xf32>
    %768 = vector.shape_cast %767 : vector<1x1x32xf32> to vector<1x32xf32>
    %c1_357 = arith.constant 1 : index
    %c0_358 = arith.constant 0 : index
    %c0_359 = arith.constant 0 : index
    %769 = vector.load %arg24[%c1_357, %c0_358, %c0_359] : memref<2x1x32xf32, #tpu.memory_space<vmem>>, vector<1x1x32xf32>
    %770 = vector.shape_cast %769 : vector<1x1x32xf32> to vector<1x32xf32>
    %cst_360 = arith.constant dense<0.000000e+00> : vector<8xf32>
    %771 = vector.multi_reduction <add>, %766, %cst_360 [1] : vector<8x32xf32> to vector<8xf32>
    %772 = vector.shape_cast %771 : vector<8xf32> to vector<8x1xf32>
    %cst_361 = arith.constant 3.200000e+01 : f32
    %773 = vector.broadcast %cst_361 : f32 to vector<8x1xf32>
    %774 = arith.divf %772, %773 : vector<8x1xf32>
    %775 = vector.broadcast %774 : vector<8x1xf32> to vector<8x32xf32>
    %776 = arith.subf %766, %775 : vector<8x32xf32>
    %777 = arith.mulf %776, %776 : vector<8x32xf32>
    %cst_362 = arith.constant dense<0.000000e+00> : vector<8xf32>
    %778 = vector.multi_reduction <add>, %777, %cst_362 [1] : vector<8x32xf32> to vector<8xf32>
    %779 = vector.shape_cast %778 : vector<8xf32> to vector<8x1xf32>
    %cst_363 = arith.constant 3.200000e+01 : f32
    %780 = vector.broadcast %cst_363 : f32 to vector<8x1xf32>
    %781 = arith.divf %779, %780 : vector<8x1xf32>
    %782 = vector.broadcast %774 : vector<8x1xf32> to vector<8x32xf32>
    %783 = arith.subf %766, %782 : vector<8x32xf32>
    %cst_364 = arith.constant 9.99999974E-6 : f32
    %784 = vector.broadcast %cst_364 : f32 to vector<8x1xf32>
    %785 = arith.addf %781, %784 : vector<8x1xf32>
    %786 = math.rsqrt %785 : vector<8x1xf32>
    %787 = vector.broadcast %786 : vector<8x1xf32> to vector<8x32xf32>
    %788 = arith.mulf %783, %787 : vector<8x32xf32>
    %789 = vector.broadcast %768 : vector<1x32xf32> to vector<8x32xf32>
    %790 = arith.mulf %788, %789 : vector<8x32xf32>
    %791 = vector.broadcast %770 : vector<1x32xf32> to vector<8x32xf32>
    %792 = arith.addf %790, %791 : vector<8x32xf32>
    %c1_365 = arith.constant 1 : index
    %c0_366 = arith.constant 0 : index
    %c0_367 = arith.constant 0 : index
    %c0_368 = arith.constant 0 : index
    %793 = vector.load %arg27[%c1_365, %c0_366, %c0_367, %c0_368] : memref<2x4x8x32xbf16, #tpu.memory_space<vmem>>, vector<1x1x8x32xbf16>
    %794 = vector.shape_cast %793 : vector<1x1x8x32xbf16> to vector<8x32xbf16>
    %c1_369 = arith.constant 1 : index
    %c1_370 = arith.constant 1 : index
    %c0_371 = arith.constant 0 : index
    %c0_372 = arith.constant 0 : index
    %795 = vector.load %arg27[%c1_369, %c1_370, %c0_371, %c0_372] : memref<2x4x8x32xbf16, #tpu.memory_space<vmem>>, vector<1x1x8x32xbf16>
    %796 = vector.shape_cast %795 : vector<1x1x8x32xbf16> to vector<8x32xbf16>
    %c1_373 = arith.constant 1 : index
    %c2_374 = arith.constant 2 : index
    %c0_375 = arith.constant 0 : index
    %c0_376 = arith.constant 0 : index
    %797 = vector.load %arg27[%c1_373, %c2_374, %c0_375, %c0_376] : memref<2x4x8x32xbf16, #tpu.memory_space<vmem>>, vector<1x1x8x32xbf16>
    %798 = vector.shape_cast %797 : vector<1x1x8x32xbf16> to vector<8x32xbf16>
    %c1_377 = arith.constant 1 : index
    %c3_378 = arith.constant 3 : index
    %c0_379 = arith.constant 0 : index
    %c0_380 = arith.constant 0 : index
    %799 = vector.load %arg27[%c1_377, %c3_378, %c0_379, %c0_380] : memref<2x4x8x32xbf16, #tpu.memory_space<vmem>>, vector<1x1x8x32xbf16>
    %800 = vector.shape_cast %799 : vector<1x1x8x32xbf16> to vector<8x32xbf16>
    %c1_381 = arith.constant 1 : index
    %c0_382 = arith.constant 0 : index
    %c0_383 = arith.constant 0 : index
    %801 = vector.load %arg25[%c1_381, %c0_382, %c0_383] : memref<2x32x96xbf16, #tpu.memory_space<vmem>>, vector<1x32x96xbf16>
    %802 = vector.shape_cast %801 : vector<1x32x96xbf16> to vector<32x96xbf16>
    %c1_384 = arith.constant 1 : index
    %c0_385 = arith.constant 0 : index
    %c0_386 = arith.constant 0 : index
    %803 = vector.load %arg26[%c1_384, %c0_385, %c0_386] : memref<2x1x96xf32, #tpu.memory_space<vmem>>, vector<1x1x96xf32>
    %804 = vector.shape_cast %803 : vector<1x1x96xf32> to vector<1x96xf32>
    %c1_387 = arith.constant 1 : index
    %c0_388 = arith.constant 0 : index
    %c0_389 = arith.constant 0 : index
    %805 = vector.load %arg28[%c1_387, %c0_388, %c0_389] : memref<2x1x32xf32, #tpu.memory_space<vmem>>, vector<1x1x32xf32>
    %806 = vector.shape_cast %805 : vector<1x1x32xf32> to vector<1x32xf32>
    %807 = arith.truncf %792 : vector<8x32xf32> to vector<8x32xbf16>
    %cst_390 = arith.constant dense<0.000000e+00> : vector<8x96xf32>
    %808 = tpu.matmul %807, %802, %cst_390 {dimension_numbers = #tpu.dot_dimension_numbers<[1], [0], [0], [1], [0, 0, 1, 1], [], []>} : vector<8x32xbf16>, vector<32x96xbf16>, vector<8x96xf32> -> vector<8x96xf32>
    %809 = vector.broadcast %804 : vector<1x96xf32> to vector<8x96xf32>
    %810 = arith.addf %808, %809 : vector<8x96xf32>
    %811 = vector.extract_strided_slice %810 {offsets = [0, 0], sizes = [8, 32], strides = [1, 1]} : vector<8x96xf32> to vector<8x32xf32>
    %812 = vector.extract_strided_slice %810 {offsets = [0, 32], sizes = [8, 32], strides = [1, 1]} : vector<8x96xf32> to vector<8x32xf32>
    %813 = vector.extract_strided_slice %810 {offsets = [0, 64], sizes = [8, 32], strides = [1, 1]} : vector<8x96xf32> to vector<8x32xf32>
    %814 = vector.extract_strided_slice %811 {offsets = [0, 0], sizes = [8, 8], strides = [1, 1]} : vector<8x32xf32> to vector<8x8xf32>
    %815 = arith.truncf %814 : vector<8x8xf32> to vector<8x8xbf16>
    %816 = vector.extract_strided_slice %812 {offsets = [0, 0], sizes = [8, 8], strides = [1, 1]} : vector<8x32xf32> to vector<8x8xf32>
    %817 = arith.truncf %816 : vector<8x8xf32> to vector<8x8xbf16>
    %818 = vector.extract_strided_slice %813 {offsets = [0, 0], sizes = [8, 8], strides = [1, 1]} : vector<8x32xf32> to vector<8x8xf32>
    %819 = arith.truncf %818 : vector<8x8xf32> to vector<8x8xbf16>
    %cst_391 = arith.constant dense<0.000000e+00> : vector<8x8xf32>
    %820 = tpu.matmul %815, %817, %cst_391 {dimension_numbers = #tpu.dot_dimension_numbers<[1], [1], [0], [0], [0, 0, 1, 0], [], []>} : vector<8x8xbf16>, vector<8x8xbf16>, vector<8x8xf32> -> vector<8x8xf32>
    %cst_392 = arith.constant 0.353553385 : f32
    %821 = vector.broadcast %cst_392 : f32 to vector<8x8xf32>
    %822 = arith.mulf %820, %821 : vector<8x8xf32>
    %cst_393 = arith.constant dense<0xFF800000> : vector<8xf32>
    %823 = vector.multi_reduction <maximumf>, %822, %cst_393 [1] : vector<8x8xf32> to vector<8xf32>
    %824 = vector.shape_cast %823 : vector<8xf32> to vector<8x1xf32>
    %825 = vector.broadcast %824 : vector<8x1xf32> to vector<8x8xf32>
    %826 = arith.subf %822, %825 : vector<8x8xf32>
    %827 = math.exp %826 : vector<8x8xf32>
    %cst_394 = arith.constant dense<0.000000e+00> : vector<8xf32>
    %828 = vector.multi_reduction <add>, %827, %cst_394 [1] : vector<8x8xf32> to vector<8xf32>
    %829 = vector.shape_cast %828 : vector<8xf32> to vector<8x1xf32>
    %830 = tpu.reciprocal %829 {approx = true} : vector<8x1xf32> -> vector<8x1xf32>
    %831 = vector.broadcast %830 : vector<8x1xf32> to vector<8x8xf32>
    %832 = arith.mulf %827, %831 : vector<8x8xf32>
    %833 = arith.truncf %832 : vector<8x8xf32> to vector<8x8xbf16>
    %cst_395 = arith.constant dense<0.000000e+00> : vector<8x8xf32>
    %834 = tpu.matmul %833, %819, %cst_395 {dimension_numbers = #tpu.dot_dimension_numbers<[1], [0], [0], [1], [0, 0, 1, 1], [], []>} : vector<8x8xbf16>, vector<8x8xbf16>, vector<8x8xf32> -> vector<8x8xf32>
    %835 = arith.truncf %834 : vector<8x8xf32> to vector<8x8xbf16>
    %cst_396 = arith.constant dense<0.000000e+00> : vector<8x32xf32>
    %836 = tpu.matmul %835, %794, %cst_396 {dimension_numbers = #tpu.dot_dimension_numbers<[1], [0], [0], [1], [0, 0, 1, 1], [], []>} : vector<8x8xbf16>, vector<8x32xbf16>, vector<8x32xf32> -> vector<8x32xf32>
    %837 = vector.extract_strided_slice %811 {offsets = [0, 8], sizes = [8, 8], strides = [1, 1]} : vector<8x32xf32> to vector<8x8xf32>
    %838 = arith.truncf %837 : vector<8x8xf32> to vector<8x8xbf16>
    %839 = vector.extract_strided_slice %812 {offsets = [0, 8], sizes = [8, 8], strides = [1, 1]} : vector<8x32xf32> to vector<8x8xf32>
    %840 = arith.truncf %839 : vector<8x8xf32> to vector<8x8xbf16>
    %841 = vector.extract_strided_slice %813 {offsets = [0, 8], sizes = [8, 8], strides = [1, 1]} : vector<8x32xf32> to vector<8x8xf32>
    %842 = arith.truncf %841 : vector<8x8xf32> to vector<8x8xbf16>
    %cst_397 = arith.constant dense<0.000000e+00> : vector<8x8xf32>
    %843 = tpu.matmul %838, %840, %cst_397 {dimension_numbers = #tpu.dot_dimension_numbers<[1], [1], [0], [0], [0, 0, 1, 0], [], []>} : vector<8x8xbf16>, vector<8x8xbf16>, vector<8x8xf32> -> vector<8x8xf32>
    %cst_398 = arith.constant 0.353553385 : f32
    %844 = vector.broadcast %cst_398 : f32 to vector<8x8xf32>
    %845 = arith.mulf %843, %844 : vector<8x8xf32>
    %cst_399 = arith.constant dense<0xFF800000> : vector<8xf32>
    %846 = vector.multi_reduction <maximumf>, %845, %cst_399 [1] : vector<8x8xf32> to vector<8xf32>
    %847 = vector.shape_cast %846 : vector<8xf32> to vector<8x1xf32>
    %848 = vector.broadcast %847 : vector<8x1xf32> to vector<8x8xf32>
    %849 = arith.subf %845, %848 : vector<8x8xf32>
    %850 = math.exp %849 : vector<8x8xf32>
    %cst_400 = arith.constant dense<0.000000e+00> : vector<8xf32>
    %851 = vector.multi_reduction <add>, %850, %cst_400 [1] : vector<8x8xf32> to vector<8xf32>
    %852 = vector.shape_cast %851 : vector<8xf32> to vector<8x1xf32>
    %853 = tpu.reciprocal %852 {approx = true} : vector<8x1xf32> -> vector<8x1xf32>
    %854 = vector.broadcast %853 : vector<8x1xf32> to vector<8x8xf32>
    %855 = arith.mulf %850, %854 : vector<8x8xf32>
    %856 = arith.truncf %855 : vector<8x8xf32> to vector<8x8xbf16>
    %cst_401 = arith.constant dense<0.000000e+00> : vector<8x8xf32>
    %857 = tpu.matmul %856, %842, %cst_401 {dimension_numbers = #tpu.dot_dimension_numbers<[1], [0], [0], [1], [0, 0, 1, 1], [], []>} : vector<8x8xbf16>, vector<8x8xbf16>, vector<8x8xf32> -> vector<8x8xf32>
    %858 = arith.truncf %857 : vector<8x8xf32> to vector<8x8xbf16>
    %cst_402 = arith.constant dense<0.000000e+00> : vector<8x32xf32>
    %859 = tpu.matmul %858, %796, %cst_402 {dimension_numbers = #tpu.dot_dimension_numbers<[1], [0], [0], [1], [0, 0, 1, 1], [], []>} : vector<8x8xbf16>, vector<8x32xbf16>, vector<8x32xf32> -> vector<8x32xf32>
    %860 = arith.addf %836, %859 : vector<8x32xf32>
    %861 = vector.extract_strided_slice %811 {offsets = [0, 16], sizes = [8, 8], strides = [1, 1]} : vector<8x32xf32> to vector<8x8xf32>
    %862 = arith.truncf %861 : vector<8x8xf32> to vector<8x8xbf16>
    %863 = vector.extract_strided_slice %812 {offsets = [0, 16], sizes = [8, 8], strides = [1, 1]} : vector<8x32xf32> to vector<8x8xf32>
    %864 = arith.truncf %863 : vector<8x8xf32> to vector<8x8xbf16>
    %865 = vector.extract_strided_slice %813 {offsets = [0, 16], sizes = [8, 8], strides = [1, 1]} : vector<8x32xf32> to vector<8x8xf32>
    %866 = arith.truncf %865 : vector<8x8xf32> to vector<8x8xbf16>
    %cst_403 = arith.constant dense<0.000000e+00> : vector<8x8xf32>
    %867 = tpu.matmul %862, %864, %cst_403 {dimension_numbers = #tpu.dot_dimension_numbers<[1], [1], [0], [0], [0, 0, 1, 0], [], []>} : vector<8x8xbf16>, vector<8x8xbf16>, vector<8x8xf32> -> vector<8x8xf32>
    %cst_404 = arith.constant 0.353553385 : f32
    %868 = vector.broadcast %cst_404 : f32 to vector<8x8xf32>
    %869 = arith.mulf %867, %868 : vector<8x8xf32>
    %cst_405 = arith.constant dense<0xFF800000> : vector<8xf32>
    %870 = vector.multi_reduction <maximumf>, %869, %cst_405 [1] : vector<8x8xf32> to vector<8xf32>
    %871 = vector.shape_cast %870 : vector<8xf32> to vector<8x1xf32>
    %872 = vector.broadcast %871 : vector<8x1xf32> to vector<8x8xf32>
    %873 = arith.subf %869, %872 : vector<8x8xf32>
    %874 = math.exp %873 : vector<8x8xf32>
    %cst_406 = arith.constant dense<0.000000e+00> : vector<8xf32>
    %875 = vector.multi_reduction <add>, %874, %cst_406 [1] : vector<8x8xf32> to vector<8xf32>
    %876 = vector.shape_cast %875 : vector<8xf32> to vector<8x1xf32>
    %877 = tpu.reciprocal %876 {approx = true} : vector<8x1xf32> -> vector<8x1xf32>
    %878 = vector.broadcast %877 : vector<8x1xf32> to vector<8x8xf32>
    %879 = arith.mulf %874, %878 : vector<8x8xf32>
    %880 = arith.truncf %879 : vector<8x8xf32> to vector<8x8xbf16>
    %cst_407 = arith.constant dense<0.000000e+00> : vector<8x8xf32>
    %881 = tpu.matmul %880, %866, %cst_407 {dimension_numbers = #tpu.dot_dimension_numbers<[1], [0], [0], [1], [0, 0, 1, 1], [], []>} : vector<8x8xbf16>, vector<8x8xbf16>, vector<8x8xf32> -> vector<8x8xf32>
    %882 = arith.truncf %881 : vector<8x8xf32> to vector<8x8xbf16>
    %cst_408 = arith.constant dense<0.000000e+00> : vector<8x32xf32>
    %883 = tpu.matmul %882, %798, %cst_408 {dimension_numbers = #tpu.dot_dimension_numbers<[1], [0], [0], [1], [0, 0, 1, 1], [], []>} : vector<8x8xbf16>, vector<8x32xbf16>, vector<8x32xf32> -> vector<8x32xf32>
    %884 = arith.addf %860, %883 : vector<8x32xf32>
    %885 = vector.extract_strided_slice %811 {offsets = [0, 24], sizes = [8, 8], strides = [1, 1]} : vector<8x32xf32> to vector<8x8xf32>
    %886 = arith.truncf %885 : vector<8x8xf32> to vector<8x8xbf16>
    %887 = vector.extract_strided_slice %812 {offsets = [0, 24], sizes = [8, 8], strides = [1, 1]} : vector<8x32xf32> to vector<8x8xf32>
    %888 = arith.truncf %887 : vector<8x8xf32> to vector<8x8xbf16>
    %889 = vector.extract_strided_slice %813 {offsets = [0, 24], sizes = [8, 8], strides = [1, 1]} : vector<8x32xf32> to vector<8x8xf32>
    %890 = arith.truncf %889 : vector<8x8xf32> to vector<8x8xbf16>
    %cst_409 = arith.constant dense<0.000000e+00> : vector<8x8xf32>
    %891 = tpu.matmul %886, %888, %cst_409 {dimension_numbers = #tpu.dot_dimension_numbers<[1], [1], [0], [0], [0, 0, 1, 0], [], []>} : vector<8x8xbf16>, vector<8x8xbf16>, vector<8x8xf32> -> vector<8x8xf32>
    %cst_410 = arith.constant 0.353553385 : f32
    %892 = vector.broadcast %cst_410 : f32 to vector<8x8xf32>
    %893 = arith.mulf %891, %892 : vector<8x8xf32>
    %cst_411 = arith.constant dense<0xFF800000> : vector<8xf32>
    %894 = vector.multi_reduction <maximumf>, %893, %cst_411 [1] : vector<8x8xf32> to vector<8xf32>
    %895 = vector.shape_cast %894 : vector<8xf32> to vector<8x1xf32>
    %896 = vector.broadcast %895 : vector<8x1xf32> to vector<8x8xf32>
    %897 = arith.subf %893, %896 : vector<8x8xf32>
    %898 = math.exp %897 : vector<8x8xf32>
    %cst_412 = arith.constant dense<0.000000e+00> : vector<8xf32>
    %899 = vector.multi_reduction <add>, %898, %cst_412 [1] : vector<8x8xf32> to vector<8xf32>
    %900 = vector.shape_cast %899 : vector<8xf32> to vector<8x1xf32>
    %901 = tpu.reciprocal %900 {approx = true} : vector<8x1xf32> -> vector<8x1xf32>
    %902 = vector.broadcast %901 : vector<8x1xf32> to vector<8x8xf32>
    %903 = arith.mulf %898, %902 : vector<8x8xf32>
    %904 = arith.truncf %903 : vector<8x8xf32> to vector<8x8xbf16>
    %cst_413 = arith.constant dense<0.000000e+00> : vector<8x8xf32>
    %905 = tpu.matmul %904, %890, %cst_413 {dimension_numbers = #tpu.dot_dimension_numbers<[1], [0], [0], [1], [0, 0, 1, 1], [], []>} : vector<8x8xbf16>, vector<8x8xbf16>, vector<8x8xf32> -> vector<8x8xf32>
    %906 = arith.truncf %905 : vector<8x8xf32> to vector<8x8xbf16>
    %cst_414 = arith.constant dense<0.000000e+00> : vector<8x32xf32>
    %907 = tpu.matmul %906, %800, %cst_414 {dimension_numbers = #tpu.dot_dimension_numbers<[1], [0], [0], [1], [0, 0, 1, 1], [], []>} : vector<8x8xbf16>, vector<8x32xbf16>, vector<8x32xf32> -> vector<8x32xf32>
    %908 = arith.addf %884, %907 : vector<8x32xf32>
    %909 = vector.broadcast %806 : vector<1x32xf32> to vector<8x32xf32>
    %910 = arith.addf %908, %909 : vector<8x32xf32>
    %911 = arith.addf %766, %910 : vector<8x32xf32>
    %c1_415 = arith.constant 1 : index
    %c0_416 = arith.constant 0 : index
    %c0_417 = arith.constant 0 : index
    %912 = vector.load %arg33[%c1_415, %c0_416, %c0_417] : memref<2x32x64xbf16, #tpu.memory_space<vmem>>, vector<1x32x64xbf16>
    %913 = vector.shape_cast %912 : vector<1x32x64xbf16> to vector<32x64xbf16>
    %cst_418 = arith.constant dense<0.000000e+00> : vector<8x64xf32>
    %914 = tpu.matmul %414, %913, %cst_418 {dimension_numbers = #tpu.dot_dimension_numbers<[1], [0], [0], [1], [0, 0, 1, 1], [], []>} : vector<8x32xbf16>, vector<32x64xbf16>, vector<8x64xf32> -> vector<8x64xf32>
    %c1_419 = arith.constant 1 : index
    %c0_420 = arith.constant 0 : index
    %c0_421 = arith.constant 0 : index
    %915 = vector.load %arg34[%c1_419, %c0_420, %c0_421] : memref<2x1x64xf32, #tpu.memory_space<vmem>>, vector<1x1x64xf32>
    %916 = vector.shape_cast %915 : vector<1x1x64xf32> to vector<1x64xf32>
    %917 = vector.broadcast %916 : vector<1x64xf32> to vector<8x64xf32>
    %918 = arith.addf %914, %917 : vector<8x64xf32>
    %c1_422 = arith.constant 1 : index
    %c0_423 = arith.constant 0 : index
    %c0_424 = arith.constant 0 : index
    %919 = vector.load %arg29[%c1_422, %c0_423, %c0_424] : memref<2x1x32xf32, #tpu.memory_space<vmem>>, vector<1x1x32xf32>
    %920 = vector.shape_cast %919 : vector<1x1x32xf32> to vector<1x32xf32>
    %c1_425 = arith.constant 1 : index
    %c0_426 = arith.constant 0 : index
    %c0_427 = arith.constant 0 : index
    %921 = vector.load %arg30[%c1_425, %c0_426, %c0_427] : memref<2x1x32xf32, #tpu.memory_space<vmem>>, vector<1x1x32xf32>
    %922 = vector.shape_cast %921 : vector<1x1x32xf32> to vector<1x32xf32>
    %cst_428 = arith.constant dense<0.000000e+00> : vector<8xf32>
    %923 = vector.multi_reduction <add>, %911, %cst_428 [1] : vector<8x32xf32> to vector<8xf32>
    %924 = vector.shape_cast %923 : vector<8xf32> to vector<8x1xf32>
    %cst_429 = arith.constant 3.200000e+01 : f32
    %925 = vector.broadcast %cst_429 : f32 to vector<8x1xf32>
    %926 = arith.divf %924, %925 : vector<8x1xf32>
    %927 = vector.broadcast %926 : vector<8x1xf32> to vector<8x32xf32>
    %928 = arith.subf %911, %927 : vector<8x32xf32>
    %929 = arith.mulf %928, %928 : vector<8x32xf32>
    %cst_430 = arith.constant dense<0.000000e+00> : vector<8xf32>
    %930 = vector.multi_reduction <add>, %929, %cst_430 [1] : vector<8x32xf32> to vector<8xf32>
    %931 = vector.shape_cast %930 : vector<8xf32> to vector<8x1xf32>
    %cst_431 = arith.constant 3.200000e+01 : f32
    %932 = vector.broadcast %cst_431 : f32 to vector<8x1xf32>
    %933 = arith.divf %931, %932 : vector<8x1xf32>
    %934 = vector.broadcast %926 : vector<8x1xf32> to vector<8x32xf32>
    %935 = arith.subf %911, %934 : vector<8x32xf32>
    %cst_432 = arith.constant 9.99999974E-6 : f32
    %936 = vector.broadcast %cst_432 : f32 to vector<8x1xf32>
    %937 = arith.addf %933, %936 : vector<8x1xf32>
    %938 = math.rsqrt %937 : vector<8x1xf32>
    %939 = vector.broadcast %938 : vector<8x1xf32> to vector<8x32xf32>
    %940 = arith.mulf %935, %939 : vector<8x32xf32>
    %941 = vector.broadcast %920 : vector<1x32xf32> to vector<8x32xf32>
    %942 = arith.mulf %940, %941 : vector<8x32xf32>
    %943 = vector.broadcast %922 : vector<1x32xf32> to vector<8x32xf32>
    %944 = arith.addf %942, %943 : vector<8x32xf32>
    %945 = arith.truncf %944 : vector<8x32xf32> to vector<8x32xbf16>
    %c1_433 = arith.constant 1 : index
    %c0_434 = arith.constant 0 : index
    %c0_435 = arith.constant 0 : index
    %946 = vector.load %arg31[%c1_433, %c0_434, %c0_435] : memref<2x32x32xbf16, #tpu.memory_space<vmem>>, vector<1x32x32xbf16>
    %947 = vector.shape_cast %946 : vector<1x32x32xbf16> to vector<32x32xbf16>
    %cst_436 = arith.constant dense<0.000000e+00> : vector<8x32xf32>
    %948 = tpu.matmul %945, %947, %cst_436 {dimension_numbers = #tpu.dot_dimension_numbers<[1], [0], [0], [1], [0, 0, 1, 1], [], []>} : vector<8x32xbf16>, vector<32x32xbf16>, vector<8x32xf32> -> vector<8x32xf32>
    %c1_437 = arith.constant 1 : index
    %c0_438 = arith.constant 0 : index
    %c0_439 = arith.constant 0 : index
    %949 = vector.load %arg32[%c1_437, %c0_438, %c0_439] : memref<2x1x32xf32, #tpu.memory_space<vmem>>, vector<1x1x32xf32>
    %950 = vector.shape_cast %949 : vector<1x1x32xf32> to vector<1x32xf32>
    %951 = vector.broadcast %950 : vector<1x32xf32> to vector<8x32xf32>
    %952 = arith.addf %948, %951 : vector<8x32xf32>
    %c1_440 = arith.constant 1 : index
    %c0_441 = arith.constant 0 : index
    %c0_442 = arith.constant 0 : index
    %c0_443 = arith.constant 0 : index
    %953 = vector.load %arg35[%c1_440, %c0_441, %c0_442, %c0_443] : memref<2x4x8x32xbf16, #tpu.memory_space<vmem>>, vector<1x1x8x32xbf16>
    %954 = vector.shape_cast %953 : vector<1x1x8x32xbf16> to vector<8x32xbf16>
    %c1_444 = arith.constant 1 : index
    %c1_445 = arith.constant 1 : index
    %c0_446 = arith.constant 0 : index
    %c0_447 = arith.constant 0 : index
    %955 = vector.load %arg35[%c1_444, %c1_445, %c0_446, %c0_447] : memref<2x4x8x32xbf16, #tpu.memory_space<vmem>>, vector<1x1x8x32xbf16>
    %956 = vector.shape_cast %955 : vector<1x1x8x32xbf16> to vector<8x32xbf16>
    %c1_448 = arith.constant 1 : index
    %c2_449 = arith.constant 2 : index
    %c0_450 = arith.constant 0 : index
    %c0_451 = arith.constant 0 : index
    %957 = vector.load %arg35[%c1_448, %c2_449, %c0_450, %c0_451] : memref<2x4x8x32xbf16, #tpu.memory_space<vmem>>, vector<1x1x8x32xbf16>
    %958 = vector.shape_cast %957 : vector<1x1x8x32xbf16> to vector<8x32xbf16>
    %c1_452 = arith.constant 1 : index
    %c3_453 = arith.constant 3 : index
    %c0_454 = arith.constant 0 : index
    %c0_455 = arith.constant 0 : index
    %959 = vector.load %arg35[%c1_452, %c3_453, %c0_454, %c0_455] : memref<2x4x8x32xbf16, #tpu.memory_space<vmem>>, vector<1x1x8x32xbf16>
    %960 = vector.shape_cast %959 : vector<1x1x8x32xbf16> to vector<8x32xbf16>
    %961 = vector.extract_strided_slice %918 {offsets = [0, 0], sizes = [8, 32], strides = [1, 1]} : vector<8x64xf32> to vector<8x32xf32>
    %962 = vector.extract_strided_slice %918 {offsets = [0, 32], sizes = [8, 32], strides = [1, 1]} : vector<8x64xf32> to vector<8x32xf32>
    %c1_456 = arith.constant 1 : index
    %c0_457 = arith.constant 0 : index
    %c0_458 = arith.constant 0 : index
    %963 = vector.load %arg36[%c1_456, %c0_457, %c0_458] : memref<2x1x32xf32, #tpu.memory_space<vmem>>, vector<1x1x32xf32>
    %964 = vector.shape_cast %963 : vector<1x1x32xf32> to vector<1x32xf32>
    %965 = vector.extract_strided_slice %952 {offsets = [0, 0], sizes = [8, 8], strides = [1, 1]} : vector<8x32xf32> to vector<8x8xf32>
    %966 = arith.truncf %965 : vector<8x8xf32> to vector<8x8xbf16>
    %967 = vector.extract_strided_slice %961 {offsets = [0, 0], sizes = [8, 8], strides = [1, 1]} : vector<8x32xf32> to vector<8x8xf32>
    %968 = arith.truncf %967 : vector<8x8xf32> to vector<8x8xbf16>
    %969 = vector.extract_strided_slice %962 {offsets = [0, 0], sizes = [8, 8], strides = [1, 1]} : vector<8x32xf32> to vector<8x8xf32>
    %970 = arith.truncf %969 : vector<8x8xf32> to vector<8x8xbf16>
    %cst_459 = arith.constant dense<0.000000e+00> : vector<8x8xf32>
    %971 = tpu.matmul %966, %968, %cst_459 {dimension_numbers = #tpu.dot_dimension_numbers<[1], [1], [0], [0], [0, 0, 1, 0], [], []>} : vector<8x8xbf16>, vector<8x8xbf16>, vector<8x8xf32> -> vector<8x8xf32>
    %cst_460 = arith.constant 0.353553385 : f32
    %972 = vector.broadcast %cst_460 : f32 to vector<8x8xf32>
    %973 = arith.mulf %971, %972 : vector<8x8xf32>
    %cst_461 = arith.constant dense<0xFF800000> : vector<8xf32>
    %974 = vector.multi_reduction <maximumf>, %973, %cst_461 [1] : vector<8x8xf32> to vector<8xf32>
    %975 = vector.shape_cast %974 : vector<8xf32> to vector<8x1xf32>
    %976 = vector.broadcast %975 : vector<8x1xf32> to vector<8x8xf32>
    %977 = arith.subf %973, %976 : vector<8x8xf32>
    %978 = math.exp %977 : vector<8x8xf32>
    %cst_462 = arith.constant dense<0.000000e+00> : vector<8xf32>
    %979 = vector.multi_reduction <add>, %978, %cst_462 [1] : vector<8x8xf32> to vector<8xf32>
    %980 = vector.shape_cast %979 : vector<8xf32> to vector<8x1xf32>
    %981 = tpu.reciprocal %980 {approx = true} : vector<8x1xf32> -> vector<8x1xf32>
    %982 = vector.broadcast %981 : vector<8x1xf32> to vector<8x8xf32>
    %983 = arith.mulf %978, %982 : vector<8x8xf32>
    %984 = arith.truncf %983 : vector<8x8xf32> to vector<8x8xbf16>
    %cst_463 = arith.constant dense<0.000000e+00> : vector<8x8xf32>
    %985 = tpu.matmul %984, %970, %cst_463 {dimension_numbers = #tpu.dot_dimension_numbers<[1], [0], [0], [1], [0, 0, 1, 1], [], []>} : vector<8x8xbf16>, vector<8x8xbf16>, vector<8x8xf32> -> vector<8x8xf32>
    %986 = arith.truncf %985 : vector<8x8xf32> to vector<8x8xbf16>
    %cst_464 = arith.constant dense<0.000000e+00> : vector<8x32xf32>
    %987 = tpu.matmul %986, %954, %cst_464 {dimension_numbers = #tpu.dot_dimension_numbers<[1], [0], [0], [1], [0, 0, 1, 1], [], []>} : vector<8x8xbf16>, vector<8x32xbf16>, vector<8x32xf32> -> vector<8x32xf32>
    %988 = vector.extract_strided_slice %952 {offsets = [0, 8], sizes = [8, 8], strides = [1, 1]} : vector<8x32xf32> to vector<8x8xf32>
    %989 = arith.truncf %988 : vector<8x8xf32> to vector<8x8xbf16>
    %990 = vector.extract_strided_slice %961 {offsets = [0, 8], sizes = [8, 8], strides = [1, 1]} : vector<8x32xf32> to vector<8x8xf32>
    %991 = arith.truncf %990 : vector<8x8xf32> to vector<8x8xbf16>
    %992 = vector.extract_strided_slice %962 {offsets = [0, 8], sizes = [8, 8], strides = [1, 1]} : vector<8x32xf32> to vector<8x8xf32>
    %993 = arith.truncf %992 : vector<8x8xf32> to vector<8x8xbf16>
    %cst_465 = arith.constant dense<0.000000e+00> : vector<8x8xf32>
    %994 = tpu.matmul %989, %991, %cst_465 {dimension_numbers = #tpu.dot_dimension_numbers<[1], [1], [0], [0], [0, 0, 1, 0], [], []>} : vector<8x8xbf16>, vector<8x8xbf16>, vector<8x8xf32> -> vector<8x8xf32>
    %cst_466 = arith.constant 0.353553385 : f32
    %995 = vector.broadcast %cst_466 : f32 to vector<8x8xf32>
    %996 = arith.mulf %994, %995 : vector<8x8xf32>
    %cst_467 = arith.constant dense<0xFF800000> : vector<8xf32>
    %997 = vector.multi_reduction <maximumf>, %996, %cst_467 [1] : vector<8x8xf32> to vector<8xf32>
    %998 = vector.shape_cast %997 : vector<8xf32> to vector<8x1xf32>
    %999 = vector.broadcast %998 : vector<8x1xf32> to vector<8x8xf32>
    %1000 = arith.subf %996, %999 : vector<8x8xf32>
    %1001 = math.exp %1000 : vector<8x8xf32>
    %cst_468 = arith.constant dense<0.000000e+00> : vector<8xf32>
    %1002 = vector.multi_reduction <add>, %1001, %cst_468 [1] : vector<8x8xf32> to vector<8xf32>
    %1003 = vector.shape_cast %1002 : vector<8xf32> to vector<8x1xf32>
    %1004 = tpu.reciprocal %1003 {approx = true} : vector<8x1xf32> -> vector<8x1xf32>
    %1005 = vector.broadcast %1004 : vector<8x1xf32> to vector<8x8xf32>
    %1006 = arith.mulf %1001, %1005 : vector<8x8xf32>
    %1007 = arith.truncf %1006 : vector<8x8xf32> to vector<8x8xbf16>
    %cst_469 = arith.constant dense<0.000000e+00> : vector<8x8xf32>
    %1008 = tpu.matmul %1007, %993, %cst_469 {dimension_numbers = #tpu.dot_dimension_numbers<[1], [0], [0], [1], [0, 0, 1, 1], [], []>} : vector<8x8xbf16>, vector<8x8xbf16>, vector<8x8xf32> -> vector<8x8xf32>
    %1009 = arith.truncf %1008 : vector<8x8xf32> to vector<8x8xbf16>
    %cst_470 = arith.constant dense<0.000000e+00> : vector<8x32xf32>
    %1010 = tpu.matmul %1009, %956, %cst_470 {dimension_numbers = #tpu.dot_dimension_numbers<[1], [0], [0], [1], [0, 0, 1, 1], [], []>} : vector<8x8xbf16>, vector<8x32xbf16>, vector<8x32xf32> -> vector<8x32xf32>
    %1011 = arith.addf %987, %1010 : vector<8x32xf32>
    %1012 = vector.extract_strided_slice %952 {offsets = [0, 16], sizes = [8, 8], strides = [1, 1]} : vector<8x32xf32> to vector<8x8xf32>
    %1013 = arith.truncf %1012 : vector<8x8xf32> to vector<8x8xbf16>
    %1014 = vector.extract_strided_slice %961 {offsets = [0, 16], sizes = [8, 8], strides = [1, 1]} : vector<8x32xf32> to vector<8x8xf32>
    %1015 = arith.truncf %1014 : vector<8x8xf32> to vector<8x8xbf16>
    %1016 = vector.extract_strided_slice %962 {offsets = [0, 16], sizes = [8, 8], strides = [1, 1]} : vector<8x32xf32> to vector<8x8xf32>
    %1017 = arith.truncf %1016 : vector<8x8xf32> to vector<8x8xbf16>
    %cst_471 = arith.constant dense<0.000000e+00> : vector<8x8xf32>
    %1018 = tpu.matmul %1013, %1015, %cst_471 {dimension_numbers = #tpu.dot_dimension_numbers<[1], [1], [0], [0], [0, 0, 1, 0], [], []>} : vector<8x8xbf16>, vector<8x8xbf16>, vector<8x8xf32> -> vector<8x8xf32>
    %cst_472 = arith.constant 0.353553385 : f32
    %1019 = vector.broadcast %cst_472 : f32 to vector<8x8xf32>
    %1020 = arith.mulf %1018, %1019 : vector<8x8xf32>
    %cst_473 = arith.constant dense<0xFF800000> : vector<8xf32>
    %1021 = vector.multi_reduction <maximumf>, %1020, %cst_473 [1] : vector<8x8xf32> to vector<8xf32>
    %1022 = vector.shape_cast %1021 : vector<8xf32> to vector<8x1xf32>
    %1023 = vector.broadcast %1022 : vector<8x1xf32> to vector<8x8xf32>
    %1024 = arith.subf %1020, %1023 : vector<8x8xf32>
    %1025 = math.exp %1024 : vector<8x8xf32>
    %cst_474 = arith.constant dense<0.000000e+00> : vector<8xf32>
    %1026 = vector.multi_reduction <add>, %1025, %cst_474 [1] : vector<8x8xf32> to vector<8xf32>
    %1027 = vector.shape_cast %1026 : vector<8xf32> to vector<8x1xf32>
    %1028 = tpu.reciprocal %1027 {approx = true} : vector<8x1xf32> -> vector<8x1xf32>
    %1029 = vector.broadcast %1028 : vector<8x1xf32> to vector<8x8xf32>
    %1030 = arith.mulf %1025, %1029 : vector<8x8xf32>
    %1031 = arith.truncf %1030 : vector<8x8xf32> to vector<8x8xbf16>
    %cst_475 = arith.constant dense<0.000000e+00> : vector<8x8xf32>
    %1032 = tpu.matmul %1031, %1017, %cst_475 {dimension_numbers = #tpu.dot_dimension_numbers<[1], [0], [0], [1], [0, 0, 1, 1], [], []>} : vector<8x8xbf16>, vector<8x8xbf16>, vector<8x8xf32> -> vector<8x8xf32>
    %1033 = arith.truncf %1032 : vector<8x8xf32> to vector<8x8xbf16>
    %cst_476 = arith.constant dense<0.000000e+00> : vector<8x32xf32>
    %1034 = tpu.matmul %1033, %958, %cst_476 {dimension_numbers = #tpu.dot_dimension_numbers<[1], [0], [0], [1], [0, 0, 1, 1], [], []>} : vector<8x8xbf16>, vector<8x32xbf16>, vector<8x32xf32> -> vector<8x32xf32>
    %1035 = arith.addf %1011, %1034 : vector<8x32xf32>
    %1036 = vector.extract_strided_slice %952 {offsets = [0, 24], sizes = [8, 8], strides = [1, 1]} : vector<8x32xf32> to vector<8x8xf32>
    %1037 = arith.truncf %1036 : vector<8x8xf32> to vector<8x8xbf16>
    %1038 = vector.extract_strided_slice %961 {offsets = [0, 24], sizes = [8, 8], strides = [1, 1]} : vector<8x32xf32> to vector<8x8xf32>
    %1039 = arith.truncf %1038 : vector<8x8xf32> to vector<8x8xbf16>
    %1040 = vector.extract_strided_slice %962 {offsets = [0, 24], sizes = [8, 8], strides = [1, 1]} : vector<8x32xf32> to vector<8x8xf32>
    %1041 = arith.truncf %1040 : vector<8x8xf32> to vector<8x8xbf16>
    %cst_477 = arith.constant dense<0.000000e+00> : vector<8x8xf32>
    %1042 = tpu.matmul %1037, %1039, %cst_477 {dimension_numbers = #tpu.dot_dimension_numbers<[1], [1], [0], [0], [0, 0, 1, 0], [], []>} : vector<8x8xbf16>, vector<8x8xbf16>, vector<8x8xf32> -> vector<8x8xf32>
    %cst_478 = arith.constant 0.353553385 : f32
    %1043 = vector.broadcast %cst_478 : f32 to vector<8x8xf32>
    %1044 = arith.mulf %1042, %1043 : vector<8x8xf32>
    %cst_479 = arith.constant dense<0xFF800000> : vector<8xf32>
    %1045 = vector.multi_reduction <maximumf>, %1044, %cst_479 [1] : vector<8x8xf32> to vector<8xf32>
    %1046 = vector.shape_cast %1045 : vector<8xf32> to vector<8x1xf32>
    %1047 = vector.broadcast %1046 : vector<8x1xf32> to vector<8x8xf32>
    %1048 = arith.subf %1044, %1047 : vector<8x8xf32>
    %1049 = math.exp %1048 : vector<8x8xf32>
    %cst_480 = arith.constant dense<0.000000e+00> : vector<8xf32>
    %1050 = vector.multi_reduction <add>, %1049, %cst_480 [1] : vector<8x8xf32> to vector<8xf32>
    %1051 = vector.shape_cast %1050 : vector<8xf32> to vector<8x1xf32>
    %1052 = tpu.reciprocal %1051 {approx = true} : vector<8x1xf32> -> vector<8x1xf32>
    %1053 = vector.broadcast %1052 : vector<8x1xf32> to vector<8x8xf32>
    %1054 = arith.mulf %1049, %1053 : vector<8x8xf32>
    %1055 = arith.truncf %1054 : vector<8x8xf32> to vector<8x8xbf16>
    %cst_481 = arith.constant dense<0.000000e+00> : vector<8x8xf32>
    %1056 = tpu.matmul %1055, %1041, %cst_481 {dimension_numbers = #tpu.dot_dimension_numbers<[1], [0], [0], [1], [0, 0, 1, 1], [], []>} : vector<8x8xbf16>, vector<8x8xbf16>, vector<8x8xf32> -> vector<8x8xf32>
    %1057 = arith.truncf %1056 : vector<8x8xf32> to vector<8x8xbf16>
    %cst_482 = arith.constant dense<0.000000e+00> : vector<8x32xf32>
    %1058 = tpu.matmul %1057, %960, %cst_482 {dimension_numbers = #tpu.dot_dimension_numbers<[1], [0], [0], [1], [0, 0, 1, 1], [], []>} : vector<8x8xbf16>, vector<8x32xbf16>, vector<8x32xf32> -> vector<8x32xf32>
    %1059 = arith.addf %1035, %1058 : vector<8x32xf32>
    %1060 = vector.broadcast %964 : vector<1x32xf32> to vector<8x32xf32>
    %1061 = arith.addf %1059, %1060 : vector<8x32xf32>
    %1062 = arith.addf %911, %1061 : vector<8x32xf32>
    %c1_483 = arith.constant 1 : index
    %c0_484 = arith.constant 0 : index
    %c0_485 = arith.constant 0 : index
    %1063 = vector.load %arg37[%c1_483, %c0_484, %c0_485] : memref<2x1x32xf32, #tpu.memory_space<vmem>>, vector<1x1x32xf32>
    %1064 = vector.shape_cast %1063 : vector<1x1x32xf32> to vector<1x32xf32>
    %c1_486 = arith.constant 1 : index
    %c0_487 = arith.constant 0 : index
    %c0_488 = arith.constant 0 : index
    %1065 = vector.load %arg38[%c1_486, %c0_487, %c0_488] : memref<2x1x32xf32, #tpu.memory_space<vmem>>, vector<1x1x32xf32>
    %1066 = vector.shape_cast %1065 : vector<1x1x32xf32> to vector<1x32xf32>
    %cst_489 = arith.constant dense<0.000000e+00> : vector<8xf32>
    %1067 = vector.multi_reduction <add>, %1062, %cst_489 [1] : vector<8x32xf32> to vector<8xf32>
    %1068 = vector.shape_cast %1067 : vector<8xf32> to vector<8x1xf32>
    %cst_490 = arith.constant 3.200000e+01 : f32
    %1069 = vector.broadcast %cst_490 : f32 to vector<8x1xf32>
    %1070 = arith.divf %1068, %1069 : vector<8x1xf32>
    %1071 = vector.broadcast %1070 : vector<8x1xf32> to vector<8x32xf32>
    %1072 = arith.subf %1062, %1071 : vector<8x32xf32>
    %1073 = arith.mulf %1072, %1072 : vector<8x32xf32>
    %cst_491 = arith.constant dense<0.000000e+00> : vector<8xf32>
    %1074 = vector.multi_reduction <add>, %1073, %cst_491 [1] : vector<8x32xf32> to vector<8xf32>
    %1075 = vector.shape_cast %1074 : vector<8xf32> to vector<8x1xf32>
    %cst_492 = arith.constant 3.200000e+01 : f32
    %1076 = vector.broadcast %cst_492 : f32 to vector<8x1xf32>
    %1077 = arith.divf %1075, %1076 : vector<8x1xf32>
    %1078 = vector.broadcast %1070 : vector<8x1xf32> to vector<8x32xf32>
    %1079 = arith.subf %1062, %1078 : vector<8x32xf32>
    %cst_493 = arith.constant 9.99999974E-6 : f32
    %1080 = vector.broadcast %cst_493 : f32 to vector<8x1xf32>
    %1081 = arith.addf %1077, %1080 : vector<8x1xf32>
    %1082 = math.rsqrt %1081 : vector<8x1xf32>
    %1083 = vector.broadcast %1082 : vector<8x1xf32> to vector<8x32xf32>
    %1084 = arith.mulf %1079, %1083 : vector<8x32xf32>
    %1085 = vector.broadcast %1064 : vector<1x32xf32> to vector<8x32xf32>
    %1086 = arith.mulf %1084, %1085 : vector<8x32xf32>
    %1087 = vector.broadcast %1066 : vector<1x32xf32> to vector<8x32xf32>
    %1088 = arith.addf %1086, %1087 : vector<8x32xf32>
    %c1_494 = arith.constant 1 : index
    %c0_495 = arith.constant 0 : index
    %c0_496 = arith.constant 0 : index
    %1089 = vector.load %arg39[%c1_494, %c0_495, %c0_496] : memref<2x32x64xbf16, #tpu.memory_space<vmem>>, vector<1x32x64xbf16>
    %1090 = vector.shape_cast %1089 : vector<1x32x64xbf16> to vector<32x64xbf16>
    %c1_497 = arith.constant 1 : index
    %c0_498 = arith.constant 0 : index
    %c0_499 = arith.constant 0 : index
    %1091 = vector.load %arg40[%c1_497, %c0_498, %c0_499] : memref<2x1x64xf32, #tpu.memory_space<vmem>>, vector<1x1x64xf32>
    %1092 = vector.shape_cast %1091 : vector<1x1x64xf32> to vector<1x64xf32>
    %c1_500 = arith.constant 1 : index
    %c0_501 = arith.constant 0 : index
    %c0_502 = arith.constant 0 : index
    %1093 = vector.load %arg41[%c1_500, %c0_501, %c0_502] : memref<2x64x32xbf16, #tpu.memory_space<vmem>>, vector<1x64x32xbf16>
    %1094 = vector.shape_cast %1093 : vector<1x64x32xbf16> to vector<64x32xbf16>
    %c1_503 = arith.constant 1 : index
    %c0_504 = arith.constant 0 : index
    %c0_505 = arith.constant 0 : index
    %1095 = vector.load %arg42[%c1_503, %c0_504, %c0_505] : memref<2x1x32xf32, #tpu.memory_space<vmem>>, vector<1x1x32xf32>
    %1096 = vector.shape_cast %1095 : vector<1x1x32xf32> to vector<1x32xf32>
    %1097 = arith.truncf %1088 : vector<8x32xf32> to vector<8x32xbf16>
    %cst_506 = arith.constant dense<0.000000e+00> : vector<8x64xf32>
    %1098 = tpu.matmul %1097, %1090, %cst_506 {dimension_numbers = #tpu.dot_dimension_numbers<[1], [0], [0], [1], [0, 0, 1, 1], [], []>} : vector<8x32xbf16>, vector<32x64xbf16>, vector<8x64xf32> -> vector<8x64xf32>
    %1099 = vector.broadcast %1092 : vector<1x64xf32> to vector<8x64xf32>
    %1100 = arith.addf %1098, %1099 : vector<8x64xf32>
    %cst_507 = arith.constant 0.000000e+00 : f32
    %1101 = vector.broadcast %cst_507 : f32 to vector<8x64xf32>
    %1102 = arith.maximumf %1100, %1101 : vector<8x64xf32>
    %1103 = arith.truncf %1102 : vector<8x64xf32> to vector<8x64xbf16>
    %cst_508 = arith.constant dense<0.000000e+00> : vector<8x32xf32>
    %1104 = tpu.matmul %1103, %1094, %cst_508 {dimension_numbers = #tpu.dot_dimension_numbers<[1], [0], [0], [1], [0, 0, 1, 1], [], []>} : vector<8x64xbf16>, vector<64x32xbf16>, vector<8x32xf32> -> vector<8x32xf32>
    %1105 = vector.broadcast %1096 : vector<1x32xf32> to vector<8x32xf32>
    %1106 = arith.addf %1104, %1105 : vector<8x32xf32>
    %1107 = arith.addf %1062, %1106 : vector<8x32xf32>
    %c0_509 = arith.constant 0 : index
    %c0_510 = arith.constant 0 : index
    %1108 = vector.load %arg43[%c0_509, %c0_510] : memref<1x32xf32, #tpu.memory_space<vmem>>, vector<1x32xf32>
    %c0_511 = arith.constant 0 : index
    %c0_512 = arith.constant 0 : index
    %1109 = vector.load %arg44[%c0_511, %c0_512] : memref<1x32xf32, #tpu.memory_space<vmem>>, vector<1x32xf32>
    %cst_513 = arith.constant dense<0.000000e+00> : vector<8xf32>
    %1110 = vector.multi_reduction <add>, %1107, %cst_513 [1] : vector<8x32xf32> to vector<8xf32>
    %1111 = vector.shape_cast %1110 : vector<8xf32> to vector<8x1xf32>
    %cst_514 = arith.constant 3.200000e+01 : f32
    %1112 = vector.broadcast %cst_514 : f32 to vector<8x1xf32>
    %1113 = arith.divf %1111, %1112 : vector<8x1xf32>
    %1114 = vector.broadcast %1113 : vector<8x1xf32> to vector<8x32xf32>
    %1115 = arith.subf %1107, %1114 : vector<8x32xf32>
    %1116 = arith.mulf %1115, %1115 : vector<8x32xf32>
    %cst_515 = arith.constant dense<0.000000e+00> : vector<8xf32>
    %1117 = vector.multi_reduction <add>, %1116, %cst_515 [1] : vector<8x32xf32> to vector<8xf32>
    %1118 = vector.shape_cast %1117 : vector<8xf32> to vector<8x1xf32>
    %cst_516 = arith.constant 3.200000e+01 : f32
    %1119 = vector.broadcast %cst_516 : f32 to vector<8x1xf32>
    %1120 = arith.divf %1118, %1119 : vector<8x1xf32>
    %1121 = vector.broadcast %1113 : vector<8x1xf32> to vector<8x32xf32>
    %1122 = arith.subf %1107, %1121 : vector<8x32xf32>
    %cst_517 = arith.constant 9.99999974E-6 : f32
    %1123 = vector.broadcast %cst_517 : f32 to vector<8x1xf32>
    %1124 = arith.addf %1120, %1123 : vector<8x1xf32>
    %1125 = math.rsqrt %1124 : vector<8x1xf32>
    %1126 = vector.broadcast %1125 : vector<8x1xf32> to vector<8x32xf32>
    %1127 = arith.mulf %1122, %1126 : vector<8x32xf32>
    %1128 = vector.broadcast %1108 : vector<1x32xf32> to vector<8x32xf32>
    %1129 = arith.mulf %1127, %1128 : vector<8x32xf32>
    %1130 = vector.broadcast %1109 : vector<1x32xf32> to vector<8x32xf32>
    %1131 = arith.addf %1129, %1130 : vector<8x32xf32>
    %1132 = arith.truncf %1131 : vector<8x32xf32> to vector<8x32xbf16>
    %c0_518 = arith.constant 0 : index
    %c0_519 = arith.constant 0 : index
    %1133 = vector.load %arg45[%c0_518, %c0_519] : memref<32x128xbf16, #tpu.memory_space<vmem>>, vector<32x128xbf16>
    %cst_520 = arith.constant dense<0.000000e+00> : vector<8x128xf32>
    %1134 = tpu.matmul %1132, %1133, %cst_520 {dimension_numbers = #tpu.dot_dimension_numbers<[1], [0], [0], [1], [0, 0, 1, 1], [], []>} : vector<8x32xbf16>, vector<32x128xbf16>, vector<8x128xf32> -> vector<8x128xf32>
    %c0_521 = arith.constant 0 : index
    %c0_522 = arith.constant 0 : index
    %1135 = vector.load %arg46[%c0_521, %c0_522] : memref<1x128xf32, #tpu.memory_space<vmem>>, vector<1x128xf32>
    %1136 = vector.broadcast %1135 : vector<1x128xf32> to vector<8x128xf32>
    %1137 = arith.addf %1134, %1136 : vector<8x128xf32>
    %c0_523 = arith.constant 0 : index
    %c0_524 = arith.constant 0 : index
    %c0_525 = arith.constant 0 : index
    %1138 = vector.load %arg47[%c0_523, %c0_524, %c0_525] : memref<1x8x128xf32, #tpu.memory_space<vmem>>, vector<1x8x128xf32>
    %1139 = vector.shape_cast %1138 : vector<1x8x128xf32> to vector<8x128xf32>
    %1140 = vector.shape_cast %1137 : vector<8x128xf32> to vector<1x8x128xf32>
    tpu.vector_store %arg47[%c0_523, %c0_524, %c0_525], %1140 {strides = array<i32>} : memref<1x8x128xf32, #tpu.memory_space<vmem>>, vector<1x8x128xf32>,
    return
  }
  func.func @transform_0(%arg0: i32) -> (i32, i32, i32) {
    %c0_i32 = arith.constant 0 : i32
    %c0_i32_0 = arith.constant 0 : i32
    %c0_i32_1 = arith.constant 0 : i32
    return %arg0, %c0_i32, %c0_i32_0 : i32, i32, i32
  }
  func.func @transform_1(%arg0: i32) -> (i32, i32, i32) {
    %c0_i32 = arith.constant 0 : i32
    %c0_i32_0 = arith.constant 0 : i32
    %c0_i32_1 = arith.constant 0 : i32
    return %arg0, %c0_i32, %c0_i32_0 : i32, i32, i32
  }
  func.func @transform_2(%arg0: i32) -> (i32, i32, i32) {
    %c0_i32 = arith.constant 0 : i32
    %c0_i32_0 = arith.constant 0 : i32
    %c0_i32_1 = arith.constant 0 : i32
    return %arg0, %c0_i32, %c0_i32_0 : i32, i32, i32
  }
  func.func @transform_3(%arg0: i32) -> (i32, i32, i32) {
    %c0_i32 = arith.constant 0 : i32
    %c0_i32_0 = arith.constant 0 : i32
    %c0_i32_1 = arith.constant 0 : i32
    return %arg0, %c0_i32, %c0_i32_0 : i32, i32, i32
  }
  func.func @transform_4(%arg0: i32) -> (i32, i32) {
    %c0_i32 = arith.constant 0 : i32
    %c0_i32_0 = arith.constant 0 : i32
    %c0_i32_1 = arith.constant 0 : i32
    return %c0_i32, %c0_i32_0 : i32, i32
  }
  func.func @transform_5(%arg0: i32) -> (i32, i32) {
    %c0_i32 = arith.constant 0 : i32
    %c0_i32_0 = arith.constant 0 : i32
    %c0_i32_1 = arith.constant 0 : i32
    return %c0_i32, %c0_i32_0 : i32, i32
  }
  func.func @transform_6(%arg0: i32) -> (i32, i32) {
    %c0_i32 = arith.constant 0 : i32
    %c0_i32_0 = arith.constant 0 : i32
    %c0_i32_1 = arith.constant 0 : i32
    return %c0_i32, %c0_i32_0 : i32, i32
  }
  func.func @transform_7(%arg0: i32) -> (i32, i32) {
    %c0_i32 = arith.constant 0 : i32
    %c0_i32_0 = arith.constant 0 : i32
    %c0_i32_1 = arith.constant 0 : i32
    return %c0_i32, %c0_i32_0 : i32, i32
  }
  func.func @transform_8(%arg0: i32) -> (i32, i32, i32) {
    %c0_i32 = arith.constant 0 : i32
    %c0_i32_0 = arith.constant 0 : i32
    %c0_i32_1 = arith.constant 0 : i32
    %c0_i32_2 = arith.constant 0 : i32
    return %c0_i32, %c0_i32_0, %c0_i32_1 : i32, i32, i32
  }
  func.func @transform_9(%arg0: i32) -> (i32, i32, i32) {
    %c0_i32 = arith.constant 0 : i32
    %c0_i32_0 = arith.constant 0 : i32
    %c0_i32_1 = arith.constant 0 : i32
    %c0_i32_2 = arith.constant 0 : i32
    return %c0_i32, %c0_i32_0, %c0_i32_1 : i32, i32, i32
  }
  func.func @transform_10(%arg0: i32) -> (i32, i32, i32) {
    %c0_i32 = arith.constant 0 : i32
    %c0_i32_0 = arith.constant 0 : i32
    %c0_i32_1 = arith.constant 0 : i32
    %c0_i32_2 = arith.constant 0 : i32
    return %c0_i32, %c0_i32_0, %c0_i32_1 : i32, i32, i32
  }
  func.func @transform_11(%arg0: i32) -> (i32, i32, i32) {
    %c0_i32 = arith.constant 0 : i32
    %c0_i32_0 = arith.constant 0 : i32
    %c0_i32_1 = arith.constant 0 : i32
    %c0_i32_2 = arith.constant 0 : i32
    return %c0_i32, %c0_i32_0, %c0_i32_1 : i32, i32, i32
  }
  func.func @transform_12(%arg0: i32) -> (i32, i32, i32, i32) {
    %c0_i32 = arith.constant 0 : i32
    %c0_i32_0 = arith.constant 0 : i32
    %c0_i32_1 = arith.constant 0 : i32
    %c0_i32_2 = arith.constant 0 : i32
    %c0_i32_3 = arith.constant 0 : i32
    return %c0_i32, %c0_i32_0, %c0_i32_1, %c0_i32_2 : i32, i32, i32, i32
  }
  func.func @transform_13(%arg0: i32) -> (i32, i32, i32) {
    %c0_i32 = arith.constant 0 : i32
    %c0_i32_0 = arith.constant 0 : i32
    %c0_i32_1 = arith.constant 0 : i32
    %c0_i32_2 = arith.constant 0 : i32
    return %c0_i32, %c0_i32_0, %c0_i32_1 : i32, i32, i32
  }
  func.func @transform_14(%arg0: i32) -> (i32, i32, i32) {
    %c0_i32 = arith.constant 0 : i32
    %c0_i32_0 = arith.constant 0 : i32
    %c0_i32_1 = arith.constant 0 : i32
    %c0_i32_2 = arith.constant 0 : i32
    return %c0_i32, %c0_i32_0, %c0_i32_1 : i32, i32, i32
  }
  func.func @transform_15(%arg0: i32) -> (i32, i32, i32) {
    %c0_i32 = arith.constant 0 : i32
    %c0_i32_0 = arith.constant 0 : i32
    %c0_i32_1 = arith.constant 0 : i32
    %c0_i32_2 = arith.constant 0 : i32
    return %c0_i32, %c0_i32_0, %c0_i32_1 : i32, i32, i32
  }
  func.func @transform_16(%arg0: i32) -> (i32, i32, i32) {
    %c0_i32 = arith.constant 0 : i32
    %c0_i32_0 = arith.constant 0 : i32
    %c0_i32_1 = arith.constant 0 : i32
    %c0_i32_2 = arith.constant 0 : i32
    return %c0_i32, %c0_i32_0, %c0_i32_1 : i32, i32, i32
  }
  func.func @transform_17(%arg0: i32) -> (i32, i32, i32) {
    %c0_i32 = arith.constant 0 : i32
    %c0_i32_0 = arith.constant 0 : i32
    %c0_i32_1 = arith.constant 0 : i32
    %c0_i32_2 = arith.constant 0 : i32
    return %c0_i32, %c0_i32_0, %c0_i32_1 : i32, i32, i32
  }
  func.func @transform_18(%arg0: i32) -> (i32, i32, i32) {
    %c0_i32 = arith.constant 0 : i32
    %c0_i32_0 = arith.constant 0 : i32
    %c0_i32_1 = arith.constant 0 : i32
    %c0_i32_2 = arith.constant 0 : i32
    return %c0_i32, %c0_i32_0, %c0_i32_1 : i32, i32, i32
  }
  func.func @transform_19(%arg0: i32) -> (i32, i32, i32) {
    %c0_i32 = arith.constant 0 : i32
    %c0_i32_0 = arith.constant 0 : i32
    %c0_i32_1 = arith.constant 0 : i32
    %c0_i32_2 = arith.constant 0 : i32
    return %c0_i32, %c0_i32_0, %c0_i32_1 : i32, i32, i32
  }
  func.func @transform_20(%arg0: i32) -> (i32, i32) {
    %c0_i32 = arith.constant 0 : i32
    %c0_i32_0 = arith.constant 0 : i32
    %c0_i32_1 = arith.constant 0 : i32
    return %c0_i32, %c0_i32_0 : i32, i32
  }
  func.func @transform_21(%arg0: i32) -> (i32, i32) {
    %c0_i32 = arith.constant 0 : i32
    %c0_i32_0 = arith.constant 0 : i32
    %c0_i32_1 = arith.constant 0 : i32
    return %c0_i32, %c0_i32_0 : i32, i32
  }
  func.func @transform_22(%arg0: i32) -> (i32, i32, i32) {
    %c0_i32 = arith.constant 0 : i32
    %c0_i32_0 = arith.constant 0 : i32
    %c0_i32_1 = arith.constant 0 : i32
    %c0_i32_2 = arith.constant 0 : i32
    return %c0_i32, %c0_i32_0, %c0_i32_1 : i32, i32, i32
  }
  func.func @transform_23(%arg0: i32) -> (i32, i32, i32) {
    %c0_i32 = arith.constant 0 : i32
    %c0_i32_0 = arith.constant 0 : i32
    %c0_i32_1 = arith.constant 0 : i32
    %c0_i32_2 = arith.constant 0 : i32
    return %c0_i32, %c0_i32_0, %c0_i32_1 : i32, i32, i32
  }
  func.func @transform_24(%arg0: i32) -> (i32, i32, i32) {
    %c0_i32 = arith.constant 0 : i32
    %c0_i32_0 = arith.constant 0 : i32
    %c0_i32_1 = arith.constant 0 : i32
    %c0_i32_2 = arith.constant 0 : i32
    return %c0_i32, %c0_i32_0, %c0_i32_1 : i32, i32, i32
  }
  func.func @transform_25(%arg0: i32) -> (i32, i32, i32) {
    %c0_i32 = arith.constant 0 : i32
    %c0_i32_0 = arith.constant 0 : i32
    %c0_i32_1 = arith.constant 0 : i32
    %c0_i32_2 = arith.constant 0 : i32
    return %c0_i32, %c0_i32_0, %c0_i32_1 : i32, i32, i32
  }
  func.func @transform_26(%arg0: i32) -> (i32, i32, i32, i32) {
    %c0_i32 = arith.constant 0 : i32
    %c0_i32_0 = arith.constant 0 : i32
    %c0_i32_1 = arith.constant 0 : i32
    %c0_i32_2 = arith.constant 0 : i32
    %c0_i32_3 = arith.constant 0 : i32
    return %c0_i32, %c0_i32_0, %c0_i32_1, %c0_i32_2 : i32, i32, i32, i32
  }
  func.func @transform_27(%arg0: i32) -> (i32, i32, i32) {
    %c0_i32 = arith.constant 0 : i32
    %c0_i32_0 = arith.constant 0 : i32
    %c0_i32_1 = arith.constant 0 : i32
    %c0_i32_2 = arith.constant 0 : i32
    return %c0_i32, %c0_i32_0, %c0_i32_1 : i32, i32, i32
  }
  func.func @transform_28(%arg0: i32) -> (i32, i32, i32) {
    %c0_i32 = arith.constant 0 : i32
    %c0_i32_0 = arith.constant 0 : i32
    %c0_i32_1 = arith.constant 0 : i32
    %c0_i32_2 = arith.constant 0 : i32
    return %c0_i32, %c0_i32_0, %c0_i32_1 : i32, i32, i32
  }
  func.func @transform_29(%arg0: i32) -> (i32, i32, i32) {
    %c0_i32 = arith.constant 0 : i32
    %c0_i32_0 = arith.constant 0 : i32
    %c0_i32_1 = arith.constant 0 : i32
    %c0_i32_2 = arith.constant 0 : i32
    return %c0_i32, %c0_i32_0, %c0_i32_1 : i32, i32, i32
  }
  func.func @transform_30(%arg0: i32) -> (i32, i32, i32) {
    %c0_i32 = arith.constant 0 : i32
    %c0_i32_0 = arith.constant 0 : i32
    %c0_i32_1 = arith.constant 0 : i32
    %c0_i32_2 = arith.constant 0 : i32
    return %c0_i32, %c0_i32_0, %c0_i32_1 : i32, i32, i32
  }
  func.func @transform_31(%arg0: i32) -> (i32, i32, i32) {
    %c0_i32 = arith.constant 0 : i32
    %c0_i32_0 = arith.constant 0 : i32
    %c0_i32_1 = arith.constant 0 : i32
    %c0_i32_2 = arith.constant 0 : i32
    return %c0_i32, %c0_i32_0, %c0_i32_1 : i32, i32, i32
  }
  func.func @transform_32(%arg0: i32) -> (i32, i32, i32) {
    %c0_i32 = arith.constant 0 : i32
    %c0_i32_0 = arith.constant 0 : i32
    %c0_i32_1 = arith.constant 0 : i32
    %c0_i32_2 = arith.constant 0 : i32
    return %c0_i32, %c0_i32_0, %c0_i32_1 : i32, i32, i32
  }
  func.func @transform_33(%arg0: i32) -> (i32, i32, i32) {
    %c0_i32 = arith.constant 0 : i32
    %c0_i32_0 = arith.constant 0 : i32
    %c0_i32_1 = arith.constant 0 : i32
    %c0_i32_2 = arith.constant 0 : i32
    return %c0_i32, %c0_i32_0, %c0_i32_1 : i32, i32, i32
  }
  func.func @transform_34(%arg0: i32) -> (i32, i32, i32, i32) {
    %c0_i32 = arith.constant 0 : i32
    %c0_i32_0 = arith.constant 0 : i32
    %c0_i32_1 = arith.constant 0 : i32
    %c0_i32_2 = arith.constant 0 : i32
    %c0_i32_3 = arith.constant 0 : i32
    return %c0_i32, %c0_i32_0, %c0_i32_1, %c0_i32_2 : i32, i32, i32, i32
  }
  func.func @transform_35(%arg0: i32) -> (i32, i32, i32) {
    %c0_i32 = arith.constant 0 : i32
    %c0_i32_0 = arith.constant 0 : i32
    %c0_i32_1 = arith.constant 0 : i32
    %c0_i32_2 = arith.constant 0 : i32
    return %c0_i32, %c0_i32_0, %c0_i32_1 : i32, i32, i32
  }
  func.func @transform_36(%arg0: i32) -> (i32, i32, i32) {
    %c0_i32 = arith.constant 0 : i32
    %c0_i32_0 = arith.constant 0 : i32
    %c0_i32_1 = arith.constant 0 : i32
    %c0_i32_2 = arith.constant 0 : i32
    return %c0_i32, %c0_i32_0, %c0_i32_1 : i32, i32, i32
  }
  func.func @transform_37(%arg0: i32) -> (i32, i32, i32) {
    %c0_i32 = arith.constant 0 : i32
    %c0_i32_0 = arith.constant 0 : i32
    %c0_i32_1 = arith.constant 0 : i32
    %c0_i32_2 = arith.constant 0 : i32
    return %c0_i32, %c0_i32_0, %c0_i32_1 : i32, i32, i32
  }
  func.func @transform_38(%arg0: i32) -> (i32, i32, i32) {
    %c0_i32 = arith.constant 0 : i32
    %c0_i32_0 = arith.constant 0 : i32
    %c0_i32_1 = arith.constant 0 : i32
    %c0_i32_2 = arith.constant 0 : i32
    return %c0_i32, %c0_i32_0, %c0_i32_1 : i32, i32, i32
  }
  func.func @transform_39(%arg0: i32) -> (i32, i32, i32) {
    %c0_i32 = arith.constant 0 : i32
    %c0_i32_0 = arith.constant 0 : i32
    %c0_i32_1 = arith.constant 0 : i32
    %c0_i32_2 = arith.constant 0 : i32
    return %c0_i32, %c0_i32_0, %c0_i32_1 : i32, i32, i32
  }
  func.func @transform_40(%arg0: i32) -> (i32, i32, i32) {
    %c0_i32 = arith.constant 0 : i32
    %c0_i32_0 = arith.constant 0 : i32
    %c0_i32_1 = arith.constant 0 : i32
    %c0_i32_2 = arith.constant 0 : i32
    return %c0_i32, %c0_i32_0, %c0_i32_1 : i32, i32, i32
  }
  func.func @transform_41(%arg0: i32) -> (i32, i32, i32) {
    %c0_i32 = arith.constant 0 : i32
    %c0_i32_0 = arith.constant 0 : i32
    %c0_i32_1 = arith.constant 0 : i32
    %c0_i32_2 = arith.constant 0 : i32
    return %c0_i32, %c0_i32_0, %c0_i32_1 : i32, i32, i32
  }
  func.func @transform_42(%arg0: i32) -> (i32, i32) {
    %c0_i32 = arith.constant 0 : i32
    %c0_i32_0 = arith.constant 0 : i32
    %c0_i32_1 = arith.constant 0 : i32
    return %c0_i32, %c0_i32_0 : i32, i32
  }
  func.func @transform_43(%arg0: i32) -> (i32, i32) {
    %c0_i32 = arith.constant 0 : i32
    %c0_i32_0 = arith.constant 0 : i32
    %c0_i32_1 = arith.constant 0 : i32
    return %c0_i32, %c0_i32_0 : i32, i32
  }
  func.func @transform_44(%arg0: i32) -> (i32, i32) {
    %c0_i32 = arith.constant 0 : i32
    %c0_i32_0 = arith.constant 0 : i32
    %c0_i32_1 = arith.constant 0 : i32
    return %c0_i32, %c0_i32_0 : i32, i32
  }
  func.func @transform_45(%arg0: i32) -> (i32, i32) {
    %c0_i32 = arith.constant 0 : i32
    %c0_i32_0 = arith.constant 0 : i32
    %c0_i32_1 = arith.constant 0 : i32
    return %c0_i32, %c0_i32_0 : i32, i32
  }
  func.func @transform_46(%arg0: i32) -> (i32, i32, i32) {
    %c0_i32 = arith.constant 0 : i32
    %c0_i32_0 = arith.constant 0 : i32
    %c0_i32_1 = arith.constant 0 : i32
    return %arg0, %c0_i32, %c0_i32_0 : i32, i32, i32
  }
}

</mosaic_0001>

<bundles_post_ra>
// kernel: forward.1
= control target key start
LH: loop header
LB: loop body
LE: loop exit
PB: predicated region body
PF: predicated region fallthrough
CT: control target
= control target key end

     0   :  { %s9658_s6 = smov 1   ;;  %s9659_s10 = smov 2   ;;  %s11105_s0 = inlined_call_operand.smem [shape: u32[47], index: -1, kind: input, shape index: {}] }
   0x1   :  { %s9733_s5 = sld [smem:[%s11105_s0]]   ;;  %s9660_s14 = smov 3  }
   0x2   :  { %s9738_s9 = sld [smem:[%s11105_s0 + %s9658_s6]]   ;;  %s9661_s18 = smov 4  }
   0x3   :  { %s9743_s13 = sld [smem:[%s11105_s0 + %s9659_s10]]   ;;  %s9662_s22 = smov 5  }
   0x4   :  { %s9748_s17 = sld [smem:[%s11105_s0 + %s9660_s14]]   ;;  %s9663_s26 = smov 6  }
   0x5   :  { %s9753_s21 = sld [smem:[%s11105_s0 + %s9661_s18]]   ;;  %s9664_s30 = smov 7  }
   0x6   :  { %s9758_s25 = sld [smem:[%s11105_s0 + %s9662_s22]]   ;;  %s9665_s4 = smov 8  }
   0x7   :  { %11191 = sst [smem:[#allocation19_spill]] %s9733_s5  ;;  %s9666_s10 = smov 9  }
   0x8   :  { %11192 = sst [smem:[#allocation20_spill]] %s9738_s9  ;;  %s9667_s15 = smov 10  }
   0x9   :  { %11193 = sst [smem:[#allocation21_spill]] %s9743_s13  ;;  %s9668_s20 = smov 11  }
   0xa   :  { %11194 = sst [smem:[#allocation22_spill]] %s9748_s17  ;;  %s9670_s1 = smov 13  }
   0xb   :  { %11195 = sst [smem:[#allocation23_spill]] %s9753_s21  ;;  %s9671_s7 = smov 14  }
   0xc   :  { %11196 = sst [smem:[#allocation24_spill]] %s9758_s25  ;;  %s9673_s22 = smov 16  }
   0xd   :  { %s9763_s29 = sld [smem:[%s11105_s0 + %s9663_s26]]   ;;  %s9669_s26 = smov 12  }
   0xe   :  { %s9768_s3 = sld [smem:[%s11105_s0 + %s9664_s30]]   ;;  %s9674_s28 = smov 17  }
   0xf   :  { %s9773_s8 = sld [smem:[%s11105_s0 + %s9665_s4]]  }
  0x10   :  { %s9778_s14 = sld [smem:[%s11105_s0 + %s9666_s10]]  }
  0x11   :  { %s9783_s19 = sld [smem:[%s11105_s0 + %s9667_s15]]   ;;  %s9672_s15 = smov 15  }
  0x12   :  { %s9788_s24 = sld [smem:[%s11105_s0 + %s9668_s20]]  }
  0x13   :  { %11197 = sst [smem:[#allocation25_spill]] %s9763_s29 }
  0x14   :  { %11198 = sst [smem:[#allocation26_spill]] %s9768_s3 }
  0x15   :  { %11199 = sst [smem:[#allocation27_spill]] %s9773_s8 }
  0x16   :  { %11200 = sst [smem:[#allocation28_spill]] %s9778_s14 }
  0x17   :  { %11201 = sst [smem:[#allocation29_spill]] %s9783_s19 }
  0x18   :  { %11202 = sst [smem:[#allocation30_spill]] %s9788_s24 }
  0x19   :  { %s9793_s30 = sld [smem:[%s11105_s0 + %s9669_s26]]  }
  0x1a   :  { %s9798_s6 = sld [smem:[%s11105_s0 + %s9670_s1]]  }
  0x1b   :  { %s9803_s12 = sld [smem:[%s11105_s0 + %s9671_s7]]   ;;  %s9675_s7 = smov 18  }
  0x1c   :  { %s9808_s20 = sld [smem:[%s11105_s0 + %s9672_s15]]   ;;  %s9676_s15 = smov 19  }
  0x1d   :  { %s9813_s27 = sld [smem:[%s11105_s0 + %s9673_s22]]   ;;  %s9677_s22 = smov 20  }
  0x1e   :  { %s9818_s4 = sld [smem:[%s11105_s0 + %s9674_s28]]   ;;  %s9678_s28 = smov 21  }
  0x1f   :  { %11203 = sst [smem:[#allocation31_spill]] %s9793_s30 }
  0x20   :  { %11204 = sst [smem:[#allocation32_spill]] %s9798_s6 }
  0x21   :  { %11205 = sst [smem:[#allocation33_spill]] %s9803_s12 }
  0x22   :  { %11206 = sst [smem:[#allocation34_spill]] %s9808_s20 }
  0x23   :  { %11207 = sst [smem:[#allocation35_spill]] %s9813_s27 }
  0x24   :  { %11208 = sst [smem:[#allocation36_spill]] %s9818_s4 }
  0x25   :  { %s9823_s17 = sld [smem:[%s11105_s0 + %s9675_s7]]   ;;  %s9679_s7 = smov 22  }
  0x26   :  { %s9828_s13 = sld [smem:[%s11105_s0 + %s9676_s15]]   ;;  %s9680_s15 = smov 23  }
  0x27   :  { %s9833_s29 = sld [smem:[%s11105_s0 + %s9677_s22]]   ;;  %s9681_s22 = smov 24  }
  0x28   :  { %s9838_s4 = sld [smem:[%s11105_s0 + %s9678_s28]]   ;;  %s9682_s28 = smov 25  }
  0x29   :  { %s9843_s20 = sld [smem:[%s11105_s0 + %s9679_s7]]   ;;  %s9683_s7 = smov 26  }
  0x2a   :  { %s9853_s12 = sld [smem:[%s11105_s0 + %s9681_s22]]   ;;  %s9685_s22 = smov 28  }
  0x2b   :  { %11209 = sst [smem:[#allocation37_spill]] %s9823_s17 }
  0x2c   :  { %11210 = sst [smem:[#allocation38_spill]] %s9828_s13 }
  0x2d   :  { %11211 = sst [smem:[#allocation39_spill]] %s9833_s29 }
  0x2e   :  { %11212 = sst [smem:[#allocation40_spill]] %s9838_s4 }
  0x2f   :  { %11213 = sst [smem:[#allocation41_spill]] %s9843_s20 }
  0x30   :  { %s9848_s13 = sld [smem:[%s11105_s0 + %s9680_s15]]   ;;  %s9684_s15 = smov 27  }
  0x31   :  { %11215 = sst [smem:[#allocation43_spill]] %s9853_s12 }
  0x32   :  { %s9858_s17 = sld [smem:[%s11105_s0 + %s9682_s28]]   ;;  %s9686_s28 = smov 29  }
  0x33   :  { %s9863_s20 = sld [smem:[%s11105_s0 + %s9683_s7]]   ;;  %s9687_s7 = smov 30  }
  0x34   :  { %s9873_s12 = sld [smem:[%s11105_s0 + %s9685_s22]]   ;;  %s9689_s22 = smov 32  }
  0x36   :  { %11214 = sst [smem:[#allocation42_spill]] %s9848_s13 }
  0x37   :  { %s9868_s13 = sld [smem:[%s11105_s0 + %s9684_s15]]   ;;  %s9688_s15 = smov 31  }
  0x38   :  { %11216 = sst [smem:[#allocation44_spill]] %s9858_s17 }
  0x39   :  { %11217 = sst [smem:[#allocation45_spill]] %s9863_s20 }
  0x3a   :  { %11219 = sst [smem:[#allocation47_spill]] %s9873_s12 }
  0x3b   :  { %s9878_s17 = sld [smem:[%s11105_s0 + %s9686_s28]]   ;;  %s9690_s28 = smov 33  }
  0x3c   :  { %s9883_s20 = sld [smem:[%s11105_s0 + %s9687_s7]]   ;;  %s9691_s7 = smov 34  }
  0x3d   :  { %11218 = sst [smem:[#allocation46_spill]] %s9868_s13 }
  0x3e   :  { %s9888_s13 = sld [smem:[%s11105_s0 + %s9688_s15]]   ;;  %s9692_s15 = smov 35  }
  0x3f   :  { %s9893_s12 = sld [smem:[%s11105_s0 + %s9689_s22]]   ;;  %s9693_s22 = smov 36  }
  0x41   :  { %11220 = sst [smem:[#allocation48_spill]] %s9878_s17 }
  0x42   :  { %11221 = sst [smem:[#allocation49_spill]] %s9883_s20 }
  0x43   :  { %s9898_s17 = sld [smem:[%s11105_s0 + %s9690_s28]]   ;;  %s9694_s28 = smov 37  }
  0x44   :  { %11222 = sst [smem:[#allocation50_spill]] %s9888_s13 }
  0x45   :  { %11223 = sst [smem:[#allocation51_spill]] %s9893_s12 }
  0x46   :  { %s9903_s20 = sld [smem:[%s11105_s0 + %s9691_s7]]   ;;  %s9695_s7 = smov 38  }
  0x47   :  { %s9908_s13 = sld [smem:[%s11105_s0 + %s9692_s15]]   ;;  %s9696_s15 = smov 39  }
  0x48   :  { %s9913_s12 = sld [smem:[%s11105_s0 + %s9693_s22]]   ;;  %s9697_s22 = smov 40  }
  0x49   :  { %11224 = sst [smem:[#allocation52_spill]] %s9898_s17 }
  0x4a   :  { %s9918_s17 = sld [smem:[%s11105_s0 + %s9694_s28]]   ;;  %s9698_s28 = smov 41  }
  0x4c   :  { %11225 = sst [smem:[#allocation53_spill]] %s9903_s20 }
  0x4d   :  { %11226 = sst [smem:[#allocation54_spill]] %s9908_s13 }
  0x4e   :  { %11227 = sst [smem:[#allocation55_spill]] %s9913_s12 }
  0x4f   :  { %s9923_s20 = sld [smem:[%s11105_s0 + %s9695_s7]]   ;;  %s9699_s7 = smov 42  }
  0x50   :  { %11228 = sst [smem:[#allocation56_spill]] %s9918_s17 }
  0x51   :  { %s9928_s13 = sld [smem:[%s11105_s0 + %s9696_s15]]   ;;  %s9700_s15 = smov 43  }
  0x52   :  { %s9933_s12 = sld [smem:[%s11105_s0 + %s9697_s22]]   ;;  %s9701_s22 = smov 44  }
  0x53   :  { %s9938_s17 = sld [smem:[%s11105_s0 + %s9698_s28]]   ;;  %s9702_s28 = smov 45  }
  0x55   :  { %11229 = sst [smem:[#allocation57_spill]] %s9923_s20 }
  0x56   :  { %s9943_s20 = sld [smem:[%s11105_s0 + %s9699_s7]]   ;;  %s9703_s7 = smov 46  }
  0x57   :  { %11230 = sst [smem:[#allocation58_spill]] %s9928_s13 }
  0x58   :  { %11231 = sst [smem:[#allocation59_spill]] %s9933_s12 }
  0x59   :  { %11232 = sst [smem:[#allocation60_spill]] %s9938_s17 }
  0x5a   :  { %s9948_s13 = sld [smem:[%s11105_s0 + %s9700_s15]]  }
  0x5b   :  { %s9953_s12 = sld [smem:[%s11105_s0 + %s9701_s22]]  }
  0x5c   :  { %11233 = sst [smem:[#allocation61_spill]] %s9943_s20 }
  0x5d   :  { %s9958_s17 = sld [smem:[%s11105_s0 + %s9702_s28]]  }
  0x5e   :  { %s9963_s27 = sld [smem:[%s11105_s0 + %s9703_s7]]  }
  0x60   :  { %11234 = sst [smem:[#allocation62_spill]] %s9948_s13 }
  0x61   :  { %11235 = sst [smem:[#allocation63_spill]] %s9953_s12 }
  0x63   :  { %11236 = sst [smem:[#allocation64_spill]] %s9958_s17 }
  0x64   :  { %11237 = sst [smem:[#allocation65_spill]] %s9963_s27 }
  0x65   :  { %98 = vsyncpa [#allocation3], 0 }
  0x66   :  { %99 = vsyncpa [#allocation6], 0 }
  0x67   :  { %100 = vsyncpa [#allocation9], 0 }
  0x68   :  { %101 = vsyncpa [#allocation12], 0 }
  0x69   :  { %102 = vsyncpa [#allocation4], 0 }
  0x6a   :  { %104 = vsyncpa [#allocation4 + $0x1], 0  ;;  %s9965_s15 = smov 0   ;;  %s9967_s16 = smov 0  }
  0x6b   :  { %s9969_s18 = smov 0   ;;  %s9971_s22 = smov 0  }
  0x6c LB: > { %s11238_s30 = sld [smem:[#allocation31_spill]]  ;;  %s11239_s24 = sld [smem:[#allocation30_spill]]  ;;  %s9656_s22 = sphi %s9971_s22, %s11333_s22   ;;  %s9652_s18 = sphi %s9969_s18, %s11336_s18   ;;  %s9648_s16 = sphi %s9967_s16, %s11335_s16   ;;  %s9644_s15 = sphi %s9965_s15, %s11334_s15  }
  0x6d   : > { %s11240_s19 = sld [smem:[#allocation29_spill]]  ;;  %s11241_s17 = sld [smem:[#allocation64_spill]] }
  0x6e   : > { %s11242_s6 = sld [smem:[#allocation32_spill]]  ;;  %s11243_s14 = sld [smem:[#allocation28_spill]] }
  0x6f   : > { %s11244_s13 = sld [smem:[#allocation62_spill]]  ;;  %s11245_s8 = sld [smem:[#allocation27_spill]] }
  0x70   : > { %s11246_s4 = sld [smem:[#allocation40_spill]]  ;;  %s11247_s3 = sld [smem:[#allocation26_spill]] }
  0x71   : > { %s11248_s29 = sld [smem:[#allocation39_spill]]  ;;  %s11249_s20 = sld [smem:[#allocation61_spill]] }
  0x72   : > { %11250 = sst [smem:[#allocation66_spill]] %s9644_s15  ;;  %s9986_s0 = sadd.s32 4294967295, %s9656_s22  }
  0x73   : > { %11251 = sst [smem:[#allocation67_spill]] %s9648_s16  ;;  %s7837_s23 = sadd.s32 4294967294, %s9656_s22  }
  0x74   : > { %11252 = sst [smem:[#allocation68_spill]] %s9652_s18  ;;  %s9990_s26 = sadd.s32 1, %s9656_s22  }
  0x75   : > { %11253 = sst [smem:[#allocation69_spill]] %s9656_s22  ;;  %s1103_s28 = sadd.s32 1, %s9652_s18 }
  0x76   : > { %11254 = sst [smem:[#allocation70_spill]] %s9986_s0  ;;  %s1100_s1 = ssub.s32 %s9656_s22, %s9990_s26 }
  0x77   : > { %11255 = sst [smem:[#allocation71_spill]] %s9990_s26  ;;  %p1113_p0 = scmp.ne.s32.totalorder %s9652_s18, %s9648_s16 }
  0x78   : > { %p1101_p1 = scmp.eq.s32.totalorder %s1100_s1, 0  ;;  %p1114_p2 = scmp.eq.s32.totalorder %s9986_s0, 1 }
  0x79   : > { %p1119_p3 = scmp.ne.s32.totalorder %s9648_s16, %s9644_s15  ;;  %p1120_p4 = scmp.eq.s32.totalorder %s7837_s23, 1 }
  0x7a   : > { %s10001_s2 = scalar_select %p1101_p1, %s9652_s18, %s1103_s28  }
  0x7b   : > { %p10003_p5 = por %p1114_p2, %p1113_p0  ;;  %p10007_p6 = por %p1120_p4, %p1119_p3 }
  0x7c   : > { %11256 = sst [smem:[#allocation72_spill]] %s10001_s2  ;;  %p7838_p7 = scmp.ge.s32.totalorder %s9656_s22, 1 }
  0x7d   : > { %s11257_s7 = scalar_select %p10003_p5, 1, 0 }
  0x7e   : > { %s11259_s10 = scalar_select %p10007_p6, 1, 0 }
  0x7f   : > { %11258 = sst [smem:[#allocation73_spill]] %s11257_s7  ;;  %p1127_p8 = scmp.lt.s32.totalorder %s9656_s22, 3 }
  0x80   : > { %11260 = sst [smem:[#allocation74_spill]] %s11259_s10  ;;  %p11138_p9 = scmp.eq.s32.totalorder %s9986_s0, 0 }
  0x81   : > { %p10014_p10 = pnand %p7838_p7, %p1127_p8  ;;  %s9704_s23 = smov [#allocation5]  }
  0x82   : > { %s1196_s28 = sshll.u32 %s9704_s23, 4  ;;  %s9705_s1 = smov [#allocation8]   ;;  %s1197_s28 = int_to_ptr.vmem [resolvable:$true] %s1196_s28 }
  0x83   : > { %s11261_s11 = scalar_select %p10014_p10, 1, 0 }
  0x84   : > { %p9063_p11 = pneg %p10014_p10  ;;  %s1278_s2 = sshll.u32 %s9705_s1, 4  ;;  %s10026_s2 = int_to_ptr.vmem [resolvable:$true] %s1278_s2 }
  0x85   : > { %s9706_s26 = smov [#allocation2]   ;;  %s9410_s15 = scalar_lea.hbm %s11248_s29, 16 }
  0x86   : > { %p10022_p12 = pnand %p11138_p9, %p9063_p11  ;;  %s1149_s10 = sshll.u32 %s9706_s26, 4  ;;  %s10028_s10 = int_to_ptr.vmem [resolvable:$true] %s1149_s10 }
  0x87   : > { %p9411_p13 = scmp.ne.s32.totalorder %s11248_s29, %s9410_s15  ;;  %p9417_p3 = scmp.lt.u32.totalorder %s9410_s15, %s11248_s29 }
  0x88   : > { %p10034_p0 = pneg %p10022_p12 }
  0x8a   : > { %p9413_p1 = pnand %p10034_p0, %p9411_p13 }
  0x8c   : > { %p9414_p2 = pneg %p9413_p1 }
  0x8e   : > { %p9419_p4 = pnand %p9417_p3, %p9414_p2 }
  0x90   : > { %9422 = shalt.err (!%p9419_p4)
}
  0x91   : > { %s9423_s1 = scalar_lea.vmem %s1197_s28, 16  ;;  %s9430_s26 = scalar_lea.vmem %s1197_s28, 32 }
  0x92   : > { %p9424_p7 = scmp.ne.s32.totalorder %s1197_s28, %s9423_s1  ;;  %p9431_p9 = scmp.lt.s32.totalorder %s1197_s28, %s1197_s28 }
  0x93   : > { %p9432_p6 = scmp.lt.s32.totalorder %s9430_s26, %s9423_s1 }
  0x94   : > { %p9426_p8 = pnand %p9424_p7, %p10034_p0 }
  0x95   : > { %p9433_p5 = por %p9432_p6, %p9431_p9 }
  0x96   : > { %p9427_p11 = pneg %p9426_p8 }
  0x98   : > { %p9434_p10 = pnand %p9433_p5, %p9427_p11 }
  0x9a   : > { %9437 = shalt.err (!%p9434_p10)
}
  0x9b   : > { %9069 = dma.hbm_to_vmem [thread:$0]  (!%p10022_p12), %s11248_s29, 16, %s1197_s28, [#allocation6]  }
  0x9c   : > { %s9438_s15 = scalar_lea.hbm %s11249_s20, 16 }
  0x9d   : > { %p9439_p13 = scmp.ne.s32.totalorder %s11249_s20, %s9438_s15  ;;  %p9445_p3 = scmp.lt.u32.totalorder %s9438_s15, %s11249_s20 }
  0x9f   : > { %p9441_p1 = pnand %p9439_p13, %p10034_p0 }
  0xa1   : > { %p9442_p2 = pneg %p9441_p1 }
  0xa3   : > { %p9447_p4 = pnand %p9445_p3, %p9442_p2 }
  0xa5   : > { %9450 = shalt.err (!%p9447_p4)
}
  0xa6   : > { %s9451_s1 = scalar_lea.vmem %s10026_s2, 16  ;;  %s9458_s26 = scalar_lea.vmem %s10026_s2, 32 }
  0xa7   : > { %p9452_p5 = scmp.ne.s32.totalorder %s10026_s2, %s9451_s1  ;;  %p9459_p10 = scmp.lt.s32.totalorder %s10026_s2, %s10026_s2 }
  0xa8   : > { %p9460_p7 = scmp.lt.s32.totalorder %s9458_s26, %s9451_s1 }
  0xa9   : > { %p9454_p6 = pnand %p9452_p5, %p10034_p0 }
  0xaa   : > { %p9461_p8 = por %p9460_p7, %p9459_p10 }
  0xab   : > { %p9455_p9 = pneg %p9454_p6 }
  0xad   : > { %p9462_p11 = pnand %p9461_p8, %p9455_p9 }
  0xaf   : > { %9465 = shalt.err (!%p9462_p11)
}
  0xb0   : > { %9075 = dma.hbm_to_vmem [thread:$0]  (!%p10022_p12), %s11249_s20, 16, %s10026_s2, [#allocation9]  }
  0xb1   : > { %s9466_s28 = scalar_lea.hbm %s11247_s3, 16 }
  0xb2   : > { %p9467_p13 = scmp.ne.s32.totalorder %s11247_s3, %s9466_s28  ;;  %p9473_p3 = scmp.lt.u32.totalorder %s9466_s28, %s11247_s3 }
  0xb4   : > { %p9469_p1 = pnand %p9467_p13, %p10034_p0 }
  0xb6   : > { %p9470_p2 = pneg %p9469_p1 }
  0xb8   : > { %p9475_p4 = pnand %p9473_p3, %p9470_p2 }
  0xba   : > { %9478 = shalt.err (!%p9475_p4)
}
  0xbb   : > { %s9479_s15 = scalar_lea.vmem %s10028_s10, 16  ;;  %s9486_s1 = scalar_lea.vmem %s10028_s10, 32 }
  0xbc   : > { %p9480_p5 = scmp.ne.s32.totalorder %s10028_s10, %s9479_s15  ;;  %p9487_p10 = scmp.lt.s32.totalorder %s10028_s10, %s10028_s10 }
  0xbd   : > { %p9488_p7 = scmp.lt.s32.totalorder %s9486_s1, %s9479_s15 }
  0xbe   : > { %p9482_p6 = pnand %p9480_p5, %p10034_p0 }
  0xbf   : > { %p9489_p8 = por %p9488_p7, %p9487_p10 }
  0xc0   : > { %p9483_p9 = pneg %p9482_p6 }
  0xc2   : > { %p9490_p11 = pnand %p9489_p8, %p9483_p9 }
  0xc4   : > { %9493 = shalt.err (!%p9490_p11)
}
  0xc5   : > { %9066 = dma.hbm_to_vmem [thread:$0]  (!%p10022_p12), %s11247_s3, 16, %s10028_s10, [#allocation3]  }
  0xc6   : > { %s9707_s2 = smov [#allocation7]   ;;  %s9708_s28 = smov [#allocation10]  }
  0xc7   : > { %s1207_s26 = sshll.u32 %s9707_s2, 4  ;;  %s1289_s20 = sshll.u32 %s9708_s28, 4  ;;  %s1208_s26 = int_to_ptr.vmem [resolvable:$true] %s1207_s26  ;;  %s1290_s20 = int_to_ptr.vmem [resolvable:$true] %s1289_s20 }
  0xc8   : > { %s9494_s29 = scalar_lea.hbm %s11246_s4, 16 }
  0xc9   : > { %p9495_p13 = scmp.ne.s32.totalorder %s11246_s4, %s9494_s29  ;;  %p9501_p3 = scmp.lt.u32.totalorder %s9494_s29, %s11246_s4 }
  0xcb   : > { %p9497_p1 = pnand %p9495_p13, %p10034_p0 }
  0xcd   : > { %p9498_p2 = pneg %p9497_p1 }
  0xcf   : > { %p9503_p4 = pnand %p9501_p3, %p9498_p2 }
  0xd1   : > { %9506 = shalt.err (!%p9503_p4)
}
  0xd2   : > { %s9507_s15 = scalar_lea.vmem %s1208_s26, 16  ;;  %s9514_s10 = scalar_lea.vmem %s1208_s26, 32 }
  0xd3   : > { %p9508_p5 = scmp.ne.s32.totalorder %s1208_s26, %s9507_s15  ;;  %p9515_p10 = scmp.lt.s32.totalorder %s1208_s26, %s1208_s26 }
  0xd4   : > { %p9516_p7 = scmp.lt.s32.totalorder %s9514_s10, %s9507_s15 }
  0xd5   : > { %p9510_p6 = pnand %p9508_p5, %p10034_p0 }
  0xd6   : > { %p9517_p8 = por %p9516_p7, %p9515_p10 }
  0xd7   : > { %p9511_p9 = pneg %p9510_p6 }
  0xd9   : > { %p9518_p11 = pnand %p9517_p8, %p9511_p9 }
  0xdb   : > { %9521 = shalt.err (!%p9518_p11)
}
  0xdc   : > { %9072 = dma.hbm_to_vmem [thread:$0]  (!%p10022_p12), %s11246_s4, 16, %s1208_s26, [#allocation6]  }
  0xdd   : > { %s9522_s29 = scalar_lea.hbm %s11244_s13, 16 }
  0xde   : > { %p9523_p13 = scmp.ne.s32.totalorder %s11244_s13, %s9522_s29  ;;  %p9529_p3 = scmp.lt.u32.totalorder %s9522_s29, %s11244_s13 }
  0xe0   : > { %p9525_p1 = pnand %p9523_p13, %p10034_p0 }
  0xe2   : > { %p9526_p2 = pneg %p9525_p1 }
  0xe4   : > { %p9531_p4 = pnand %p9529_p3, %p9526_p2 }
  0xe6   : > { %9534 = shalt.err (!%p9531_p4)
}
  0xe7   : > { %s9535_s1 = scalar_lea.vmem %s1290_s20, 16  ;;  %s9542_s2 = scalar_lea.vmem %s1290_s20, 32 }
  0xe8   : > { %p9536_p5 = scmp.ne.s32.totalorder %s1290_s20, %s9535_s1  ;;  %p9543_p10 = scmp.lt.s32.totalorder %s1290_s20, %s1290_s20 }
  0xe9   : > { %p9544_p7 = scmp.lt.s32.totalorder %s9542_s2, %s9535_s1 }
  0xea   : > { %p9538_p6 = pnand %p9536_p5, %p10034_p0 }
  0xeb   : > { %p9545_p8 = por %p9544_p7, %p9543_p10 }
  0xec   : > { %p9539_p9 = pneg %p9538_p6 }
  0xee   : > { %p9546_p11 = pnand %p9545_p8, %p9539_p9 }
  0xf0   : > { %9549 = shalt.err (!%p9546_p11)
}
  0xf1   : > { %9078 = dma.hbm_to_vmem [thread:$0]  (!%p10022_p12), %s11244_s13, 16, %s1290_s20, [#allocation9]  }
  0xf2   : > { %s9709_s26 = smov [#allocation11]   ;;  %s9550_s15 = scalar_lea.hbm %s11241_s17, 16 }
  0xf3   : > { %s1303_s28 = sshll.u32 %s9709_s26, 4  ;;  %p9551_p13 = scmp.ne.s32.totalorder %s11241_s17, %s9550_s15  ;;  %s1304_s28 = int_to_ptr.vmem [resolvable:$true] %s1303_s28 }
  0xf4   : > { %p9557_p3 = scmp.lt.u32.totalorder %s9550_s15, %s11241_s17 }
  0xf5   : > { %p9553_p1 = pnand %p9551_p13, %p10034_p0 }
  0xf7   : > { %p9554_p2 = pneg %p9553_p1 }
  0xf9   : > { %p9559_p4 = pnand %p9557_p3, %p9554_p2 }
  0xfb   : > { %9562 = shalt.err (!%p9559_p4)
}
  0xfc   : > { %s9563_s10 = scalar_lea.vmem %s1304_s28, 16  ;;  %s9570_s29 = scalar_lea.vmem %s1304_s28, 32 }
  0xfd   : > { %p9564_p5 = scmp.ne.s32.totalorder %s1304_s28, %s9563_s10  ;;  %p9571_p10 = scmp.lt.s32.totalorder %s1304_s28, %s1304_s28 }
  0xfe   : > { %p9572_p7 = scmp.lt.s32.totalorder %s9570_s29, %s9563_s10 }
  0xff   : > { %p9566_p6 = pnand %p9564_p5, %p10034_p0 }
 0x100   : > { %p9573_p8 = por %p9572_p7, %p9571_p10 }
 0x101   : > { %p9567_p9 = pneg %p9566_p6 }
 0x103   : > { %p9574_p11 = pnand %p9573_p8, %p9567_p9 }
 0x105   : > { %9577 = shalt.err (!%p9574_p11)
}
 0x106   : > { %9081 = dma.hbm_to_vmem [thread:$0]  (!%p10022_p12), %s11241_s17, 16, %s1304_s28, [#allocation12]  }
 0x107   : > { %p11264_p13 = scmp.ne.s32.totalorder %s11261_s11, 0 }
 0x108   : > { %p11265_p1 = scmp.eq.s32.totalorder (!%p11264_p13), %s9986_s0, 0 }
 0x109   : > { %1344 = sbr.rel (%p11264_p13) target bundleno = 21463 (0x53d7), region = 204 }
 0x110   : > { %9623 = dma.done.wait (%p11265_p1), [#allocation3], 16   ;;  %p11266_p2 = pmov %p11265_p1 }
 0x111   : > { %p11267_p0 = pmov %p11265_p1 }
 0x112   : > { %9625 = vsyncadd (%p11266_p2), [#allocation3], 4294967280 }
 0x113   : > { %9627 = dma.done.wait (%p11267_p0), [#allocation6], 32   ;;  %p11268_p3 = pmov %p11267_p0 }
 0x114   : > { %p11269_p4 = pmov %p11267_p0 }
 0x115   : > { %9629 = vsyncadd (%p11268_p3), [#allocation6], 4294967264 }
 0x116   : > { %9631 = dma.done.wait (%p11269_p4), [#allocation9], 32   ;;  %p11270_p12 = pmov %p11267_p0 }
 0x117   : > { %p11271_p5 = pmov %p11267_p0 }
 0x118   : > { %9633 = vsyncadd (%p11270_p12), [#allocation9], 4294967264 }
 0x119   : > { %9635 = dma.done.wait (%p11271_p5), [#allocation12], 16   ;;  %p11272_p6 = pmov %p11267_p0 }
 0x11a   : > { %s11273_s9 = sld [smem:[#allocation20_spill]]  ;;  %s11274_s5 = sld [smem:[#allocation19_spill]]  ;;  %v9710_v0 = vmov 0   ;;  %vm1516_vm0 = vcmask 261120   ;;  %v9198_v15 = vld [vmem:[%s11240_s19] sm:$0xff]   ;;  %v9711_v16 = vmov 0.0  }
 0x11b   : > { %9637 = vsyncadd (%p11272_p6), [#allocation12], 4294967280  ;;  %s11275_s21 = sld [smem:[#allocation23_spill]]  ;;  %s11276_s25 = sld [smem:[#allocation24_spill]]  ;;  %9197 = vset.pattern.permute.xlu0 %v9710_v0  ;;  %8444 = vmatprep.subr.bf16.mxu0 %v9711_v16  ;;  %vm9712_vm1 = vmmov 0   ;;  %v9199_v17 = vld [vmem:[%s11240_s19 + $0x8] sm:$0xff]  }
 0x11c   : > { %p1485_p9 = scmp.lt.s32.totalorder %s9986_s0, 1  ;;  %8448 = vmatprep.mubr.msk.bf16.mxu0 %vm9712_vm1, %v9711_v16  ;;  %8445 = vmatpush3.bf16.msra.mxu0 %v9198_v15  ;;  %v7857_v22 = vld [vmem:[%s11245_s8] ss:$0 sm:$0xff]  ;;  %s11161_s1 = smov 96   ;;  %vm1624_vm2 = vcmask 64512   ;;  %vm1689_vm3 = vcmask 1043456  }
 0x11d   : > { %8452 = vmatprep.subr.bf16.mxu1 %v9711_v16  ;;  %8446 = vmatprep.subr.bf16.mxu0 %v9711_v16  ;;  %v7858_v24 = vld [vmem:[%s11243_s14] ss:$0 sm:$0xff]  ;;  %s11163_s2 = smov 88   ;;  %s11159_s26 = smov 120   ;;  %vm2401_vm4 = vcmask 523264   ;;  %vm3860_vm5 = vcmask 1040384  }
 0x11e   : > { %s10128_s20 = scalar_select %p1485_p9, %s9986_s0, 1  ;;  %8454 = vmatprep.mubr.msk.bf16.mxu1 %vm9712_vm1, %v9711_v16  ;;  %v7862_v28 = vld [vmem:[%s11239_s24] ss:$0 sm:$0xff]  ;;  %vm3856_vm6 = vcmask 146432  }
 0x11f   : > { %s11157_s28 = smov 56   ;;  %s11153_s15 = smov 64  }
 0x120   : > { %s10131_s18 = sshll.u32 %s10128_s20, 3  ;;  %8447 = vmatpush3.bf16.msra.mxu0 %v9199_v17  ;;  %s11143_s10 = smov 80  }
 0x121   : > { %s1492_s11 = scalar_lea.vmem %s11273_s9, %s10131_s18  ;;  %s1488_s23 = scalar_lea.vmem %s11274_s5, %s10131_s18  ;;  %v1504_v2 = vld [vmem:[%s11275_s21] sm:$0xff]  ;;  %8458 = vmatprep.subr.bf16.mxu0 %v9711_v16 }
 0x122   : > { %v1503_v1 = vld [vmem:[%s1492_s11] sm:$0xff]  ;;  %s11155_s29 = smov 112   ;;  %s11151_s11 = smov 48  }
 0x123   : > { %1507 = vperm.xlu0 %9197, %v1503_v1   ;;  %v1502_v4 = vld [vmem:[%s1488_s23] sm:$0xff]  ;;  %s11149_s23 = smov 104   ;;  %s11287_s3 = smov 64  }
 0x124   : > { %v1512_v6 = vld [vmem:[%s11276_s25] sm:$0xff]  ;;  %s11288_s4 = smov 80   ;;  %s11289_s5 = smov 48  }
 0x125   : > { %s11291_s9 = smov 72   ;;  %s11292_s13 = smov 40  }
 0x126   : > { %s11303_s17 = sld [smem:[#allocation45_spill]]  ;;  %s11305_s21 = sld [smem:[#allocation51_spill]] }
 0x127   : > { %s11308_s25 = sld [smem:[#allocation48_spill]]  ;;  %s11313_s22 = sld [smem:[#allocation57_spill]] }
 0x128   : > { %s11315_s27 = sld [smem:[#allocation59_spill]]  ;;  %s11316_s0 = sld [smem:[#allocation55_spill]] }
 0x129   : > { %s11317_s16 = sld [smem:[#allocation56_spill]]  ;;  %s11320_s12 = sld [smem:[#allocation60_spill]] }
 0x12d   : > { %s11314_s7 = smov %s11313_s22 }
 0x1a2   : > { %v1508_v3 = vpop.permute.xlu0 %1507 }
 0x1a3   : > { %v1510_v5 = vmul.f32 %v1508_v3, %v1504_v2 }
 0x1a5   : > { %v1511_v7 = vadd.f32 %v1510_v5, %v1502_v4 }
 0x1a7   : > { %v10139_v8 = vadd.f32 %v1512_v6, %v1511_v7 }
 0x1a9   : > { %v1517_v9 = vsel %vm1516_vm0, %v10139_v8, 0.0 }
 0x1aa   : > { %1518 = vadd.xlane.f32.xlu0 %v1517_v9 }
 0x237   : > { %v1519_v10 = vpop.xlane.xlu0 %1518 }
 0x238   : > { %v1521_v11 = vmul.f32 0.03125, %v1519_v10 }
 0x23a   : > { %v1522_v12 = vsub.f32 %v10139_v8, %v1521_v11  ;;  %v1545_v11 = vld [vmem:[%s11238_s30] sm:$0xf] }
 0x23c   : > { %v1523_v13 = vmul.f32 %v1522_v12, %v1522_v12 }
 0x23e   : > { %v1524_v14 = vsel %vm1516_vm0, %v1523_v13, 0.0  ;;  %v7859_v13 = vld [vmem:[%s11238_s30 + $0x4] sm:$0xf] }
 0x23f   : > { %1525 = vadd.xlane.f32.xlu1 %v1524_v14  ;;  %v1850_v14 = vsel %vm1689_vm3, %v7859_v13, 0 }
 0x2cc   : > { %v1526_v18 = vpop.xlane.xlu1 %1525 }
 0x2cd   : > { %v1527_v19 = vmul.f32 0.03125, %v1526_v18 }
 0x2cf   : > { %v1528_v20 = vadd.f32 1e-05, %v1527_v19 }
 0x2d1   : > { %9290 = vrsqrt.f32 %v1528_v20 }
 0x2db   : > { %v9291_v21 = vpop.eup %9290 }
 0x2dc   : > { %v1530_v23 = vmul.f32 %v9291_v21, %v1522_v12  ;;  %v1896_v12 = vsel %vm1689_vm3, %v1545_v11, 0 }
 0x2de   : > { %v1537_v25 = vmul.f32 %v7857_v22, %v1530_v23 }
 0x2e0   : > { %v1544_v26 = vadd.f32 %v7858_v24, %v1537_v25 }
 0x2e2   : > { %v1558_v27 = vpack.c.bf16 %v1544_v26, %v1544_v26 }
 0x2e4   : > { %8449 = vmatmul.mubr.msk.bf16.vlgmr.msra.gmra.mrb[0].mxu0 %vm1516_vm0, %v1558_v27 }
 0x2e5   : > { %8460 = vmatprep.mubr.msk.bf16.mxu0 %vm9712_vm1, %v9711_v16 }
 0x3b7   : > { %v1614_v29 = vpop.f32.mrb[0].mxu0 }
 0x3b8   : > { %v1615_v30 = vadd.f32 %v7862_v28, %v1614_v29  ;;  %v8450_v31 = vpop.f32.mrb[1].mxu0 }
 0x3b9   : > { %v1617_v32 = vpop.f32.mrb[2].mxu0 }
 0x3ba   : > { %v10161_v33 = vpack.c.bf16 %v1615_v30, %v1615_v30  ;;  %v8451_v34 = vpop.f32.mrb[3].mxu0 }
 0x3bc   : > { %1622 = vrot.lane.b32.xlu1 %v10161_v33, %s11161_s1 }
 0x3c0   : > { %1736 = vrot.lane.b32.xlu1 %v10161_v33, %s11163_s2 }
 0x3c4   : > { %1734 = vrot.lane.b32.xlu1 %v10161_v33, %s11159_s26  ;;  %s11283_s26 = sld [smem:[#allocation38_spill]] }
 0x42e   : > { %v1623_v35 = vpop.permute.xlu1 %1622 }
 0x42f   : > { %v1629_v36 = vsel %vm1624_vm2, %v1623_v35, 0 }
 0x430   : > { %8453 = vmatpush3.bf16.xpose.msra.mxu1 %v1629_v36 }
 0x431   : > { %8464 = vmatprep.subr.bf16.mxu1 %v9711_v16 }
 0x432   : > { %v1737_v37 = vpop.permute.xlu1 %1736 }
 0x433   : > { %v1742_v38 = vsel %vm1624_vm2, %v1737_v37, 0 }
 0x436   : > { %v1735_v39 = vpop.permute.xlu1 %1734 }
 0x437   : > { %8455 = vmatmul.mubr.msk.bf16.vlgmr.msra.gmra.mrb[0].mxu1 %vm1624_vm2, %v10161_v33 }
 0x438   : > { %8465 = vmatpush3.bf16.xpose.msra.mxu1 %v1742_v38  ;;  %8466 = vmatprep.mubr.msk.bf16.mxu1 %vm9712_vm1, %v9711_v16 }
 0x439   : > { %8476 = vmatprep.subr.bf16.mxu1 %v9711_v16 }
 0x43f   : > { %8467 = vmatmul.mubr.msk.bf16.vlgmr.msra.gmra.mrb[4].mxu1 %vm1624_vm2, %v1735_v39 }
 0x440   : > { %8478 = vmatprep.mubr.msk.bf16.mxu1 %vm9712_vm1, %v9711_v16  ;;  %8477 = vmatpush3.bf16.msra.mxu1 %v1850_v14 }
 0x441   : > { %8488 = vmatprep.subr.bf16.mxu1 %v9711_v16 }
 0x50a   : > { %v1665_v40 = vpop.f32.mrb[0].mxu1 }
 0x50b   : > { %v1671_v41 = vmul.f32 0.35355338, %v1665_v40  ;;  %v8456_v42 = vpop.f32.mrb[1].mxu1 }
 0x50c   : > { %v1668_v43 = vpop.f32.mrb[2].mxu1 }
 0x50d   : > { %v8457_v44 = vpop.f32.mrb[3].mxu1  ;;  %v1672_v45 = vsel %vm1624_vm2, %v1671_v41, -inf }
 0x50e   : > { %1673 = vmax.xlane.f32.xlu1 %v1672_v45 }
 0x512   : > { %v1778_v46 = vpop.f32.mrb[4].mxu1 }
 0x513   : > { %v1784_v47 = vmul.f32 0.35355338, %v1778_v46  ;;  %v8468_v48 = vpop.f32.mrb[5].mxu1 }
 0x514   : > { %v1781_v49 = vpop.f32.mrb[6].mxu1 }
 0x515   : > { %v8469_v50 = vpop.f32.mrb[7].mxu1  ;;  %v1785_v51 = vsel %vm1624_vm2, %v1784_v47, -inf }
 0x516   : > { %1786 = vmax.xlane.f32.xlu0 %v1785_v51 }
 0x51f   : > { %1797 = vrot.lane.b32.xlu1 %v10161_v33, %s11157_s28  ;;  %s11282_s28 = sld [smem:[#allocation36_spill]] }
 0x59b   : > { %v1674_v52 = vpop.xlane.xlu1 %1673 }
 0x59c   : > { %v1675_v53 = vsub.f32 %v1671_v41, %v1674_v52 }
 0x59e   : > { %v1676_v54 = vmul.f32 1.442695, %v1675_v53 }
 0x59f   : > { %v1798_v4 = vpop.permute.xlu1 %1797 }
 0x5a0   : > { %9292 = vpow2.f32 %v1676_v54  ;;  %v1803_v6 = vsel %vm1689_vm3, %v1798_v4, 0 }
 0x5a3   : > { %v1787_v55 = vpop.xlane.xlu0 %1786 }
 0x5a4   : > { %v1788_v56 = vsub.f32 %v1784_v47, %v1787_v55 }
 0x5a6   : > { %v1789_v57 = vmul.f32 1.442695, %v1788_v56 }
 0x5a8   : > { %9294 = vpow2.f32 %v1789_v57 }
 0x5aa   : > { %v9293_v58 = vpop.eup %9292 }
 0x5ab   : > { %v1678_v59 = vsel %vm1624_vm2, %v9293_v58, 0.0 }
 0x5ac   : > { %1679 = vadd.xlane.f32.xlu0 %v1678_v59  ;;  %v7860_v59 = vld [vmem:[%s11238_s30 + $0x8] sm:$0xf] }
 0x5b2   : > { %v9295_v60 = vpop.eup %9294 }
 0x5b3   : > { %v1791_v61 = vsel %vm1624_vm2, %v9295_v60, 0.0 }
 0x5b4   : > { %1792 = vadd.xlane.f32.xlu0 %v1791_v61 }
 0x5ca   : > { %1684 = vrot.lane.b32.xlu0 %v10161_v33, %s11153_s15  ;;  %s11280_s15 = sld [smem:[#allocation34_spill]] }
 0x5ce   : > { %1940 = vrot.lane.b32.xlu0 %v10161_v33, %s11143_s10  ;;  %s11145_s10 = smov 72  }
 0x5d2   : > { %1938 = vrot.lane.b32.xlu0 %v10161_v33, %s11155_s29  ;;  %s11281_s29 = smov %s11280_s15 }
 0x639   : > { %v1680_v62 = vpop.xlane.xlu0 %1679 }
 0x63a   : > { %9296 = vrcp.f32 %v1680_v62 }
 0x641   : > { %v1793_v63 = vpop.xlane.xlu0 %1792 }
 0x642   : > { %9298 = vrcp.f32 %v1793_v63 }
 0x644   : > { %v9297_v0 = vpop.eup %9296 }
 0x645   : > { %v1685_v1 = vpop.permute.xlu0 %1684  ;;  %v1682_v2 = vmul.f32 %v9297_v0, %v9293_v58 }
 0x646   : > { %v1691_v3 = vsel %vm1689_vm3, %v1685_v1, 0 }
 0x647   : > { %8459 = vmatpush3.bf16.msra.mxu0 %v1691_v3  ;;  %v1683_v5 = vpack.c.bf16 %v1682_v2, %v1682_v2 }
 0x648   : > { %8470 = vmatprep.subr.bf16.mxu0 %v9711_v16 }
 0x649   : > { %v1941_v21 = vpop.permute.xlu0 %1940 }
 0x64a   : > { %8461 = vmatmul.mubr.msk.bf16.vlgmr.msra.gmra.mrb[4].mxu0 %vm1624_vm2, %v1683_v5  ;;  %v1946_v26 = vsel %vm1624_vm2, %v1941_v21, 0 }
 0x64b   : > { %8471 = vmatpush3.bf16.msra.mxu0 %v1803_v6  ;;  %8472 = vmatprep.mubr.msk.bf16.mxu0 %vm9712_vm1, %v9711_v16 }
 0x64c   : > { %v9299_v7 = vpop.eup %9298  ;;  %8482 = vmatprep.subr.bf16.mxu0 %v9711_v16 }
 0x64d   : > { %v1795_v9 = vmul.f32 %v9299_v7, %v9295_v60  ;;  %v1939_v28 = vpop.permute.xlu0 %1938  ;;  %v2054_v60 = vsel %vm1689_vm3, %v7860_v59, 0 }
 0x64f   : > { %v1796_v10 = vpack.c.bf16 %v1795_v9, %v1795_v9 }
 0x652   : > { %8473 = vmatmul.mubr.msk.bf16.vlgmr.msra.gmra.mrb[8].mxu0 %vm1624_vm2, %v1796_v10 }
 0x653   : > { %8484 = vmatprep.mubr.msk.bf16.mxu0 %vm9712_vm1, %v9711_v16  ;;  %8483 = vmatpush3.bf16.msra.mxu0 %v1896_v12 }
 0x654   : > { %8494 = vmatprep.subr.bf16.mxu0 %v9711_v16 }
 0x71d   : > { %v1727_v15 = vpop.f32.mrb[4].mxu0 }
 0x71e   : > { %v1733_v17 = vpack.c.bf16 %v1727_v15, %v1727_v15  ;;  %v8462_v18 = vpop.f32.mrb[5].mxu0 }
 0x71f   : > { %v1730_v19 = vpop.f32.mrb[6].mxu0 }
 0x720   : > { %v8463_v20 = vpop.f32.mrb[7].mxu0  ;;  %8485 = vmatmul.mubr.msk.bf16.vlgmr.msra.gmra.mrb[12].mxu0 %vm1624_vm2, %v1733_v17 }
 0x721   : > { %8496 = vmatprep.mubr.msk.bf16.mxu0 %vm9712_vm1, %v9711_v16 }
 0x725   : > { %v1839_v22 = vpop.f32.mrb[8].mxu0 }
 0x726   : > { %v1845_v23 = vpack.c.bf16 %v1839_v22, %v1839_v22  ;;  %v8474_v24 = vpop.f32.mrb[9].mxu0 }
 0x727   : > { %v1842_v25 = vpop.f32.mrb[10].mxu0 }
 0x728   : > { %v8475_v27 = vpop.f32.mrb[11].mxu0  ;;  %8479 = vmatmul.mubr.msk.bf16.vlgmr.msra.gmra.mrb[8].mxu1 %vm1624_vm2, %v1845_v23  ;;  %v7861_v25 = vld [vmem:[%s11238_s30 + $0xc] sm:$0xf] }
 0x729   : > { %8489 = vmatpush3.bf16.xpose.msra.mxu1 %v1946_v26  ;;  %8490 = vmatprep.mubr.msk.bf16.mxu1 %vm9712_vm1, %v9711_v16  ;;  %v2213_v26 = vsel %vm1689_vm3, %v7861_v25, 0 }
 0x72a   : > { %8500 = vmatprep.subr.bf16.mxu1 %v9711_v16 }
 0x730   : > { %8491 = vmatmul.mubr.msk.bf16.vlgmr.msra.gmra.mrb[12].mxu1 %vm1624_vm2, %v1939_v28 }
 0x731   : > { %8502 = vmatprep.mubr.msk.bf16.mxu1 %vm9712_vm1, %v9711_v16  ;;  %8501 = vmatpush3.bf16.msra.mxu1 %v2054_v60 }
 0x732   : > { %8512 = vmatprep.subr.bf16.mxu1 %v9711_v16 }
 0x7f3   : > { %v1932_v29 = vpop.f32.mrb[12].mxu0 }
 0x7f4   : > { %v8486_v30 = vpop.f32.mrb[13].mxu0 }
 0x7f5   : > { %v1935_v31 = vpop.f32.mrb[14].mxu0 }
 0x7f6   : > { %v8487_v32 = vpop.f32.mrb[15].mxu0 }
 0x7f7   : > { %v7878_v32 = vld [vmem:[%s11242_s6] ss:$0 sm:$0xff] }
 0x7fb   : > { %v1886_v34 = vpop.f32.mrb[8].mxu1 }
 0x7fc   : > { %v10219_v35 = vadd.f32 %v1932_v29, %v1886_v34  ;;  %v8480_v36 = vpop.f32.mrb[9].mxu1 }
 0x7fd   : > { %v1889_v37 = vpop.f32.mrb[10].mxu1 }
 0x7fe   : > { %v8481_v38 = vpop.f32.mrb[11].mxu1 }
 0x803   : > { %v1982_v39 = vpop.f32.mrb[12].mxu1 }
 0x804   : > { %v1988_v40 = vmul.f32 0.35355338, %v1982_v39  ;;  %v8492_v41 = vpop.f32.mrb[13].mxu1 }
 0x805   : > { %v1985_v42 = vpop.f32.mrb[14].mxu1 }
 0x806   : > { %v8493_v43 = vpop.f32.mrb[15].mxu1  ;;  %v1989_v44 = vsel %vm1624_vm2, %v1988_v40, -inf }
 0x807   : > { %1990 = vmax.xlane.f32.xlu0 %v1989_v44 }
 0x81d   : > { %2001 = vrot.lane.b32.xlu0 %v10161_v33, %s11151_s11  ;;  %s11279_s11 = sld [smem:[#allocation33_spill]] }
 0x821   : > { %2097 = vrot.lane.b32.xlu0 %v10161_v33, %s11149_s23  ;;  %s11278_s23 = sld [smem:[#allocation37_spill]] }
 0x827   : > { %v9204_v60 = vld [vmem:[%s11278_s23 + $0x10] sm:$0xff]  }
 0x894   : > { %v1991_v45 = vpop.xlane.xlu0 %1990 }
 0x895   : > { %v1992_v46 = vsub.f32 %v1988_v40, %v1991_v45 }
 0x897   : > { %v1993_v47 = vmul.f32 1.442695, %v1992_v46 }
 0x898   : > { %v2002_v48 = vpop.permute.xlu0 %2001 }
 0x899   : > { %9300 = vpow2.f32 %v1993_v47  ;;  %v2007_v49 = vsel %vm1689_vm3, %v2002_v48, 0 }
 0x89a   : > { %8495 = vmatpush3.bf16.msra.mxu0 %v2007_v49  ;;  %v9203_v49 = vld [vmem:[%s11278_s23 + $0x8] sm:$0xff]  }
 0x89b   : > { %8506 = vmatprep.subr.bf16.mxu0 %v9711_v16 }
 0x89c   : > { %v2098_v58 = vpop.permute.xlu0 %2097 }
 0x8a3   : > { %v9301_v50 = vpop.eup %9300 }
 0x8a4   : > { %v1995_v51 = vsel %vm1624_vm2, %v9301_v50, 0.0 }
 0x8a5   : > { %1996 = vadd.xlane.f32.xlu1 %v1995_v51 }
 0x8b6   : > { %2099 = vrot.lane.b32.xlu1 %v10161_v33, %s11145_s10  ;;  %s11147_s10 = smov 40  }
 0x932   : > { %v1997_v52 = vpop.xlane.xlu1 %1996 }
 0x933   : > { %9302 = vrcp.f32 %v1997_v52 }
 0x936   : > { %v2100_v55 = vpop.permute.xlu1 %2099 }
 0x937   : > { %v2105_v57 = vsel %vm1624_vm2, %v2100_v55, 0 }
 0x93d   : > { %v9303_v53 = vpop.eup %9302 }
 0x93e   : > { %v1999_v54 = vmul.f32 %v9303_v53, %v9301_v50 }
 0x940   : > { %v2000_v56 = vpack.c.bf16 %v1999_v54, %v1999_v54  ;;  %v7879_v54 = vld [vmem:[%s11279_s11] ss:$0 sm:$0xff] }
 0x942   : > { %8497 = vmatmul.mubr.msk.bf16.vlgmr.msra.gmra.mrb[16].mxu0 %vm1624_vm2, %v2000_v56  ;;  %v7880_v56 = vld [vmem:[%s11280_s15] ss:$0 sm:$0xff]  ;;  %s11284_s15 = smov 120  }
 0x943   : > { %8507 = vmatpush3.bf16.xpose.msra.mxu0 %v2105_v57  ;;  %8508 = vmatprep.mubr.msk.bf16.mxu0 %vm9712_vm1, %v9711_v16 }
 0x944   : > { %8518 = vmatprep.subr.bf16.mxu0 %v9711_v16 }
 0x94a   : > { %8509 = vmatmul.mubr.msk.bf16.vlgmr.msra.gmra.mrb[20].mxu0 %vm1624_vm2, %v2098_v58 }
 0x94b   : > { %8520 = vmatprep.mubr.msk.bf16.mxu0 %vm9712_vm1, %v9711_v16  ;;  %8519 = vmatpush3.bf16.msra.mxu0 %v2213_v26  ;;  %v7893_v26 = vld [vmem:[%s11245_s8 + $0x1] ss:$0 sm:$0xff]  ;;  %s11290_s8 = smov 104  }
 0x94c   : > { %8532 = vmatprep.subr.bf16.mxu0 %v9711_v16 }
 0xa15   : > { %v2043_v61 = vpop.f32.mrb[16].mxu0 }
 0xa16   : > { %v2049_v62 = vpack.c.bf16 %v2043_v61, %v2043_v61  ;;  %v8498_v63 = vpop.f32.mrb[17].mxu0  ;;  %v9205_v61 = vld [vmem:[%s11278_s23 + $0x18] sm:$0xff]  }
 0xa17   : > { %v2046_v0 = vpop.f32.mrb[18].mxu0 }
 0xa18   : > { %v8499_v1 = vpop.f32.mrb[19].mxu0  ;;  %8503 = vmatmul.mubr.msk.bf16.vlgmr.msra.gmra.mrb[16].mxu1 %vm1624_vm2, %v2049_v62  ;;  %v7881_v62 = vld [vmem:[%s11282_s28] ss:$0 sm:$0xff] }
 0xa19   : > { %8514 = vmatprep.mubr.msk.bf16.mxu1 %vm9712_vm1, %v9711_v16 }
 0xa1d   : > { %v2141_v2 = vpop.f32.mrb[20].mxu0 }
 0xa1e   : > { %v2147_v3 = vmul.f32 0.35355338, %v2141_v2  ;;  %v8510_v4 = vpop.f32.mrb[21].mxu0 }
 0xa1f   : > { %v2144_v5 = vpop.f32.mrb[22].mxu0 }
 0xa20   : > { %v8511_v6 = vpop.f32.mrb[23].mxu0  ;;  %v2148_v7 = vsel %vm1624_vm2, %v2147_v3, -inf }
 0xa21   : > { %2149 = vmax.xlane.f32.xlu0 %v2148_v7  ;;  %v7885_v6 = vld [vmem:[%s11283_s26] ss:$0 sm:$0xff] }
 0xa37   : > { %2160 = vrot.lane.b32.xlu0 %v10161_v33, %s11147_s10  ;;  %s11277_s10 = sld [smem:[#allocation35_spill]] }
 0xa3d   : > { %v9200_v47 = vld [vmem:[%s11277_s10] sm:$0xff]   ;;  %v9201_v48 = vld [vmem:[%s11277_s10 + $0x8] sm:$0xff]  }
 0xaae   : > { %v2150_v9 = vpop.xlane.xlu0 %2149 }
 0xaaf   : > { %v2151_v10 = vsub.f32 %v2147_v3, %v2150_v9 }
 0xab1   : > { %v2152_v11 = vmul.f32 1.442695, %v2151_v10 }
 0xab2   : > { %v2161_v12 = vpop.permute.xlu0 %2160 }
 0xab3   : > { %9304 = vpow2.f32 %v2152_v11  ;;  %v2166_v13 = vsel %vm1689_vm3, %v2161_v12, 0 }
 0xab4   : > { %8513 = vmatpush3.bf16.msra.mxu1 %v2166_v13 }
 0xab5   : > { %8524 = vmatprep.subr.bf16.mxu1 %v9711_v16 }
 0xabd   : > { %v9305_v14 = vpop.eup %9304 }
 0xabe   : > { %v2154_v15 = vsel %vm1624_vm2, %v9305_v14, 0.0 }
 0xabf   : > { %2155 = vadd.xlane.f32.xlu1 %v2154_v15 }
 0xaeb   : > { %v2090_v17 = vpop.f32.mrb[16].mxu1 }
 0xaec   : > { %v2096_v18 = vadd.f32 %v2090_v17, %v10219_v35  ;;  %v8504_v19 = vpop.f32.mrb[17].mxu1 }
 0xaed   : > { %v2093_v33 = vpop.f32.mrb[18].mxu1 }
 0xaee   : > { %v8505_v20 = vpop.f32.mrb[19].mxu1 }
 0xaef   : > { %v9206_v20 = vld [vmem:[%s11240_s19 + $0x10] sm:$0xff]  }
 0xb4c   : > { %v2156_v21 = vpop.xlane.xlu1 %2155 }
 0xb4d   : > { %9306 = vrcp.f32 %v2156_v21  ;;  %v9207_v21 = vld [vmem:[%s11240_s19 + $0x18] sm:$0xff]   ;;  %s11304_s19 = sld [smem:[#allocation46_spill]] }
 0xb57   : > { %v9307_v22 = vpop.eup %9306 }
 0xb58   : > { %v2158_v23 = vmul.f32 %v9307_v22, %v9305_v14 }
 0xb5a   : > { %v2159_v24 = vpack.c.bf16 %v2158_v23, %v2158_v23 }
 0xb5c   : > { %8515 = vmatmul.mubr.msk.bf16.vlgmr.msra.gmra.mrb[20].mxu1 %vm1624_vm2, %v2159_v24 }
 0xb5d   : > { %8528 = vmatprep.mubr.msk.bf16.mxu1 %vm9712_vm1, %v9711_v16  ;;  %8525 = vmatpush3.bf16.msra.mxu1 %v9200_v47 }
 0xb5e   : > { %8526 = vmatprep.subr.bf16.mxu1 %v9711_v16 }
 0xb61   : > { %8527 = vmatpush3.bf16.msra.mxu1 %v9201_v48 }
 0xb62   : > { %8544 = vmatprep.subr.bf16.mxu1 %v9711_v16 }
 0xc2f   : > { %v2202_v27 = vpop.f32.mrb[20].mxu1 }
 0xc30   : > { %v2208_v28 = vpack.c.bf16 %v2202_v27, %v2202_v27  ;;  %v8516_v29 = vpop.f32.mrb[21].mxu1 }
 0xc31   : > { %v2205_v30 = vpop.f32.mrb[22].mxu1 }
 0xc32   : > { %v8517_v31 = vpop.f32.mrb[23].mxu1  ;;  %8521 = vmatmul.mubr.msk.bf16.vlgmr.msra.gmra.mrb[24].mxu0 %vm1624_vm2, %v2208_v28  ;;  %v7894_v28 = vld [vmem:[%s11243_s14 + $0x1] ss:$0 sm:$0xff]  ;;  %s11293_s14 = sld [smem:[#allocation25_spill]] }
 0xc33   : > { %8540 = vmatprep.mubr.msk.bf16.mxu0 %vm9712_vm1, %v9711_v16 }
 0xd05   : > { %v2249_v34 = vpop.f32.mrb[24].mxu0 }
 0xd06   : > { %v2255_v35 = vadd.f32 %v2249_v34, %v2096_v18  ;;  %v8522_v36 = vpop.f32.mrb[25].mxu0 }
 0xd07   : > { %v2252_v37 = vpop.f32.mrb[26].mxu0 }
 0xd08   : > { %v2262_v38 = vadd.f32 %v7878_v32, %v2255_v35  ;;  %v8523_v39 = vpop.f32.mrb[27].mxu0  ;;  %v7905_v32 = vld [vmem:[%s11239_s24 + $0x1] ss:$0 sm:$0xff]  ;;  %s11307_s24 = sld [smem:[#allocation47_spill]] }
 0xd0a   : > { %v2263_v40 = vadd.f32 %v2262_v38, %v10139_v8  ;;  %v9202_v8 = vld [vmem:[%s11278_s23] sm:$0xff]  }
 0xd0b   : > { %8533 = vmatpush3.bf16.msra.mxu0 %v9202_v8 }
 0xd0c   : > { %v2266_v41 = vsel %vm1516_vm0, %v2263_v40, 0.0  ;;  %8534 = vmatprep.subr.bf16.mxu0 %v9711_v16 }
 0xd0d   : > { %2267 = vadd.xlane.f32.xlu1 %v2266_v41 }
 0xd0f   : > { %8535 = vmatpush3.bf16.msra.mxu0 %v9203_v49 }
 0xd10   : > { %8536 = vmatprep.subr.bf16.mxu0 %v9711_v16 }
 0xd13   : > { %8537 = vmatpush3.bf16.msra.mxu0 %v9204_v60 }
 0xd14   : > { %8538 = vmatprep.subr.bf16.mxu0 %v9711_v16 }
 0xd17   : > { %8539 = vmatpush3.bf16.msra.mxu0 %v9205_v61 }
 0xd18   : > { %8558 = vmatprep.subr.bf16.mxu0 %v9711_v16 }
 0xd9a   : > { %v2268_v42 = vpop.xlane.xlu1 %2267 }
 0xd9b   : > { %v2269_v43 = vmul.f32 0.03125, %v2268_v42 }
 0xd9d   : > { %v2270_v44 = vsub.f32 %v2263_v40, %v2269_v43 }
 0xd9f   : > { %v2271_v45 = vmul.f32 %v2270_v44, %v2270_v44 }
 0xda1   : > { %v2272_v46 = vsel %vm1516_vm0, %v2271_v45, 0.0 }
 0xda2   : > { %2273 = vadd.xlane.f32.xlu1 %v2272_v46 }
 0xe2f   : > { %v2274_v50 = vpop.xlane.xlu1 %2273 }
 0xe30   : > { %v2275_v51 = vmul.f32 0.03125, %v2274_v50 }
 0xe32   : > { %v2276_v52 = vadd.f32 1e-05, %v2275_v51 }
 0xe34   : > { %9308 = vrsqrt.f32 %v2276_v52 }
 0xe3e   : > { %v9309_v53 = vpop.eup %9308 }
 0xe3f   : > { %v2278_v55 = vmul.f32 %v9309_v53, %v2270_v44 }
 0xe41   : > { %v2285_v57 = vmul.f32 %v7879_v54, %v2278_v55 }
 0xe43   : > { %v2292_v58 = vadd.f32 %v7880_v56, %v2285_v57 }
 0xe45   : > { %v2307_v59 = vpack.c.bf16 %v2292_v58, %v2292_v58 }
 0xe47   : > { %8529 = vmatmul.mubr.msk.bf16.vlgmr.msra.gmra.mrb[24].mxu1 %vm1516_vm0, %v2307_v59 }
 0xe48   : > { %8548 = vmatprep.mubr.msk.bf16.mxu1 %vm9712_vm1, %v9711_v16  ;;  %8545 = vmatpush3.bf16.msra.mxu1 %v9206_v20 }
 0xe49   : > { %8546 = vmatprep.subr.bf16.mxu1 %v9711_v16 }
 0xe4c   : > { %8547 = vmatpush3.bf16.msra.mxu1 %v9207_v21 }
 0xe4d   : > { %8552 = vmatprep.subr.bf16.mxu1 %v9711_v16 }
 0xf1a   : > { %v2363_v63 = vpop.f32.mrb[24].mxu1 }
 0xf1b   : > { %v2364_v0 = vadd.f32 %v7881_v62, %v2363_v63  ;;  %v8530_v1 = vpop.f32.mrb[25].mxu1 }
 0xf1c   : > { %v2366_v2 = vpop.f32.mrb[26].mxu1 }
 0xf1d   : > { %v2369_v3 = vmax.f32 %v2364_v0, 0.0  ;;  %v8531_v4 = vpop.f32.mrb[27].mxu1 }
 0xf1f   : > { %v2370_v5 = vpack.c.bf16 %v2369_v3, %v2369_v3 }
 0xf21   : > { %8541 = vmatmul.mubr.msk.bf16.vlgmr.msra.gmra.mrb[28].mxu0 %vm2401_vm4, %v2370_v5 }
 0xf22   : > { %8560 = vmatprep.mubr.msk.bf16.mxu0 %vm9712_vm1, %v9711_v16 }
 0xff4   : > { %v2439_v7 = vpop.f32.mrb[28].mxu0 }
 0xff5   : > { %v2440_v9 = vadd.f32 %v7885_v6, %v2439_v7  ;;  %v8542_v10 = vpop.f32.mrb[29].mxu0 }
 0xff6   : > { %v2442_v11 = vpop.f32.mrb[30].mxu0 }
 0xff7   : > { %v10287_v12 = vadd.f32 %v2440_v9, %v2263_v40  ;;  %v8543_v13 = vpop.f32.mrb[31].mxu0 }
 0xff9   : > { %v2450_v14 = vsel %vm1516_vm0, %v10287_v12, 0.0 }
 0xffa   : > { %2451 = vadd.xlane.f32.xlu1 %v2450_v14 }
0x1087   : > { %v2452_v15 = vpop.xlane.xlu1 %2451 }
0x1088   : > { %v2453_v17 = vmul.f32 0.03125, %v2452_v15 }
0x108a   : > { %v2454_v18 = vsub.f32 %v10287_v12, %v2453_v17  ;;  %v7895_v17 = vld [vmem:[%s11238_s30 + $0x10] sm:$0xf] }
0x108c   : > { %v2455_v19 = vmul.f32 %v2454_v18, %v2454_v18 }
0x108e   : > { %v2456_v33 = vsel %vm1516_vm0, %v2455_v19, 0.0  ;;  %v7896_v19 = vld [vmem:[%s11238_s30 + $0x14] sm:$0xf] }
0x108f   : > { %2457 = vadd.xlane.f32.xlu1 %v2456_v33  ;;  %v2784_v33 = vsel %vm1689_vm3, %v7896_v19, 0 }
0x111c   : > { %v2458_v22 = vpop.xlane.xlu1 %2457 }
0x111d   : > { %v2459_v23 = vmul.f32 0.03125, %v2458_v22 }
0x111f   : > { %v2460_v24 = vadd.f32 1e-05, %v2459_v23 }
0x1121   : > { %9310 = vrsqrt.f32 %v2460_v24 }
0x112b   : > { %v9311_v25 = vpop.eup %9310 }
0x112c   : > { %v2462_v27 = vmul.f32 %v9311_v25, %v2454_v18  ;;  %v2830_v18 = vsel %vm1689_vm3, %v7895_v17, 0 }
0x112e   : > { %v2469_v29 = vmul.f32 %v7893_v26, %v2462_v27 }
0x1130   : > { %v2476_v30 = vadd.f32 %v7894_v28, %v2469_v29 }
0x1132   : > { %v2494_v31 = vpack.c.bf16 %v2476_v30, %v2476_v30 }
0x1134   : > { %8549 = vmatmul.mubr.msk.bf16.vlgmr.msra.gmra.mrb[28].mxu1 %vm1516_vm0, %v2494_v31 }
0x1135   : > { %8554 = vmatprep.mubr.msk.bf16.mxu1 %vm9712_vm1, %v9711_v16 }
0x1207   : > { %v2550_v34 = vpop.f32.mrb[28].mxu1 }
0x1208   : > { %v2551_v35 = vadd.f32 %v7905_v32, %v2550_v34  ;;  %v8550_v36 = vpop.f32.mrb[29].mxu1 }
0x1209   : > { %v2553_v37 = vpop.f32.mrb[30].mxu1 }
0x120a   : > { %v10303_v38 = vpack.c.bf16 %v2551_v35, %v2551_v35  ;;  %v8551_v39 = vpop.f32.mrb[31].mxu1 }
0x120c   : > { %2670 = vrot.lane.b32.xlu1 %v10303_v38, %s11163_s2  ;;  %2558 = vrot.lane.b32.xlu0 %v10303_v38, %s11161_s1  ;;  %s11285_s1 = smov 56   ;;  %s11286_s2 = smov 112  }
0x1210   : > { %2668 = vrot.lane.b32.xlu0 %v10303_v38, %s11284_s15 }
0x127e   : > { %v2559_v40 = vpop.permute.xlu0 %2558  ;;  %v2671_v42 = vpop.permute.xlu1 %2670 }
0x127f   : > { %v2564_v41 = vsel %vm1624_vm2, %v2559_v40, 0  ;;  %v2676_v43 = vsel %vm1624_vm2, %v2671_v42, 0 }
0x1280   : > { %8553 = vmatpush3.bf16.xpose.msra.mxu1 %v2564_v41 }
0x1281   : > { %8564 = vmatprep.subr.bf16.mxu1 %v9711_v16 }
0x1282   : > { %v2669_v44 = vpop.permute.xlu0 %2668 }
0x1287   : > { %8555 = vmatmul.mubr.msk.bf16.vlgmr.msra.gmra.mrb[32].mxu1 %vm1624_vm2, %v10303_v38 }
0x1288   : > { %8565 = vmatpush3.bf16.xpose.msra.mxu1 %v2676_v43  ;;  %8566 = vmatprep.mubr.msk.bf16.mxu1 %vm9712_vm1, %v9711_v16 }
0x1289   : > { %8576 = vmatprep.subr.bf16.mxu1 %v9711_v16 }
0x128f   : > { %8567 = vmatmul.mubr.msk.bf16.vlgmr.msra.gmra.mrb[36].mxu1 %vm1624_vm2, %v2669_v44 }
0x1290   : > { %8578 = vmatprep.mubr.msk.bf16.mxu1 %vm9712_vm1, %v9711_v16  ;;  %8577 = vmatpush3.bf16.msra.mxu1 %v2784_v33 }
0x1291   : > { %8588 = vmatprep.subr.bf16.mxu1 %v9711_v16 }
0x135a   : > { %v2600_v45 = vpop.f32.mrb[32].mxu1 }
0x135b   : > { %v2606_v46 = vmul.f32 0.35355338, %v2600_v45  ;;  %v8556_v47 = vpop.f32.mrb[33].mxu1 }
0x135c   : > { %v2603_v48 = vpop.f32.mrb[34].mxu1 }
0x135d   : > { %v8557_v8 = vpop.f32.mrb[35].mxu1  ;;  %v2607_v49 = vsel %vm1624_vm2, %v2606_v46, -inf }
0x135e   : > { %2608 = vmax.xlane.f32.xlu0 %v2607_v49 }
0x1362   : > { %v2712_v50 = vpop.f32.mrb[36].mxu1 }
0x1363   : > { %v2718_v51 = vmul.f32 0.35355338, %v2712_v50  ;;  %v8568_v52 = vpop.f32.mrb[37].mxu1 }
0x1364   : > { %v2715_v53 = vpop.f32.mrb[38].mxu1 }
0x1365   : > { %v8569_v54 = vpop.f32.mrb[39].mxu1  ;;  %v2719_v55 = vsel %vm1624_vm2, %v2718_v51, -inf }
0x1366   : > { %2720 = vmax.xlane.f32.xlu1 %v2719_v55 }
0x1377   : > { %2731 = vrot.lane.b32.xlu1 %v10303_v38, %s11285_s1 }
0x137b   : > { %2872 = vrot.lane.b32.xlu1 %v10303_v38, %s11286_s2 }
0x13eb   : > { %v2609_v56 = vpop.xlane.xlu0 %2608 }
0x13ec   : > { %v2610_v57 = vsub.f32 %v2606_v46, %v2609_v56 }
0x13ee   : > { %v2611_v58 = vmul.f32 1.442695, %v2610_v57 }
0x13f0   : > { %9312 = vpow2.f32 %v2611_v58 }
0x13f3   : > { %v2721_v59 = vpop.xlane.xlu1 %2720 }
0x13f4   : > { %v2722_v60 = vsub.f32 %v2718_v51, %v2721_v59 }
0x13f6   : > { %v2723_v61 = vmul.f32 1.442695, %v2722_v60 }
0x13f7   : > { %v2732_v9 = vpop.permute.xlu1 %2731 }
0x13f8   : > { %9314 = vpow2.f32 %v2723_v61  ;;  %v2737_v11 = vsel %vm1689_vm3, %v2732_v9, 0 }
0x13fa   : > { %v9313_v62 = vpop.eup %9312 }
0x13fb   : > { %v2613_v63 = vsel %vm1624_vm2, %v9313_v62, 0.0  ;;  %v2873_v32 = vpop.permute.xlu1 %2872 }
0x13fc   : > { %2614 = vadd.xlane.f32.xlu0 %v2613_v63  ;;  %v7897_v63 = vld [vmem:[%s11238_s30 + $0x18] sm:$0xf] }
0x1402   : > { %v9315_v0 = vpop.eup %9314 }
0x1403   : > { %v2725_v1 = vsel %vm1624_vm2, %v9315_v0, 0.0 }
0x1404   : > { %2726 = vadd.xlane.f32.xlu0 %v2725_v1 }
0x141a   : > { %2619 = vrot.lane.b32.xlu0 %v10303_v38, %s11287_s3 }
0x141e   : > { %2874 = vrot.lane.b32.xlu0 %v10303_v38, %s11288_s4 }
0x1489   : > { %v2615_v2 = vpop.xlane.xlu0 %2614 }
0x148a   : > { %9316 = vrcp.f32 %v2615_v2 }
0x1491   : > { %v2727_v3 = vpop.xlane.xlu0 %2726 }
0x1492   : > { %9318 = vrcp.f32 %v2727_v3 }
0x1494   : > { %v9317_v4 = vpop.eup %9316 }
0x1495   : > { %v2620_v5 = vpop.permute.xlu0 %2619  ;;  %v2617_v6 = vmul.f32 %v9317_v4, %v9313_v62 }
0x1496   : > { %v2625_v7 = vsel %vm1689_vm3, %v2620_v5, 0 }
0x1497   : > { %8559 = vmatpush3.bf16.msra.mxu0 %v2625_v7  ;;  %v2618_v10 = vpack.c.bf16 %v2617_v6, %v2617_v6 }
0x1498   : > { %8570 = vmatprep.subr.bf16.mxu0 %v9711_v16 }
0x1499   : > { %v2875_v25 = vpop.permute.xlu0 %2874 }
0x149a   : > { %8561 = vmatmul.mubr.msk.bf16.vlgmr.msra.gmra.mrb[32].mxu0 %vm1624_vm2, %v2618_v10  ;;  %v2880_v30 = vsel %vm1624_vm2, %v2875_v25, 0 }
0x149b   : > { %8571 = vmatpush3.bf16.msra.mxu0 %v2737_v11  ;;  %8572 = vmatprep.mubr.msk.bf16.mxu0 %vm9712_vm1, %v9711_v16 }
0x149c   : > { %v9319_v13 = vpop.eup %9318  ;;  %8582 = vmatprep.subr.bf16.mxu0 %v9711_v16 }
0x149d   : > { %v2729_v14 = vmul.f32 %v9319_v13, %v9315_v0  ;;  %v2988_v0 = vsel %vm1689_vm3, %v7897_v63, 0 }
0x149f   : > { %v2730_v15 = vpack.c.bf16 %v2729_v14, %v2729_v14 }
0x14a2   : > { %8573 = vmatmul.mubr.msk.bf16.vlgmr.msra.gmra.mrb[36].mxu0 %vm1624_vm2, %v2730_v15 }
0x14a3   : > { %8584 = vmatprep.mubr.msk.bf16.mxu0 %vm9712_vm1, %v9711_v16  ;;  %8583 = vmatpush3.bf16.msra.mxu0 %v2830_v18 }
0x14a4   : > { %8594 = vmatprep.subr.bf16.mxu0 %v9711_v16 }
0x156d   : > { %v2661_v20 = vpop.f32.mrb[32].mxu0 }
0x156e   : > { %v2667_v21 = vpack.c.bf16 %v2661_v20, %v2661_v20  ;;  %v8562_v22 = vpop.f32.mrb[33].mxu0 }
0x156f   : > { %v2664_v23 = vpop.f32.mrb[34].mxu0 }
0x1570   : > { %v8563_v24 = vpop.f32.mrb[35].mxu0  ;;  %8585 = vmatmul.mubr.msk.bf16.vlgmr.msra.gmra.mrb[40].mxu0 %vm1624_vm2, %v2667_v21 }
0x1571   : > { %8596 = vmatprep.mubr.msk.bf16.mxu0 %vm9712_vm1, %v9711_v16 }
0x1575   : > { %v2773_v26 = vpop.f32.mrb[36].mxu0 }
0x1576   : > { %v2779_v27 = vpack.c.bf16 %v2773_v26, %v2773_v26  ;;  %v8574_v28 = vpop.f32.mrb[37].mxu0 }
0x1577   : > { %v2776_v29 = vpop.f32.mrb[38].mxu0 }
0x1578   : > { %v8575_v31 = vpop.f32.mrb[39].mxu0  ;;  %8579 = vmatmul.mubr.msk.bf16.vlgmr.msra.gmra.mrb[40].mxu1 %vm1624_vm2, %v2779_v27 }
0x1579   : > { %8589 = vmatpush3.bf16.xpose.msra.mxu1 %v2880_v30  ;;  %8590 = vmatprep.mubr.msk.bf16.mxu1 %vm9712_vm1, %v9711_v16 }
0x157a   : > { %8600 = vmatprep.subr.bf16.mxu1 %v9711_v16 }
0x1580   : > { %8591 = vmatmul.mubr.msk.bf16.vlgmr.msra.gmra.mrb[44].mxu1 %vm1624_vm2, %v2873_v32 }
0x1581   : > { %8602 = vmatprep.mubr.msk.bf16.mxu1 %vm9712_vm1, %v9711_v16  ;;  %8601 = vmatpush3.bf16.msra.mxu1 %v2988_v0 }
0x1582   : > { %8612 = vmatprep.subr.bf16.mxu1 %v9711_v16 }
0x1643   : > { %v2866_v34 = vpop.f32.mrb[40].mxu0 }
0x1644   : > { %v8586_v35 = vpop.f32.mrb[41].mxu0 }
0x1645   : > { %v2869_v36 = vpop.f32.mrb[42].mxu0 }
0x1646   : > { %v8587_v37 = vpop.f32.mrb[43].mxu0 }
0x1647   : > { %v7921_v37 = vld [vmem:[%s11242_s6 + $0x1] ss:$0 sm:$0xff]  ;;  %s11294_s6 = sld [smem:[#allocation21_spill]] }
0x164b   : > { %v2820_v39 = vpop.f32.mrb[40].mxu1 }
0x164c   : > { %v10361_v40 = vadd.f32 %v2866_v34, %v2820_v39  ;;  %v8580_v41 = vpop.f32.mrb[41].mxu1 }
0x164d   : > { %v2823_v42 = vpop.f32.mrb[42].mxu1 }
0x164e   : > { %v8581_v43 = vpop.f32.mrb[43].mxu1 }
0x1653   : > { %v2916_v44 = vpop.f32.mrb[44].mxu1 }
0x1654   : > { %v2922_v45 = vmul.f32 0.35355338, %v2916_v44  ;;  %v8592_v46 = vpop.f32.mrb[45].mxu1 }
0x1655   : > { %v2919_v47 = vpop.f32.mrb[46].mxu1 }
0x1656   : > { %v8593_v48 = vpop.f32.mrb[47].mxu1  ;;  %v2923_v8 = vsel %vm1624_vm2, %v2922_v45, -inf }
0x1657   : > { %2924 = vmax.xlane.f32.xlu0 %v2923_v8 }
0x166d   : > { %2935 = vrot.lane.b32.xlu0 %v10303_v38, %s11289_s5 }
0x1671   : > { %3031 = vrot.lane.b32.xlu0 %v10303_v38, %s11290_s8 }
0x16e4   : > { %v2925_v49 = vpop.xlane.xlu0 %2924 }
0x16e5   : > { %v2926_v50 = vsub.f32 %v2922_v45, %v2925_v49 }
0x16e7   : > { %v2927_v51 = vmul.f32 1.442695, %v2926_v50 }
0x16e8   : > { %v2936_v52 = vpop.permute.xlu0 %2935 }
0x16e9   : > { %9320 = vpow2.f32 %v2927_v51  ;;  %v2941_v53 = vsel %vm1689_vm3, %v2936_v52, 0  ;;  %v9208_v51 = vld [vmem:[%s11277_s10 + $0x10] sm:$0xff]   ;;  %v9209_v52 = vld [vmem:[%s11277_s10 + $0x18] sm:$0xff]   ;;  %s9036_s10 = smul.u32 7, %s10128_s20 }
0x16ea   : > { %8595 = vmatpush3.bf16.msra.mxu0 %v2941_v53  ;;  %v9219_v53 = vld [vmem:[%s11278_s23 + $0x20] sm:$0xff]  }
0x16eb   : > { %8606 = vmatprep.subr.bf16.mxu0 %v9711_v16 }
0x16ec   : > { %v3032_v62 = vpop.permute.xlu0 %3031 }
0x16f3   : > { %v9321_v54 = vpop.eup %9320 }
0x16f4   : > { %v2929_v55 = vsel %vm1624_vm2, %v9321_v54, 0.0 }
0x16f5   : > { %2930 = vadd.xlane.f32.xlu1 %v2929_v55  ;;  %v9225_v55 = vld [vmem:[%s11278_s23 + $0x30] sm:$0xff]  }
0x1706   : > { %3033 = vrot.lane.b32.xlu1 %v10303_v38, %s11291_s9 }
0x1782   : > { %v2931_v56 = vpop.xlane.xlu1 %2930 }
0x1783   : > { %9322 = vrcp.f32 %v2931_v56 }
0x1786   : > { %v3034_v59 = vpop.permute.xlu1 %3033 }
0x1787   : > { %v3039_v61 = vsel %vm1624_vm2, %v3034_v59, 0 }
0x178d   : > { %v9323_v57 = vpop.eup %9322 }
0x178e   : > { %v2933_v58 = vmul.f32 %v9323_v57, %v9321_v54  ;;  %v9222_v54 = vld [vmem:[%s11278_s23 + $0x28] sm:$0xff]  }
0x1790   : > { %v2934_v60 = vpack.c.bf16 %v2933_v58, %v2933_v58 }
0x1792   : > { %8597 = vmatmul.mubr.msk.bf16.vlgmr.msra.gmra.mrb[44].mxu0 %vm1624_vm2, %v2934_v60  ;;  %v7924_v60 = vld [vmem:[%s11279_s11 + $0x1] ss:$0 sm:$0xff]  ;;  %s1496_s11 = scalar_lea.vmem %s11294_s6, %s9036_s10  ;;  %s11295_s6 = sld [smem:[#allocation22_spill]] }
0x1793   : > { %8607 = vmatpush3.bf16.xpose.msra.mxu0 %v3039_v61  ;;  %8608 = vmatprep.mubr.msk.bf16.mxu0 %vm9712_vm1, %v9711_v16  ;;  %s11296_s10 = sld [smem:[#allocation43_spill]] }
0x1794   : > { %8618 = vmatprep.subr.bf16.mxu0 %v9711_v16 }
0x1798   : > { %s1500_s20 = scalar_lea.vmem %s11295_s6, %s10131_s18  ;;  %s11297_s18 = sld [smem:[#allocation41_spill]] }
0x1799   : > { %s11299_s6 = sld [smem:[#allocation42_spill]] }
0x179a   : > { %8609 = vmatmul.mubr.msk.bf16.vlgmr.msra.gmra.mrb[48].mxu0 %vm1624_vm2, %v3032_v62  ;;  %v7925_v62 = vld [vmem:[%s11281_s29 + $0x1] ss:$0 sm:$0xff]  ;;  %s11311_s29 = sld [smem:[#allocation53_spill]] }
0x179b   : > { %8620 = vmatprep.mubr.msk.bf16.mxu0 %vm9712_vm1, %v9711_v16 }
0x1865   : > { %v2977_v1 = vpop.f32.mrb[44].mxu0 }
0x1866   : > { %v2983_v2 = vpack.c.bf16 %v2977_v1, %v2977_v1  ;;  %v8598_v3 = vpop.f32.mrb[45].mxu0  ;;  %v9211_v1 = vld [vmem:[%s11293_s14] sm:$0xff]  }
0x1867   : > { %v2980_v4 = vpop.f32.mrb[46].mxu0  ;;  %v9212_v3 = vld [vmem:[%s11293_s14 + $0x48] sm:$0xff]  }
0x1868   : > { %v8599_v5 = vpop.f32.mrb[47].mxu0  ;;  %8603 = vmatmul.mubr.msk.bf16.vlgmr.msra.gmra.mrb[48].mxu1 %vm1624_vm2, %v2983_v2  ;;  %v9213_v4 = vld [vmem:[%s11293_s14 + $0x8] sm:$0xff]  }
0x1869   : > { %8614 = vmatprep.mubr.msk.bf16.mxu1 %vm9712_vm1, %v9711_v16  ;;  %v9214_v5 = vld [vmem:[%s11293_s14 + $0x50] sm:$0xff]  }
0x186d   : > { %v3075_v6 = vpop.f32.mrb[48].mxu0 }
0x186e   : > { %v3081_v7 = vmul.f32 0.35355338, %v3075_v6  ;;  %v8610_v9 = vpop.f32.mrb[49].mxu0  ;;  %v9215_v6 = vld [vmem:[%s11293_s14 + $0x10] sm:$0xff]  }
0x186f   : > { %v3078_v10 = vpop.f32.mrb[50].mxu0  ;;  %v9217_v9 = vld [vmem:[%s11293_s14 + $0x18] sm:$0xff]  }
0x1870   : > { %v8611_v11 = vpop.f32.mrb[51].mxu0  ;;  %v3082_v13 = vsel %vm1624_vm2, %v3081_v7, -inf  ;;  %v9218_v10 = vld [vmem:[%s11293_s14 + $0x60] sm:$0xff]  }
0x1871   : > { %3083 = vmax.xlane.f32.xlu1 %v3082_v13  ;;  %v9220_v11 = vld [vmem:[%s11293_s14 + $0x20] sm:$0xff]   ;;  %v9221_v13 = vld [vmem:[%s11293_s14 + $0x68] sm:$0xff]  }
0x18fe   : > { %v3084_v14 = vpop.xlane.xlu1 %3083 }
0x18ff   : > { %v3085_v15 = vsub.f32 %v3081_v7, %v3084_v14  ;;  %v9216_v7 = vld [vmem:[%s11293_s14 + $0x58] sm:$0xff]   ;;  %v9223_v14 = vld [vmem:[%s11293_s14 + $0x28] sm:$0xff]  }
0x1901   : > { %v3086_v17 = vmul.f32 1.442695, %v3085_v15  ;;  %v9224_v15 = vld [vmem:[%s11293_s14 + $0x70] sm:$0xff]  }
0x1903   : > { %9324 = vpow2.f32 %v3086_v17  ;;  %v9226_v17 = vld [vmem:[%s11293_s14 + $0x30] sm:$0xff]  }
0x190d   : > { %v9325_v18 = vpop.eup %9324 }
0x190e   : > { %v3088_v19 = vsel %vm1624_vm2, %v9325_v18, 0.0 }
0x190f   : > { %3089 = vadd.xlane.f32.xlu0 %v3088_v19 }
0x1925   : > { %3094 = vrot.lane.b32.xlu0 %v10303_v38, %s11292_s13  ;;  %v7898_v38 = vld [vmem:[%s11238_s30 + $0x1c] sm:$0xf]  ;;  %s11312_s30 = sld [smem:[#allocation54_spill]] }
0x1926   : > { %v3147_v30 = vsel %vm1689_vm3, %v7898_v38, 0 }
0x1927   : > { %8619 = vmatpush3.bf16.msra.mxu0 %v3147_v30  ;;  %v9233_v30 = vld [vmem:[%s11293_s14 + $0x100] sm:$0xff]  }
0x1928   : > { %8632 = vmatprep.subr.bf16.mxu0 %v9711_v16 }
0x193b   : > { %v3024_v33 = vpop.f32.mrb[48].mxu1 }
0x193c   : > { %v3030_v20 = vadd.f32 %v3024_v33, %v10361_v40  ;;  %v8604_v21 = vpop.f32.mrb[49].mxu1  ;;  %v10441_v33 = vld [vmem:[%s1496_s11] sm:$0x7f]  ;;  %s11298_s11 = smov %s11297_s18 }
0x193d   : > { %v3027_v22 = vpop.f32.mrb[50].mxu1 }
0x193e   : > { %v8605_v23 = vpop.f32.mrb[51].mxu1  ;;  %v9228_v22 = vld [vmem:[%s11278_s23 + $0x38] sm:$0xff]   ;;  %s11306_s23 = sld [smem:[#allocation49_spill]] }
0x193f   : > { %v9229_v23 = vld [vmem:[%s11293_s14 + $0x38] sm:$0xff]  }
0x199c   : > { %v3090_v24 = vpop.xlane.xlu0 %3089 }
0x199d   : > { %9326 = vrcp.f32 %v3090_v24 }
0x19a0   : > { %v3095_v25 = vpop.permute.xlu0 %3094 }
0x19a1   : > { %v3100_v26 = vsel %vm1689_vm3, %v3095_v25, 0 }
0x19a2   : > { %8613 = vmatpush3.bf16.msra.mxu1 %v3100_v26 }
0x19a3   : > { %8624 = vmatprep.subr.bf16.mxu1 %v9711_v16 }
0x19a7   : > { %v9327_v27 = vpop.eup %9326 }
0x19a8   : > { %v3092_v28 = vmul.f32 %v9327_v27, %v9325_v18  ;;  %v3417_v18 = vlaneseq }
0x19aa   : > { %v3093_v29 = vpack.c.bf16 %v3092_v28, %v3092_v28  ;;  %v10439_v19 = vshrl.u32 %v3417_v18, 7  ;;  %v9230_v28 = vld [vmem:[%s11293_s14 + $0xc0] sm:$0xff]   ;;  %v9256_v18 = vld [vmem:[%s11293_s14 + $0xb0] sm:$0xff]  }
0x19ac   : > { %8615 = vmatmul.mubr.msk.bf16.vlgmr.msra.gmra.mrb[52].mxu1 %vm1624_vm2, %v3093_v29  ;;  %v3423_v21 = vsub.s32 1, %v10439_v19  ;;  %v3419_v24 = vsub.s32 0, %v10439_v19  ;;  %v9231_v29 = vld [vmem:[%s11293_s14 + $0x140] sm:$0xff]  }
0x19ad   : > { %8628 = vmatprep.mubr.msk.bf16.mxu1 %vm9712_vm1, %v9711_v16  ;;  %8625 = vmatpush3.bf16.msra.mxu1 %v9208_v51 }
0x19ae   : > { %8626 = vmatprep.subr.bf16.mxu1 %v9711_v16  ;;  %v3424_v25 = vrot.slane %v10441_v33, %v3423_v21  ;;  %v3420_v26 = vrot.slane %v10441_v33, %v3419_v24 }
0x19b0   : > { %v3453_v27 = vpack.c.bf16 %v3424_v25, %v3424_v25  ;;  %v3452_v38 = vpack.c.bf16 %v3420_v26, %v3420_v26 }
0x19b1   : > { %8627 = vmatpush3.bf16.msra.mxu1 %v9209_v52 }
0x1a7f   : > { %v3136_v31 = vpop.f32.mrb[52].mxu1 }
0x1a80   : > { %v3142_v32 = vpack.c.bf16 %v3136_v31, %v3136_v31  ;;  %v8616_v34 = vpop.f32.mrb[53].mxu1  ;;  %v9235_v31 = vld [vmem:[%s11293_s14 + $0x148] sm:$0xff]  }
0x1a81   : > { %v3139_v35 = vpop.f32.mrb[54].mxu1  ;;  %v9239_v34 = vld [vmem:[%s11293_s14 + $0x150] sm:$0xff]  }
0x1a82   : > { %v8617_v36 = vpop.f32.mrb[55].mxu1  ;;  %8621 = vmatmul.mubr.msk.bf16.vlgmr.msra.gmra.mrb[52].mxu0 %vm1624_vm2, %v3142_v32  ;;  %v9237_v32 = vld [vmem:[%s11293_s14 + $0x108] sm:$0xff]   ;;  %v9241_v35 = vld [vmem:[%s11293_s14 + $0x110] sm:$0xff]  }
0x1a83   : > { %8640 = vmatprep.mubr.msk.bf16.mxu0 %vm9712_vm1, %v9711_v16  ;;  %8633 = vmatpush3.bf16.msra.mxu0 %v9219_v53  ;;  %v9243_v36 = vld [vmem:[%s11293_s14 + $0x158] sm:$0xff]  }
0x1a84   : > { %8634 = vmatprep.subr.bf16.mxu0 %v9711_v16 }
0x1a87   : > { %8635 = vmatpush3.bf16.msra.mxu0 %v9222_v54 }
0x1a88   : > { %8636 = vmatprep.subr.bf16.mxu0 %v9711_v16 }
0x1a8b   : > { %8637 = vmatpush3.bf16.msra.mxu0 %v9225_v55 }
0x1a8c   : > { %8638 = vmatprep.subr.bf16.mxu0 %v9711_v16 }
0x1a8f   : > { %8639 = vmatpush3.bf16.msra.mxu0 %v9228_v22  ;;  %v9262_v22 = vld [vmem:[%s11293_s14 + $0x180] sm:$0xff]  }
0x1a90   : > { %8264 = vmatprep.subr.bf16.mxu0 %v9230_v28 }
0x1b55   : > { %v3183_v39 = vpop.f32.mrb[52].mxu0 }
0x1b56   : > { %v3189_v40 = vadd.f32 %v3183_v39, %v3030_v20  ;;  %v8622_v41 = vpop.f32.mrb[53].mxu0  ;;  %v9227_v20 = vld [vmem:[%s11293_s14 + $0x78] sm:$0xff]   ;;  %v9247_v39 = vld [vmem:[%s11293_s14 + $0x160] sm:$0xff]  }
0x1b57   : > { %v3186_v42 = vpop.f32.mrb[54].mxu0  ;;  %v9251_v41 = vld [vmem:[%s11293_s14 + $0x168] sm:$0xff]  }
0x1b58   : > { %v3196_v43 = vadd.f32 %v7921_v37, %v3189_v40  ;;  %v8623_v44 = vpop.f32.mrb[55].mxu0  ;;  %v9245_v37 = vld [vmem:[%s11293_s14 + $0x118] sm:$0xff]   ;;  %v9249_v40 = vld [vmem:[%s11293_s14 + $0x120] sm:$0xff]   ;;  %v9253_v42 = vld [vmem:[%s11293_s14 + $0x128] sm:$0xff]  }
0x1b59   : > { %v9257_v44 = vld [vmem:[%s11293_s14 + $0x130] sm:$0xff]  }
0x1b5a   : > { %v10405_v45 = vadd.f32 %v3196_v43, %v10287_v12  ;;  %v9210_v12 = vld [vmem:[%s11293_s14 + $0x40] sm:$0xff]   ;;  %v9255_v43 = vld [vmem:[%s11293_s14 + $0x170] sm:$0xff]  }
0x1b5b   : > { %8242 = vmatprep.subr.bf16.mxu1 %v9210_v12 }
0x1b5c   : > { %v3202_v46 = vsel %vm1516_vm0, %v10405_v45, 0.0 }
0x1b5d   : > { %3203 = vadd.xlane.f32.xlu1 %v3202_v46  ;;  %v3431_v46 = vsub.s32 3, %v10439_v19 }
0x1b5f   : > { %v3432_v51 = vrot.slane %v10441_v33, %v3431_v46 }
0x1bea   : > { %v3204_v47 = vpop.xlane.xlu1 %3203 }
0x1beb   : > { %v3205_v48 = vmul.f32 0.03125, %v3204_v47  ;;  %v3439_v47 = vsub.s32 5, %v10439_v19 }
0x1bed   : > { %v3206_v8 = vsub.f32 %v10405_v45, %v3205_v48  ;;  %v9259_v48 = vld [vmem:[%s11293_s14 + $0x178] sm:$0xff]   ;;  %v3440_v52 = vrot.slane %v10441_v33, %v3439_v47 }
0x1bef   : > { %v3207_v49 = vmul.f32 %v3206_v8, %v3206_v8  ;;  %v3457_v54 = vpack.c.bf16 %v3440_v52, %v3440_v52 }
0x1bf1   : > { %v3208_v50 = vsel %vm1516_vm0, %v3207_v49, 0.0  ;;  %v3435_v49 = vsub.s32 4, %v10439_v19 }
0x1bf2   : > { %3209 = vadd.xlane.f32.xlu1 %v3208_v50  ;;  %v9261_v50 = vld [vmem:[%s11293_s14 + $0x138] sm:$0xff]  }
0x1bf3   : > { %v3436_v53 = vrot.slane %v10441_v33, %v3435_v49 }
0x1bf5   : > { %v3456_v55 = vpack.c.bf16 %v3436_v53, %v3436_v53  ;;  %v4024_v53 = vld [vmem:[%s1500_s20] sm:$0xff]  ;;  %s11300_s20 = sld [smem:[#allocation44_spill]] }
0x1c7f   : > { %v3210_v56 = vpop.xlane.xlu1 %3209 }
0x1c80   : > { %v3211_v57 = vmul.f32 0.03125, %v3210_v56  ;;  %v3443_v56 = vsub.s32 6, %v10439_v19 }
0x1c82   : > { %v3212_v58 = vadd.f32 1e-05, %v3211_v57  ;;  %v3444_v57 = vrot.slane %v10441_v33, %v3443_v56 }
0x1c84   : > { %9328 = vrsqrt.f32 %v3212_v58  ;;  %v7940_v58 = vld [vmem:[%s11282_s28 + $0x1] ss:$0 sm:$0xff]  ;;  %v3458_v26 = vpack.c.bf16 %v3444_v57, %v3444_v57  ;;  %s11310_s28 = sld [smem:[#allocation50_spill]] }
0x1c8e   : > { %v9329_v59 = vpop.eup %9328 }
0x1c8f   : > { %v3214_v61 = vmul.f32 %v9329_v59, %v3206_v8  ;;  %v3427_v8 = vsub.s32 2, %v10439_v19  ;;  %v9265_v19 = vld [vmem:[%s11296_s10 + $0x8] sm:$0xff]  }
0x1c91   : > { %v3221_v63 = vmul.f32 %v7924_v60, %v3214_v61  ;;  %v3428_v12 = vrot.slane %v10441_v33, %v3427_v8  ;;  %v9258_v33 = vld [vmem:[%s11293_s14 + $0xf8] sm:$0xff]  }
0x1c93   : > { %v3228_v0 = vadd.f32 %v7925_v62, %v3221_v63  ;;  %v3454_v21 = vpack.c.bf16 %v3428_v12, %v3428_v12 }
0x1c95   : > { %v3247_v2 = vpack.c.bf16 %v3228_v0, %v3228_v0 }
0x1c97   : > { %8629 = vmatmul.mubr.msk.bf16.vlgmr.msra.gmra.mrb[56].mxu1 %vm1516_vm0, %v3247_v2  ;;  %v3455_v2 = vpack.c.bf16 %v3432_v51, %v3432_v51 }
0x1c98   : > { %8243 = vmatpush3.bf16.msra.mxu1 %v9211_v1  ;;  %3896 = vmatprep.mubr.bf16.mxu1 %v3453_v27  ;;  %v9232_v1 = vld [vmem:[%s11293_s14 + $0x80] sm:$0xff]  }
0x1c99   : > { %8244 = vmatprep.subr.bf16.mxu1 %v9212_v3 }
0x1c9c   : > { %8245 = vmatpush3.bf16.msra.mxu1 %v9213_v4  ;;  %v9234_v4 = vld [vmem:[%s11293_s14 + $0xc8] sm:$0xff]  }
0x1c9d   : > { %8246 = vmatprep.subr.bf16.mxu1 %v9214_v5  ;;  %v9236_v5 = vld [vmem:[%s11293_s14 + $0x88] sm:$0xff]  }
0x1ca0   : > { %8247 = vmatpush3.bf16.msra.mxu1 %v9215_v6  ;;  %v9238_v6 = vld [vmem:[%s11293_s14 + $0xd0] sm:$0xff]  }
0x1ca1   : > { %8248 = vmatprep.subr.bf16.mxu1 %v9216_v7  ;;  %v9240_v7 = vld [vmem:[%s11293_s14 + $0x90] sm:$0xff]  }
0x1ca4   : > { %8249 = vmatpush3.bf16.msra.mxu1 %v9217_v9  ;;  %v9242_v9 = vld [vmem:[%s11293_s14 + $0xd8] sm:$0xff]  }
0x1ca5   : > { %8250 = vmatprep.subr.bf16.mxu1 %v9218_v10  ;;  %v9244_v10 = vld [vmem:[%s11293_s14 + $0x98] sm:$0xff]  }
0x1ca8   : > { %8251 = vmatpush3.bf16.msra.mxu1 %v9220_v11  ;;  %v9246_v11 = vld [vmem:[%s11293_s14 + $0xe0] sm:$0xff]  }
0x1ca9   : > { %8252 = vmatprep.subr.bf16.mxu1 %v9221_v13  ;;  %v9248_v13 = vld [vmem:[%s11293_s14 + $0xa0] sm:$0xff]  }
0x1cac   : > { %8253 = vmatpush3.bf16.msra.mxu1 %v9223_v14  ;;  %v9250_v14 = vld [vmem:[%s11293_s14 + $0xe8] sm:$0xff]  }
0x1cad   : > { %8254 = vmatprep.subr.bf16.mxu1 %v9224_v15  ;;  %v9252_v15 = vld [vmem:[%s11293_s14 + $0xa8] sm:$0xff]  }
0x1cb0   : > { %8255 = vmatpush3.bf16.msra.mxu1 %v9226_v17  ;;  %v9254_v17 = vld [vmem:[%s11293_s14 + $0xf0] sm:$0xff]  }
0x1cb1   : > { %8256 = vmatprep.subr.bf16.mxu1 %v9227_v20  ;;  %v9260_v20 = vld [vmem:[%s11293_s14 + $0xb8] sm:$0xff]  }
0x1cb4   : > { %8257 = vmatpush3.bf16.msra.mxu1 %v9229_v23  ;;  %v9263_v23 = vld [vmem:[%s11293_s14 + $0x188] ss:$0 sps:$4 sm:$0x11]   ;;  %s11301_s14 = smov 88  }
0x1cb5   : > { %8286 = vmatprep.subr.bf16.mxu1 %v9231_v29  ;;  %v3862_v25 = vsel %vm3860_vm5, %v9263_v23, 0 }
0x1cb7   : > { %3897 = vmatmul.mubr.bf16.vlgmr.msra.gmra.mrb[60].mxu1 %v3452_v38 }
0x1cb8   : > { %8287 = vmatpush3.bf16.msra.mxu1 %v9233_v30  ;;  %3976 = vmatprep.mubr.bf16.mxu1 %v3457_v54 }
0x1cb9   : > { %8288 = vmatprep.subr.bf16.mxu1 %v9235_v31 }
0x1cbc   : > { %8289 = vmatpush3.bf16.msra.mxu1 %v9237_v32 }
0x1cbd   : > { %8290 = vmatprep.subr.bf16.mxu1 %v9239_v34 }
0x1cc0   : > { %8291 = vmatpush3.bf16.msra.mxu1 %v9241_v35 }
0x1cc1   : > { %8292 = vmatprep.subr.bf16.mxu1 %v9243_v36 }
0x1cc4   : > { %8293 = vmatpush3.bf16.msra.mxu1 %v9245_v37 }
0x1cc5   : > { %8294 = vmatprep.subr.bf16.mxu1 %v9247_v39 }
0x1cc8   : > { %8295 = vmatpush3.bf16.msra.mxu1 %v9249_v40 }
0x1cc9   : > { %8296 = vmatprep.subr.bf16.mxu1 %v9251_v41 }
0x1ccc   : > { %8297 = vmatpush3.bf16.msra.mxu1 %v9253_v42  ;;  %v3558_v42 = vld [vmem:[#allocation2] sm:$0x1] }
0x1ccd   : > { %8298 = vmatprep.subr.bf16.mxu1 %v9255_v43 }
0x1cd0   : > { %8299 = vmatpush3.bf16.msra.mxu1 %v9257_v44 }
0x1cd1   : > { %8300 = vmatprep.subr.bf16.mxu1 %v9259_v48 }
0x1cd4   : > { %8301 = vmatpush3.bf16.msra.mxu1 %v9261_v50 }
0x1cd5   : > { %8666 = vmatprep.subr.bf16.mxu1 %v9711_v16 }
0x1cd7   : > { %3977 = vmatmul.mubr.bf16.vlgmr.msra.gmra.mrb[64].mxu1 %v3456_v55 }
0x1cd8   : > { %8668 = vmatprep.mubr.msk.bf16.mxu1 %vm9712_vm1, %v9711_v16 }
0x1d6a   : > { %v3303_v59 = vpop.f32.mrb[56].mxu1 }
0x1d6b   : > { %v3304_v60 = vadd.f32 %v7940_v58, %v3303_v59  ;;  %v8630_v61 = vpop.f32.mrb[57].mxu1 }
0x1d6c   : > { %v3306_v62 = vpop.f32.mrb[58].mxu1 }
0x1d6d   : > { %v3309_v63 = vmax.f32 %v3304_v60, 0.0  ;;  %v8631_v0 = vpop.f32.mrb[59].mxu1 }
0x1d6e   : > { %v9264_v0 = vld [vmem:[%s11296_s10] sm:$0xff]  }
0x1d6f   : > { %v3310_v3 = vpack.c.bf16 %v3309_v63, %v3309_v63 }
0x1d71   : > { %8641 = vmatmul.mubr.msk.bf16.vlgmr.msra.gmra.mrb[56].mxu0 %vm2401_vm4, %v3310_v3 }
0x1d72   : > { %8265 = vmatpush3.bf16.msra.mxu0 %v9232_v1  ;;  %3936 = vmatprep.mubr.bf16.mxu0 %v3455_v2 }
0x1d73   : > { %8266 = vmatprep.subr.bf16.mxu0 %v9234_v4  ;;  %v8003_v4 = vld [vmem:[%s11297_s18] ss:$0 sm:$0xff]  ;;  %s11302_s18 = smov 96  }
0x1d76   : > { %8267 = vmatpush3.bf16.msra.mxu0 %v9236_v5 }
0x1d77   : > { %8268 = vmatprep.subr.bf16.mxu0 %v9238_v6  ;;  %v8004_v6 = vld [vmem:[%s11299_s6] ss:$0 sm:$0xff] }
0x1d7a   : > { %8269 = vmatpush3.bf16.msra.mxu0 %v9240_v7 }
0x1d7b   : > { %8270 = vmatprep.subr.bf16.mxu0 %v9242_v9 }
0x1d7e   : > { %8271 = vmatpush3.bf16.msra.mxu0 %v9244_v10 }
0x1d7f   : > { %8272 = vmatprep.subr.bf16.mxu0 %v9246_v11  ;;  %v8008_v11 = vld [vmem:[%s11300_s20] ss:$0 sm:$0xff] }
0x1d82   : > { %8273 = vmatpush3.bf16.msra.mxu0 %v9248_v13 }
0x1d83   : > { %8274 = vmatprep.subr.bf16.mxu0 %v9250_v14 }
0x1d86   : > { %8275 = vmatpush3.bf16.msra.mxu0 %v9252_v15 }
0x1d87   : > { %8276 = vmatprep.subr.bf16.mxu0 %v9254_v17 }
0x1d8a   : > { %8277 = vmatpush3.bf16.msra.mxu0 %v9256_v18  ;;  %v8258_v27 = vpop.f32.mrb[60].mxu1 }
0x1d8b   : > { %8278 = vmatprep.subr.bf16.mxu0 %v9258_v33  ;;  %v8259_v28 = vpop.f32.mrb[61].mxu1 }
0x1d8c   : > { %v8260_v29 = vadd.f32 %v8259_v28, %v8258_v27  ;;  %v8261_v38 = vpop.f32.mrb[62].mxu1 }
0x1d8d   : > { %v8262_v30 = vpop.f32.mrb[63].mxu1 }
0x1d8e   : > { %8279 = vmatpush3.bf16.msra.mxu0 %v9260_v20  ;;  %v3899_v46 = vadd.f32 %v8260_v29, %v3558_v42 }
0x1d8f   : > { %8644 = vmatprep.subr.bf16.mxu0 %v9711_v16 }
0x1d91   : > { %3937 = vmatmul.mubr.bf16.vlgmr.msra.gmra.mrb[60].mxu0 %v3454_v21 }
0x1d92   : > { %8645 = vmatpush3.bf16.msra.mxu0 %v9262_v22  ;;  %8648 = vmatprep.mubr.msk.bf16.mxu0 %vm9712_vm1, %v9711_v16 }
0x1d93   : > { %8646 = vmatprep.subr.bf16.mxu0 %v9711_v16 }
0x1d96   : > { %8647 = vmatpush3.bf16.msra.mxu0 %v3862_v25 }
0x1d97   : > { %8652 = vmatprep.subr.bf16.mxu0 %v9711_v16 }
0x1d99   : > { %8649 = vmatmul.mubr.msk.bf16.vlgmr.msra.gmra.mrb[64].mxu0 %vm3856_vm6, %v3458_v26 }
0x1d9a   : > { %8656 = vmatprep.mubr.msk.bf16.mxu0 %vm9712_vm1, %v9711_v16  ;;  %8653 = vmatpush3.bf16.msra.mxu0 %v9264_v0  ;;  %v8005_v0 = vld [vmem:[%s11303_s17 + $0x4] sm:$0xf] }
0x1d9b   : > { %8654 = vmatprep.subr.bf16.mxu0 %v9711_v16 }
0x1d9e   : > { %8655 = vmatpush3.bf16.msra.mxu0 %v9265_v19  ;;  %v4362_v19 = vsel %vm1689_vm3, %v8005_v0, 0 }
0x1d9f   : > { %8660 = vmatprep.subr.bf16.mxu0 %v9711_v16 }
0x1daa   : > { %v8302_v31 = vpop.f32.mrb[64].mxu1 }
0x1dab   : > { %v8303_v32 = vpop.f32.mrb[65].mxu1 }
0x1dac   : > { %v8305_v34 = vpop.f32.mrb[66].mxu1  ;;  %v8304_v35 = vadd.f32 %v8303_v32, %v8302_v31 }
0x1dad   : > { %v8306_v36 = vpop.f32.mrb[67].mxu1 }
0x1e44   : > { %v10508_v37 = vpop.f32.mrb[56].mxu0 }
0x1e45   : > { %v8642_v39 = vpop.f32.mrb[57].mxu0 }
0x1e46   : > { %v3381_v40 = vpop.f32.mrb[58].mxu0 }
0x1e47   : > { %v8643_v41 = vpop.f32.mrb[59].mxu0 }
0x1e64   : > { %v8280_v43 = vpop.f32.mrb[60].mxu0 }
0x1e65   : > { %v8281_v44 = vpop.f32.mrb[61].mxu0 }
0x1e66   : > { %v8282_v47 = vadd.f32 %v8281_v44, %v8280_v43  ;;  %v8283_v48 = vpop.f32.mrb[62].mxu0 }
0x1e67   : > { %v8284_v8 = vpop.f32.mrb[63].mxu0 }
0x1e68   : > { %v3939_v49 = vadd.f32 %v8282_v47, %v3899_v46 }
0x1e6a   : > { %v3979_v50 = vadd.f32 %v8304_v35, %v3939_v49 }
0x1e6c   : > { %v4018_v51 = vpop.f32.mrb[64].mxu0 }
0x1e6d   : > { %v4019_v52 = vadd.f32 %v4018_v51, %v3979_v50  ;;  %v8650_v12 = vpop.f32.mrb[65].mxu0 }
0x1e6e   : > { %v4021_v54 = vpop.f32.mrb[66].mxu0 }
0x1e6f   : > { %v4028_v55 = vrot.slane %v4019_v52, %v3419_v24  ;;  %v8651_v56 = vpop.f32.mrb[67].mxu0 }
0x1e71   : > { %v10514_v57 = vadd.f32 %v4028_v55, %v4024_v53 }
0x1e73   : > { %v4032_v58 = vsel %vm1516_vm0, %v10514_v57, 0.0 }
0x1e74   : > { %4033 = vadd.xlane.f32.xlu1 %v4032_v58 }
0x1f01   : > { %v4034_v59 = vpop.xlane.xlu1 %4033 }
0x1f02   : > { %v4035_v60 = vmul.f32 0.03125, %v4034_v59 }
0x1f04   : > { %v4036_v61 = vsub.f32 %v10514_v57, %v4035_v60 }
0x1f06   : > { %v4037_v62 = vmul.f32 %v4036_v61, %v4036_v61 }
0x1f08   : > { %v4038_v63 = vsel %vm1516_vm0, %v4037_v62, 0.0  ;;  %v4059_v62 = vld [vmem:[%s11303_s17] sm:$0xf] }
0x1f09   : > { %4039 = vadd.xlane.f32.xlu1 %v4038_v63  ;;  %v4408_v63 = vsel %vm1689_vm3, %v4059_v62, 0 }
0x1f96   : > { %v4040_v24 = vpop.xlane.xlu1 %4039 }
0x1f97   : > { %v4041_v1 = vmul.f32 0.03125, %v4040_v24 }
0x1f99   : > { %v4042_v2 = vadd.f32 1e-05, %v4041_v1 }
0x1f9b   : > { %9330 = vrsqrt.f32 %v4042_v2 }
0x1fa5   : > { %v9331_v3 = vpop.eup %9330 }
0x1fa6   : > { %v4044_v5 = vmul.f32 %v9331_v3, %v4036_v61 }
0x1fa8   : > { %v4051_v7 = vmul.f32 %v8003_v4, %v4044_v5 }
0x1faa   : > { %v4058_v9 = vadd.f32 %v8004_v6, %v4051_v7 }
0x1fac   : > { %v4072_v10 = vpack.c.bf16 %v4058_v9, %v4058_v9 }
0x1fae   : > { %8657 = vmatmul.mubr.msk.bf16.vlgmr.msra.gmra.mrb[68].mxu0 %vm1516_vm0, %v4072_v10 }
0x1faf   : > { %8662 = vmatprep.mubr.msk.bf16.mxu0 %vm9712_vm1, %v9711_v16 }
0x2081   : > { %v4128_v13 = vpop.f32.mrb[68].mxu0 }
0x2082   : > { %v4129_v14 = vadd.f32 %v8008_v11, %v4128_v13  ;;  %v8658_v15 = vpop.f32.mrb[69].mxu0 }
0x2083   : > { %v4131_v17 = vpop.f32.mrb[70].mxu0 }
0x2084   : > { %v10530_v18 = vpack.c.bf16 %v4129_v14, %v4129_v14  ;;  %v8659_v33 = vpop.f32.mrb[71].mxu0 }
0x2086   : > { %4248 = vrot.lane.b32.xlu0 %v10530_v18, %s11301_s14  ;;  %4136 = vrot.lane.b32.xlu1 %v10530_v18, %s11302_s18 }
0x208a   : > { %4246 = vrot.lane.b32.xlu0 %v10530_v18, %s11284_s15 }
0x20f8   : > { %v4137_v20 = vpop.permute.xlu1 %4136  ;;  %v4249_v22 = vpop.permute.xlu0 %4248 }
0x20f9   : > { %v4142_v21 = vsel %vm1624_vm2, %v4137_v20, 0  ;;  %v4254_v23 = vsel %vm1624_vm2, %v4249_v22, 0 }
0x20fa   : > { %8661 = vmatpush3.bf16.xpose.msra.mxu0 %v4142_v21 }
0x20fb   : > { %8672 = vmatprep.subr.bf16.mxu0 %v9711_v16 }
0x20fc   : > { %v4247_v25 = vpop.permute.xlu0 %4246 }
0x2101   : > { %8663 = vmatmul.mubr.msk.bf16.vlgmr.msra.gmra.mrb[72].mxu0 %vm1624_vm2, %v10530_v18 }
0x2102   : > { %8673 = vmatpush3.bf16.xpose.msra.mxu0 %v4254_v23  ;;  %8674 = vmatprep.mubr.msk.bf16.mxu0 %vm9712_vm1, %v9711_v16 }
0x2103   : > { %8684 = vmatprep.subr.bf16.mxu0 %v9711_v16 }
0x2109   : > { %8675 = vmatmul.mubr.msk.bf16.vlgmr.msra.gmra.mrb[76].mxu0 %vm1624_vm2, %v4247_v25 }
0x210a   : > { %8686 = vmatprep.mubr.msk.bf16.mxu0 %vm9712_vm1, %v9711_v16  ;;  %8685 = vmatpush3.bf16.msra.mxu0 %v4362_v19 }
0x210b   : > { %8696 = vmatprep.subr.bf16.mxu0 %v9711_v16 }
0x21d4   : > { %v4178_v26 = vpop.f32.mrb[72].mxu0 }
0x21d5   : > { %v4184_v27 = vmul.f32 0.35355338, %v4178_v26  ;;  %v8664_v28 = vpop.f32.mrb[73].mxu0 }
0x21d6   : > { %v4181_v29 = vpop.f32.mrb[74].mxu0 }
0x21d7   : > { %v8665_v38 = vpop.f32.mrb[75].mxu0  ;;  %v4185_v30 = vsel %vm1624_vm2, %v4184_v27, -inf }
0x21d8   : > { %4186 = vmax.xlane.f32.xlu0 %v4185_v30 }
0x21dc   : > { %v4290_v31 = vpop.f32.mrb[76].mxu0 }
0x21dd   : > { %v4296_v32 = vmul.f32 0.35355338, %v4290_v31  ;;  %v8676_v34 = vpop.f32.mrb[77].mxu0 }
0x21de   : > { %v4293_v35 = vpop.f32.mrb[78].mxu0 }
0x21df   : > { %v8677_v36 = vpop.f32.mrb[79].mxu0  ;;  %v4297_v39 = vsel %vm1624_vm2, %v4296_v32, -inf }
0x21e0   : > { %4298 = vmax.xlane.f32.xlu1 %v4297_v39 }
0x21f1   : > { %4309 = vrot.lane.b32.xlu1 %v10530_v18, %s11285_s1 }
0x21f5   : > { %4452 = vrot.lane.b32.xlu1 %v10530_v18, %s11288_s4 }
0x2265   : > { %v4187_v40 = vpop.xlane.xlu0 %4186 }
0x2266   : > { %v4188_v41 = vsub.f32 %v4184_v27, %v4187_v40 }
0x2268   : > { %v4189_v42 = vmul.f32 1.442695, %v4188_v41 }
0x226a   : > { %9332 = vpow2.f32 %v4189_v42 }
0x226d   : > { %v4299_v43 = vpop.xlane.xlu1 %4298 }
0x226e   : > { %v4300_v44 = vsub.f32 %v4296_v32, %v4299_v43 }
0x2270   : > { %v4301_v46 = vmul.f32 1.442695, %v4300_v44 }
0x2271   : > { %v4310_v55 = vpop.permute.xlu1 %4309 }
0x2272   : > { %9334 = vpow2.f32 %v4301_v46  ;;  %v4315_v58 = vsel %vm1689_vm3, %v4310_v55, 0 }
0x2274   : > { %v9333_v47 = vpop.eup %9332 }
0x2275   : > { %v4191_v48 = vsel %vm1624_vm2, %v9333_v47, 0.0  ;;  %v4453_v5 = vpop.permute.xlu1 %4452 }
0x2276   : > { %4192 = vadd.xlane.f32.xlu0 %v4191_v48  ;;  %v4458_v11 = vsel %vm1624_vm2, %v4453_v5, 0 }
0x227c   : > { %v9335_v8 = vpop.eup %9334 }
0x227d   : > { %v4303_v49 = vsel %vm1624_vm2, %v9335_v8, 0.0 }
0x227e   : > { %4304 = vadd.xlane.f32.xlu0 %v4303_v49  ;;  %v8006_v49 = vld [vmem:[%s11303_s17 + $0x8] sm:$0xf] }
0x2294   : > { %4197 = vrot.lane.b32.xlu0 %v10530_v18, %s11287_s3 }
0x2298   : > { %4450 = vrot.lane.b32.xlu0 %v10530_v18, %s11286_s2 }
0x2303   : > { %v4193_v50 = vpop.xlane.xlu0 %4192 }
0x2304   : > { %9336 = vrcp.f32 %v4193_v50  ;;  %v4566_v50 = vsel %vm1689_vm3, %v8006_v49, 0 }
0x230b   : > { %v4305_v51 = vpop.xlane.xlu0 %4304 }
0x230c   : > { %9338 = vrcp.f32 %v4305_v51 }
0x230e   : > { %v9337_v52 = vpop.eup %9336 }
0x230f   : > { %v4195_v12 = vmul.f32 %v9337_v52, %v9333_v47  ;;  %v4198_v53 = vpop.permute.xlu0 %4197 }
0x2310   : > { %v4203_v54 = vsel %vm1689_vm3, %v4198_v53, 0 }
0x2311   : > { %8667 = vmatpush3.bf16.msra.mxu1 %v4203_v54  ;;  %v4196_v56 = vpack.c.bf16 %v4195_v12, %v4195_v12 }
0x2312   : > { %8678 = vmatprep.subr.bf16.mxu1 %v9711_v16 }
0x2313   : > { %v4451_v14 = vpop.permute.xlu0 %4450 }
0x2314   : > { %8669 = vmatmul.mubr.msk.bf16.vlgmr.msra.gmra.mrb[68].mxu1 %vm1624_vm2, %v4196_v56 }
0x2315   : > { %8679 = vmatpush3.bf16.msra.mxu1 %v4315_v58  ;;  %8680 = vmatprep.mubr.msk.bf16.mxu1 %vm9712_vm1, %v9711_v16 }
0x2316   : > { %v9339_v59 = vpop.eup %9338  ;;  %8690 = vmatprep.subr.bf16.mxu1 %v9711_v16 }
0x2317   : > { %v4307_v60 = vmul.f32 %v9339_v59, %v9335_v8 }
0x2319   : > { %v4308_v61 = vpack.c.bf16 %v4307_v60, %v4307_v60 }
0x231c   : > { %8681 = vmatmul.mubr.msk.bf16.vlgmr.msra.gmra.mrb[72].mxu1 %vm1624_vm2, %v4308_v61 }
0x231d   : > { %8692 = vmatprep.mubr.msk.bf16.mxu1 %vm9712_vm1, %v9711_v16  ;;  %8691 = vmatpush3.bf16.msra.mxu1 %v4408_v63 }
0x231e   : > { %8702 = vmatprep.subr.bf16.mxu1 %v9711_v16 }
0x23e7   : > { %v4239_v24 = vpop.f32.mrb[68].mxu1 }
0x23e8   : > { %v4245_v1 = vpack.c.bf16 %v4239_v24, %v4239_v24  ;;  %v8670_v2 = vpop.f32.mrb[69].mxu1 }
0x23e9   : > { %v4242_v3 = vpop.f32.mrb[70].mxu1 }
0x23ea   : > { %v8671_v4 = vpop.f32.mrb[71].mxu1  ;;  %8693 = vmatmul.mubr.msk.bf16.vlgmr.msra.gmra.mrb[76].mxu1 %vm1624_vm2, %v4245_v1  ;;  %v7944_v1 = vld [vmem:[%s11283_s26 + $0x1] ss:$0 sm:$0xff]  ;;  %s11309_s26 = sld [smem:[#allocation52_spill]] }
0x23eb   : > { %8704 = vmatprep.mubr.msk.bf16.mxu1 %vm9712_vm1, %v9711_v16  ;;  %v3379_v2 = vadd.f32 %v7944_v1, %v10508_v37 }
0x23ed   : > { %v3384_v5 = vadd.f32 %v3379_v2, %v10405_v45  ;;  %v8007_v45 = vld [vmem:[%s11303_s17 + $0xc] sm:$0xf] }
0x23ef   : > { %v4351_v6 = vpop.f32.mrb[72].mxu1 }
0x23f0   : > { %v4357_v7 = vpack.c.bf16 %v4351_v6, %v4351_v6  ;;  %v8682_v9 = vpop.f32.mrb[73].mxu1 }
0x23f1   : > { %v4354_v10 = vpop.f32.mrb[74].mxu1 }
0x23f2   : > { %v8683_v13 = vpop.f32.mrb[75].mxu1  ;;  %8687 = vmatmul.mubr.msk.bf16.vlgmr.msra.gmra.mrb[80].mxu0 %vm1624_vm2, %v4357_v7 }
0x23f3   : > { %8697 = vmatpush3.bf16.xpose.msra.mxu0 %v4458_v11  ;;  %8698 = vmatprep.mubr.msk.bf16.mxu0 %vm9712_vm1, %v9711_v16 }
0x23f4   : > { %8708 = vmatprep.subr.bf16.mxu0 %v9711_v16 }
0x23fa   : > { %8699 = vmatmul.mubr.msk.bf16.vlgmr.msra.gmra.mrb[84].mxu0 %vm1624_vm2, %v4451_v14 }
0x23fb   : > { %8710 = vmatprep.mubr.msk.bf16.mxu0 %vm9712_vm1, %v9711_v16  ;;  %8709 = vmatpush3.bf16.msra.mxu0 %v4566_v50 }
0x23fc   : > { %8720 = vmatprep.subr.bf16.mxu0 %v9711_v16 }
0x24bd   : > { %v4444_v15 = vpop.f32.mrb[76].mxu1 }
0x24be   : > { %v8694_v17 = vpop.f32.mrb[77].mxu1 }
0x24bf   : > { %v4447_v33 = vpop.f32.mrb[78].mxu1  ;;  %v4725_v17 = vsel %vm1689_vm3, %v8007_v45, 0 }
0x24c0   : > { %v8695_v20 = vpop.f32.mrb[79].mxu1 }
0x24c5   : > { %v4398_v21 = vpop.f32.mrb[80].mxu0 }
0x24c6   : > { %v10588_v22 = vadd.f32 %v4444_v15, %v4398_v21  ;;  %v8688_v23 = vpop.f32.mrb[81].mxu0 }
0x24c7   : > { %v4401_v25 = vpop.f32.mrb[82].mxu0 }
0x24c8   : > { %v8689_v26 = vpop.f32.mrb[83].mxu0 }
0x24cd   : > { %v4494_v27 = vpop.f32.mrb[84].mxu0 }
0x24ce   : > { %v4500_v28 = vmul.f32 0.35355338, %v4494_v27  ;;  %v8700_v29 = vpop.f32.mrb[85].mxu0  ;;  %v8024_v27 = vld [vmem:[%s11304_s19] ss:$0 sm:$0xff] }
0x24cf   : > { %v4497_v38 = vpop.f32.mrb[86].mxu0 }
0x24d0   : > { %v8701_v30 = vpop.f32.mrb[87].mxu0  ;;  %v4501_v31 = vsel %vm1624_vm2, %v4500_v28, -inf }
0x24d1   : > { %4502 = vmax.xlane.f32.xlu1 %v4501_v31 }
0x24e2   : > { %4611 = vrot.lane.b32.xlu1 %v10530_v18, %s11291_s9 }
0x24e6   : > { %4609 = vrot.lane.b32.xlu1 %v10530_v18, %s11290_s8 }
0x255e   : > { %v4503_v32 = vpop.xlane.xlu1 %4502 }
0x255f   : > { %v4504_v34 = vsub.f32 %v4500_v28, %v4503_v32 }
0x2561   : > { %v4505_v35 = vmul.f32 1.442695, %v4504_v34 }
0x2562   : > { %v4612_v46 = vpop.permute.xlu1 %4611 }
0x2563   : > { %9340 = vpow2.f32 %v4505_v35  ;;  %v4617_v48 = vsel %vm1624_vm2, %v4612_v46, 0 }
0x2566   : > { %v4610_v8 = vpop.permute.xlu1 %4609 }
0x256d   : > { %v9341_v36 = vpop.eup %9340 }
0x256e   : > { %v4507_v39 = vsel %vm1624_vm2, %v9341_v36, 0.0 }
0x256f   : > { %4508 = vadd.xlane.f32.xlu0 %v4507_v39 }
0x2585   : > { %4513 = vrot.lane.b32.xlu0 %v10530_v18, %s11289_s5 }
0x25fc   : > { %v4509_v40 = vpop.xlane.xlu0 %4508 }
0x25fd   : > { %9342 = vrcp.f32 %v4509_v40 }
0x2600   : > { %v4514_v41 = vpop.permute.xlu0 %4513 }
0x2601   : > { %v4519_v42 = vsel %vm1689_vm3, %v4514_v41, 0  ;;  %v9266_v41 = vld [vmem:[%s11305_s21] sm:$0xff]  }
0x2602   : > { %8703 = vmatpush3.bf16.msra.mxu1 %v4519_v42  ;;  %v9267_v42 = vld [vmem:[%s11305_s21 + $0x8] sm:$0xff]  }
0x2603   : > { %8714 = vmatprep.subr.bf16.mxu1 %v9711_v16 }
0x2607   : > { %v9343_v43 = vpop.eup %9342 }
0x2608   : > { %v4511_v44 = vmul.f32 %v9343_v43, %v9341_v36 }
0x260a   : > { %v4512_v47 = vpack.c.bf16 %v4511_v44, %v4511_v44 }
0x260c   : > { %8705 = vmatmul.mubr.msk.bf16.vlgmr.msra.gmra.mrb[80].mxu1 %vm1624_vm2, %v4512_v47 }
0x260d   : > { %8715 = vmatpush3.bf16.xpose.msra.mxu1 %v4617_v48  ;;  %8716 = vmatprep.mubr.msk.bf16.mxu1 %vm9712_vm1, %v9711_v16 }
0x260e   : > { %8726 = vmatprep.subr.bf16.mxu1 %v9711_v16 }
0x2614   : > { %8717 = vmatmul.mubr.msk.bf16.vlgmr.msra.gmra.mrb[84].mxu1 %vm1624_vm2, %v4610_v8 }
0x2615   : > { %8728 = vmatprep.mubr.msk.bf16.mxu1 %vm9712_vm1, %v9711_v16  ;;  %8727 = vmatpush3.bf16.msra.mxu1 %v4725_v17 }
0x2616   : > { %8740 = vmatprep.subr.bf16.mxu1 %v9711_v16 }
0x26df   : > { %v4555_v51 = vpop.f32.mrb[80].mxu1 }
0x26e0   : > { %v4561_v52 = vpack.c.bf16 %v4555_v51, %v4555_v51  ;;  %v8706_v12 = vpop.f32.mrb[81].mxu1  ;;  %v7950_v51 = vld [vmem:[#allocation5] ss:$0 sm:$0xff] }
0x26e1   : > { %v4558_v53 = vpop.f32.mrb[82].mxu1  ;;  %v7951_v12 = vld [vmem:[#allocation7] ss:$0 sm:$0xff] }
0x26e2   : > { %v8707_v54 = vpop.f32.mrb[83].mxu1  ;;  %8711 = vmatmul.mubr.msk.bf16.vlgmr.msra.gmra.mrb[88].mxu0 %vm1624_vm2, %v4561_v52 }
0x26e3   : > { %8722 = vmatprep.mubr.msk.bf16.mxu0 %vm9712_vm1, %v9711_v16 }
0x26e7   : > { %v4653_v55 = vpop.f32.mrb[84].mxu1 }
0x26e8   : > { %v4659_v56 = vmul.f32 0.35355338, %v4653_v55  ;;  %v8718_v58 = vpop.f32.mrb[85].mxu1 }
0x26e9   : > { %v4656_v59 = vpop.f32.mrb[86].mxu1  ;;  %v9269_v58 = vld [vmem:[%s11306_s23 + $0x8] sm:$0xff]  }
0x26ea   : > { %v8719_v60 = vpop.f32.mrb[87].mxu1  ;;  %v4660_v61 = vsel %vm1624_vm2, %v4659_v56, -inf }
0x26eb   : > { %4661 = vmax.xlane.f32.xlu0 %v4660_v61 }
0x2701   : > { %4672 = vrot.lane.b32.xlu0 %v10530_v18, %s11292_s13  ;;  %v3387_v18 = vsel %vm1516_vm0, %v3384_v5, 0.0 }
0x2778   : > { %v4662_v62 = vpop.xlane.xlu0 %4661 }
0x2779   : > { %v4663_v63 = vsub.f32 %v4659_v56, %v4662_v62  ;;  %v9268_v56 = vld [vmem:[%s11306_s23] sm:$0xff]  }
0x277b   : > { %v4664_v0 = vmul.f32 1.442695, %v4663_v63  ;;  %v8029_v63 = vld [vmem:[%s11307_s24] ss:$0 sm:$0xff] }
0x277c   : > { %v4673_v19 = vpop.permute.xlu0 %4672 }
0x277d   : > { %9344 = vpow2.f32 %v4664_v0  ;;  %v4678_v24 = vsel %vm1689_vm3, %v4673_v19, 0  ;;  %v8030_v19 = vld [vmem:[%s11308_s25] ss:$0 sm:$0xff] }
0x277e   : > { %8721 = vmatpush3.bf16.msra.mxu0 %v4678_v24 }
0x277f   : > { %8732 = vmatprep.subr.bf16.mxu0 %v9711_v16 }
0x2787   : > { %v9345_v3 = vpop.eup %9344 }
0x2788   : > { %v4666_v4 = vsel %vm1624_vm2, %v9345_v3, 0.0 }
0x2789   : > { %4667 = vadd.xlane.f32.xlu1 %v4666_v4 }
0x278d   : > { %3388 = vadd.xlane.f32.xlu1 %v3387_v18 }
0x27b5   : > { %v4602_v6 = vpop.f32.mrb[88].mxu0 }
0x27b6   : > { %v4608_v7 = vadd.f32 %v4602_v6, %v10588_v22  ;;  %v8712_v9 = vpop.f32.mrb[89].mxu0 }
0x27b7   : > { %v4605_v10 = vpop.f32.mrb[90].mxu0 }
0x27b8   : > { %v8713_v11 = vpop.f32.mrb[91].mxu0 }
0x27b9   : > { %v8031_v11 = vld [vmem:[%s11310_s28] ss:$0 sm:$0xff] }
0x2816   : > { %v4668_v13 = vpop.xlane.xlu1 %4667 }
0x2817   : > { %9346 = vrcp.f32 %v4668_v13 }
0x281a   : > { %v3389_v25 = vpop.xlane.xlu1 %3388 }
0x281b   : > { %v3390_v26 = vmul.f32 0.03125, %v3389_v25 }
0x281d   : > { %v3391_v31 = vsub.f32 %v3384_v5, %v3390_v26 }
0x281f   : > { %v3392_v39 = vmul.f32 %v3391_v31, %v3391_v31 }
0x2821   : > { %v9347_v14 = vpop.eup %9346  ;;  %v3393_v40 = vsel %vm1516_vm0, %v3392_v39, 0.0 }
0x2822   : > { %v4670_v37 = vmul.f32 %v9347_v14, %v9345_v3  ;;  %v8025_v3 = vld [vmem:[%s11309_s26] ss:$0 sm:$0xff] }
0x2824   : > { %v4671_v15 = vpack.c.bf16 %v4670_v37, %v4670_v37 }
0x2826   : > { %8723 = vmatmul.mubr.msk.bf16.vlgmr.msra.gmra.mrb[92].mxu0 %vm1624_vm2, %v4671_v15 }
0x2827   : > { %8736 = vmatprep.mubr.msk.bf16.mxu0 %vm9712_vm1, %v9711_v16  ;;  %8733 = vmatpush3.bf16.msra.mxu0 %v9266_v41 }
0x2828   : > { %8734 = vmatprep.subr.bf16.mxu0 %v9711_v16 }
0x282b   : > { %8735 = vmatpush3.bf16.msra.mxu0 %v9267_v42 }
0x282c   : > { %8748 = vmatprep.subr.bf16.mxu0 %v9711_v16 }
0x28f9   : > { %v4714_v33 = vpop.f32.mrb[92].mxu0 }
0x28fa   : > { %v4720_v20 = vpack.c.bf16 %v4714_v33, %v4714_v33  ;;  %v8724_v21 = vpop.f32.mrb[93].mxu0 }
0x28fb   : > { %v4717_v22 = vpop.f32.mrb[94].mxu0 }
0x28fc   : > { %v8725_v23 = vpop.f32.mrb[95].mxu0  ;;  %8729 = vmatmul.mubr.msk.bf16.vlgmr.msra.gmra.mrb[88].mxu1 %vm1624_vm2, %v4720_v20 }
0x28fd   : > { %8744 = vmatprep.mubr.msk.bf16.mxu1 %vm9712_vm1, %v9711_v16  ;;  %8741 = vmatpush3.bf16.msra.mxu1 %v9268_v56 }
0x28fe   : > { %8742 = vmatprep.subr.bf16.mxu1 %v9711_v16 }
0x2901   : > { %8743 = vmatpush3.bf16.msra.mxu1 %v9269_v58 }
0x2902   : > { %8754 = vmatprep.subr.bf16.mxu1 %v9711_v16 }
0x29cf   : > { %v4761_v28 = vpop.f32.mrb[88].mxu1 }
0x29d0   : > { %v4767_v29 = vadd.f32 %v4761_v28, %v4608_v7  ;;  %v8730_v38 = vpop.f32.mrb[89].mxu1 }
0x29d1   : > { %v4764_v30 = vpop.f32.mrb[90].mxu1 }
0x29d2   : > { %v4774_v32 = vadd.f32 %v8024_v27, %v4767_v29  ;;  %v8731_v34 = vpop.f32.mrb[91].mxu1 }
0x29d4   : > { %v10636_v35 = vadd.f32 %v4774_v32, %v10514_v57 }
0x29d6   : > { %v4844_v36 = vsel %vm1516_vm0, %v10636_v35, 0.0 }
0x29d7   : > { %4845 = vadd.xlane.f32.xlu1 %v4844_v36 }
0x29db   : > { %3394 = vadd.xlane.f32.xlu1 %v3393_v40 }
0x2a64   : > { %v4846_v43 = vpop.xlane.xlu1 %4845 }
0x2a65   : > { %v4847_v44 = vmul.f32 0.03125, %v4846_v43 }
0x2a67   : > { %v4848_v57 = vsub.f32 %v10636_v35, %v4847_v44 }
0x2a68   : > { %v3395_v46 = vpop.xlane.xlu1 %3394 }
0x2a69   : > { %v3396_v47 = vmul.f32 0.03125, %v3395_v46  ;;  %v4849_v48 = vmul.f32 %v4848_v57, %v4848_v57 }
0x2a6b   : > { %v3397_v8 = vadd.f32 1e-05, %v3396_v47  ;;  %v4850_v49 = vsel %vm1516_vm0, %v4849_v48, 0.0 }
0x2a6c   : > { %4851 = vadd.xlane.f32.xlu1 %v4850_v49 }
0x2a6d   : > { %9348 = vrsqrt.f32 %v3397_v8 }
0x2a77   : > { %v9349_v50 = vpop.eup %9348 }
0x2a78   : > { %v3399_v52 = vmul.f32 %v9349_v50, %v3391_v31 }
0x2a7a   : > { %v3406_v53 = vmul.f32 %v7950_v51, %v3399_v52 }
0x2a7c   : > { %v3413_v54 = vadd.f32 %v7951_v12, %v3406_v53 }
0x2a7e   : > { %v10647_v55 = vpack.c.bf16 %v3413_v54, %v3413_v54 }
0x2a80   : > { %8737 = vmatmul.mubr.msk.bf16.vlgmr.msra.gmra.mrb[96].mxu0 %vm1516_vm0, %v10647_v55 }
0x2a81   : > { %8750 = vmatprep.mubr.msk.bf16.mxu0 %vm9712_vm1, %v9711_v16 }
0x2af9   : > { %v4852_v59 = vpop.xlane.xlu1 %4851 }
0x2afa   : > { %v4853_v60 = vmul.f32 0.03125, %v4852_v59 }
0x2afc   : > { %v4854_v61 = vadd.f32 1e-05, %v4853_v60  ;;  %v4938_v60 = vld [vmem:[%s11311_s29] sm:$0xf] }
0x2afe   : > { %9350 = vrsqrt.f32 %v4854_v61  ;;  %v5220_v61 = vsel %vm1689_vm3, %v4938_v60, 0 }
0x2b08   : > { %v9351_v62 = vpop.eup %9350 }
0x2b09   : > { %v4856_v0 = vmul.f32 %v9351_v62, %v4848_v57  ;;  %v8035_v62 = vld [vmem:[%s11311_s29 + $0x4] sm:$0xf] }
0x2b0b   : > { %v4863_v24 = vmul.f32 %v8029_v63, %v4856_v0  ;;  %v5174_v63 = vsel %vm1689_vm3, %v8035_v62, 0 }
0x2b0d   : > { %v4870_v1 = vadd.f32 %v8030_v19, %v4863_v24 }
0x2b0f   : > { %v4871_v2 = vpack.c.bf16 %v4870_v1, %v4870_v1 }
0x2b11   : > { %8745 = vmatmul.mubr.msk.bf16.vlgmr.msra.gmra.mrb[92].mxu1 %vm1516_vm0, %v4871_v2 }
0x2b12   : > { %8756 = vmatprep.mubr.msk.bf16.mxu1 %vm9712_vm1, %v9711_v16 }
0x2b53   : > { %v4836_v4 = vpop.f32.mrb[96].mxu0 }
0x2b54   : > { %v4837_v5 = vadd.f32 %v8025_v3, %v4836_v4  ;;  %v8738_v18 = vpop.f32.mrb[97].mxu0 }
0x2b55   : > { %v4839_v6 = vpop.f32.mrb[98].mxu0 }
0x2b56   : > { %v10663_v7 = vpack.c.bf16 %v4837_v5, %v4837_v5  ;;  %v8739_v9 = vpop.f32.mrb[99].mxu0 }
0x2b58   : > { %5060 = vrot.lane.b32.xlu0 %v10663_v7, %s11284_s15  ;;  %v4952_v10 = vsel %vm1624_vm2, %v10663_v7, 0 }
0x2b59   : > { %8749 = vmatpush3.bf16.xpose.msra.mxu0 %v4952_v10 }
0x2b5a   : > { %8760 = vmatprep.subr.bf16.mxu0 %v9711_v16 }
0x2bca   : > { %v5061_v15 = vpop.permute.xlu0 %5060 }
0x2bcb   : > { %v5066_v20 = vsel %vm1624_vm2, %v5061_v15, 0 }
0x2be4   : > { %v4932_v13 = vpop.f32.mrb[92].mxu1 }
0x2be5   : > { %v4933_v14 = vadd.f32 %v8031_v11, %v4932_v13  ;;  %v8746_v37 = vpop.f32.mrb[93].mxu1 }
0x2be6   : > { %v4935_v45 = vpop.f32.mrb[94].mxu1 }
0x2be7   : > { %v10671_v17 = vpack.c.bf16 %v4933_v14, %v4933_v14  ;;  %v8747_v33 = vpop.f32.mrb[95].mxu1 }
0x2be9   : > { %5058 = vrot.lane.b32.xlu1 %v10671_v17, %s11284_s15  ;;  %8751 = vmatmul.mubr.msk.bf16.vlgmr.msra.gmra.mrb[100].mxu0 %vm1624_vm2, %v10671_v17 }
0x2bea   : > { %8761 = vmatpush3.bf16.xpose.msra.mxu0 %v5066_v20  ;;  %8762 = vmatprep.mubr.msk.bf16.mxu0 %vm9712_vm1, %v9711_v16 }
0x2beb   : > { %8772 = vmatprep.subr.bf16.mxu0 %v9711_v16 }
0x2c5b   : > { %v5059_v21 = vpop.permute.xlu1 %5058 }
0x2c5c   : > { %8763 = vmatmul.mubr.msk.bf16.vlgmr.msra.gmra.mrb[104].mxu0 %vm1624_vm2, %v5059_v21 }
0x2c5d   : > { %8774 = vmatprep.mubr.msk.bf16.mxu0 %vm9712_vm1, %v9711_v16  ;;  %8773 = vmatpush3.bf16.msra.mxu0 %v5174_v63 }
0x2c5e   : > { %8784 = vmatprep.subr.bf16.mxu0 %v9711_v16 }
0x2cbc   : > { %v4988_v22 = vpop.f32.mrb[100].mxu0 }
0x2cbd   : > { %v4994_v23 = vmul.f32 0.35355338, %v4988_v22  ;;  %v8752_v25 = vpop.f32.mrb[101].mxu0 }
0x2cbe   : > { %v4991_v26 = vpop.f32.mrb[102].mxu0 }
0x2cbf   : > { %v8753_v27 = vpop.f32.mrb[103].mxu0  ;;  %v4995_v28 = vsel %vm1624_vm2, %v4994_v23, -inf }
0x2cc0   : > { %4996 = vmax.xlane.f32.xlu0 %v4995_v28 }
0x2d2f   : > { %v5102_v29 = vpop.f32.mrb[104].mxu0 }
0x2d30   : > { %v5108_v38 = vmul.f32 0.35355338, %v5102_v29  ;;  %v8764_v30 = vpop.f32.mrb[105].mxu0 }
0x2d31   : > { %v5105_v31 = vpop.f32.mrb[106].mxu0 }
0x2d32   : > { %v8765_v32 = vpop.f32.mrb[107].mxu0  ;;  %v5109_v34 = vsel %vm1624_vm2, %v5108_v38, -inf }
0x2d33   : > { %5110 = vmax.xlane.f32.xlu1 %v5109_v34 }
0x2d44   : > { %5121 = vrot.lane.b32.xlu1 %v10663_v7, %s11301_s14 }
0x2d4d   : > { %v4997_v36 = vpop.xlane.xlu0 %4996 }
0x2d4e   : > { %v4998_v39 = vsub.f32 %v4994_v23, %v4997_v36 }
0x2d50   : > { %v4999_v40 = vmul.f32 1.442695, %v4998_v39 }
0x2d52   : > { %9352 = vpow2.f32 %v4999_v40 }
0x2d5c   : > { %v9353_v41 = vpop.eup %9352 }
0x2d5d   : > { %v5001_v42 = vsel %vm1624_vm2, %v9353_v41, 0.0 }
0x2d5e   : > { %5002 = vadd.xlane.f32.xlu0 %v5001_v42 }
0x2dc0   : > { %v5111_v43 = vpop.xlane.xlu1 %5110 }
0x2dc1   : > { %v5112_v44 = vsub.f32 %v5108_v38, %v5111_v43 }
0x2dc3   : > { %v5113_v57 = vmul.f32 1.442695, %v5112_v44 }
0x2dc4   : > { %v5122_v12 = vpop.permute.xlu1 %5121 }
0x2dc5   : > { %9354 = vpow2.f32 %v5113_v57  ;;  %v5127_v54 = vsel %vm1689_vm3, %v5122_v12, 0 }
0x2dcf   : > { %v9355_v46 = vpop.eup %9354 }
0x2dd0   : > { %v5115_v47 = vsel %vm1624_vm2, %v9355_v46, 0.0 }
0x2dd1   : > { %5116 = vadd.xlane.f32.xlu0 %v5115_v47 }
0x2de7   : > { %5008 = vrot.lane.b32.xlu0 %v10663_v7, %s11302_s18 }
0x2deb   : > { %5264 = vrot.lane.b32.xlu0 %v10663_v7, %s11286_s2  ;;  %v5003_v48 = vpop.xlane.xlu0 %5002 }
0x2dec   : > { %9356 = vrcp.f32 %v5003_v48 }
0x2def   : > { %5262 = vrot.lane.b32.xlu0 %v10671_v17, %s11286_s2 }
0x2df6   : > { %v9357_v8 = vpop.eup %9356 }
0x2df7   : > { %v5005_v50 = vmul.f32 %v9357_v8, %v9353_v41 }
0x2df9   : > { %v5006_v53 = vpack.c.bf16 %v5005_v50, %v5005_v50 }
0x2e5e   : > { %v5117_v49 = vpop.xlane.xlu0 %5116 }
0x2e5f   : > { %9358 = vrcp.f32 %v5117_v49 }
0x2e62   : > { %v5009_v51 = vpop.permute.xlu0 %5008 }
0x2e63   : > { %v5014_v52 = vsel %vm1689_vm3, %v5009_v51, 0 }
0x2e64   : > { %8755 = vmatpush3.bf16.msra.mxu1 %v5014_v52 }
0x2e65   : > { %8766 = vmatprep.subr.bf16.mxu1 %v9711_v16 }
0x2e66   : > { %v5265_v3 = vpop.permute.xlu0 %5264 }
0x2e67   : > { %8757 = vmatmul.mubr.msk.bf16.vlgmr.msra.gmra.mrb[96].mxu1 %vm1624_vm2, %v5006_v53  ;;  %v5270_v9 = vsel %vm1624_vm2, %v5265_v3, 0 }
0x2e68   : > { %8767 = vmatpush3.bf16.msra.mxu1 %v5127_v54  ;;  %8768 = vmatprep.mubr.msk.bf16.mxu1 %vm9712_vm1, %v9711_v16 }
0x2e69   : > { %v9359_v56 = vpop.eup %9358  ;;  %8778 = vmatprep.subr.bf16.mxu1 %v9711_v16 }
0x2e6a   : > { %v5119_v58 = vmul.f32 %v9359_v56, %v9355_v46  ;;  %v5263_v11 = vpop.permute.xlu0 %5262  ;;  %v8036_v46 = vld [vmem:[%s11311_s29 + $0x8] sm:$0xf] }
0x2e6b   : > { %v5378_v47 = vsel %vm1689_vm3, %v8036_v46, 0 }
0x2e6c   : > { %v5120_v59 = vpack.c.bf16 %v5119_v58, %v5119_v58 }
0x2e6f   : > { %8769 = vmatmul.mubr.msk.bf16.vlgmr.msra.gmra.mrb[100].mxu1 %vm1624_vm2, %v5120_v59 }
0x2e70   : > { %8780 = vmatprep.mubr.msk.bf16.mxu1 %vm9712_vm1, %v9711_v16  ;;  %8779 = vmatpush3.bf16.msra.mxu1 %v5220_v61 }
0x2e71   : > { %8790 = vmatprep.subr.bf16.mxu1 %v9711_v16 }
0x2f3a   : > { %v5050_v0 = vpop.f32.mrb[96].mxu1 }
0x2f3b   : > { %v5056_v19 = vpack.c.bf16 %v5050_v0, %v5050_v0  ;;  %v8758_v24 = vpop.f32.mrb[97].mxu1 }
0x2f3c   : > { %v5053_v1 = vpop.f32.mrb[98].mxu1 }
0x2f3d   : > { %v8759_v2 = vpop.f32.mrb[99].mxu1  ;;  %8781 = vmatmul.mubr.msk.bf16.vlgmr.msra.gmra.mrb[104].mxu1 %vm1624_vm2, %v5056_v19 }
0x2f3e   : > { %8792 = vmatprep.mubr.msk.bf16.mxu1 %vm9712_vm1, %v9711_v16 }
0x2f42   : > { %v5163_v4 = vpop.f32.mrb[100].mxu1 }
0x2f43   : > { %v5169_v5 = vpack.c.bf16 %v5163_v4, %v5163_v4  ;;  %v8770_v18 = vpop.f32.mrb[101].mxu1 }
0x2f44   : > { %v5166_v6 = vpop.f32.mrb[102].mxu1 }
0x2f45   : > { %v8771_v10 = vpop.f32.mrb[103].mxu1  ;;  %8775 = vmatmul.mubr.msk.bf16.vlgmr.msra.gmra.mrb[108].mxu0 %vm1624_vm2, %v5169_v5 }
0x2f46   : > { %8785 = vmatpush3.bf16.xpose.msra.mxu0 %v5270_v9  ;;  %8786 = vmatprep.mubr.msk.bf16.mxu0 %vm9712_vm1, %v9711_v16  ;;  %v8037_v9 = vld [vmem:[%s11311_s29 + $0xc] sm:$0xf] }
0x2f47   : > { %8796 = vmatprep.subr.bf16.mxu0 %v9711_v16  ;;  %v5537_v10 = vsel %vm1689_vm3, %v8037_v9, 0 }
0x2f4d   : > { %8787 = vmatmul.mubr.msk.bf16.vlgmr.msra.gmra.mrb[112].mxu0 %vm1624_vm2, %v5263_v11 }
0x2f4e   : > { %8798 = vmatprep.mubr.msk.bf16.mxu0 %vm9712_vm1, %v9711_v16  ;;  %8797 = vmatpush3.bf16.msra.mxu0 %v5378_v47 }
0x2f4f   : > { %8808 = vmatprep.subr.bf16.mxu0 %v9711_v16 }
0x3010   : > { %v5256_v13 = vpop.f32.mrb[104].mxu1 }
0x3011   : > { %v8782_v14 = vpop.f32.mrb[105].mxu1 }
0x3012   : > { %v5259_v37 = vpop.f32.mrb[106].mxu1 }
0x3013   : > { %v8783_v15 = vpop.f32.mrb[107].mxu1 }
0x3018   : > { %v5210_v45 = vpop.f32.mrb[108].mxu0 }
0x3019   : > { %v10723_v33 = vadd.f32 %v5256_v13, %v5210_v45  ;;  %v8776_v20 = vpop.f32.mrb[109].mxu0  ;;  %v8050_v45 = vld [vmem:[%s11312_s30] ss:$0 sm:$0xff] }
0x301a   : > { %v5213_v21 = vpop.f32.mrb[110].mxu0 }
0x301b   : > { %v8777_v22 = vpop.f32.mrb[111].mxu0 }
0x3020   : > { %v5306_v23 = vpop.f32.mrb[112].mxu0 }
0x3021   : > { %v5312_v25 = vmul.f32 0.35355338, %v5306_v23  ;;  %v8788_v26 = vpop.f32.mrb[113].mxu0 }
0x3022   : > { %v5309_v27 = vpop.f32.mrb[114].mxu0 }
0x3023   : > { %v8789_v28 = vpop.f32.mrb[115].mxu0  ;;  %v5313_v29 = vsel %vm1624_vm2, %v5312_v25, -inf }
0x3024   : > { %5314 = vmax.xlane.f32.xlu1 %v5313_v29 }
0x3035   : > { %5423 = vrot.lane.b32.xlu1 %v10663_v7, %s11290_s8 }
0x3039   : > { %5421 = vrot.lane.b32.xlu1 %v10671_v17, %s11290_s8 }
0x30b1   : > { %v5315_v38 = vpop.xlane.xlu1 %5314 }
0x30b2   : > { %v5316_v30 = vsub.f32 %v5312_v25, %v5315_v38 }
0x30b4   : > { %v5317_v31 = vmul.f32 1.442695, %v5316_v30 }
0x30b5   : > { %v5424_v42 = vpop.permute.xlu1 %5423 }
0x30b6   : > { %9360 = vpow2.f32 %v5317_v31  ;;  %v5429_v44 = vsel %vm1624_vm2, %v5424_v42, 0  ;;  %v8051_v42 = vld [vmem:[%s11316_s0] ss:$0 sm:$0xff] }
0x30b9   : > { %v5422_v57 = vpop.permute.xlu1 %5421 }
0x30c0   : > { %v9361_v32 = vpop.eup %9360 }
0x30c1   : > { %v5319_v34 = vsel %vm1624_vm2, %v9361_v32, 0.0 }
0x30c2   : > { %5320 = vadd.xlane.f32.xlu0 %v5319_v34  ;;  %v9271_v34 = vld [vmem:[%s11314_s7 + $0x8] sm:$0xff]  }
0x30d8   : > { %5325 = vrot.lane.b32.xlu0 %v10663_v7, %s11288_s4 }
0x314f   : > { %v5321_v36 = vpop.xlane.xlu0 %5320 }
0x3150   : > { %9362 = vrcp.f32 %v5321_v36  ;;  %v9273_v36 = vld [vmem:[%s11315_s27 + $0x8] sm:$0xff]  }
0x3153   : > { %v5326_v39 = vpop.permute.xlu0 %5325 }
0x3154   : > { %v5331_v40 = vsel %vm1689_vm3, %v5326_v39, 0 }
0x3155   : > { %8791 = vmatpush3.bf16.msra.mxu1 %v5331_v40 }
0x3156   : > { %8802 = vmatprep.subr.bf16.mxu1 %v9711_v16 }
0x315a   : > { %v9363_v17 = vpop.eup %9362 }
0x315b   : > { %v5323_v41 = vmul.f32 %v9363_v17, %v9361_v32  ;;  %v9270_v32 = vld [vmem:[%s11313_s22] sm:$0xff]   ;;  %s11318_s22 = sld [smem:[#allocation58_spill]] }
0x315d   : > { %v5324_v43 = vpack.c.bf16 %v5323_v41, %v5323_v41 }
0x315f   : > { %8793 = vmatmul.mubr.msk.bf16.vlgmr.msra.gmra.mrb[108].mxu1 %vm1624_vm2, %v5324_v43 }
0x3160   : > { %8803 = vmatpush3.bf16.xpose.msra.mxu1 %v5429_v44  ;;  %8804 = vmatprep.mubr.msk.bf16.mxu1 %vm9712_vm1, %v9711_v16  ;;  %v8052_v44 = vld [vmem:[%s11317_s16] ss:$0 sm:$0xff] }
0x3161   : > { %8814 = vmatprep.subr.bf16.mxu1 %v9711_v16  ;;  %s11319_s7 = smov %s11318_s22 }
0x3167   : > { %8805 = vmatmul.mubr.msk.bf16.vlgmr.msra.gmra.mrb[112].mxu1 %vm1624_vm2, %v5422_v57 }
0x3168   : > { %8816 = vmatprep.mubr.msk.bf16.mxu1 %vm9712_vm1, %v9711_v16  ;;  %8815 = vmatpush3.bf16.msra.mxu1 %v5537_v10 }
0x3169   : > { %8828 = vmatprep.subr.bf16.mxu1 %v9711_v16 }
0x3232   : > { %v5367_v48 = vpop.f32.mrb[108].mxu1 }
0x3233   : > { %v5373_v8 = vpack.c.bf16 %v5367_v48, %v5367_v48  ;;  %v8794_v49 = vpop.f32.mrb[109].mxu1  ;;  %v9274_v48 = vld [vmem:[%s11315_s27 + $0x10] sm:$0xff]  }
0x3234   : > { %v5370_v50 = vpop.f32.mrb[110].mxu1  ;;  %v8053_v49 = vld [vmem:[%s11318_s22] ss:$0 sm:$0xff] }
0x3235   : > { %v8795_v51 = vpop.f32.mrb[111].mxu1  ;;  %8799 = vmatmul.mubr.msk.bf16.vlgmr.msra.gmra.mrb[116].mxu0 %vm1624_vm2, %v5373_v8  ;;  %v9275_v8 = vld [vmem:[%s11315_s27 + $0x18] sm:$0xff]  }
0x3236   : > { %8810 = vmatprep.mubr.msk.bf16.mxu0 %vm9712_vm1, %v9711_v16 }
0x323a   : > { %v5465_v52 = vpop.f32.mrb[112].mxu1 }
0x323b   : > { %v5471_v12 = vmul.f32 0.35355338, %v5465_v52  ;;  %v8806_v53 = vpop.f32.mrb[113].mxu1 }
0x323c   : > { %v5468_v54 = vpop.f32.mrb[114].mxu1 }
0x323d   : > { %v8807_v56 = vpop.f32.mrb[115].mxu1  ;;  %v5472_v58 = vsel %vm1624_vm2, %v5471_v12, -inf }
0x323e   : > { %5473 = vmax.xlane.f32.xlu0 %v5472_v58  ;;  %v8057_v58 = vld [vmem:[%s11320_s12] ss:$0 sm:$0xff] }
0x3254   : > { %5484 = vrot.lane.b32.xlu0 %v10663_v7, %s11291_s9 }
0x32cb   : > { %v5474_v59 = vpop.xlane.xlu0 %5473 }
0x32cc   : > { %v5475_v60 = vsub.f32 %v5471_v12, %v5474_v59 }
0x32ce   : > { %v5476_v61 = vmul.f32 1.442695, %v5475_v60 }
0x32cf   : > { %v5485_v62 = vpop.permute.xlu0 %5484 }
0x32d0   : > { %9364 = vpow2.f32 %v5476_v61  ;;  %v5490_v63 = vsel %vm1689_vm3, %v5485_v62, 0 }
0x32d1   : > { %8809 = vmatpush3.bf16.msra.mxu0 %v5490_v63 }
0x32d2   : > { %8820 = vmatprep.subr.bf16.mxu0 %v9711_v16 }
0x32da   : > { %v9365_v0 = vpop.eup %9364 }
0x32db   : > { %v5478_v19 = vsel %vm1624_vm2, %v9365_v0, 0.0 }
0x32dc   : > { %5479 = vadd.xlane.f32.xlu1 %v5478_v19 }
0x3308   : > { %v5414_v24 = vpop.f32.mrb[116].mxu0 }
0x3309   : > { %v5420_v1 = vadd.f32 %v5414_v24, %v10723_v33  ;;  %v8800_v2 = vpop.f32.mrb[117].mxu0 }
0x330a   : > { %v5417_v7 = vpop.f32.mrb[118].mxu0 }
0x330b   : > { %v8801_v3 = vpop.f32.mrb[119].mxu0 }
0x3369   : > { %v5480_v4 = vpop.xlane.xlu1 %5479 }
0x336a   : > { %9366 = vrcp.f32 %v5480_v4  ;;  %v9276_v4 = vld [vmem:[%s11296_s10 + $0x10] sm:$0xff]  }
0x3374   : > { %v9367_v5 = vpop.eup %9366 }
0x3375   : > { %v5482_v18 = vmul.f32 %v9367_v5, %v9365_v0  ;;  %v9277_v5 = vld [vmem:[%s11296_s10 + $0x18] sm:$0xff]  }
0x3377   : > { %v5483_v6 = vpack.c.bf16 %v5482_v18, %v5482_v18 }
0x3379   : > { %8811 = vmatmul.mubr.msk.bf16.vlgmr.msra.gmra.mrb[120].mxu0 %vm1624_vm2, %v5483_v6 }
0x337a   : > { %8824 = vmatprep.mubr.msk.bf16.mxu0 %vm9712_vm1, %v9711_v16  ;;  %8821 = vmatpush3.bf16.msra.mxu0 %v9270_v32 }
0x337b   : > { %8822 = vmatprep.subr.bf16.mxu0 %v9711_v16 }
0x337e   : > { %8823 = vmatpush3.bf16.msra.mxu0 %v9271_v34 }
0x337f   : > { %8840 = vmatprep.subr.bf16.mxu0 %v9711_v16 }
0x344c   : > { %v5526_v11 = vpop.f32.mrb[120].mxu0 }
0x344d   : > { %v5532_v13 = vpack.c.bf16 %v5526_v11, %v5526_v11  ;;  %v8812_v14 = vpop.f32.mrb[121].mxu0  ;;  %v8065_v11 = vld [vmem:[%s11298_s11 + $0x1] ss:$0 sm:$0xff] }
0x344e   : > { %v5529_v37 = vpop.f32.mrb[122].mxu0  ;;  %v8066_v14 = vld [vmem:[%s11299_s6 + $0x1] ss:$0 sm:$0xff] }
0x344f   : > { %v8813_v15 = vpop.f32.mrb[123].mxu0  ;;  %8817 = vmatmul.mubr.msk.bf16.vlgmr.msra.gmra.mrb[116].mxu1 %vm1624_vm2, %v5532_v13 }
0x3450   : > { %8836 = vmatprep.mubr.msk.bf16.mxu1 %vm9712_vm1, %v9711_v16 }
0x3522   : > { %v5573_v33 = vpop.f32.mrb[116].mxu1 }
0x3523   : > { %v5579_v20 = vadd.f32 %v5573_v33, %v5420_v1  ;;  %v8818_v21 = vpop.f32.mrb[117].mxu1  ;;  %v8077_v33 = vld [vmem:[%s11300_s20 + $0x1] ss:$0 sm:$0xff] }
0x3524   : > { %v5576_v22 = vpop.f32.mrb[118].mxu1 }
0x3525   : > { %v5586_v23 = vadd.f32 %v8050_v45, %v5579_v20  ;;  %v8819_v25 = vpop.f32.mrb[119].mxu1 }
0x3527   : > { %v5587_v26 = vadd.f32 %v5586_v23, %v10636_v35  ;;  %v9272_v35 = vld [vmem:[%s11315_s27] sm:$0xff]  }
0x3528   : > { %8829 = vmatpush3.bf16.msra.mxu1 %v9272_v35 }
0x3529   : > { %v5590_v27 = vsel %vm1516_vm0, %v5587_v26, 0.0  ;;  %8830 = vmatprep.subr.bf16.mxu1 %v9711_v16 }
0x352a   : > { %5591 = vadd.xlane.f32.xlu1 %v5590_v27 }
0x352c   : > { %8831 = vmatpush3.bf16.msra.mxu1 %v9273_v36 }
0x352d   : > { %8832 = vmatprep.subr.bf16.mxu1 %v9711_v16 }
0x3530   : > { %8833 = vmatpush3.bf16.msra.mxu1 %v9274_v48 }
0x3531   : > { %8834 = vmatprep.subr.bf16.mxu1 %v9711_v16 }
0x3534   : > { %8835 = vmatpush3.bf16.msra.mxu1 %v9275_v8 }
0x3535   : > { %8854 = vmatprep.subr.bf16.mxu1 %v9711_v16 }
0x35b7   : > { %v5592_v28 = vpop.xlane.xlu1 %5591 }
0x35b8   : > { %v5593_v29 = vmul.f32 0.03125, %v5592_v28 }
0x35ba   : > { %v5594_v38 = vsub.f32 %v5587_v26, %v5593_v29 }
0x35bc   : > { %v5595_v30 = vmul.f32 %v5594_v38, %v5594_v38 }
0x35be   : > { %v5596_v31 = vsel %vm1516_vm0, %v5595_v30, 0.0 }
0x35bf   : > { %5597 = vadd.xlane.f32.xlu1 %v5596_v31 }
0x364c   : > { %v5598_v39 = vpop.xlane.xlu1 %5597 }
0x364d   : > { %v5599_v40 = vmul.f32 0.03125, %v5598_v39 }
0x364f   : > { %v5600_v17 = vadd.f32 1e-05, %v5599_v40 }
0x3651   : > { %9368 = vrsqrt.f32 %v5600_v17 }
0x365b   : > { %v9369_v41 = vpop.eup %9368 }
0x365c   : > { %v5602_v43 = vmul.f32 %v9369_v41, %v5594_v38 }
0x365e   : > { %v5609_v57 = vmul.f32 %v8051_v42, %v5602_v43 }
0x3660   : > { %v5616_v46 = vadd.f32 %v8052_v44, %v5609_v57 }
0x3662   : > { %v5631_v47 = vpack.c.bf16 %v5616_v46, %v5616_v46 }
0x3664   : > { %8825 = vmatmul.mubr.msk.bf16.vlgmr.msra.gmra.mrb[124].mxu0 %vm1516_vm0, %v5631_v47 }
0x3665   : > { %8844 = vmatprep.mubr.msk.bf16.mxu0 %vm9712_vm1, %v9711_v16  ;;  %8841 = vmatpush3.bf16.msra.mxu0 %v9276_v4 }
0x3666   : > { %8842 = vmatprep.subr.bf16.mxu0 %v9711_v16 }
0x3669   : > { %8843 = vmatpush3.bf16.msra.mxu0 %v9277_v5 }
0x366a   : > { %8848 = vmatprep.subr.bf16.mxu0 %v9711_v16 }
0x3737   : > { %v5687_v50 = vpop.f32.mrb[124].mxu0 }
0x3738   : > { %v5688_v51 = vadd.f32 %v8053_v49, %v5687_v50  ;;  %v8826_v52 = vpop.f32.mrb[125].mxu0 }
0x3739   : > { %v5690_v12 = vpop.f32.mrb[126].mxu0 }
0x373a   : > { %v5693_v53 = vmax.f32 %v5688_v51, 0.0  ;;  %v8827_v54 = vpop.f32.mrb[127].mxu0 }
0x373c   : > { %v5694_v56 = vpack.c.bf16 %v5693_v53, %v5693_v53 }
0x373e   : > { %8837 = vmatmul.mubr.msk.bf16.vlgmr.msra.gmra.mrb[120].mxu1 %vm2401_vm4, %v5694_v56 }
0x373f   : > { %8856 = vmatprep.mubr.msk.bf16.mxu1 %vm9712_vm1, %v9711_v16 }
0x3811   : > { %v5762_v59 = vpop.f32.mrb[120].mxu1 }
0x3812   : > { %v5763_v60 = vadd.f32 %v8057_v58, %v5762_v59  ;;  %v8838_v61 = vpop.f32.mrb[121].mxu1 }
0x3813   : > { %v5765_v62 = vpop.f32.mrb[122].mxu1 }
0x3814   : > { %v10791_v63 = vadd.f32 %v5763_v60, %v5587_v26  ;;  %v8839_v0 = vpop.f32.mrb[123].mxu1 }
0x3816   : > { %v5773_v19 = vsel %vm1516_vm0, %v10791_v63, 0.0 }
0x3817   : > { %5774 = vadd.xlane.f32.xlu1 %v5773_v19 }
0x38a4   : > { %v5775_v24 = vpop.xlane.xlu1 %5774 }
0x38a5   : > { %v5776_v1 = vmul.f32 0.03125, %v5775_v24 }
0x38a7   : > { %v5777_v2 = vsub.f32 %v10791_v63, %v5776_v1 }
0x38a9   : > { %v5778_v7 = vmul.f32 %v5777_v2, %v5777_v2 }
0x38ab   : > { %v5779_v3 = vsel %vm1516_vm0, %v5778_v7, 0.0 }
0x38ac   : > { %5780 = vadd.xlane.f32.xlu1 %v5779_v3  ;;  %v8068_v3 = vld [vmem:[%s11303_s17 + $0x14] sm:$0xf] }
0x38ad   : > { %v6107_v4 = vsel %vm1689_vm3, %v8068_v3, 0 }
0x3939   : > { %v5781_v18 = vpop.xlane.xlu1 %5780 }
0x393a   : > { %v5782_v6 = vmul.f32 0.03125, %v5781_v18 }
0x393c   : > { %v5783_v9 = vadd.f32 1e-05, %v5782_v6 }
0x393e   : > { %9370 = vrsqrt.f32 %v5783_v9 }
0x3948   : > { %v9371_v10 = vpop.eup %9370 }
0x3949   : > { %v5785_v13 = vmul.f32 %v9371_v10, %v5777_v2  ;;  %v8067_v2 = vld [vmem:[%s11303_s17 + $0x10] sm:$0xf] }
0x394a   : > { %v6153_v7 = vsel %vm1689_vm3, %v8067_v2, 0 }
0x394b   : > { %v5792_v37 = vmul.f32 %v8065_v11, %v5785_v13 }
0x394d   : > { %v5799_v15 = vadd.f32 %v8066_v14, %v5792_v37 }
0x394f   : > { %v5817_v45 = vpack.c.bf16 %v5799_v15, %v5799_v15 }
0x3951   : > { %8845 = vmatmul.mubr.msk.bf16.vlgmr.msra.gmra.mrb[128].mxu0 %vm1516_vm0, %v5817_v45 }
0x3952   : > { %8850 = vmatprep.mubr.msk.bf16.mxu0 %vm9712_vm1, %v9711_v16 }
0x3a24   : > { %v5873_v20 = vpop.f32.mrb[128].mxu0 }
0x3a25   : > { %v5874_v21 = vadd.f32 %v8077_v33, %v5873_v20  ;;  %v8846_v22 = vpop.f32.mrb[129].mxu0 }
0x3a26   : > { %v5876_v23 = vpop.f32.mrb[130].mxu0 }
0x3a27   : > { %v10807_v25 = vpack.c.bf16 %v5874_v21, %v5874_v21  ;;  %v8847_v26 = vpop.f32.mrb[131].mxu0 }
0x3a29   : > { %5993 = vrot.lane.b32.xlu1 %v10807_v25, %s11301_s14  ;;  %5881 = vrot.lane.b32.xlu0 %v10807_v25, %s11302_s18 }
0x3a2d   : > { %5991 = vrot.lane.b32.xlu0 %v10807_v25, %s11284_s15 }
0x3a9b   : > { %v5882_v27 = vpop.permute.xlu0 %5881  ;;  %v5994_v29 = vpop.permute.xlu1 %5993 }
0x3a9c   : > { %v5887_v28 = vsel %vm1624_vm2, %v5882_v27, 0  ;;  %v5999_v38 = vsel %vm1624_vm2, %v5994_v29, 0 }
0x3a9d   : > { %8849 = vmatpush3.bf16.xpose.msra.mxu0 %v5887_v28 }
0x3a9e   : > { %8860 = vmatprep.subr.bf16.mxu0 %v9711_v16 }
0x3a9f   : > { %v5992_v30 = vpop.permute.xlu0 %5991 }
0x3aa4   : > { %8851 = vmatmul.mubr.msk.bf16.vlgmr.msra.gmra.mrb[132].mxu0 %vm1624_vm2, %v10807_v25 }
0x3aa5   : > { %8861 = vmatpush3.bf16.xpose.msra.mxu0 %v5999_v38  ;;  %8862 = vmatprep.mubr.msk.bf16.mxu0 %vm9712_vm1, %v9711_v16 }
0x3aa6   : > { %8872 = vmatprep.subr.bf16.mxu0 %v9711_v16 }
0x3aac   : > { %8863 = vmatmul.mubr.msk.bf16.vlgmr.msra.gmra.mrb[136].mxu0 %vm1624_vm2, %v5992_v30 }
0x3aad   : > { %8874 = vmatprep.mubr.msk.bf16.mxu0 %vm9712_vm1, %v9711_v16  ;;  %8873 = vmatpush3.bf16.msra.mxu0 %v6107_v4 }
0x3aae   : > { %8884 = vmatprep.subr.bf16.mxu0 %v9711_v16 }
0x3b77   : > { %v5923_v31 = vpop.f32.mrb[132].mxu0 }
0x3b78   : > { %v5929_v32 = vmul.f32 0.35355338, %v5923_v31  ;;  %v8852_v34 = vpop.f32.mrb[133].mxu0 }
0x3b79   : > { %v5926_v35 = vpop.f32.mrb[134].mxu0 }
0x3b7a   : > { %v8853_v36 = vpop.f32.mrb[135].mxu0  ;;  %v5930_v39 = vsel %vm1624_vm2, %v5929_v32, -inf }
0x3b7b   : > { %5931 = vmax.xlane.f32.xlu0 %v5930_v39 }
0x3b7f   : > { %v6035_v40 = vpop.f32.mrb[136].mxu0 }
0x3b80   : > { %v6041_v17 = vmul.f32 0.35355338, %v6035_v40  ;;  %v8864_v41 = vpop.f32.mrb[137].mxu0 }
0x3b81   : > { %v6038_v42 = vpop.f32.mrb[138].mxu0 }
0x3b82   : > { %v8865_v43 = vpop.f32.mrb[139].mxu0  ;;  %v6042_v44 = vsel %vm1624_vm2, %v6041_v17, -inf }
0x3b83   : > { %6043 = vmax.xlane.f32.xlu1 %v6042_v44 }
0x3b94   : > { %6054 = vrot.lane.b32.xlu1 %v10807_v25, %s11285_s1  ;;  %s11327_s1 = sld [smem:[#allocation73_spill]] }
0x3b98   : > { %6195 = vrot.lane.b32.xlu1 %v10807_v25, %s11286_s2 }
0x3b9a   : > { %p11328_p7 = scmp.ne.s32.totalorder %s11327_s1, 0 }
0x3c08   : > { %v5932_v57 = vpop.xlane.xlu0 %5931 }
0x3c09   : > { %v5933_v46 = vsub.f32 %v5929_v32, %v5932_v57 }
0x3c0b   : > { %v5934_v47 = vmul.f32 1.442695, %v5933_v46 }
0x3c0d   : > { %9372 = vpow2.f32 %v5934_v47 }
0x3c10   : > { %v6044_v48 = vpop.xlane.xlu1 %6043 }
0x3c11   : > { %v6045_v8 = vsub.f32 %v6041_v17, %v6044_v48 }
0x3c13   : > { %v6046_v49 = vmul.f32 1.442695, %v6045_v8 }
0x3c14   : > { %v6055_v61 = vpop.permute.xlu1 %6054 }
0x3c15   : > { %9374 = vpow2.f32 %v6046_v49  ;;  %v6060_v0 = vsel %vm1689_vm3, %v6055_v61, 0 }
0x3c17   : > { %v9373_v50 = vpop.eup %9372 }
0x3c18   : > { %v5936_v51 = vsel %vm1624_vm2, %v9373_v50, 0.0  ;;  %v6196_v20 = vpop.permute.xlu1 %6195 }
0x3c19   : > { %5937 = vadd.xlane.f32.xlu0 %v5936_v51 }
0x3c1f   : > { %v9375_v52 = vpop.eup %9374 }
0x3c20   : > { %v6048_v12 = vsel %vm1624_vm2, %v9375_v52, 0.0 }
0x3c21   : > { %6049 = vadd.xlane.f32.xlu0 %v6048_v12 }
0x3c37   : > { %5942 = vrot.lane.b32.xlu0 %v10807_v25, %s11287_s3  ;;  %s11324_s3 = sld [smem:[#allocation67_spill]] }
0x3c3b   : > { %6197 = vrot.lane.b32.xlu0 %v10807_v25, %s11288_s4 }
0x3ca6   : > { %v5938_v53 = vpop.xlane.xlu0 %5937 }
0x3ca7   : > { %9376 = vrcp.f32 %v5938_v53 }
0x3cae   : > { %v6050_v54 = vpop.xlane.xlu0 %6049 }
0x3caf   : > { %9378 = vrcp.f32 %v6050_v54 }
0x3cb1   : > { %v9377_v56 = vpop.eup %9376 }
0x3cb2   : > { %v5940_v58 = vmul.f32 %v9377_v56, %v9373_v50  ;;  %v5943_v59 = vpop.permute.xlu0 %5942 }
0x3cb3   : > { %v5948_v60 = vsel %vm1689_vm3, %v5943_v59, 0 }
0x3cb4   : > { %8855 = vmatpush3.bf16.msra.mxu1 %v5948_v60  ;;  %v5941_v62 = vpack.c.bf16 %v5940_v58, %v5940_v58 }
0x3cb5   : > { %8866 = vmatprep.subr.bf16.mxu1 %v9711_v16 }
0x3cb6   : > { %v6198_v11 = vpop.permute.xlu0 %6197 }
0x3cb7   : > { %8857 = vmatmul.mubr.msk.bf16.vlgmr.msra.gmra.mrb[124].mxu1 %vm1624_vm2, %v5941_v62  ;;  %v6203_v45 = vsel %vm1624_vm2, %v6198_v11, 0 }
0x3cb8   : > { %8867 = vmatpush3.bf16.msra.mxu1 %v6060_v0  ;;  %8868 = vmatprep.mubr.msk.bf16.mxu1 %vm9712_vm1, %v9711_v16 }
0x3cb9   : > { %v9379_v19 = vpop.eup %9378  ;;  %8878 = vmatprep.subr.bf16.mxu1 %v9711_v16 }
0x3cba   : > { %v6052_v24 = vmul.f32 %v9379_v19, %v9375_v52  ;;  %v8069_v52 = vld [vmem:[%s11303_s17 + $0x18] sm:$0xf] }
0x3cbb   : > { %v6311_v12 = vsel %vm1689_vm3, %v8069_v52, 0 }
0x3cbc   : > { %v6053_v1 = vpack.c.bf16 %v6052_v24, %v6052_v24 }
0x3cbf   : > { %8869 = vmatmul.mubr.msk.bf16.vlgmr.msra.gmra.mrb[128].mxu1 %vm1624_vm2, %v6053_v1 }
0x3cc0   : > { %8880 = vmatprep.mubr.msk.bf16.mxu1 %vm9712_vm1, %v9711_v16  ;;  %8879 = vmatpush3.bf16.msra.mxu1 %v6153_v7 }
0x3cc1   : > { %8890 = vmatprep.subr.bf16.mxu1 %v9711_v16 }
0x3d8a   : > { %v5984_v5 = vpop.f32.mrb[124].mxu1 }
0x3d8b   : > { %v5990_v18 = vpack.c.bf16 %v5984_v5, %v5984_v5  ;;  %v8858_v6 = vpop.f32.mrb[125].mxu1 }
0x3d8c   : > { %v5987_v9 = vpop.f32.mrb[126].mxu1 }
0x3d8d   : > { %v8859_v10 = vpop.f32.mrb[127].mxu1  ;;  %8881 = vmatmul.mubr.msk.bf16.vlgmr.msra.gmra.mrb[132].mxu1 %vm1624_vm2, %v5990_v18 }
0x3d8e   : > { %8892 = vmatprep.mubr.msk.bf16.mxu1 %vm9712_vm1, %v9711_v16 }
0x3d92   : > { %v6096_v13 = vpop.f32.mrb[128].mxu1 }
0x3d93   : > { %v6102_v14 = vpack.c.bf16 %v6096_v13, %v6096_v13  ;;  %v8870_v37 = vpop.f32.mrb[129].mxu1 }
0x3d94   : > { %v6099_v15 = vpop.f32.mrb[130].mxu1 }
0x3d95   : > { %v8871_v33 = vpop.f32.mrb[131].mxu1  ;;  %8875 = vmatmul.mubr.msk.bf16.vlgmr.msra.gmra.mrb[140].mxu0 %vm1624_vm2, %v6102_v14 }
0x3d96   : > { %8885 = vmatpush3.bf16.xpose.msra.mxu0 %v6203_v45  ;;  %8886 = vmatprep.mubr.msk.bf16.mxu0 %vm9712_vm1, %v9711_v16  ;;  %v9278_v45 = vld [vmem:[%s11305_s21 + $0x10] sm:$0xff]   ;;  %v9279_v33 = vld [vmem:[%s11305_s21 + $0x18] sm:$0xff]  }
0x3d97   : > { %8896 = vmatprep.subr.bf16.mxu0 %v9711_v16 }
0x3d9d   : > { %8887 = vmatmul.mubr.msk.bf16.vlgmr.msra.gmra.mrb[144].mxu0 %vm1624_vm2, %v6196_v20  ;;  %v8070_v20 = vld [vmem:[%s11303_s17 + $0x1c] sm:$0xf] }
0x3d9e   : > { %8898 = vmatprep.mubr.msk.bf16.mxu0 %vm9712_vm1, %v9711_v16  ;;  %8897 = vmatpush3.bf16.msra.mxu0 %v6311_v12 }
0x3d9f   : > { %8908 = vmatprep.subr.bf16.mxu0 %v9711_v16 }
0x3e60   : > { %v6189_v21 = vpop.f32.mrb[132].mxu1 }
0x3e61   : > { %v8882_v22 = vpop.f32.mrb[133].mxu1 }
0x3e62   : > { %v6192_v23 = vpop.f32.mrb[134].mxu1 }
0x3e63   : > { %v8883_v26 = vpop.f32.mrb[135].mxu1 }
0x3e68   : > { %v6143_v27 = vpop.f32.mrb[140].mxu0 }
0x3e69   : > { %v10865_v28 = vadd.f32 %v6189_v21, %v6143_v27  ;;  %v8876_v29 = vpop.f32.mrb[141].mxu0  ;;  %v6470_v21 = vsel %vm1689_vm3, %v8070_v20, 0 }
0x3e6a   : > { %v6146_v38 = vpop.f32.mrb[142].mxu0 }
0x3e6b   : > { %v8877_v30 = vpop.f32.mrb[143].mxu0 }
0x3e70   : > { %v6239_v31 = vpop.f32.mrb[144].mxu0 }
0x3e71   : > { %v6245_v32 = vmul.f32 0.35355338, %v6239_v31  ;;  %v8888_v34 = vpop.f32.mrb[145].mxu0 }
0x3e72   : > { %v6242_v35 = vpop.f32.mrb[146].mxu0 }
0x3e73   : > { %v8889_v36 = vpop.f32.mrb[147].mxu0  ;;  %v6246_v39 = vsel %vm1624_vm2, %v6245_v32, -inf }
0x3e74   : > { %6247 = vmax.xlane.f32.xlu0 %v6246_v39  ;;  %v8093_v36 = vld [vmem:[%s11304_s19 + $0x1] ss:$0 sm:$0xff] }
0x3e8a   : > { %6258 = vrot.lane.b32.xlu0 %v10807_v25, %s11289_s5  ;;  %s11321_s5 = sld [smem:[#allocation57_spill]] }
0x3e8e   : > { %6354 = vrot.lane.b32.xlu0 %v10807_v25, %s11290_s8 }
0x3f01   : > { %v6248_v40 = vpop.xlane.xlu0 %6247 }
0x3f02   : > { %v6249_v17 = vsub.f32 %v6245_v32, %v6248_v40 }
0x3f04   : > { %v6250_v41 = vmul.f32 1.442695, %v6249_v17 }
0x3f05   : > { %v6259_v42 = vpop.permute.xlu0 %6258 }
0x3f06   : > { %9380 = vpow2.f32 %v6250_v41  ;;  %v6264_v43 = vsel %vm1689_vm3, %v6259_v42, 0 }
0x3f07   : > { %8891 = vmatpush3.bf16.msra.mxu1 %v6264_v43 }
0x3f08   : > { %8902 = vmatprep.subr.bf16.mxu1 %v9711_v16 }
0x3f09   : > { %v6355_v51 = vpop.permute.xlu0 %6354 }
0x3f10   : > { %v9381_v44 = vpop.eup %9380 }
0x3f11   : > { %v6252_v57 = vsel %vm1624_vm2, %v9381_v44, 0.0 }
0x3f12   : > { %6253 = vadd.xlane.f32.xlu1 %v6252_v57 }
0x3f23   : > { %6356 = vrot.lane.b32.xlu1 %v10807_v25, %s11291_s9 }
0x3f9f   : > { %v6254_v46 = vpop.xlane.xlu1 %6253 }
0x3fa0   : > { %9382 = vrcp.f32 %v6254_v46 }
0x3fa3   : > { %v6357_v8 = vpop.permute.xlu1 %6356 }
0x3fa4   : > { %v6362_v50 = vsel %vm1624_vm2, %v6357_v8, 0 }
0x3faa   : > { %v9383_v47 = vpop.eup %9382 }
0x3fab   : > { %v6256_v48 = vmul.f32 %v9383_v47, %v9381_v44 }
0x3fad   : > { %v6257_v49 = vpack.c.bf16 %v6256_v48, %v6256_v48 }
0x3faf   : > { %8893 = vmatmul.mubr.msk.bf16.vlgmr.msra.gmra.mrb[136].mxu1 %vm1624_vm2, %v6257_v49 }
0x3fb0   : > { %8903 = vmatpush3.bf16.xpose.msra.mxu1 %v6362_v50  ;;  %8904 = vmatprep.mubr.msk.bf16.mxu1 %vm9712_vm1, %v9711_v16  ;;  %v9280_v50 = vld [vmem:[%s11306_s23 + $0x10] sm:$0xff]  }
0x3fb1   : > { %8914 = vmatprep.subr.bf16.mxu1 %v9711_v16 }
0x3fb7   : > { %8905 = vmatmul.mubr.msk.bf16.vlgmr.msra.gmra.mrb[140].mxu1 %vm1624_vm2, %v6355_v51 }
0x3fb8   : > { %8916 = vmatprep.mubr.msk.bf16.mxu1 %vm9712_vm1, %v9711_v16  ;;  %8915 = vmatpush3.bf16.msra.mxu1 %v6470_v21 }
0x3fb9   : > { %8928 = vmatprep.subr.bf16.mxu1 %v9711_v16 }
0x4082   : > { %v6300_v53 = vpop.f32.mrb[136].mxu1 }
0x4083   : > { %v6306_v54 = vpack.c.bf16 %v6300_v53, %v6300_v53  ;;  %v8894_v56 = vpop.f32.mrb[137].mxu1 }
0x4084   : > { %v6303_v58 = vpop.f32.mrb[138].mxu1 }
0x4085   : > { %v8895_v59 = vpop.f32.mrb[139].mxu1  ;;  %8899 = vmatmul.mubr.msk.bf16.vlgmr.msra.gmra.mrb[148].mxu0 %vm1624_vm2, %v6306_v54  ;;  %v8105_v54 = vld [vmem:[%s11307_s24 + $0x1] ss:$0 sm:$0xff] }
0x4086   : > { %8910 = vmatprep.mubr.msk.bf16.mxu0 %vm9712_vm1, %v9711_v16  ;;  %v8106_v58 = vld [vmem:[%s11308_s25 + $0x1] ss:$0 sm:$0xff] }
0x408a   : > { %v6398_v60 = vpop.f32.mrb[140].mxu1 }
0x408b   : > { %v6404_v61 = vmul.f32 0.35355338, %v6398_v60  ;;  %v8906_v62 = vpop.f32.mrb[141].mxu1 }
0x408c   : > { %v6401_v0 = vpop.f32.mrb[142].mxu1  ;;  %v8112_v62 = vld [vmem:[%s11310_s28 + $0x1] ss:$0 sm:$0xff] }
0x408d   : > { %v8907_v19 = vpop.f32.mrb[143].mxu1  ;;  %v6405_v24 = vsel %vm1624_vm2, %v6404_v61, -inf }
0x408e   : > { %6406 = vmax.xlane.f32.xlu1 %v6405_v24 }
0x411b   : > { %v6407_v1 = vpop.xlane.xlu1 %6406 }
0x411c   : > { %v6408_v2 = vsub.f32 %v6404_v61, %v6407_v1 }
0x411e   : > { %v6409_v7 = vmul.f32 1.442695, %v6408_v2 }
0x4120   : > { %9384 = vpow2.f32 %v6409_v7 }
0x412a   : > { %v9385_v3 = vpop.eup %9384 }
0x412b   : > { %v6411_v4 = vsel %vm1624_vm2, %v9385_v3, 0.0 }
0x412c   : > { %6412 = vadd.xlane.f32.xlu0 %v6411_v4 }
0x4142   : > { %6417 = vrot.lane.b32.xlu0 %v10807_v25, %s11292_s13  ;;  %s11323_s13 = sld [smem:[#allocation63_spill]] }
0x4158   : > { %v6347_v5 = vpop.f32.mrb[148].mxu0 }
0x4159   : > { %v6353_v18 = vadd.f32 %v6347_v5, %v10865_v28  ;;  %v8900_v6 = vpop.f32.mrb[149].mxu0 }
0x415a   : > { %v6350_v9 = vpop.f32.mrb[150].mxu0 }
0x415b   : > { %v8901_v10 = vpop.f32.mrb[151].mxu0 }
0x41b9   : > { %v6413_v11 = vpop.xlane.xlu0 %6412 }
0x41ba   : > { %9386 = vrcp.f32 %v6413_v11 }
0x41bd   : > { %v6418_v13 = vpop.permute.xlu0 %6417 }
0x41be   : > { %v6423_v14 = vsel %vm1689_vm3, %v6418_v13, 0 }
0x41bf   : > { %8909 = vmatpush3.bf16.msra.mxu0 %v6423_v14 }
0x41c0   : > { %8920 = vmatprep.subr.bf16.mxu0 %v9711_v16 }
0x41c4   : > { %v9387_v37 = vpop.eup %9386 }
0x41c5   : > { %v6415_v15 = vmul.f32 %v9387_v37, %v9385_v3 }
0x41c7   : > { %v6416_v25 = vpack.c.bf16 %v6415_v15, %v6415_v15 }
0x41c9   : > { %8911 = vmatmul.mubr.msk.bf16.vlgmr.msra.gmra.mrb[152].mxu0 %vm1624_vm2, %v6416_v25 }
0x41ca   : > { %8921 = vmatpush3.bf16.msra.mxu0 %v9278_v45  ;;  %8924 = vmatprep.mubr.msk.bf16.mxu0 %vm9712_vm1, %v9711_v16 }
0x41cb   : > { %8922 = vmatprep.subr.bf16.mxu0 %v9711_v16 }
0x41ce   : > { %8923 = vmatpush3.bf16.msra.mxu0 %v9279_v33 }
0x41cf   : > { %8936 = vmatprep.subr.bf16.mxu0 %v9711_v16 }
0x41d1   : > { %8925 = vmatmul.mubr.msk.bf16.vlgmr.msra.gmra.mrb[156].mxu0 %vm1516_vm0, %v10647_v55  ;;  %v8099_v55 = vld [vmem:[%s11309_s26 + $0x1] ss:$0 sm:$0xff] }
0x41d2   : > { %8938 = vmatprep.mubr.msk.bf16.mxu0 %vm9712_vm1, %v9711_v16 }
0x429c   : > { %v6459_v22 = vpop.f32.mrb[152].mxu0 }
0x429d   : > { %v6465_v23 = vpack.c.bf16 %v6459_v22, %v6459_v22  ;;  %v8912_v26 = vpop.f32.mrb[153].mxu0 }
0x429e   : > { %v6462_v27 = vpop.f32.mrb[154].mxu0 }
0x429f   : > { %v8913_v28 = vpop.f32.mrb[155].mxu0  ;;  %8917 = vmatmul.mubr.msk.bf16.vlgmr.msra.gmra.mrb[144].mxu1 %vm1624_vm2, %v6465_v23 }
0x42a0   : > { %8932 = vmatprep.mubr.msk.bf16.mxu1 %vm9712_vm1, %v9711_v16  ;;  %8929 = vmatpush3.bf16.msra.mxu1 %v9280_v50 }
0x42a1   : > { %8930 = vmatprep.subr.bf16.mxu1 %v9711_v16 }
0x42a4   : > { %v6580_v29 = vpop.f32.mrb[156].mxu0 }
0x42a5   : > { %v6581_v38 = vadd.f32 %v8099_v55, %v6580_v29  ;;  %v8926_v30 = vpop.f32.mrb[157].mxu0 }
0x42a6   : > { %v6583_v31 = vpop.f32.mrb[158].mxu0 }
0x42a7   : > { %v10916_v32 = vpack.c.bf16 %v6581_v38, %v6581_v38  ;;  %v8927_v34 = vpop.f32.mrb[159].mxu0 }
0x42a9   : > { %v6702_v35 = vsel %vm1624_vm2, %v10916_v32, 0 }
0x42aa   : > { %8937 = vmatpush3.bf16.xpose.msra.mxu0 %v6702_v35 }
0x42ab   : > { %8948 = vmatprep.subr.bf16.mxu0 %v9711_v16 }
0x4372   : > { %v6506_v39 = vpop.f32.mrb[144].mxu1 }
0x4373   : > { %v6512_v40 = vadd.f32 %v6506_v39, %v6353_v18  ;;  %v8918_v17 = vpop.f32.mrb[145].mxu1 }
0x4374   : > { %v6509_v41 = vpop.f32.mrb[146].mxu1 }
0x4375   : > { %v6519_v42 = vadd.f32 %v8093_v36, %v6512_v40  ;;  %v8919_v43 = vpop.f32.mrb[147].mxu1  ;;  %v8117_v40 = vld [vmem:[%s11311_s29 + $0x14] sm:$0xf] }
0x4376   : > { %v6924_v17 = vsel %vm1689_vm3, %v8117_v40, 0 }
0x4377   : > { %v10923_v44 = vadd.f32 %v6519_v42, %v10791_v63  ;;  %v9281_v63 = vld [vmem:[%s11306_s23 + $0x18] sm:$0xff]  }
0x4378   : > { %8931 = vmatpush3.bf16.msra.mxu1 %v9281_v63 }
0x4379   : > { %v6590_v57 = vsel %vm1516_vm0, %v10923_v44, 0.0  ;;  %8942 = vmatprep.subr.bf16.mxu1 %v9711_v16 }
0x437a   : > { %6591 = vadd.xlane.f32.xlu1 %v6590_v57 }
0x4407   : > { %v6592_v46 = vpop.xlane.xlu1 %6591 }
0x4408   : > { %v6593_v47 = vmul.f32 0.03125, %v6592_v46  ;;  %v8116_v46 = vld [vmem:[%s11311_s29 + $0x10] sm:$0xf] }
0x440a   : > { %v6594_v48 = vsub.f32 %v10923_v44, %v6593_v47 }
0x440c   : > { %v6595_v8 = vmul.f32 %v6594_v48, %v6594_v48 }
0x440e   : > { %v6596_v49 = vsel %vm1516_vm0, %v6595_v8, 0.0  ;;  %v6970_v8 = vsel %vm1689_vm3, %v8116_v46, 0 }
0x440f   : > { %6597 = vadd.xlane.f32.xlu1 %v6596_v49 }
0x4420   : > { %6810 = vrot.lane.b32.xlu1 %v10916_v32, %s11284_s15 }
0x449c   : > { %v6598_v51 = vpop.xlane.xlu1 %6597 }
0x449d   : > { %v6599_v52 = vmul.f32 0.03125, %v6598_v51 }
0x449f   : > { %v6600_v12 = vadd.f32 1e-05, %v6599_v52 }
0x44a0   : > { %v6811_v1 = vpop.permute.xlu1 %6810 }
0x44a1   : > { %9388 = vrsqrt.f32 %v6600_v12  ;;  %v6816_v4 = vsel %vm1624_vm2, %v6811_v1, 0 }
0x44ab   : > { %v9389_v53 = vpop.eup %9388 }
0x44ac   : > { %v6602_v56 = vmul.f32 %v9389_v53, %v6594_v48 }
0x44ae   : > { %v6609_v59 = vmul.f32 %v8105_v54, %v6602_v56 }
0x44b0   : > { %v6616_v60 = vadd.f32 %v8106_v58, %v6609_v59 }
0x44b2   : > { %v6617_v61 = vpack.c.bf16 %v6616_v60, %v6616_v60 }
0x44b4   : > { %8933 = vmatmul.mubr.msk.bf16.vlgmr.msra.gmra.mrb[148].mxu1 %vm1516_vm0, %v6617_v61 }
0x44b5   : > { %8944 = vmatprep.mubr.msk.bf16.mxu1 %vm9712_vm1, %v9711_v16 }
0x4587   : > { %v6680_v0 = vpop.f32.mrb[148].mxu1 }
0x4588   : > { %v6681_v19 = vadd.f32 %v8112_v62, %v6680_v0  ;;  %v8934_v24 = vpop.f32.mrb[149].mxu1 }
0x4589   : > { %v6683_v2 = vpop.f32.mrb[150].mxu1 }
0x458a   : > { %v10941_v7 = vpack.c.bf16 %v6681_v19, %v6681_v19  ;;  %v8935_v3 = vpop.f32.mrb[151].mxu1 }
0x458c   : > { %6808 = vrot.lane.b32.xlu0 %v10941_v7, %s11284_s15  ;;  %8939 = vmatmul.mubr.msk.bf16.vlgmr.msra.gmra.mrb[160].mxu0 %vm1624_vm2, %v10941_v7 }
0x458d   : > { %8949 = vmatpush3.bf16.xpose.msra.mxu0 %v6816_v4  ;;  %8950 = vmatprep.mubr.msk.bf16.mxu0 %vm9712_vm1, %v9711_v16 }
0x458e   : > { %8960 = vmatprep.subr.bf16.mxu0 %v9711_v16 }
0x45fe   : > { %v6809_v5 = vpop.permute.xlu0 %6808 }
0x45ff   : > { %8951 = vmatmul.mubr.msk.bf16.vlgmr.msra.gmra.mrb[164].mxu0 %vm1624_vm2, %v6809_v5 }
0x4600   : > { %8962 = vmatprep.mubr.msk.bf16.mxu0 %vm9712_vm1, %v9711_v16  ;;  %8961 = vmatpush3.bf16.msra.mxu0 %v6924_v17 }
0x4601   : > { %8972 = vmatprep.subr.bf16.mxu0 %v9711_v16 }
0x465f   : > { %v6738_v18 = vpop.f32.mrb[160].mxu0 }
0x4660   : > { %v6744_v6 = vmul.f32 0.35355338, %v6738_v18  ;;  %v8940_v9 = vpop.f32.mrb[161].mxu0 }
0x4661   : > { %v6741_v10 = vpop.f32.mrb[162].mxu0 }
0x4662   : > { %v8941_v11 = vpop.f32.mrb[163].mxu0  ;;  %v6745_v13 = vsel %vm1624_vm2, %v6744_v6, -inf }
0x4663   : > { %6746 = vmax.xlane.f32.xlu0 %v6745_v13 }
0x46d2   : > { %v6852_v14 = vpop.f32.mrb[164].mxu0 }
0x46d3   : > { %v6858_v37 = vmul.f32 0.35355338, %v6852_v14  ;;  %v8952_v15 = vpop.f32.mrb[165].mxu0 }
0x46d4   : > { %v6855_v45 = vpop.f32.mrb[166].mxu0 }
0x46d5   : > { %v8953_v25 = vpop.f32.mrb[167].mxu0  ;;  %v6859_v33 = vsel %vm1624_vm2, %v6858_v37, -inf }
0x46d6   : > { %6860 = vmax.xlane.f32.xlu1 %v6859_v33 }
0x46e7   : > { %6758 = vrot.lane.b32.xlu1 %v10916_v32, %s11302_s18 }
0x46eb   : > { %7014 = vrot.lane.b32.xlu1 %v10916_v32, %s11286_s2 }
0x46ef   : > { %7012 = vrot.lane.b32.xlu1 %v10941_v7, %s11286_s2 }
0x46f0   : > { %v6747_v20 = vpop.xlane.xlu0 %6746 }
0x46f1   : > { %v6748_v21 = vsub.f32 %v6744_v6, %v6747_v20 }
0x46f3   : > { %v6749_v22 = vmul.f32 1.442695, %v6748_v21 }
0x46f5   : > { %9390 = vpow2.f32 %v6749_v22 }
0x46ff   : > { %v9391_v23 = vpop.eup %9390 }
0x4700   : > { %v6751_v26 = vsel %vm1624_vm2, %v9391_v23, 0.0 }
0x4701   : > { %6752 = vadd.xlane.f32.xlu0 %v6751_v26 }
0x4763   : > { %v6861_v27 = vpop.xlane.xlu1 %6860 }
0x4764   : > { %v6862_v28 = vsub.f32 %v6858_v37, %v6861_v27 }
0x4766   : > { %v6863_v55 = vmul.f32 1.442695, %v6862_v28 }
0x4767   : > { %v6759_v29 = vpop.permute.xlu1 %6758 }
0x4768   : > { %9392 = vpow2.f32 %v6863_v55  ;;  %v6764_v38 = vsel %vm1689_vm3, %v6759_v29, 0  ;;  %v8118_v55 = vld [vmem:[%s11311_s29 + $0x18] sm:$0xf] }
0x4769   : > { %8943 = vmatpush3.bf16.msra.mxu1 %v6764_v38  ;;  %v7128_v29 = vsel %vm1689_vm3, %v8118_v55, 0 }
0x476a   : > { %8954 = vmatprep.subr.bf16.mxu1 %v9711_v16 }
0x476b   : > { %v7015_v12 = vpop.permute.xlu1 %7014 }
0x476c   : > { %v7020_v59 = vsel %vm1624_vm2, %v7015_v12, 0 }
0x476f   : > { %v7013_v61 = vpop.permute.xlu1 %7012 }
0x4772   : > { %v9393_v30 = vpop.eup %9392 }
0x4773   : > { %v6865_v31 = vsel %vm1624_vm2, %v9393_v30, 0.0 }
0x4774   : > { %6866 = vadd.xlane.f32.xlu0 %v6865_v31 }
0x478a   : > { %6871 = vrot.lane.b32.xlu0 %v10916_v32, %s11301_s14  ;;  %s11326_s14 = sld [smem:[#allocation65_spill]] }
0x478e   : > { %v6753_v34 = vpop.xlane.xlu0 %6752 }
0x478f   : > { %9394 = vrcp.f32 %v6753_v34 }
0x4799   : > { %v9395_v35 = vpop.eup %9394 }
0x479a   : > { %v6755_v36 = vmul.f32 %v9395_v35, %v9391_v23 }
0x479c   : > { %v6756_v39 = vpack.c.bf16 %v6755_v36, %v6755_v36 }
0x479e   : > { %8945 = vmatmul.mubr.msk.bf16.vlgmr.msra.gmra.mrb[152].mxu1 %vm1624_vm2, %v6756_v39 }
0x479f   : > { %8956 = vmatprep.mubr.msk.bf16.mxu1 %vm9712_vm1, %v9711_v16 }
0x4801   : > { %v6867_v41 = vpop.xlane.xlu0 %6866 }
0x4802   : > { %9396 = vrcp.f32 %v6867_v41 }
0x4805   : > { %v6872_v42 = vpop.permute.xlu0 %6871 }
0x4806   : > { %v6877_v43 = vsel %vm1689_vm3, %v6872_v42, 0 }
0x4807   : > { %8955 = vmatpush3.bf16.msra.mxu1 %v6877_v43 }
0x4808   : > { %8966 = vmatprep.subr.bf16.mxu1 %v9711_v16 }
0x480c   : > { %v9397_v57 = vpop.eup %9396 }
0x480d   : > { %v6869_v47 = vmul.f32 %v9397_v57, %v9393_v30 }
0x480f   : > { %v6870_v48 = vpack.c.bf16 %v6869_v47, %v6869_v47 }
0x4811   : > { %8957 = vmatmul.mubr.msk.bf16.vlgmr.msra.gmra.mrb[156].mxu1 %vm1624_vm2, %v6870_v48 }
0x4812   : > { %8967 = vmatpush3.bf16.msra.mxu1 %v6970_v8  ;;  %8968 = vmatprep.mubr.msk.bf16.mxu1 %vm9712_vm1, %v9711_v16 }
0x4813   : > { %8978 = vmatprep.subr.bf16.mxu1 %v9711_v16 }
0x4871   : > { %v6800_v49 = vpop.f32.mrb[152].mxu1 }
0x4872   : > { %v6806_v50 = vpack.c.bf16 %v6800_v49, %v6800_v49  ;;  %v8946_v63 = vpop.f32.mrb[153].mxu1 }
0x4873   : > { %v6803_v51 = vpop.f32.mrb[154].mxu1 }
0x4874   : > { %v8947_v52 = vpop.f32.mrb[155].mxu1  ;;  %8969 = vmatmul.mubr.msk.bf16.vlgmr.msra.gmra.mrb[160].mxu1 %vm1624_vm2, %v6806_v50 }
0x4875   : > { %8980 = vmatprep.mubr.msk.bf16.mxu1 %vm9712_vm1, %v9711_v16 }
0x48e4   : > { %v6913_v53 = vpop.f32.mrb[156].mxu1 }
0x48e5   : > { %v6919_v54 = vpack.c.bf16 %v6913_v53, %v6913_v53  ;;  %v8958_v56 = vpop.f32.mrb[157].mxu1 }
0x48e6   : > { %v6916_v58 = vpop.f32.mrb[158].mxu1 }
0x48e7   : > { %v8959_v60 = vpop.f32.mrb[159].mxu1  ;;  %8963 = vmatmul.mubr.msk.bf16.vlgmr.msra.gmra.mrb[168].mxu0 %vm1624_vm2, %v6919_v54 }
0x48e8   : > { %8973 = vmatpush3.bf16.xpose.msra.mxu0 %v7020_v59  ;;  %8974 = vmatprep.mubr.msk.bf16.mxu0 %vm9712_vm1, %v9711_v16 }
0x48e9   : > { %8984 = vmatprep.subr.bf16.mxu0 %v9711_v16 }
0x48ef   : > { %8975 = vmatmul.mubr.msk.bf16.vlgmr.msra.gmra.mrb[172].mxu0 %vm1624_vm2, %v7013_v61 }
0x48f0   : > { %8986 = vmatprep.mubr.msk.bf16.mxu0 %vm9712_vm1, %v9711_v16  ;;  %8985 = vmatpush3.bf16.msra.mxu0 %v7128_v29  ;;  %v9286_v29 = vld [vmem:[%s11315_s27 + $0x30] sm:$0xff]  }
0x48f1   : > { %8996 = vmatprep.subr.bf16.mxu0 %v9711_v16 }
0x4947   : > { %v7006_v62 = vpop.f32.mrb[160].mxu1 }
0x4948   : > { %v8970_v0 = vpop.f32.mrb[161].mxu1 }
0x4949   : > { %v7009_v19 = vpop.f32.mrb[162].mxu1 }
0x494a   : > { %v8971_v24 = vpop.f32.mrb[163].mxu1 }
0x494b   : > { %v8133_v24 = vld [vmem:[%s11312_s30 + $0x1] ss:$0 sm:$0xff] }
0x49ba   : > { %v6960_v1 = vpop.f32.mrb[168].mxu0 }
0x49bb   : > { %v10993_v2 = vadd.f32 %v7006_v62, %v6960_v1  ;;  %v8964_v3 = vpop.f32.mrb[169].mxu0 }
0x49bc   : > { %v6963_v4 = vpop.f32.mrb[170].mxu0 }
0x49bd   : > { %v8965_v5 = vpop.f32.mrb[171].mxu0 }
0x49c2   : > { %v7056_v18 = vpop.f32.mrb[172].mxu0 }
0x49c3   : > { %v7062_v6 = vmul.f32 0.35355338, %v7056_v18  ;;  %v8976_v9 = vpop.f32.mrb[173].mxu0 }
0x49c4   : > { %v7059_v10 = vpop.f32.mrb[174].mxu0 }
0x49c5   : > { %v8977_v11 = vpop.f32.mrb[175].mxu0  ;;  %v7063_v13 = vsel %vm1624_vm2, %v7062_v6, -inf }
0x49c6   : > { %7064 = vmax.xlane.f32.xlu0 %v7063_v13 }
0x49dc   : > { %7075 = vrot.lane.b32.xlu0 %v10916_v32, %s11288_s4  ;;  %s1482_s4 = sand.u32 1, %s11324_s3  }
0x49e0   : > { %7171 = vrot.lane.b32.xlu0 %v10941_v7, %s11290_s8 }
0x4a53   : > { %v7065_v14 = vpop.xlane.xlu0 %7064 }
0x4a54   : > { %v7066_v37 = vsub.f32 %v7062_v6, %v7065_v14 }
0x4a56   : > { %v7067_v15 = vmul.f32 1.442695, %v7066_v37 }
0x4a57   : > { %v7076_v45 = vpop.permute.xlu0 %7075 }
0x4a58   : > { %9398 = vpow2.f32 %v7067_v15  ;;  %v7081_v25 = vsel %vm1689_vm3, %v7076_v45, 0  ;;  %v9282_v15 = vld [vmem:[%s11321_s5 + $0x10] sm:$0xff]   ;;  %v9283_v45 = vld [vmem:[%s11321_s5 + $0x18] sm:$0xff]  }
0x4a59   : > { %8979 = vmatpush3.bf16.msra.mxu1 %v7081_v25  ;;  %v9285_v25 = vld [vmem:[%s11315_s27 + $0x28] sm:$0xff]  }
0x4a5a   : > { %8990 = vmatprep.subr.bf16.mxu1 %v9711_v16 }
0x4a5b   : > { %v7172_v28 = vpop.permute.xlu0 %7171 }
0x4a62   : > { %v9399_v33 = vpop.eup %9398 }
0x4a63   : > { %v7069_v20 = vsel %vm1624_vm2, %v9399_v33, 0.0 }
0x4a64   : > { %7070 = vadd.xlane.f32.xlu1 %v7069_v20 }
0x4a75   : > { %7173 = vrot.lane.b32.xlu1 %v10916_v32, %s11290_s8  ;;  %s11325_s8 = sld [smem:[#allocation70_spill]] }
0x4a7b   : > { %s8169_s2 = sshll.u32 %s11325_s8, 7  ;;  %s9724_s8 = smov [#allocation13]  }
0x4a7c   : > { %s11067_s22 = scalar_lea.hbm %s11326_s14, %s8169_s2 }
0x4af1   : > { %v7071_v21 = vpop.xlane.xlu1 %7070 }
0x4af2   : > { %9400 = vrcp.f32 %v7071_v21 }
0x4af5   : > { %v7174_v23 = vpop.permute.xlu1 %7173 }
0x4af6   : > { %v7179_v27 = vsel %vm1624_vm2, %v7174_v23, 0 }
0x4afc   : > { %v9401_v7 = vpop.eup %9400 }
0x4afd   : > { %v7073_v22 = vmul.f32 %v9401_v7, %v9399_v33 }
0x4aff   : > { %v7074_v26 = vpack.c.bf16 %v7073_v22, %v7073_v22  ;;  %v8136_v22 = vld [vmem:[%s11316_s0 + $0x1] ss:$0 sm:$0xff] }
0x4b01   : > { %8981 = vmatmul.mubr.msk.bf16.vlgmr.msra.gmra.mrb[164].mxu1 %vm1624_vm2, %v7074_v26 }
0x4b02   : > { %8991 = vmatpush3.bf16.xpose.msra.mxu1 %v7179_v27  ;;  %8992 = vmatprep.mubr.msk.bf16.mxu1 %vm9712_vm1, %v9711_v16 }
0x4b03   : > { %9002 = vmatprep.subr.bf16.mxu1 %v9711_v16 }
0x4b09   : > { %8993 = vmatmul.mubr.msk.bf16.vlgmr.msra.gmra.mrb[168].mxu1 %vm1624_vm2, %v7172_v28 }
0x4b0a   : > { %9004 = vmatprep.mubr.msk.bf16.mxu1 %vm9712_vm1, %v9711_v16 }
0x4bd4   : > { %v7117_v38 = vpop.f32.mrb[164].mxu1 }
0x4bd5   : > { %v7123_v30 = vpack.c.bf16 %v7117_v38, %v7117_v38  ;;  %v8982_v31 = vpop.f32.mrb[165].mxu1  ;;  %v9287_v38 = vld [vmem:[%s11315_s27 + $0x38] sm:$0xff]  }
0x4bd6   : > { %v7120_v34 = vpop.f32.mrb[166].mxu1 }
0x4bd7   : > { %v8983_v35 = vpop.f32.mrb[167].mxu1  ;;  %8987 = vmatmul.mubr.msk.bf16.vlgmr.msra.gmra.mrb[176].mxu0 %vm1624_vm2, %v7123_v30  ;;  %v8152_v30 = vld [vmem:[%s11319_s7 + $0x1] ss:$0 sm:$0xff] }
0x4bd8   : > { %8998 = vmatprep.mubr.msk.bf16.mxu0 %vm9712_vm1, %v9711_v16 }
0x4bdc   : > { %v7215_v36 = vpop.f32.mrb[168].mxu1 }
0x4bdd   : > { %v7221_v39 = vmul.f32 0.35355338, %v7215_v36  ;;  %v8994_v40 = vpop.f32.mrb[169].mxu1 }
0x4bde   : > { %v7218_v17 = vpop.f32.mrb[170].mxu1 }
0x4bdf   : > { %v8995_v41 = vpop.f32.mrb[171].mxu1  ;;  %v7222_v42 = vsel %vm1624_vm2, %v7221_v39, -inf }
0x4be0   : > { %7223 = vmax.xlane.f32.xlu1 %v7222_v42  ;;  %v8156_v41 = vld [vmem:[%s11320_s12 + $0x1] ss:$0 sm:$0xff] }
0x4c6d   : > { %v7224_v43 = vpop.xlane.xlu1 %7223 }
0x4c6e   : > { %v7225_v57 = vsub.f32 %v7221_v39, %v7224_v43 }
0x4c70   : > { %v7226_v46 = vmul.f32 1.442695, %v7225_v57 }
0x4c72   : > { %9402 = vpow2.f32 %v7226_v46 }
0x4c7c   : > { %v9403_v47 = vpop.eup %9402 }
0x4c7d   : > { %v7228_v48 = vsel %vm1624_vm2, %v9403_v47, 0.0 }
0x4c7e   : > { %7229 = vadd.xlane.f32.xlu0 %v7228_v48 }
0x4c94   : > { %7234 = vrot.lane.b32.xlu0 %v10916_v32, %s11291_s9  ;;  %v8119_v32 = vld [vmem:[%s11311_s29 + $0x1c] sm:$0xf]  ;;  %s11322_s9 = smov %s11317_s16  ;;  %s7853_s16 = sshll.u32 %s1482_s4, 3 }
0x4c95   : > { %v7287_v59 = vsel %vm1689_vm3, %v8119_v32, 0  ;;  %v8137_v26 = vld [vmem:[%s11322_s9 + $0x1] ss:$0 sm:$0xff]  ;;  %s1484_s15 = scalar_lea.vmem [#allocation13], %s7853_s16  ;;  %s7623_s9 = scalar_lea.sflag [#allocation4], %s1482_s4 }
0x4c96   : > { %9003 = vmatpush3.bf16.msra.mxu1 %v7287_v59  ;;  %v8162_v59 = vld [vmem:[#allocation8] ss:$0 sm:$0xff]  ;;  %s7636_s18 = sshll.u32 %s1484_s15, 4  ;;  %s9582_s16 = sshll.u32 %s9724_s8, 4  ;;  %s11069_s18 = int_to_ptr.vmem [resolvable:$true] %s7636_s18  ;;  %s9583_s16 = int_to_ptr.vmem [resolvable:$false] %s9582_s16 }
0x4c97   : > { %9016 = vmatprep.subr.bf16.mxu1 %v9711_v16  ;;  %s9578_s3 = scalar_lea.vmem %s11069_s18, 128  ;;  %s9584_s0 = scalar_lea.vmem %s9583_s16, 256 }
0x4c98   : > { %p9579_p10 = scmp.ne.s32.totalorder %s11069_s18, %s9578_s3  ;;  %p9585_p13 = scmp.lt.s32.totalorder %s11069_s18, %s9583_s16 }
0x4c99   : > { %p9586_p1 = scmp.lt.s32.totalorder %s9584_s0, %s9578_s3 }
0x4c9a   : > { %p9580_p8 = pnand %p9579_p10, %p11328_p7 }
0x4c9b   : > { %p9587_p2 = por %p9586_p1, %p9585_p13 }
0x4c9c   : > { %p9581_p11 = pneg %p9580_p8 }
0x4c9e   : > { %p9588_p0 = pnand %p9587_p2, %p9581_p11 }
0x4caa   : > { %v7164_v8 = vpop.f32.mrb[176].mxu0 }
0x4cab   : > { %v7170_v49 = vadd.f32 %v7164_v8, %v10993_v2  ;;  %v8988_v50 = vpop.f32.mrb[177].mxu0 }
0x4cac   : > { %v7167_v63 = vpop.f32.mrb[178].mxu0 }
0x4cad   : > { %v8989_v51 = vpop.f32.mrb[179].mxu0 }
0x4d0b   : > { %v7230_v52 = vpop.xlane.xlu0 %7229 }
0x4d0c   : > { %9404 = vrcp.f32 %v7230_v52 }
0x4d0f   : > { %v7235_v12 = vpop.permute.xlu0 %7234 }
0x4d10   : > { %v7240_v53 = vsel %vm1689_vm3, %v7235_v12, 0  ;;  %v9288_v12 = vld [vmem:[%s11323_s13] sm:$0xff]  }
0x4d11   : > { %8997 = vmatpush3.bf16.msra.mxu0 %v7240_v53  ;;  %v9289_v53 = vld [vmem:[%s11323_s13 + $0x8] sm:$0xff]  }
0x4d12   : > { %9008 = vmatprep.subr.bf16.mxu0 %v9711_v16 }
0x4d16   : > { %v9405_v54 = vpop.eup %9404 }
0x4d17   : > { %v7232_v56 = vmul.f32 %v9405_v54, %v9403_v47 }
0x4d19   : > { %v7233_v58 = vpack.c.bf16 %v7232_v56, %v7232_v56 }
0x4d1b   : > { %8999 = vmatmul.mubr.msk.bf16.vlgmr.msra.gmra.mrb[180].mxu0 %vm1624_vm2, %v7233_v58 }
0x4d1c   : > { %9012 = vmatprep.mubr.msk.bf16.mxu0 %vm9712_vm1, %v9711_v16  ;;  %9009 = vmatpush3.bf16.msra.mxu0 %v9282_v15 }
0x4d1d   : > { %9010 = vmatprep.subr.bf16.mxu0 %v9711_v16 }
0x4d20   : > { %9011 = vmatpush3.bf16.msra.mxu0 %v9283_v45 }
0x4d21   : > { %9028 = vmatprep.subr.bf16.mxu0 %v9711_v16 }
0x4dee   : > { %v7276_v60 = vpop.f32.mrb[180].mxu0 }
0x4def   : > { %v7282_v61 = vpack.c.bf16 %v7276_v60, %v7276_v60  ;;  %v9000_v62 = vpop.f32.mrb[181].mxu0 }
0x4df0   : > { %v7279_v0 = vpop.f32.mrb[182].mxu0 }
0x4df1   : > { %v9001_v19 = vpop.f32.mrb[183].mxu0  ;;  %9005 = vmatmul.mubr.msk.bf16.vlgmr.msra.gmra.mrb[172].mxu1 %vm1624_vm2, %v7282_v61  ;;  %v8163_v61 = vld [vmem:[#allocation10] ss:$0 sm:$0xff] }
0x4df2   : > { %9024 = vmatprep.mubr.msk.bf16.mxu1 %vm9712_vm1, %v9711_v16 }
0x4ec4   : > { %v7323_v1 = vpop.f32.mrb[172].mxu1 }
0x4ec5   : > { %v7329_v2 = vadd.f32 %v7323_v1, %v7170_v49  ;;  %v9006_v3 = vpop.f32.mrb[173].mxu1 }
0x4ec6   : > { %v7326_v4 = vpop.f32.mrb[174].mxu1 }
0x4ec7   : > { %v7336_v5 = vadd.f32 %v8133_v24, %v7329_v2  ;;  %v9007_v18 = vpop.f32.mrb[175].mxu1 }
0x4ec9   : > { %v7337_v6 = vadd.f32 %v7336_v5, %v10923_v44  ;;  %v9284_v44 = vld [vmem:[%s11315_s27 + $0x20] sm:$0xff]  }
0x4eca   : > { %9017 = vmatpush3.bf16.msra.mxu1 %v9284_v44 }
0x4ecb   : > { %v7342_v9 = vsel %vm1516_vm0, %v7337_v6, 0.0  ;;  %9018 = vmatprep.subr.bf16.mxu1 %v9711_v16 }
0x4ecc   : > { %7343 = vadd.xlane.f32.xlu1 %v7342_v9 }
0x4ece   : > { %9019 = vmatpush3.bf16.msra.mxu1 %v9285_v25 }
0x4ecf   : > { %9020 = vmatprep.subr.bf16.mxu1 %v9711_v16 }
0x4ed2   : > { %9021 = vmatpush3.bf16.msra.mxu1 %v9286_v29 }
0x4ed3   : > { %9022 = vmatprep.subr.bf16.mxu1 %v9711_v16 }
0x4ed6   : > { %9023 = vmatpush3.bf16.msra.mxu1 %v9287_v38 }
0x4f59   : > { %v7344_v10 = vpop.xlane.xlu1 %7343 }
0x4f5a   : > { %v7345_v11 = vmul.f32 0.03125, %v7344_v10 }
0x4f5c   : > { %v7346_v13 = vsub.f32 %v7337_v6, %v7345_v11 }
0x4f5e   : > { %v7347_v14 = vmul.f32 %v7346_v13, %v7346_v13 }
0x4f60   : > { %v7348_v37 = vsel %vm1516_vm0, %v7347_v14, 0.0 }
0x4f61   : > { %7349 = vadd.xlane.f32.xlu1 %v7348_v37 }
0x4fee   : > { %v7350_v33 = vpop.xlane.xlu1 %7349 }
0x4fef   : > { %v7351_v20 = vmul.f32 0.03125, %v7350_v33 }
0x4ff1   : > { %v7352_v21 = vadd.f32 1e-05, %v7351_v20 }
0x4ff3   : > { %9406 = vrsqrt.f32 %v7352_v21 }
0x4ffd   : > { %v9407_v7 = vpop.eup %9406 }
0x4ffe   : > { %v7354_v23 = vmul.f32 %v9407_v7, %v7346_v13 }
0x5000   : > { %v7361_v27 = vmul.f32 %v8136_v22, %v7354_v23 }
0x5002   : > { %v7368_v28 = vadd.f32 %v8137_v26, %v7361_v27 }
0x5004   : > { %v7387_v55 = vpack.c.bf16 %v7368_v28, %v7368_v28 }
0x5006   : > { %9013 = vmatmul.mubr.msk.bf16.vlgmr.msra.gmra.mrb[184].mxu0 %vm1516_vm0, %v7387_v55 }
0x5007   : > { %9032 = vmatprep.mubr.msk.bf16.mxu0 %vm9712_vm1, %v9711_v16  ;;  %9029 = vmatpush3.bf16.msra.mxu0 %v9288_v12 }
0x5008   : > { %9030 = vmatprep.subr.bf16.mxu0 %v9711_v16  ;;  %v8164_v16 = vld [vmem:[#allocation11] ss:$0 sm:$0xff] }
0x500b   : > { %9031 = vmatpush3.bf16.msra.mxu0 %v9289_v53 }
0x50d9   : > { %v7443_v31 = vpop.f32.mrb[184].mxu0 }
0x50da   : > { %v7444_v34 = vadd.f32 %v8152_v30, %v7443_v31  ;;  %v9014_v35 = vpop.f32.mrb[185].mxu0 }
0x50db   : > { %v7446_v36 = vpop.f32.mrb[186].mxu0 }
0x50dc   : > { %v7449_v39 = vmax.f32 %v7444_v34, 0.0  ;;  %v9015_v40 = vpop.f32.mrb[187].mxu0 }
0x50de   : > { %v7450_v17 = vpack.c.bf16 %v7449_v39, %v7449_v39 }
0x50e0   : > { %9025 = vmatmul.mubr.msk.bf16.vlgmr.msra.gmra.mrb[176].mxu1 %vm2401_vm4, %v7450_v17 }
0x51b3   : > { %v7518_v42 = vpop.f32.mrb[176].mxu1 }
0x51b4   : > { %v7519_v43 = vadd.f32 %v8156_v41, %v7518_v42  ;;  %v9026_v57 = vpop.f32.mrb[177].mxu1 }
0x51b5   : > { %v7521_v46 = vpop.f32.mrb[178].mxu1 }
0x51b6   : > { %v7524_v47 = vadd.f32 %v7519_v43, %v7337_v6  ;;  %v9027_v48 = vpop.f32.mrb[179].mxu1 }
0x51b8   : > { %v7527_v8 = vsel %vm1516_vm0, %v7524_v47, 0.0 }
0x51b9   : > { %7528 = vadd.xlane.f32.xlu1 %v7527_v8 }
0x5246   : > { %v7529_v49 = vpop.xlane.xlu1 %7528 }
0x5247   : > { %v7530_v50 = vmul.f32 0.03125, %v7529_v49 }
0x5249   : > { %v7531_v63 = vsub.f32 %v7524_v47, %v7530_v50 }
0x524b   : > { %v7532_v51 = vmul.f32 %v7531_v63, %v7531_v63 }
0x524d   : > { %v7533_v52 = vsel %vm1516_vm0, %v7532_v51, 0.0 }
0x524e   : > { %7534 = vadd.xlane.f32.xlu1 %v7533_v52 }
0x52db   : > { %v7535_v54 = vpop.xlane.xlu1 %7534 }
0x52dc   : > { %v7536_v56 = vmul.f32 0.03125, %v7535_v54 }
0x52de   : > { %v7537_v58 = vadd.f32 1e-05, %v7536_v56 }
0x52e0   : > { %9408 = vrsqrt.f32 %v7537_v58 }
0x52ea   : > { %v9409_v32 = vpop.eup %9408 }
0x52eb   : > { %v7539_v60 = vmul.f32 %v9409_v32, %v7531_v63 }
0x52ed   : > { %v7546_v62 = vmul.f32 %v8162_v59, %v7539_v60 }
0x52ef   : > { %v7553_v0 = vadd.f32 %v8163_v61, %v7546_v62 }
0x52f1   : > { %v7554_v19 = vpack.c.bf16 %v7553_v0, %v7553_v0 }
0x52f3   : > { %9033 = vmatmul.mubr.msk.bf16.vlgmr.msra.gmra.mrb[188].mxu0 %vm1516_vm0, %v7554_v19 }
0x53c6   : > { %v7615_v24 = vpop.f32.mrb[188].mxu0 }
0x53c7   : > { %v7616_v1 = vadd.f32 %v8164_v16, %v7615_v24  ;;  %v9034_v2 = vpop.f32.mrb[189].mxu0 }
0x53c8   : > { %v7618_v3 = vpop.f32.mrb[190].mxu0 }
0x53c9   : > { %7621 = vst [vmem:[%s1484_s15] sm:$0xff] %v7616_v1  ;;  %v9035_v4 = vpop.f32.mrb[191].mxu0 }
0x53ca   : > { %9591 = shalt.err (!%p9588_p0)
}
0x53cb   : > { %s9592_s4 = scalar_lea.hbm %s11067_s22, 128  ;;  %s9596_s2 = scalar_lea.hbm %s11326_s14, 256 }
0x53cc   : > { %p9593_p3 = scmp.ne.s32.totalorder %s11067_s22, %s9592_s4  ;;  %p9597_p5 = scmp.lt.u32.totalorder %s11067_s22, %s11326_s14 }
0x53cd   : > { %p9598_p6 = scmp.lt.u32.totalorder %s9596_s2, %s9592_s4  ;;  %p9600_p10 = scmp.lt.u32.totalorder %s9592_s4, %s11067_s22 }
0x53ce   : > { %p9594_p4 = pnand %p9593_p3, %p11328_p7 }
0x53cf   : > { %p9599_p9 = por %p9598_p6, %p9597_p5 }
0x53d0   : > { %p9595_p12 = pneg %p9594_p4 }
0x53d1   : > { %p9601_p8 = por %p9600_p10, %p9599_p9 }
0x53d3   : > { %p9602_p11 = pnand %p9601_p8, %p9595_p12 }
0x53d5   : > { %9605 = shalt.err (!%p9602_p11)
}
0x53d6   : > { %9061 = dma.vmem_to_hbm [thread:$0]  (%p11328_p7), %s11069_s18, 128, %s11067_s22, %s7623_s9  }
0x53d7 PF: > { %s11329_s0 = sld [smem:[#allocation69_spill]]  ;;  %s11330_s15 = sld [smem:[#allocation66_spill]] }
0x53d8   : > { %s11331_s3 = sld [smem:[#allocation74_spill]] }
0x53dd   : > { %p9098_p13 = scmp.ge.s32.totalorder %s11329_s0, 2  ;;  %s7648_s8 = sand.u32 1, %s11330_s15  }
0x53de   : > { %p11332_p1 = scmp.ne.s32.totalorder %s11331_s3, 0  ;;  %s7649_s16 = scalar_lea.sflag [#allocation4], %s7648_s8 }
0x53e0   : > { %p9083_p2 = pnand %p9098_p13, %p11332_p1 }
0x53e2   : > { %9639 = dma.done.wait (!%p9083_p2), %s7649_s16, 128  }
0x53e3   : > { %9641 = vsyncadd (!%p9083_p2), %s7649_s16, 4294967168  ;;  %s11333_s22 = sld [smem:[#allocation71_spill]]  ;;  %s11334_s15 = sld [smem:[#allocation67_spill]] }
0x53e4   : > { %s11335_s16 = sld [smem:[#allocation68_spill]]  ;;  %s11336_s18 = sld [smem:[#allocation72_spill]] }
0x53e9   : > { %p107_p0 = scmp.ge.s32.totalorder %s11333_s22, 4  }
0x53eb   :  { %109 = sbr.rel (!%p107_p0) target bundleno = 108 (0x6c), region = 369 }
0x53f2   :  { %7654 = vsyncpa [#allocation3], 1 }
0x53f3   :  { %7656 = vsyncpa [#allocation3 + $0x1], 1 }
0x53f4   :  { %7657 = vsyncpa [#allocation6], 1 }
0x53f5   :  { %7658 = vsyncpa [#allocation9], 1 }
0x53f6   :  { %7659 = vsyncpa [#allocation12], 1 }
0x53f7   :  { %7660 = vsyncpa [#allocation4], 1 }
0x53f8   :  { %7662 = vsyncpa [#allocation4 + $0x1], 1 }

</bundles_post_ra>
